<compile_context>
chip_gen: v6e
topology: v6e:2x2x1
jax: 0.10.0
libtpu: 0.0.40
codegen_flags: <defaults>
</compile_context>

<pallas_src>
import numpy as np
import jax
import jax.numpy as jnp
from jax import lax
from jax.experimental import pallas as pl
from jax.experimental.pallas import tpu as pltpu

HIDDEN = 8192 // 64     # 128
INPUT_SIZE = 16
KSIZE = 3
LEAKY_SLOPE = 0.01      # PyTorch nn.LeakyReLU default
CONV_DIMS = [(256, 128), (128, 64), (64, 32), (32, 16), (16, 8), (8, 4), (4, 1)]
CONV_ACTS = ["leaky", "leaky", "leaky", "leaky", "leaky", "leaky", "tanh"]
UPSAMPLE_AFTER = {1: 2, 3: 4, 5: 4}     # (0-based) conv index -> nearest factor
PAD_C = max(cin for cin, _ in CONV_DIMS)     # 256 rows in the halo scratch


# ----------------------------------------------------------------------------
# Kernel 1: bidirectional LSTM (single layer), whole problem resident in VMEM.
# ----------------------------------------------------------------------------
def lstm_bidir_kernel(z_ref, wif_ref, whf_ref, bf_ref,
                      wib_ref, whb_ref, bb_ref, out_ref):
    # z_ref: (T*B, I), time-major rows (row = t*B + b)
    # w_i*: (I, 4H); w_h*: (H, 4H); b*: (1, 4H) (= b_ih + b_hh)
    # out_ref: (T, B, 2H); [..., :H] forward direction, [..., H:] backward.
    T, B, _ = out_ref.shape
    H = HIDDEN

    z = z_ref[...]
    # Hoisted input projections: ONE batched matmul per direction (instead of
    # 2T tiny M=B matmuls inside the recurrence); bias folded in.
    xf = jnp.dot(z, wif_ref[...], preferred_element_type=jnp.float32) + bf_ref[...]
    xb = jnp.dot(z, wib_ref[...], preferred_element_type=jnp.float32) + bb_ref[...]
    whf = whf_ref[...]
    whb = whb_ref[...]

    def cell(gates, c):
        # PyTorch gate order: i, f, g, o
        i_g = jax.nn.sigmoid(gates[:, 0:H])
        f_g = jax.nn.sigmoid(gates[:, H:2 * H])
        g_g = jnp.tanh(gates[:, 2 * H:3 * H])
        o_g = jax.nn.sigmoid(gates[:, 3 * H:4 * H])
        c_new = f_g * c + i_g * g_g
        return o_g * jnp.tanh(c_new), c_new

    hf = jnp.zeros((B, H), jnp.float32)
    cf = jnp.zeros((B, H), jnp.float32)
    hb = jnp.zeros((B, H), jnp.float32)
    cb = jnp.zeros((B, H), jnp.float32)

    # Forward & backward recurrences interleaved in one unrolled loop: two
    # independent latency chains per step, so MXU/EUP slots overlap.  T is
    # small and static, so the loop is fully unrolled with static indices.
    # TODO(synk): on v7x an alternative is one direction per TensorCore via
    # pl.core_map; the interleaved single-call form is best on v5e/v6e.
    for s in range(T):
        tb = T - 1 - s
        gf = xf[s * B:(s + 1) * B, :] + jnp.dot(
            hf, whf, preferred_element_type=jnp.float32)
        gb = xb[tb * B:(tb + 1) * B, :] + jnp.dot(
            hb, whb, preferred_element_type=jnp.float32)
        hf, cf = cell(gf, cf)
        hb, cb = cell(gb, cb)
        out_ref[s, :, 0:H] = hf
        out_ref[tb, :, H:2 * H] = hb


def lstm_bidir(z, lstm_params):
    # z: (B, T, I) float32 -> (B, T, 2H)
    B, T, I = z.shape
    zt = jnp.transpose(z, (1, 0, 2)).reshape(T * B, I)   # time-major rows
    out = pl.pallas_call(
        lstm_bidir_kernel,
        out_shape=jax.ShapeDtypeStruct((T, B, 2 * HIDDEN), jnp.float32),
    )(zt, *lstm_params)
    return jnp.transpose(out, (1, 0, 2))                 # (B, T, 2H)


# ----------------------------------------------------------------------------
# Kernel 2: fully fused conv stack (7 convs + 3 upsamples), one batch element
# per grid step; all weights + activations live in VMEM for the whole kernel.
# ----------------------------------------------------------------------------
def conv_stack_kernel(x_ref,
                      w0, b0, w1, b1, w2, b2, w3, b3, w4, b4, w5, b5, w6, b6,
                      sel0, sel1, sel2,
                      out_ref, pad_ref):
    ws = (w0, w1, w2, w3, w4, w5, w6)
    bs = (b0, b1, b2, b3, b4, b5, b6)
    sels = {1: sel0, 3: sel1, 5: sel2}   # conv index -> upsample selection ref

    def conv(x, w_ref, b_ref, act):
        # x: (Cin, L) value; w_ref: (3, Cout, Cin); b_ref: (Cout, 1)
        cin, L = x.shape
        cout = w_ref.shape[1]
        # 'same' padding via a zero halo in the VMEM scratch (no HBM copy).
        # Only the rows that will actually be read (0:cin) are touched.
        zero_col = jnp.zeros((cin, 1), jnp.float32)
        pad_ref[0:cin, 0:1] = zero_col
        pad_ref[0:cin, L + 1:L + 2] = zero_col
        pad_ref[0:cin, 1:L + 1] = x
        acc = jnp.zeros((cout, L), jnp.float32)
        for k in range(KSIZE):                       # static unroll over taps
            acc = acc + jnp.dot(w_ref[k], pad_ref[0:cin, k:k + L],
                                preferred_element_type=jnp.float32)
        acc = acc + b_ref[...]                       # (Cout,1) broadcasts over L
        if act == "leaky":
            return jnp.where(acc > 0, acc, LEAKY_SLOPE * acc)
        return jnp.tanh(acc)

    h = x_ref[0]                                     # (256, T)
    for li in range(len(CONV_DIMS)):
        h = conv(h, ws[li], bs[li], CONV_ACTS[li])
        if li in UPSAMPLE_AFTER:
            # Exact nearest upsample as a 0/1 selection matmul on the MXU:
            # y[:, j] = x[:, j // r].  Selection matrix is a hoisted constant.
            h = jnp.dot(h, sels[li][...], preferred_element_type=jnp.float32)
    out_ref[0] = h                                   # (1, 32*T): lane-dense store


def conv_stack(x, conv_params):
    # x: (B, 256, T) NCW -> (B, 1, 32*T)
    B, cin0, L0 = x.shape
    lout = L0 * 32

    # Build the 0/1 nearest-upsample selection matrices ONCE (host-side numpy
    # constants), instead of rebuilding them with iota/compare per grid step.
    sels = []
    L = L0
    for li in range(len(CONV_DIMS)):
        if li in UPSAMPLE_AFTER:
            r = UPSAMPLE_AFTER[li]
            sels.append(jnp.asarray(np.repeat(np.eye(L, dtype=np.float32), r, axis=1)))
            L *= r

    flat = []
    in_specs = [pl.BlockSpec((1, cin0, L0), lambda b: (b, 0, 0))]
    for w, bias in conv_params:
        flat += [w, bias]
        in_specs.append(pl.BlockSpec(w.shape, lambda b: (0, 0, 0)))
        in_specs.append(pl.BlockSpec(bias.shape, lambda b: (0, 0)))
    for s in sels:
        flat.append(s)
        in_specs.append(pl.BlockSpec(s.shape, lambda b: (0, 0)))

    return pl.pallas_call(
        conv_stack_kernel,
        out_shape=jax.ShapeDtypeStruct((B, 1, lout), jnp.float32),
        grid=(B,),
        in_specs=in_specs,
        out_specs=pl.BlockSpec((1, 1, lout), lambda b: (b, 0, 0)),
        scratch_shapes=[pltpu.VMEM((PAD_C, lout + 2), jnp.float32)],
        compiler_params=pltpu.CompilerParams(dimension_semantics=("parallel",)),
    )(x, *flat)


# ----------------------------------------------------------------------------
# Parameter construction (deterministic, synthetic weights, PyTorch layouts).
# ----------------------------------------------------------------------------
def init_params(key):
    keys = iter(jax.random.split(key, 64))

    def unif(k, shape, bound):
        return jax.random.uniform(k, shape, jnp.float32, -bound, bound)

    stdv = 1.0 / jnp.sqrt(jnp.float32(HIDDEN))

    def lstm_dir():
        w_ih = unif(next(keys), (4 * HIDDEN, INPUT_SIZE), stdv)
        w_hh = unif(next(keys), (4 * HIDDEN, HIDDEN), stdv)
        b_ih = unif(next(keys), (4 * HIDDEN,), stdv)
        b_hh = unif(next(keys), (4 * HIDDEN,), stdv)
        return (jnp.transpose(w_ih), jnp.transpose(w_hh),
                (b_ih + b_hh).reshape(1, 4 * HIDDEN))

    wif, whf, bf = lstm_dir()
    wib, whb, bb = lstm_dir()
    lstm_params = (wif, whf, bf, wib, whb, bb)

    conv_params = []
    for cin, cout in CONV_DIMS:
        bound = 1.0 / jnp.sqrt(jnp.float32(cin * KSIZE))
        w = unif(next(keys), (cout, cin, KSIZE), bound)     # PyTorch layout
        b = unif(next(keys), (cout,), bound)
        conv_params.append((jnp.transpose(w, (2, 0, 1)),    # (3, Cout, Cin)
                            b.reshape(cout, 1)))
    return lstm_params, conv_params


# ----------------------------------------------------------------------------
# Full Generator forward (2 pallas_calls total).
# ----------------------------------------------------------------------------
def generator_forward(z, params):
    lstm_params, conv_params = params
    B, T, _ = z.shape
    h = lstm_bidir(z, lstm_params)            # (B, T, 256)
    x = h.reshape(B, 2 * HIDDEN, T)           # faithful PyTorch .reshape (not a transpose)
    return conv_stack(x, conv_params)         # (B, 1, 32*T)


# ----------------------------------------------------------------------------
# Pure-JAX reference for correctness checking.
# ----------------------------------------------------------------------------
def generator_reference(z, params):
    lstm_params, conv_params = params
    wif, whf, bf, wib, whb, bb = lstm_params
    B, T, _ = z.shape
    H = HIDDEN

    def run_dir(wi, wh, b, reverse):
        def cell(carry, x_t):
            h, c = carry
            g = x_t @ wi + h @ wh + b[0]
            i_g = jax.nn.sigmoid(g[:, 0:H])
            f_g = jax.nn.sigmoid(g[:, H:2 * H])
            g_g = jnp.tanh(g[:, 2 * H:3 * H])
            o_g = jax.nn.sigmoid(g[:, 3 * H:4 * H])
            c = f_g * c + i_g * g_g
            h = o_g * jnp.tanh(c)
            return (h, c), h
        xs = jnp.transpose(z, (1, 0, 2))
        xs = xs[::-1] if reverse else xs
        _, hs = lax.scan(cell, (jnp.zeros((B, H)), jnp.zeros((B, H))), xs)
        hs = hs[::-1] if reverse else hs
        return jnp.transpose(hs, (1, 0, 2))

    h = jnp.concatenate([run_dir(wif, whf, bf, False),
                         run_dir(wib, whb, bb, True)], axis=-1)   # (B, T, 2H)
    x = h.reshape(B, 2 * H, T)

    def conv(x, w, b, act):
        L = x.shape[-1]
        xpad = jnp.pad(x, ((0, 0), (0, 0), (1, 1)))
        y = sum(jnp.einsum("oc,bcl->bol", w[k], xpad[:, :, k:k + L])
                for k in range(KSIZE)) + b[None]
        if act == "leaky":
            return jnp.where(y > 0, y, LEAKY_SLOPE * y)
        return jnp.tanh(y)

    for li, (w, b) in enumerate(conv_params):
        x = conv(x, w, b, CONV_ACTS[li])
        if li in UPSAMPLE_AFTER:
            x = jnp.repeat(x, UPSAMPLE_AFTER[li], axis=-1)
    return x


if __name__ == "__main__":
    key = jax.random.PRNGKey(0)
    k_param, k_in = jax.random.split(key)
    params = init_params(k_param)

    B, T = 2, 8
    z = jax.random.normal(k_in, (B, T, INPUT_SIZE), jnp.float32)

    out = jax.block_until_ready(jax.jit(generator_forward)(z, params))
    ref = jax.block_until_ready(jax.jit(generator_reference)(z, params))

    assert out.shape == (B, 1, 32 * T), out.shape
    assert out.dtype == jnp.float32
    assert bool(jnp.all(jnp.isfinite(out)))
    assert float(jnp.max(jnp.abs(out - ref))) < 5e-2
    print("KERNEL_OK")
</pallas_src>

<mosaic_0001>
module attributes {stable_mosaic.version = 11 : i64} {
  func.func @lstm_bidir_kernel(%arg0: memref<16x16xf32, #tpu.memory_space<vmem>>, %arg1: memref<16x512xf32, #tpu.memory_space<vmem>>, %arg2: memref<128x512xf32, #tpu.memory_space<vmem>>, %arg3: memref<1x512xf32, #tpu.memory_space<vmem>>, %arg4: memref<16x512xf32, #tpu.memory_space<vmem>>, %arg5: memref<128x512xf32, #tpu.memory_space<vmem>>, %arg6: memref<1x512xf32, #tpu.memory_space<vmem>>, %arg7: memref<8x2x256xf32, #tpu.memory_space<vmem>>) attributes {dimension_semantics = [], scalar_prefetch = 0 : i64, scratch_operands = 0 : i64, tpu.core_type = #tpu.core_type<tc>} {
    %c0 = arith.constant 0 : index
    %c0_0 = arith.constant 0 : index
    %0 = vector.load %arg0[%c0, %c0_0] : memref<16x16xf32, #tpu.memory_space<vmem>>, vector<16x16xf32>
    %c0_1 = arith.constant 0 : index
    %c0_2 = arith.constant 0 : index
    %1 = vector.load %arg1[%c0_1, %c0_2] : memref<16x512xf32, #tpu.memory_space<vmem>>, vector<16x512xf32>
    %cst = arith.constant dense<0.000000e+00> : vector<16x512xf32>
    %2 = tpu.matmul %0, %1, %cst {dimension_numbers = #tpu.dot_dimension_numbers<[1], [0], [0], [1], [0, 0, 1, 1], [], []>} : vector<16x16xf32>, vector<16x512xf32>, vector<16x512xf32> -> vector<16x512xf32>
    %c0_3 = arith.constant 0 : index
    %c0_4 = arith.constant 0 : index
    %3 = vector.load %arg3[%c0_3, %c0_4] : memref<1x512xf32, #tpu.memory_space<vmem>>, vector<1x512xf32>
    %4 = vector.broadcast %3 : vector<1x512xf32> to vector<16x512xf32>
    %5 = arith.addf %2, %4 : vector<16x512xf32>
    %c0_5 = arith.constant 0 : index
    %c0_6 = arith.constant 0 : index
    %6 = vector.load %arg4[%c0_5, %c0_6] : memref<16x512xf32, #tpu.memory_space<vmem>>, vector<16x512xf32>
    %cst_7 = arith.constant dense<0.000000e+00> : vector<16x512xf32>
    %7 = tpu.matmul %0, %6, %cst_7 {dimension_numbers = #tpu.dot_dimension_numbers<[1], [0], [0], [1], [0, 0, 1, 1], [], []>} : vector<16x16xf32>, vector<16x512xf32>, vector<16x512xf32> -> vector<16x512xf32>
    %c0_8 = arith.constant 0 : index
    %c0_9 = arith.constant 0 : index
    %8 = vector.load %arg6[%c0_8, %c0_9] : memref<1x512xf32, #tpu.memory_space<vmem>>, vector<1x512xf32>
    %9 = vector.broadcast %8 : vector<1x512xf32> to vector<16x512xf32>
    %10 = arith.addf %7, %9 : vector<16x512xf32>
    %c0_10 = arith.constant 0 : index
    %c0_11 = arith.constant 0 : index
    %11 = vector.load %arg2[%c0_10, %c0_11] : memref<128x512xf32, #tpu.memory_space<vmem>>, vector<128x512xf32>
    %c0_12 = arith.constant 0 : index
    %c0_13 = arith.constant 0 : index
    %12 = vector.load %arg5[%c0_12, %c0_13] : memref<128x512xf32, #tpu.memory_space<vmem>>, vector<128x512xf32>
    %cst_14 = arith.constant 0.000000e+00 : f32
    %13 = vector.broadcast %cst_14 : f32 to vector<2x128xf32>
    %cst_15 = arith.constant 0.000000e+00 : f32
    %14 = vector.broadcast %cst_15 : f32 to vector<2x128xf32>
    %cst_16 = arith.constant 0.000000e+00 : f32
    %15 = vector.broadcast %cst_16 : f32 to vector<2x128xf32>
    %cst_17 = arith.constant 0.000000e+00 : f32
    %16 = vector.broadcast %cst_17 : f32 to vector<2x128xf32>
    %17 = vector.extract_strided_slice %5 {offsets = [0, 0], sizes = [2, 512], strides = [1, 1]} : vector<16x512xf32> to vector<2x512xf32>
    %cst_18 = arith.constant dense<0.000000e+00> : vector<2x512xf32>
    %18 = tpu.matmul %13, %11, %cst_18 {dimension_numbers = #tpu.dot_dimension_numbers<[1], [0], [0], [1], [0, 0, 1, 1], [], []>} : vector<2x128xf32>, vector<128x512xf32>, vector<2x512xf32> -> vector<2x512xf32>
    %19 = arith.addf %17, %18 : vector<2x512xf32>
    %20 = vector.extract_strided_slice %10 {offsets = [14, 0], sizes = [2, 512], strides = [1, 1]} : vector<16x512xf32> to vector<2x512xf32>
    %cst_19 = arith.constant dense<0.000000e+00> : vector<2x512xf32>
    %21 = tpu.matmul %15, %12, %cst_19 {dimension_numbers = #tpu.dot_dimension_numbers<[1], [0], [0], [1], [0, 0, 1, 1], [], []>} : vector<2x128xf32>, vector<128x512xf32>, vector<2x512xf32> -> vector<2x512xf32>
    %22 = arith.addf %20, %21 : vector<2x512xf32>
    %23 = vector.extract_strided_slice %19 {offsets = [0, 0], sizes = [2, 128], strides = [1, 1]} : vector<2x512xf32> to vector<2x128xf32>
    %24 = arith.negf %23 : vector<2x128xf32>
    %25 = math.exp %24 : vector<2x128xf32>
    %cst_20 = arith.constant 1.000000e+00 : f32
    %26 = vector.broadcast %cst_20 : f32 to vector<2x128xf32>
    %27 = arith.addf %26, %25 : vector<2x128xf32>
    %28 = arith.divf %26, %27 : vector<2x128xf32>
    %29 = vector.extract_strided_slice %19 {offsets = [0, 128], sizes = [2, 128], strides = [1, 1]} : vector<2x512xf32> to vector<2x128xf32>
    %30 = arith.negf %29 : vector<2x128xf32>
    %31 = math.exp %30 : vector<2x128xf32>
    %cst_21 = arith.constant 1.000000e+00 : f32
    %32 = vector.broadcast %cst_21 : f32 to vector<2x128xf32>
    %33 = arith.addf %32, %31 : vector<2x128xf32>
    %34 = arith.divf %32, %33 : vector<2x128xf32>
    %35 = vector.extract_strided_slice %19 {offsets = [0, 256], sizes = [2, 128], strides = [1, 1]} : vector<2x512xf32> to vector<2x128xf32>
    %36 = math.tanh %35 : vector<2x128xf32>
    %37 = vector.extract_strided_slice %19 {offsets = [0, 384], sizes = [2, 128], strides = [1, 1]} : vector<2x512xf32> to vector<2x128xf32>
    %38 = arith.negf %37 : vector<2x128xf32>
    %39 = math.exp %38 : vector<2x128xf32>
    %cst_22 = arith.constant 1.000000e+00 : f32
    %40 = vector.broadcast %cst_22 : f32 to vector<2x128xf32>
    %41 = arith.addf %40, %39 : vector<2x128xf32>
    %42 = arith.divf %40, %41 : vector<2x128xf32>
    %43 = arith.mulf %34, %14 : vector<2x128xf32>
    %44 = arith.mulf %28, %36 : vector<2x128xf32>
    %45 = arith.addf %43, %44 : vector<2x128xf32>
    %46 = math.tanh %45 : vector<2x128xf32>
    %47 = arith.mulf %42, %46 : vector<2x128xf32>
    %48 = vector.extract_strided_slice %22 {offsets = [0, 0], sizes = [2, 128], strides = [1, 1]} : vector<2x512xf32> to vector<2x128xf32>
    %49 = arith.negf %48 : vector<2x128xf32>
    %50 = math.exp %49 : vector<2x128xf32>
    %cst_23 = arith.constant 1.000000e+00 : f32
    %51 = vector.broadcast %cst_23 : f32 to vector<2x128xf32>
    %52 = arith.addf %51, %50 : vector<2x128xf32>
    %53 = arith.divf %51, %52 : vector<2x128xf32>
    %54 = vector.extract_strided_slice %22 {offsets = [0, 128], sizes = [2, 128], strides = [1, 1]} : vector<2x512xf32> to vector<2x128xf32>
    %55 = arith.negf %54 : vector<2x128xf32>
    %56 = math.exp %55 : vector<2x128xf32>
    %cst_24 = arith.constant 1.000000e+00 : f32
    %57 = vector.broadcast %cst_24 : f32 to vector<2x128xf32>
    %58 = arith.addf %57, %56 : vector<2x128xf32>
    %59 = arith.divf %57, %58 : vector<2x128xf32>
    %60 = vector.extract_strided_slice %22 {offsets = [0, 256], sizes = [2, 128], strides = [1, 1]} : vector<2x512xf32> to vector<2x128xf32>
    %61 = math.tanh %60 : vector<2x128xf32>
    %62 = vector.extract_strided_slice %22 {offsets = [0, 384], sizes = [2, 128], strides = [1, 1]} : vector<2x512xf32> to vector<2x128xf32>
    %63 = arith.negf %62 : vector<2x128xf32>
    %64 = math.exp %63 : vector<2x128xf32>
    %cst_25 = arith.constant 1.000000e+00 : f32
    %65 = vector.broadcast %cst_25 : f32 to vector<2x128xf32>
    %66 = arith.addf %65, %64 : vector<2x128xf32>
    %67 = arith.divf %65, %66 : vector<2x128xf32>
    %68 = arith.mulf %59, %16 : vector<2x128xf32>
    %69 = arith.mulf %53, %61 : vector<2x128xf32>
    %70 = arith.addf %68, %69 : vector<2x128xf32>
    %71 = math.tanh %70 : vector<2x128xf32>
    %72 = arith.mulf %67, %71 : vector<2x128xf32>
    %c0_26 = arith.constant 0 : index
    %c0_27 = arith.constant 0 : index
    %c0_28 = arith.constant 0 : index
    %73 = vector.load %arg7[%c0_26, %c0_27, %c0_28] : memref<8x2x256xf32, #tpu.memory_space<vmem>>, vector<1x2x128xf32>
    %74 = vector.shape_cast %73 : vector<1x2x128xf32> to vector<2x128xf32>
    %75 = vector.shape_cast %47 : vector<2x128xf32> to vector<1x2x128xf32>
    tpu.vector_store %arg7[%c0_26, %c0_27, %c0_28], %75 {strides = array<i32>} : memref<8x2x256xf32, #tpu.memory_space<vmem>>, vector<1x2x128xf32>,
    %c7 = arith.constant 7 : index
    %c0_29 = arith.constant 0 : index
    %c128 = arith.constant 128 : index
    %76 = vector.load %arg7[%c7, %c0_29, %c128] : memref<8x2x256xf32, #tpu.memory_space<vmem>>, vector<1x2x128xf32>
    %77 = vector.shape_cast %76 : vector<1x2x128xf32> to vector<2x128xf32>
    %78 = vector.shape_cast %72 : vector<2x128xf32> to vector<1x2x128xf32>
    tpu.vector_store %arg7[%c7, %c0_29, %c128], %78 {strides = array<i32>} : memref<8x2x256xf32, #tpu.memory_space<vmem>>, vector<1x2x128xf32>,
    %79 = vector.extract_strided_slice %5 {offsets = [2, 0], sizes = [2, 512], strides = [1, 1]} : vector<16x512xf32> to vector<2x512xf32>
    %cst_30 = arith.constant dense<0.000000e+00> : vector<2x512xf32>
    %80 = tpu.matmul %47, %11, %cst_30 {dimension_numbers = #tpu.dot_dimension_numbers<[1], [0], [0], [1], [0, 0, 1, 1], [], []>} : vector<2x128xf32>, vector<128x512xf32>, vector<2x512xf32> -> vector<2x512xf32>
    %81 = arith.addf %79, %80 : vector<2x512xf32>
    %82 = vector.extract_strided_slice %10 {offsets = [12, 0], sizes = [2, 512], strides = [1, 1]} : vector<16x512xf32> to vector<2x512xf32>
    %cst_31 = arith.constant dense<0.000000e+00> : vector<2x512xf32>
    %83 = tpu.matmul %72, %12, %cst_31 {dimension_numbers = #tpu.dot_dimension_numbers<[1], [0], [0], [1], [0, 0, 1, 1], [], []>} : vector<2x128xf32>, vector<128x512xf32>, vector<2x512xf32> -> vector<2x512xf32>
    %84 = arith.addf %82, %83 : vector<2x512xf32>
    %85 = vector.extract_strided_slice %81 {offsets = [0, 0], sizes = [2, 128], strides = [1, 1]} : vector<2x512xf32> to vector<2x128xf32>
    %86 = arith.negf %85 : vector<2x128xf32>
    %87 = math.exp %86 : vector<2x128xf32>
    %cst_32 = arith.constant 1.000000e+00 : f32
    %88 = vector.broadcast %cst_32 : f32 to vector<2x128xf32>
    %89 = arith.addf %88, %87 : vector<2x128xf32>
    %90 = arith.divf %88, %89 : vector<2x128xf32>
    %91 = vector.extract_strided_slice %81 {offsets = [0, 128], sizes = [2, 128], strides = [1, 1]} : vector<2x512xf32> to vector<2x128xf32>
    %92 = arith.negf %91 : vector<2x128xf32>
    %93 = math.exp %92 : vector<2x128xf32>
    %cst_33 = arith.constant 1.000000e+00 : f32
    %94 = vector.broadcast %cst_33 : f32 to vector<2x128xf32>
    %95 = arith.addf %94, %93 : vector<2x128xf32>
    %96 = arith.divf %94, %95 : vector<2x128xf32>
    %97 = vector.extract_strided_slice %81 {offsets = [0, 256], sizes = [2, 128], strides = [1, 1]} : vector<2x512xf32> to vector<2x128xf32>
    %98 = math.tanh %97 : vector<2x128xf32>
    %99 = vector.extract_strided_slice %81 {offsets = [0, 384], sizes = [2, 128], strides = [1, 1]} : vector<2x512xf32> to vector<2x128xf32>
    %100 = arith.negf %99 : vector<2x128xf32>
    %101 = math.exp %100 : vector<2x128xf32>
    %cst_34 = arith.constant 1.000000e+00 : f32
    %102 = vector.broadcast %cst_34 : f32 to vector<2x128xf32>
    %103 = arith.addf %102, %101 : vector<2x128xf32>
    %104 = arith.divf %102, %103 : vector<2x128xf32>
    %105 = arith.mulf %96, %45 : vector<2x128xf32>
    %106 = arith.mulf %90, %98 : vector<2x128xf32>
    %107 = arith.addf %105, %106 : vector<2x128xf32>
    %108 = math.tanh %107 : vector<2x128xf32>
    %109 = arith.mulf %104, %108 : vector<2x128xf32>
    %110 = vector.extract_strided_slice %84 {offsets = [0, 0], sizes = [2, 128], strides = [1, 1]} : vector<2x512xf32> to vector<2x128xf32>
    %111 = arith.negf %110 : vector<2x128xf32>
    %112 = math.exp %111 : vector<2x128xf32>
    %cst_35 = arith.constant 1.000000e+00 : f32
    %113 = vector.broadcast %cst_35 : f32 to vector<2x128xf32>
    %114 = arith.addf %113, %112 : vector<2x128xf32>
    %115 = arith.divf %113, %114 : vector<2x128xf32>
    %116 = vector.extract_strided_slice %84 {offsets = [0, 128], sizes = [2, 128], strides = [1, 1]} : vector<2x512xf32> to vector<2x128xf32>
    %117 = arith.negf %116 : vector<2x128xf32>
    %118 = math.exp %117 : vector<2x128xf32>
    %cst_36 = arith.constant 1.000000e+00 : f32
    %119 = vector.broadcast %cst_36 : f32 to vector<2x128xf32>
    %120 = arith.addf %119, %118 : vector<2x128xf32>
    %121 = arith.divf %119, %120 : vector<2x128xf32>
    %122 = vector.extract_strided_slice %84 {offsets = [0, 256], sizes = [2, 128], strides = [1, 1]} : vector<2x512xf32> to vector<2x128xf32>
    %123 = math.tanh %122 : vector<2x128xf32>
    %124 = vector.extract_strided_slice %84 {offsets = [0, 384], sizes = [2, 128], strides = [1, 1]} : vector<2x512xf32> to vector<2x128xf32>
    %125 = arith.negf %124 : vector<2x128xf32>
    %126 = math.exp %125 : vector<2x128xf32>
    %cst_37 = arith.constant 1.000000e+00 : f32
    %127 = vector.broadcast %cst_37 : f32 to vector<2x128xf32>
    %128 = arith.addf %127, %126 : vector<2x128xf32>
    %129 = arith.divf %127, %128 : vector<2x128xf32>
    %130 = arith.mulf %121, %70 : vector<2x128xf32>
    %131 = arith.mulf %115, %123 : vector<2x128xf32>
    %132 = arith.addf %130, %131 : vector<2x128xf32>
    %133 = math.tanh %132 : vector<2x128xf32>
    %134 = arith.mulf %129, %133 : vector<2x128xf32>
    %c1 = arith.constant 1 : index
    %c0_38 = arith.constant 0 : index
    %c0_39 = arith.constant 0 : index
    %135 = vector.load %arg7[%c1, %c0_38, %c0_39] : memref<8x2x256xf32, #tpu.memory_space<vmem>>, vector<1x2x128xf32>
    %136 = vector.shape_cast %135 : vector<1x2x128xf32> to vector<2x128xf32>
    %137 = vector.shape_cast %109 : vector<2x128xf32> to vector<1x2x128xf32>
    tpu.vector_store %arg7[%c1, %c0_38, %c0_39], %137 {strides = array<i32>} : memref<8x2x256xf32, #tpu.memory_space<vmem>>, vector<1x2x128xf32>,
    %c6 = arith.constant 6 : index
    %c0_40 = arith.constant 0 : index
    %c128_41 = arith.constant 128 : index
    %138 = vector.load %arg7[%c6, %c0_40, %c128_41] : memref<8x2x256xf32, #tpu.memory_space<vmem>>, vector<1x2x128xf32>
    %139 = vector.shape_cast %138 : vector<1x2x128xf32> to vector<2x128xf32>
    %140 = vector.shape_cast %134 : vector<2x128xf32> to vector<1x2x128xf32>
    tpu.vector_store %arg7[%c6, %c0_40, %c128_41], %140 {strides = array<i32>} : memref<8x2x256xf32, #tpu.memory_space<vmem>>, vector<1x2x128xf32>,
    %141 = vector.extract_strided_slice %5 {offsets = [4, 0], sizes = [2, 512], strides = [1, 1]} : vector<16x512xf32> to vector<2x512xf32>
    %cst_42 = arith.constant dense<0.000000e+00> : vector<2x512xf32>
    %142 = tpu.matmul %109, %11, %cst_42 {dimension_numbers = #tpu.dot_dimension_numbers<[1], [0], [0], [1], [0, 0, 1, 1], [], []>} : vector<2x128xf32>, vector<128x512xf32>, vector<2x512xf32> -> vector<2x512xf32>
    %143 = arith.addf %141, %142 : vector<2x512xf32>
    %144 = vector.extract_strided_slice %10 {offsets = [10, 0], sizes = [2, 512], strides = [1, 1]} : vector<16x512xf32> to vector<2x512xf32>
    %cst_43 = arith.constant dense<0.000000e+00> : vector<2x512xf32>
    %145 = tpu.matmul %134, %12, %cst_43 {dimension_numbers = #tpu.dot_dimension_numbers<[1], [0], [0], [1], [0, 0, 1, 1], [], []>} : vector<2x128xf32>, vector<128x512xf32>, vector<2x512xf32> -> vector<2x512xf32>
    %146 = arith.addf %144, %145 : vector<2x512xf32>
    %147 = vector.extract_strided_slice %143 {offsets = [0, 0], sizes = [2, 128], strides = [1, 1]} : vector<2x512xf32> to vector<2x128xf32>
    %148 = arith.negf %147 : vector<2x128xf32>
    %149 = math.exp %148 : vector<2x128xf32>
    %cst_44 = arith.constant 1.000000e+00 : f32
    %150 = vector.broadcast %cst_44 : f32 to vector<2x128xf32>
    %151 = arith.addf %150, %149 : vector<2x128xf32>
    %152 = arith.divf %150, %151 : vector<2x128xf32>
    %153 = vector.extract_strided_slice %143 {offsets = [0, 128], sizes = [2, 128], strides = [1, 1]} : vector<2x512xf32> to vector<2x128xf32>
    %154 = arith.negf %153 : vector<2x128xf32>
    %155 = math.exp %154 : vector<2x128xf32>
    %cst_45 = arith.constant 1.000000e+00 : f32
    %156 = vector.broadcast %cst_45 : f32 to vector<2x128xf32>
    %157 = arith.addf %156, %155 : vector<2x128xf32>
    %158 = arith.divf %156, %157 : vector<2x128xf32>
    %159 = vector.extract_strided_slice %143 {offsets = [0, 256], sizes = [2, 128], strides = [1, 1]} : vector<2x512xf32> to vector<2x128xf32>
    %160 = math.tanh %159 : vector<2x128xf32>
    %161 = vector.extract_strided_slice %143 {offsets = [0, 384], sizes = [2, 128], strides = [1, 1]} : vector<2x512xf32> to vector<2x128xf32>
    %162 = arith.negf %161 : vector<2x128xf32>
    %163 = math.exp %162 : vector<2x128xf32>
    %cst_46 = arith.constant 1.000000e+00 : f32
    %164 = vector.broadcast %cst_46 : f32 to vector<2x128xf32>
    %165 = arith.addf %164, %163 : vector<2x128xf32>
    %166 = arith.divf %164, %165 : vector<2x128xf32>
    %167 = arith.mulf %158, %107 : vector<2x128xf32>
    %168 = arith.mulf %152, %160 : vector<2x128xf32>
    %169 = arith.addf %167, %168 : vector<2x128xf32>
    %170 = math.tanh %169 : vector<2x128xf32>
    %171 = arith.mulf %166, %170 : vector<2x128xf32>
    %172 = vector.extract_strided_slice %146 {offsets = [0, 0], sizes = [2, 128], strides = [1, 1]} : vector<2x512xf32> to vector<2x128xf32>
    %173 = arith.negf %172 : vector<2x128xf32>
    %174 = math.exp %173 : vector<2x128xf32>
    %cst_47 = arith.constant 1.000000e+00 : f32
    %175 = vector.broadcast %cst_47 : f32 to vector<2x128xf32>
    %176 = arith.addf %175, %174 : vector<2x128xf32>
    %177 = arith.divf %175, %176 : vector<2x128xf32>
    %178 = vector.extract_strided_slice %146 {offsets = [0, 128], sizes = [2, 128], strides = [1, 1]} : vector<2x512xf32> to vector<2x128xf32>
    %179 = arith.negf %178 : vector<2x128xf32>
    %180 = math.exp %179 : vector<2x128xf32>
    %cst_48 = arith.constant 1.000000e+00 : f32
    %181 = vector.broadcast %cst_48 : f32 to vector<2x128xf32>
    %182 = arith.addf %181, %180 : vector<2x128xf32>
    %183 = arith.divf %181, %182 : vector<2x128xf32>
    %184 = vector.extract_strided_slice %146 {offsets = [0, 256], sizes = [2, 128], strides = [1, 1]} : vector<2x512xf32> to vector<2x128xf32>
    %185 = math.tanh %184 : vector<2x128xf32>
    %186 = vector.extract_strided_slice %146 {offsets = [0, 384], sizes = [2, 128], strides = [1, 1]} : vector<2x512xf32> to vector<2x128xf32>
    %187 = arith.negf %186 : vector<2x128xf32>
    %188 = math.exp %187 : vector<2x128xf32>
    %cst_49 = arith.constant 1.000000e+00 : f32
    %189 = vector.broadcast %cst_49 : f32 to vector<2x128xf32>
    %190 = arith.addf %189, %188 : vector<2x128xf32>
    %191 = arith.divf %189, %190 : vector<2x128xf32>
    %192 = arith.mulf %183, %132 : vector<2x128xf32>
    %193 = arith.mulf %177, %185 : vector<2x128xf32>
    %194 = arith.addf %192, %193 : vector<2x128xf32>
    %195 = math.tanh %194 : vector<2x128xf32>
    %196 = arith.mulf %191, %195 : vector<2x128xf32>
    %c2 = arith.constant 2 : index
    %c0_50 = arith.constant 0 : index
    %c0_51 = arith.constant 0 : index
    %197 = vector.load %arg7[%c2, %c0_50, %c0_51] : memref<8x2x256xf32, #tpu.memory_space<vmem>>, vector<1x2x128xf32>
    %198 = vector.shape_cast %197 : vector<1x2x128xf32> to vector<2x128xf32>
    %199 = vector.shape_cast %171 : vector<2x128xf32> to vector<1x2x128xf32>
    tpu.vector_store %arg7[%c2, %c0_50, %c0_51], %199 {strides = array<i32>} : memref<8x2x256xf32, #tpu.memory_space<vmem>>, vector<1x2x128xf32>,
    %c5 = arith.constant 5 : index
    %c0_52 = arith.constant 0 : index
    %c128_53 = arith.constant 128 : index
    %200 = vector.load %arg7[%c5, %c0_52, %c128_53] : memref<8x2x256xf32, #tpu.memory_space<vmem>>, vector<1x2x128xf32>
    %201 = vector.shape_cast %200 : vector<1x2x128xf32> to vector<2x128xf32>
    %202 = vector.shape_cast %196 : vector<2x128xf32> to vector<1x2x128xf32>
    tpu.vector_store %arg7[%c5, %c0_52, %c128_53], %202 {strides = array<i32>} : memref<8x2x256xf32, #tpu.memory_space<vmem>>, vector<1x2x128xf32>,
    %203 = vector.extract_strided_slice %5 {offsets = [6, 0], sizes = [2, 512], strides = [1, 1]} : vector<16x512xf32> to vector<2x512xf32>
    %cst_54 = arith.constant dense<0.000000e+00> : vector<2x512xf32>
    %204 = tpu.matmul %171, %11, %cst_54 {dimension_numbers = #tpu.dot_dimension_numbers<[1], [0], [0], [1], [0, 0, 1, 1], [], []>} : vector<2x128xf32>, vector<128x512xf32>, vector<2x512xf32> -> vector<2x512xf32>
    %205 = arith.addf %203, %204 : vector<2x512xf32>
    %206 = vector.extract_strided_slice %10 {offsets = [8, 0], sizes = [2, 512], strides = [1, 1]} : vector<16x512xf32> to vector<2x512xf32>
    %cst_55 = arith.constant dense<0.000000e+00> : vector<2x512xf32>
    %207 = tpu.matmul %196, %12, %cst_55 {dimension_numbers = #tpu.dot_dimension_numbers<[1], [0], [0], [1], [0, 0, 1, 1], [], []>} : vector<2x128xf32>, vector<128x512xf32>, vector<2x512xf32> -> vector<2x512xf32>
    %208 = arith.addf %206, %207 : vector<2x512xf32>
    %209 = vector.extract_strided_slice %205 {offsets = [0, 0], sizes = [2, 128], strides = [1, 1]} : vector<2x512xf32> to vector<2x128xf32>
    %210 = arith.negf %209 : vector<2x128xf32>
    %211 = math.exp %210 : vector<2x128xf32>
    %cst_56 = arith.constant 1.000000e+00 : f32
    %212 = vector.broadcast %cst_56 : f32 to vector<2x128xf32>
    %213 = arith.addf %212, %211 : vector<2x128xf32>
    %214 = arith.divf %212, %213 : vector<2x128xf32>
    %215 = vector.extract_strided_slice %205 {offsets = [0, 128], sizes = [2, 128], strides = [1, 1]} : vector<2x512xf32> to vector<2x128xf32>
    %216 = arith.negf %215 : vector<2x128xf32>
    %217 = math.exp %216 : vector<2x128xf32>
    %cst_57 = arith.constant 1.000000e+00 : f32
    %218 = vector.broadcast %cst_57 : f32 to vector<2x128xf32>
    %219 = arith.addf %218, %217 : vector<2x128xf32>
    %220 = arith.divf %218, %219 : vector<2x128xf32>
    %221 = vector.extract_strided_slice %205 {offsets = [0, 256], sizes = [2, 128], strides = [1, 1]} : vector<2x512xf32> to vector<2x128xf32>
    %222 = math.tanh %221 : vector<2x128xf32>
    %223 = vector.extract_strided_slice %205 {offsets = [0, 384], sizes = [2, 128], strides = [1, 1]} : vector<2x512xf32> to vector<2x128xf32>
    %224 = arith.negf %223 : vector<2x128xf32>
    %225 = math.exp %224 : vector<2x128xf32>
    %cst_58 = arith.constant 1.000000e+00 : f32
    %226 = vector.broadcast %cst_58 : f32 to vector<2x128xf32>
    %227 = arith.addf %226, %225 : vector<2x128xf32>
    %228 = arith.divf %226, %227 : vector<2x128xf32>
    %229 = arith.mulf %220, %169 : vector<2x128xf32>
    %230 = arith.mulf %214, %222 : vector<2x128xf32>
    %231 = arith.addf %229, %230 : vector<2x128xf32>
    %232 = math.tanh %231 : vector<2x128xf32>
    %233 = arith.mulf %228, %232 : vector<2x128xf32>
    %234 = vector.extract_strided_slice %208 {offsets = [0, 0], sizes = [2, 128], strides = [1, 1]} : vector<2x512xf32> to vector<2x128xf32>
    %235 = arith.negf %234 : vector<2x128xf32>
    %236 = math.exp %235 : vector<2x128xf32>
    %cst_59 = arith.constant 1.000000e+00 : f32
    %237 = vector.broadcast %cst_59 : f32 to vector<2x128xf32>
    %238 = arith.addf %237, %236 : vector<2x128xf32>
    %239 = arith.divf %237, %238 : vector<2x128xf32>
    %240 = vector.extract_strided_slice %208 {offsets = [0, 128], sizes = [2, 128], strides = [1, 1]} : vector<2x512xf32> to vector<2x128xf32>
    %241 = arith.negf %240 : vector<2x128xf32>
    %242 = math.exp %241 : vector<2x128xf32>
    %cst_60 = arith.constant 1.000000e+00 : f32
    %243 = vector.broadcast %cst_60 : f32 to vector<2x128xf32>
    %244 = arith.addf %243, %242 : vector<2x128xf32>
    %245 = arith.divf %243, %244 : vector<2x128xf32>
    %246 = vector.extract_strided_slice %208 {offsets = [0, 256], sizes = [2, 128], strides = [1, 1]} : vector<2x512xf32> to vector<2x128xf32>
    %247 = math.tanh %246 : vector<2x128xf32>
    %248 = vector.extract_strided_slice %208 {offsets = [0, 384], sizes = [2, 128], strides = [1, 1]} : vector<2x512xf32> to vector<2x128xf32>
    %249 = arith.negf %248 : vector<2x128xf32>
    %250 = math.exp %249 : vector<2x128xf32>
    %cst_61 = arith.constant 1.000000e+00 : f32
    %251 = vector.broadcast %cst_61 : f32 to vector<2x128xf32>
    %252 = arith.addf %251, %250 : vector<2x128xf32>
    %253 = arith.divf %251, %252 : vector<2x128xf32>
    %254 = arith.mulf %245, %194 : vector<2x128xf32>
    %255 = arith.mulf %239, %247 : vector<2x128xf32>
    %256 = arith.addf %254, %255 : vector<2x128xf32>
    %257 = math.tanh %256 : vector<2x128xf32>
    %258 = arith.mulf %253, %257 : vector<2x128xf32>
    %c3 = arith.constant 3 : index
    %c0_62 = arith.constant 0 : index
    %c0_63 = arith.constant 0 : index
    %259 = vector.load %arg7[%c3, %c0_62, %c0_63] : memref<8x2x256xf32, #tpu.memory_space<vmem>>, vector<1x2x128xf32>
    %260 = vector.shape_cast %259 : vector<1x2x128xf32> to vector<2x128xf32>
    %261 = vector.shape_cast %233 : vector<2x128xf32> to vector<1x2x128xf32>
    tpu.vector_store %arg7[%c3, %c0_62, %c0_63], %261 {strides = array<i32>} : memref<8x2x256xf32, #tpu.memory_space<vmem>>, vector<1x2x128xf32>,
    %c4 = arith.constant 4 : index
    %c0_64 = arith.constant 0 : index
    %c128_65 = arith.constant 128 : index
    %262 = vector.load %arg7[%c4, %c0_64, %c128_65] : memref<8x2x256xf32, #tpu.memory_space<vmem>>, vector<1x2x128xf32>
    %263 = vector.shape_cast %262 : vector<1x2x128xf32> to vector<2x128xf32>
    %264 = vector.shape_cast %258 : vector<2x128xf32> to vector<1x2x128xf32>
    tpu.vector_store %arg7[%c4, %c0_64, %c128_65], %264 {strides = array<i32>} : memref<8x2x256xf32, #tpu.memory_space<vmem>>, vector<1x2x128xf32>,
    %265 = vector.extract_strided_slice %5 {offsets = [8, 0], sizes = [2, 512], strides = [1, 1]} : vector<16x512xf32> to vector<2x512xf32>
    %cst_66 = arith.constant dense<0.000000e+00> : vector<2x512xf32>
    %266 = tpu.matmul %233, %11, %cst_66 {dimension_numbers = #tpu.dot_dimension_numbers<[1], [0], [0], [1], [0, 0, 1, 1], [], []>} : vector<2x128xf32>, vector<128x512xf32>, vector<2x512xf32> -> vector<2x512xf32>
    %267 = arith.addf %265, %266 : vector<2x512xf32>
    %268 = vector.extract_strided_slice %10 {offsets = [6, 0], sizes = [2, 512], strides = [1, 1]} : vector<16x512xf32> to vector<2x512xf32>
    %cst_67 = arith.constant dense<0.000000e+00> : vector<2x512xf32>
    %269 = tpu.matmul %258, %12, %cst_67 {dimension_numbers = #tpu.dot_dimension_numbers<[1], [0], [0], [1], [0, 0, 1, 1], [], []>} : vector<2x128xf32>, vector<128x512xf32>, vector<2x512xf32> -> vector<2x512xf32>
    %270 = arith.addf %268, %269 : vector<2x512xf32>
    %271 = vector.extract_strided_slice %267 {offsets = [0, 0], sizes = [2, 128], strides = [1, 1]} : vector<2x512xf32> to vector<2x128xf32>
    %272 = arith.negf %271 : vector<2x128xf32>
    %273 = math.exp %272 : vector<2x128xf32>
    %cst_68 = arith.constant 1.000000e+00 : f32
    %274 = vector.broadcast %cst_68 : f32 to vector<2x128xf32>
    %275 = arith.addf %274, %273 : vector<2x128xf32>
    %276 = arith.divf %274, %275 : vector<2x128xf32>
    %277 = vector.extract_strided_slice %267 {offsets = [0, 128], sizes = [2, 128], strides = [1, 1]} : vector<2x512xf32> to vector<2x128xf32>
    %278 = arith.negf %277 : vector<2x128xf32>
    %279 = math.exp %278 : vector<2x128xf32>
    %cst_69 = arith.constant 1.000000e+00 : f32
    %280 = vector.broadcast %cst_69 : f32 to vector<2x128xf32>
    %281 = arith.addf %280, %279 : vector<2x128xf32>
    %282 = arith.divf %280, %281 : vector<2x128xf32>
    %283 = vector.extract_strided_slice %267 {offsets = [0, 256], sizes = [2, 128], strides = [1, 1]} : vector<2x512xf32> to vector<2x128xf32>
    %284 = math.tanh %283 : vector<2x128xf32>
    %285 = vector.extract_strided_slice %267 {offsets = [0, 384], sizes = [2, 128], strides = [1, 1]} : vector<2x512xf32> to vector<2x128xf32>
    %286 = arith.negf %285 : vector<2x128xf32>
    %287 = math.exp %286 : vector<2x128xf32>
    %cst_70 = arith.constant 1.000000e+00 : f32
    %288 = vector.broadcast %cst_70 : f32 to vector<2x128xf32>
    %289 = arith.addf %288, %287 : vector<2x128xf32>
    %290 = arith.divf %288, %289 : vector<2x128xf32>
    %291 = arith.mulf %282, %231 : vector<2x128xf32>
    %292 = arith.mulf %276, %284 : vector<2x128xf32>
    %293 = arith.addf %291, %292 : vector<2x128xf32>
    %294 = math.tanh %293 : vector<2x128xf32>
    %295 = arith.mulf %290, %294 : vector<2x128xf32>
    %296 = vector.extract_strided_slice %270 {offsets = [0, 0], sizes = [2, 128], strides = [1, 1]} : vector<2x512xf32> to vector<2x128xf32>
    %297 = arith.negf %296 : vector<2x128xf32>
    %298 = math.exp %297 : vector<2x128xf32>
    %cst_71 = arith.constant 1.000000e+00 : f32
    %299 = vector.broadcast %cst_71 : f32 to vector<2x128xf32>
    %300 = arith.addf %299, %298 : vector<2x128xf32>
    %301 = arith.divf %299, %300 : vector<2x128xf32>
    %302 = vector.extract_strided_slice %270 {offsets = [0, 128], sizes = [2, 128], strides = [1, 1]} : vector<2x512xf32> to vector<2x128xf32>
    %303 = arith.negf %302 : vector<2x128xf32>
    %304 = math.exp %303 : vector<2x128xf32>
    %cst_72 = arith.constant 1.000000e+00 : f32
    %305 = vector.broadcast %cst_72 : f32 to vector<2x128xf32>
    %306 = arith.addf %305, %304 : vector<2x128xf32>
    %307 = arith.divf %305, %306 : vector<2x128xf32>
    %308 = vector.extract_strided_slice %270 {offsets = [0, 256], sizes = [2, 128], strides = [1, 1]} : vector<2x512xf32> to vector<2x128xf32>
    %309 = math.tanh %308 : vector<2x128xf32>
    %310 = vector.extract_strided_slice %270 {offsets = [0, 384], sizes = [2, 128], strides = [1, 1]} : vector<2x512xf32> to vector<2x128xf32>
    %311 = arith.negf %310 : vector<2x128xf32>
    %312 = math.exp %311 : vector<2x128xf32>
    %cst_73 = arith.constant 1.000000e+00 : f32
    %313 = vector.broadcast %cst_73 : f32 to vector<2x128xf32>
    %314 = arith.addf %313, %312 : vector<2x128xf32>
    %315 = arith.divf %313, %314 : vector<2x128xf32>
    %316 = arith.mulf %307, %256 : vector<2x128xf32>
    %317 = arith.mulf %301, %309 : vector<2x128xf32>
    %318 = arith.addf %316, %317 : vector<2x128xf32>
    %319 = math.tanh %318 : vector<2x128xf32>
    %320 = arith.mulf %315, %319 : vector<2x128xf32>
    %c4_74 = arith.constant 4 : index
    %c0_75 = arith.constant 0 : index
    %c0_76 = arith.constant 0 : index
    %321 = vector.load %arg7[%c4_74, %c0_75, %c0_76] : memref<8x2x256xf32, #tpu.memory_space<vmem>>, vector<1x2x128xf32>
    %322 = vector.shape_cast %321 : vector<1x2x128xf32> to vector<2x128xf32>
    %323 = vector.shape_cast %295 : vector<2x128xf32> to vector<1x2x128xf32>
    tpu.vector_store %arg7[%c4_74, %c0_75, %c0_76], %323 {strides = array<i32>} : memref<8x2x256xf32, #tpu.memory_space<vmem>>, vector<1x2x128xf32>,
    %c3_77 = arith.constant 3 : index
    %c0_78 = arith.constant 0 : index
    %c128_79 = arith.constant 128 : index
    %324 = vector.load %arg7[%c3_77, %c0_78, %c128_79] : memref<8x2x256xf32, #tpu.memory_space<vmem>>, vector<1x2x128xf32>
    %325 = vector.shape_cast %324 : vector<1x2x128xf32> to vector<2x128xf32>
    %326 = vector.shape_cast %320 : vector<2x128xf32> to vector<1x2x128xf32>
    tpu.vector_store %arg7[%c3_77, %c0_78, %c128_79], %326 {strides = array<i32>} : memref<8x2x256xf32, #tpu.memory_space<vmem>>, vector<1x2x128xf32>,
    %327 = vector.extract_strided_slice %5 {offsets = [10, 0], sizes = [2, 512], strides = [1, 1]} : vector<16x512xf32> to vector<2x512xf32>
    %cst_80 = arith.constant dense<0.000000e+00> : vector<2x512xf32>
    %328 = tpu.matmul %295, %11, %cst_80 {dimension_numbers = #tpu.dot_dimension_numbers<[1], [0], [0], [1], [0, 0, 1, 1], [], []>} : vector<2x128xf32>, vector<128x512xf32>, vector<2x512xf32> -> vector<2x512xf32>
    %329 = arith.addf %327, %328 : vector<2x512xf32>
    %330 = vector.extract_strided_slice %10 {offsets = [4, 0], sizes = [2, 512], strides = [1, 1]} : vector<16x512xf32> to vector<2x512xf32>
    %cst_81 = arith.constant dense<0.000000e+00> : vector<2x512xf32>
    %331 = tpu.matmul %320, %12, %cst_81 {dimension_numbers = #tpu.dot_dimension_numbers<[1], [0], [0], [1], [0, 0, 1, 1], [], []>} : vector<2x128xf32>, vector<128x512xf32>, vector<2x512xf32> -> vector<2x512xf32>
    %332 = arith.addf %330, %331 : vector<2x512xf32>
    %333 = vector.extract_strided_slice %329 {offsets = [0, 0], sizes = [2, 128], strides = [1, 1]} : vector<2x512xf32> to vector<2x128xf32>
    %334 = arith.negf %333 : vector<2x128xf32>
    %335 = math.exp %334 : vector<2x128xf32>
    %cst_82 = arith.constant 1.000000e+00 : f32
    %336 = vector.broadcast %cst_82 : f32 to vector<2x128xf32>
    %337 = arith.addf %336, %335 : vector<2x128xf32>
    %338 = arith.divf %336, %337 : vector<2x128xf32>
    %339 = vector.extract_strided_slice %329 {offsets = [0, 128], sizes = [2, 128], strides = [1, 1]} : vector<2x512xf32> to vector<2x128xf32>
    %340 = arith.negf %339 : vector<2x128xf32>
    %341 = math.exp %340 : vector<2x128xf32>
    %cst_83 = arith.constant 1.000000e+00 : f32
    %342 = vector.broadcast %cst_83 : f32 to vector<2x128xf32>
    %343 = arith.addf %342, %341 : vector<2x128xf32>
    %344 = arith.divf %342, %343 : vector<2x128xf32>
    %345 = vector.extract_strided_slice %329 {offsets = [0, 256], sizes = [2, 128], strides = [1, 1]} : vector<2x512xf32> to vector<2x128xf32>
    %346 = math.tanh %345 : vector<2x128xf32>
    %347 = vector.extract_strided_slice %329 {offsets = [0, 384], sizes = [2, 128], strides = [1, 1]} : vector<2x512xf32> to vector<2x128xf32>
    %348 = arith.negf %347 : vector<2x128xf32>
    %349 = math.exp %348 : vector<2x128xf32>
    %cst_84 = arith.constant 1.000000e+00 : f32
    %350 = vector.broadcast %cst_84 : f32 to vector<2x128xf32>
    %351 = arith.addf %350, %349 : vector<2x128xf32>
    %352 = arith.divf %350, %351 : vector<2x128xf32>
    %353 = arith.mulf %344, %293 : vector<2x128xf32>
    %354 = arith.mulf %338, %346 : vector<2x128xf32>
    %355 = arith.addf %353, %354 : vector<2x128xf32>
    %356 = math.tanh %355 : vector<2x128xf32>
    %357 = arith.mulf %352, %356 : vector<2x128xf32>
    %358 = vector.extract_strided_slice %332 {offsets = [0, 0], sizes = [2, 128], strides = [1, 1]} : vector<2x512xf32> to vector<2x128xf32>
    %359 = arith.negf %358 : vector<2x128xf32>
    %360 = math.exp %359 : vector<2x128xf32>
    %cst_85 = arith.constant 1.000000e+00 : f32
    %361 = vector.broadcast %cst_85 : f32 to vector<2x128xf32>
    %362 = arith.addf %361, %360 : vector<2x128xf32>
    %363 = arith.divf %361, %362 : vector<2x128xf32>
    %364 = vector.extract_strided_slice %332 {offsets = [0, 128], sizes = [2, 128], strides = [1, 1]} : vector<2x512xf32> to vector<2x128xf32>
    %365 = arith.negf %364 : vector<2x128xf32>
    %366 = math.exp %365 : vector<2x128xf32>
    %cst_86 = arith.constant 1.000000e+00 : f32
    %367 = vector.broadcast %cst_86 : f32 to vector<2x128xf32>
    %368 = arith.addf %367, %366 : vector<2x128xf32>
    %369 = arith.divf %367, %368 : vector<2x128xf32>
    %370 = vector.extract_strided_slice %332 {offsets = [0, 256], sizes = [2, 128], strides = [1, 1]} : vector<2x512xf32> to vector<2x128xf32>
    %371 = math.tanh %370 : vector<2x128xf32>
    %372 = vector.extract_strided_slice %332 {offsets = [0, 384], sizes = [2, 128], strides = [1, 1]} : vector<2x512xf32> to vector<2x128xf32>
    %373 = arith.negf %372 : vector<2x128xf32>
    %374 = math.exp %373 : vector<2x128xf32>
    %cst_87 = arith.constant 1.000000e+00 : f32
    %375 = vector.broadcast %cst_87 : f32 to vector<2x128xf32>
    %376 = arith.addf %375, %374 : vector<2x128xf32>
    %377 = arith.divf %375, %376 : vector<2x128xf32>
    %378 = arith.mulf %369, %318 : vector<2x128xf32>
    %379 = arith.mulf %363, %371 : vector<2x128xf32>
    %380 = arith.addf %378, %379 : vector<2x128xf32>
    %381 = math.tanh %380 : vector<2x128xf32>
    %382 = arith.mulf %377, %381 : vector<2x128xf32>
    %c5_88 = arith.constant 5 : index
    %c0_89 = arith.constant 0 : index
    %c0_90 = arith.constant 0 : index
    %383 = vector.load %arg7[%c5_88, %c0_89, %c0_90] : memref<8x2x256xf32, #tpu.memory_space<vmem>>, vector<1x2x128xf32>
    %384 = vector.shape_cast %383 : vector<1x2x128xf32> to vector<2x128xf32>
    %385 = vector.shape_cast %357 : vector<2x128xf32> to vector<1x2x128xf32>
    tpu.vector_store %arg7[%c5_88, %c0_89, %c0_90], %385 {strides = array<i32>} : memref<8x2x256xf32, #tpu.memory_space<vmem>>, vector<1x2x128xf32>,
    %c2_91 = arith.constant 2 : index
    %c0_92 = arith.constant 0 : index
    %c128_93 = arith.constant 128 : index
    %386 = vector.load %arg7[%c2_91, %c0_92, %c128_93] : memref<8x2x256xf32, #tpu.memory_space<vmem>>, vector<1x2x128xf32>
    %387 = vector.shape_cast %386 : vector<1x2x128xf32> to vector<2x128xf32>
    %388 = vector.shape_cast %382 : vector<2x128xf32> to vector<1x2x128xf32>
    tpu.vector_store %arg7[%c2_91, %c0_92, %c128_93], %388 {strides = array<i32>} : memref<8x2x256xf32, #tpu.memory_space<vmem>>, vector<1x2x128xf32>,
    %389 = vector.extract_strided_slice %5 {offsets = [12, 0], sizes = [2, 512], strides = [1, 1]} : vector<16x512xf32> to vector<2x512xf32>
    %cst_94 = arith.constant dense<0.000000e+00> : vector<2x512xf32>
    %390 = tpu.matmul %357, %11, %cst_94 {dimension_numbers = #tpu.dot_dimension_numbers<[1], [0], [0], [1], [0, 0, 1, 1], [], []>} : vector<2x128xf32>, vector<128x512xf32>, vector<2x512xf32> -> vector<2x512xf32>
    %391 = arith.addf %389, %390 : vector<2x512xf32>
    %392 = vector.extract_strided_slice %10 {offsets = [2, 0], sizes = [2, 512], strides = [1, 1]} : vector<16x512xf32> to vector<2x512xf32>
    %cst_95 = arith.constant dense<0.000000e+00> : vector<2x512xf32>
    %393 = tpu.matmul %382, %12, %cst_95 {dimension_numbers = #tpu.dot_dimension_numbers<[1], [0], [0], [1], [0, 0, 1, 1], [], []>} : vector<2x128xf32>, vector<128x512xf32>, vector<2x512xf32> -> vector<2x512xf32>
    %394 = arith.addf %392, %393 : vector<2x512xf32>
    %395 = vector.extract_strided_slice %391 {offsets = [0, 0], sizes = [2, 128], strides = [1, 1]} : vector<2x512xf32> to vector<2x128xf32>
    %396 = arith.negf %395 : vector<2x128xf32>
    %397 = math.exp %396 : vector<2x128xf32>
    %cst_96 = arith.constant 1.000000e+00 : f32
    %398 = vector.broadcast %cst_96 : f32 to vector<2x128xf32>
    %399 = arith.addf %398, %397 : vector<2x128xf32>
    %400 = arith.divf %398, %399 : vector<2x128xf32>
    %401 = vector.extract_strided_slice %391 {offsets = [0, 128], sizes = [2, 128], strides = [1, 1]} : vector<2x512xf32> to vector<2x128xf32>
    %402 = arith.negf %401 : vector<2x128xf32>
    %403 = math.exp %402 : vector<2x128xf32>
    %cst_97 = arith.constant 1.000000e+00 : f32
    %404 = vector.broadcast %cst_97 : f32 to vector<2x128xf32>
    %405 = arith.addf %404, %403 : vector<2x128xf32>
    %406 = arith.divf %404, %405 : vector<2x128xf32>
    %407 = vector.extract_strided_slice %391 {offsets = [0, 256], sizes = [2, 128], strides = [1, 1]} : vector<2x512xf32> to vector<2x128xf32>
    %408 = math.tanh %407 : vector<2x128xf32>
    %409 = vector.extract_strided_slice %391 {offsets = [0, 384], sizes = [2, 128], strides = [1, 1]} : vector<2x512xf32> to vector<2x128xf32>
    %410 = arith.negf %409 : vector<2x128xf32>
    %411 = math.exp %410 : vector<2x128xf32>
    %cst_98 = arith.constant 1.000000e+00 : f32
    %412 = vector.broadcast %cst_98 : f32 to vector<2x128xf32>
    %413 = arith.addf %412, %411 : vector<2x128xf32>
    %414 = arith.divf %412, %413 : vector<2x128xf32>
    %415 = arith.mulf %406, %355 : vector<2x128xf32>
    %416 = arith.mulf %400, %408 : vector<2x128xf32>
    %417 = arith.addf %415, %416 : vector<2x128xf32>
    %418 = math.tanh %417 : vector<2x128xf32>
    %419 = arith.mulf %414, %418 : vector<2x128xf32>
    %420 = vector.extract_strided_slice %394 {offsets = [0, 0], sizes = [2, 128], strides = [1, 1]} : vector<2x512xf32> to vector<2x128xf32>
    %421 = arith.negf %420 : vector<2x128xf32>
    %422 = math.exp %421 : vector<2x128xf32>
    %cst_99 = arith.constant 1.000000e+00 : f32
    %423 = vector.broadcast %cst_99 : f32 to vector<2x128xf32>
    %424 = arith.addf %423, %422 : vector<2x128xf32>
    %425 = arith.divf %423, %424 : vector<2x128xf32>
    %426 = vector.extract_strided_slice %394 {offsets = [0, 128], sizes = [2, 128], strides = [1, 1]} : vector<2x512xf32> to vector<2x128xf32>
    %427 = arith.negf %426 : vector<2x128xf32>
    %428 = math.exp %427 : vector<2x128xf32>
    %cst_100 = arith.constant 1.000000e+00 : f32
    %429 = vector.broadcast %cst_100 : f32 to vector<2x128xf32>
    %430 = arith.addf %429, %428 : vector<2x128xf32>
    %431 = arith.divf %429, %430 : vector<2x128xf32>
    %432 = vector.extract_strided_slice %394 {offsets = [0, 256], sizes = [2, 128], strides = [1, 1]} : vector<2x512xf32> to vector<2x128xf32>
    %433 = math.tanh %432 : vector<2x128xf32>
    %434 = vector.extract_strided_slice %394 {offsets = [0, 384], sizes = [2, 128], strides = [1, 1]} : vector<2x512xf32> to vector<2x128xf32>
    %435 = arith.negf %434 : vector<2x128xf32>
    %436 = math.exp %435 : vector<2x128xf32>
    %cst_101 = arith.constant 1.000000e+00 : f32
    %437 = vector.broadcast %cst_101 : f32 to vector<2x128xf32>
    %438 = arith.addf %437, %436 : vector<2x128xf32>
    %439 = arith.divf %437, %438 : vector<2x128xf32>
    %440 = arith.mulf %431, %380 : vector<2x128xf32>
    %441 = arith.mulf %425, %433 : vector<2x128xf32>
    %442 = arith.addf %440, %441 : vector<2x128xf32>
    %443 = math.tanh %442 : vector<2x128xf32>
    %444 = arith.mulf %439, %443 : vector<2x128xf32>
    %c6_102 = arith.constant 6 : index
    %c0_103 = arith.constant 0 : index
    %c0_104 = arith.constant 0 : index
    %445 = vector.load %arg7[%c6_102, %c0_103, %c0_104] : memref<8x2x256xf32, #tpu.memory_space<vmem>>, vector<1x2x128xf32>
    %446 = vector.shape_cast %445 : vector<1x2x128xf32> to vector<2x128xf32>
    %447 = vector.shape_cast %419 : vector<2x128xf32> to vector<1x2x128xf32>
    tpu.vector_store %arg7[%c6_102, %c0_103, %c0_104], %447 {strides = array<i32>} : memref<8x2x256xf32, #tpu.memory_space<vmem>>, vector<1x2x128xf32>,
    %c1_105 = arith.constant 1 : index
    %c0_106 = arith.constant 0 : index
    %c128_107 = arith.constant 128 : index
    %448 = vector.load %arg7[%c1_105, %c0_106, %c128_107] : memref<8x2x256xf32, #tpu.memory_space<vmem>>, vector<1x2x128xf32>
    %449 = vector.shape_cast %448 : vector<1x2x128xf32> to vector<2x128xf32>
    %450 = vector.shape_cast %444 : vector<2x128xf32> to vector<1x2x128xf32>
    tpu.vector_store %arg7[%c1_105, %c0_106, %c128_107], %450 {strides = array<i32>} : memref<8x2x256xf32, #tpu.memory_space<vmem>>, vector<1x2x128xf32>,
    %451 = vector.extract_strided_slice %5 {offsets = [14, 0], sizes = [2, 512], strides = [1, 1]} : vector<16x512xf32> to vector<2x512xf32>
    %cst_108 = arith.constant dense<0.000000e+00> : vector<2x512xf32>
    %452 = tpu.matmul %419, %11, %cst_108 {dimension_numbers = #tpu.dot_dimension_numbers<[1], [0], [0], [1], [0, 0, 1, 1], [], []>} : vector<2x128xf32>, vector<128x512xf32>, vector<2x512xf32> -> vector<2x512xf32>
    %453 = arith.addf %451, %452 : vector<2x512xf32>
    %454 = vector.extract_strided_slice %10 {offsets = [0, 0], sizes = [2, 512], strides = [1, 1]} : vector<16x512xf32> to vector<2x512xf32>
    %cst_109 = arith.constant dense<0.000000e+00> : vector<2x512xf32>
    %455 = tpu.matmul %444, %12, %cst_109 {dimension_numbers = #tpu.dot_dimension_numbers<[1], [0], [0], [1], [0, 0, 1, 1], [], []>} : vector<2x128xf32>, vector<128x512xf32>, vector<2x512xf32> -> vector<2x512xf32>
    %456 = arith.addf %454, %455 : vector<2x512xf32>
    %457 = vector.extract_strided_slice %453 {offsets = [0, 0], sizes = [2, 128], strides = [1, 1]} : vector<2x512xf32> to vector<2x128xf32>
    %458 = arith.negf %457 : vector<2x128xf32>
    %459 = math.exp %458 : vector<2x128xf32>
    %cst_110 = arith.constant 1.000000e+00 : f32
    %460 = vector.broadcast %cst_110 : f32 to vector<2x128xf32>
    %461 = arith.addf %460, %459 : vector<2x128xf32>
    %462 = arith.divf %460, %461 : vector<2x128xf32>
    %463 = vector.extract_strided_slice %453 {offsets = [0, 128], sizes = [2, 128], strides = [1, 1]} : vector<2x512xf32> to vector<2x128xf32>
    %464 = arith.negf %463 : vector<2x128xf32>
    %465 = math.exp %464 : vector<2x128xf32>
    %cst_111 = arith.constant 1.000000e+00 : f32
    %466 = vector.broadcast %cst_111 : f32 to vector<2x128xf32>
    %467 = arith.addf %466, %465 : vector<2x128xf32>
    %468 = arith.divf %466, %467 : vector<2x128xf32>
    %469 = vector.extract_strided_slice %453 {offsets = [0, 256], sizes = [2, 128], strides = [1, 1]} : vector<2x512xf32> to vector<2x128xf32>
    %470 = math.tanh %469 : vector<2x128xf32>
    %471 = vector.extract_strided_slice %453 {offsets = [0, 384], sizes = [2, 128], strides = [1, 1]} : vector<2x512xf32> to vector<2x128xf32>
    %472 = arith.negf %471 : vector<2x128xf32>
    %473 = math.exp %472 : vector<2x128xf32>
    %cst_112 = arith.constant 1.000000e+00 : f32
    %474 = vector.broadcast %cst_112 : f32 to vector<2x128xf32>
    %475 = arith.addf %474, %473 : vector<2x128xf32>
    %476 = arith.divf %474, %475 : vector<2x128xf32>
    %477 = arith.mulf %468, %417 : vector<2x128xf32>
    %478 = arith.mulf %462, %470 : vector<2x128xf32>
    %479 = arith.addf %477, %478 : vector<2x128xf32>
    %480 = math.tanh %479 : vector<2x128xf32>
    %481 = arith.mulf %476, %480 : vector<2x128xf32>
    %482 = vector.extract_strided_slice %456 {offsets = [0, 0], sizes = [2, 128], strides = [1, 1]} : vector<2x512xf32> to vector<2x128xf32>
    %483 = arith.negf %482 : vector<2x128xf32>
    %484 = math.exp %483 : vector<2x128xf32>
    %cst_113 = arith.constant 1.000000e+00 : f32
    %485 = vector.broadcast %cst_113 : f32 to vector<2x128xf32>
    %486 = arith.addf %485, %484 : vector<2x128xf32>
    %487 = arith.divf %485, %486 : vector<2x128xf32>
    %488 = vector.extract_strided_slice %456 {offsets = [0, 128], sizes = [2, 128], strides = [1, 1]} : vector<2x512xf32> to vector<2x128xf32>
    %489 = arith.negf %488 : vector<2x128xf32>
    %490 = math.exp %489 : vector<2x128xf32>
    %cst_114 = arith.constant 1.000000e+00 : f32
    %491 = vector.broadcast %cst_114 : f32 to vector<2x128xf32>
    %492 = arith.addf %491, %490 : vector<2x128xf32>
    %493 = arith.divf %491, %492 : vector<2x128xf32>
    %494 = vector.extract_strided_slice %456 {offsets = [0, 256], sizes = [2, 128], strides = [1, 1]} : vector<2x512xf32> to vector<2x128xf32>
    %495 = math.tanh %494 : vector<2x128xf32>
    %496 = vector.extract_strided_slice %456 {offsets = [0, 384], sizes = [2, 128], strides = [1, 1]} : vector<2x512xf32> to vector<2x128xf32>
    %497 = arith.negf %496 : vector<2x128xf32>
    %498 = math.exp %497 : vector<2x128xf32>
    %cst_115 = arith.constant 1.000000e+00 : f32
    %499 = vector.broadcast %cst_115 : f32 to vector<2x128xf32>
    %500 = arith.addf %499, %498 : vector<2x128xf32>
    %501 = arith.divf %499, %500 : vector<2x128xf32>
    %502 = arith.mulf %493, %442 : vector<2x128xf32>
    %503 = arith.mulf %487, %495 : vector<2x128xf32>
    %504 = arith.addf %502, %503 : vector<2x128xf32>
    %505 = math.tanh %504 : vector<2x128xf32>
    %506 = arith.mulf %501, %505 : vector<2x128xf32>
    %c7_116 = arith.constant 7 : index
    %c0_117 = arith.constant 0 : index
    %c0_118 = arith.constant 0 : index
    %507 = vector.load %arg7[%c7_116, %c0_117, %c0_118] : memref<8x2x256xf32, #tpu.memory_space<vmem>>, vector<1x2x128xf32>
    %508 = vector.shape_cast %507 : vector<1x2x128xf32> to vector<2x128xf32>
    %509 = vector.shape_cast %481 : vector<2x128xf32> to vector<1x2x128xf32>
    tpu.vector_store %arg7[%c7_116, %c0_117, %c0_118], %509 {strides = array<i32>} : memref<8x2x256xf32, #tpu.memory_space<vmem>>, vector<1x2x128xf32>,
    %c0_119 = arith.constant 0 : index
    %c0_120 = arith.constant 0 : index
    %c128_121 = arith.constant 128 : index
    %510 = vector.load %arg7[%c0_119, %c0_120, %c128_121] : memref<8x2x256xf32, #tpu.memory_space<vmem>>, vector<1x2x128xf32>
    %511 = vector.shape_cast %510 : vector<1x2x128xf32> to vector<2x128xf32>
    %512 = vector.shape_cast %506 : vector<2x128xf32> to vector<1x2x128xf32>
    tpu.vector_store %arg7[%c0_119, %c0_120, %c128_121], %512 {strides = array<i32>} : memref<8x2x256xf32, #tpu.memory_space<vmem>>, vector<1x2x128xf32>,
    return
  }
}

module attributes {stable_mosaic.version = 11 : i64} {
  func.func @conv_stack_kernel(%arg0: i32, %arg1: memref<1x256x8xf32, #tpu.memory_space<vmem>>, %arg2: memref<3x128x256xf32, #tpu.memory_space<vmem>>, %arg3: memref<128x1xf32, #tpu.memory_space<vmem>>, %arg4: memref<3x64x128xf32, #tpu.memory_space<vmem>>, %arg5: memref<64x1xf32, #tpu.memory_space<vmem>>, %arg6: memref<3x32x64xf32, #tpu.memory_space<vmem>>, %arg7: memref<32x1xf32, #tpu.memory_space<vmem>>, %arg8: memref<3x16x32xf32, #tpu.memory_space<vmem>>, %arg9: memref<16x1xf32, #tpu.memory_space<vmem>>, %arg10: memref<3x8x16xf32, #tpu.memory_space<vmem>>, %arg11: memref<8x1xf32, #tpu.memory_space<vmem>>, %arg12: memref<3x4x8xf32, #tpu.memory_space<vmem>>, %arg13: memref<4x1xf32, #tpu.memory_space<vmem>>, %arg14: memref<3x1x4xf32, #tpu.memory_space<vmem>>, %arg15: memref<1x1xf32, #tpu.memory_space<vmem>>, %arg16: memref<8x16xf32, #tpu.memory_space<vmem>>, %arg17: memref<16x64xf32, #tpu.memory_space<vmem>>, %arg18: memref<64x256xf32, #tpu.memory_space<vmem>>, %arg19: memref<1x1x256xf32, #tpu.memory_space<vmem>>, %arg20: memref<256x258xf32, #tpu.memory_space<vmem>>) attributes {dimension_semantics = [#tpu.dimension_semantics<parallel>], iteration_bounds = array<i64: 2>, scalar_prefetch = 0 : i64, scratch_operands = 1 : i64, tpu.core_type = #tpu.core_type<tc>, window_params = [{transform_indices = @transform_0, window_bounds = array<i64: 1, 256, 8>}, {pipeline_mode = #tpu.pipeline_mode<synchronous>, transform_indices = @transform_1, window_bounds = array<i64: 3, 128, 256>}, {pipeline_mode = #tpu.pipeline_mode<synchronous>, transform_indices = @transform_2, window_bounds = array<i64: 128, 1>}, {pipeline_mode = #tpu.pipeline_mode<synchronous>, transform_indices = @transform_3, window_bounds = array<i64: 3, 64, 128>}, {pipeline_mode = #tpu.pipeline_mode<synchronous>, transform_indices = @transform_4, window_bounds = array<i64: 64, 1>}, {pipeline_mode = #tpu.pipeline_mode<synchronous>, transform_indices = @transform_5, window_bounds = array<i64: 3, 32, 64>}, {pipeline_mode = #tpu.pipeline_mode<synchronous>, transform_indices = @transform_6, window_bounds = array<i64: 32, 1>}, {pipeline_mode = #tpu.pipeline_mode<synchronous>, transform_indices = @transform_7, window_bounds = array<i64: 3, 16, 32>}, {pipeline_mode = #tpu.pipeline_mode<synchronous>, transform_indices = @transform_8, window_bounds = array<i64: 16, 1>}, {pipeline_mode = #tpu.pipeline_mode<synchronous>, transform_indices = @transform_9, window_bounds = array<i64: 3, 8, 16>}, {pipeline_mode = #tpu.pipeline_mode<synchronous>, transform_indices = @transform_10, window_bounds = array<i64: 8, 1>}, {pipeline_mode = #tpu.pipeline_mode<synchronous>, transform_indices = @transform_11, window_bounds = array<i64: 3, 4, 8>}, {pipeline_mode = #tpu.pipeline_mode<synchronous>, transform_indices = @transform_12, window_bounds = array<i64: 4, 1>}, {pipeline_mode = #tpu.pipeline_mode<synchronous>, transform_indices = @transform_13, window_bounds = array<i64: 3, 1, 4>}, {pipeline_mode = #tpu.pipeline_mode<synchronous>, transform_indices = @transform_14, window_bounds = array<i64: 1, 1>}, {pipeline_mode = #tpu.pipeline_mode<synchronous>, transform_indices = @transform_15, window_bounds = array<i64: 8, 16>}, {pipeline_mode = #tpu.pipeline_mode<synchronous>, transform_indices = @transform_16, window_bounds = array<i64: 16, 64>}, {pipeline_mode = #tpu.pipeline_mode<synchronous>, transform_indices = @transform_17, window_bounds = array<i64: 64, 256>}, {transform_indices = @transform_18, window_bounds = array<i64: 1, 1, 256>}]} {
    %c0 = arith.constant 0 : index
    %c0_0 = arith.constant 0 : index
    %c0_1 = arith.constant 0 : index
    %0 = vector.load %arg1[%c0, %c0_0, %c0_1] : memref<1x256x8xf32, #tpu.memory_space<vmem>>, vector<1x256x8xf32>
    %1 = vector.shape_cast %0 : vector<1x256x8xf32> to vector<256x8xf32>
    %cst = arith.constant 0.000000e+00 : f32
    %2 = vector.broadcast %cst : f32 to vector<256x1xf32>
    %c0_2 = arith.constant 0 : index
    %c0_3 = arith.constant 0 : index
    %3 = vector.load %arg20[%c0_2, %c0_3] : memref<256x258xf32, #tpu.memory_space<vmem>>, vector<256x1xf32>
    tpu.vector_store %arg20[%c0_2, %c0_3], %2 {strides = array<i32>} : memref<256x258xf32, #tpu.memory_space<vmem>>, vector<256x1xf32>,
    %c0_4 = arith.constant 0 : index
    %c9 = arith.constant 9 : index
    %4 = vector.load %arg20[%c0_4, %c9] : memref<256x258xf32, #tpu.memory_space<vmem>>, vector<256x1xf32>
    tpu.vector_store %arg20[%c0_4, %c9], %2 {strides = array<i32>} : memref<256x258xf32, #tpu.memory_space<vmem>>, vector<256x1xf32>,
    %c0_5 = arith.constant 0 : index
    %c1 = arith.constant 1 : index
    %5 = vector.load %arg20[%c0_5, %c1] : memref<256x258xf32, #tpu.memory_space<vmem>>, vector<256x8xf32>
    tpu.vector_store %arg20[%c0_5, %c1], %1 {strides = array<i32>} : memref<256x258xf32, #tpu.memory_space<vmem>>, vector<256x8xf32>,
    %cst_6 = arith.constant 0.000000e+00 : f32
    %6 = vector.broadcast %cst_6 : f32 to vector<128x8xf32>
    %c0_7 = arith.constant 0 : index
    %c0_8 = arith.constant 0 : index
    %c0_9 = arith.constant 0 : index
    %7 = vector.load %arg2[%c0_7, %c0_8, %c0_9] : memref<3x128x256xf32, #tpu.memory_space<vmem>>, vector<1x128x256xf32>
    %8 = vector.shape_cast %7 : vector<1x128x256xf32> to vector<128x256xf32>
    %c0_10 = arith.constant 0 : index
    %c0_11 = arith.constant 0 : index
    %9 = vector.load %arg20[%c0_10, %c0_11] : memref<256x258xf32, #tpu.memory_space<vmem>>, vector<256x8xf32>
    %cst_12 = arith.constant dense<0.000000e+00> : vector<128x8xf32>
    %10 = tpu.matmul %8, %9, %cst_12 {dimension_numbers = #tpu.dot_dimension_numbers<[1], [0], [0], [1], [0, 0, 1, 1], [], []>} : vector<128x256xf32>, vector<256x8xf32>, vector<128x8xf32> -> vector<128x8xf32>
    %11 = arith.addf %6, %10 : vector<128x8xf32>
    %c1_13 = arith.constant 1 : index
    %c0_14 = arith.constant 0 : index
    %c0_15 = arith.constant 0 : index
    %12 = vector.load %arg2[%c1_13, %c0_14, %c0_15] : memref<3x128x256xf32, #tpu.memory_space<vmem>>, vector<1x128x256xf32>
    %13 = vector.shape_cast %12 : vector<1x128x256xf32> to vector<128x256xf32>
    %c0_16 = arith.constant 0 : index
    %c1_17 = arith.constant 1 : index
    %14 = vector.load %arg20[%c0_16, %c1_17] : memref<256x258xf32, #tpu.memory_space<vmem>>, vector<256x8xf32>
    %cst_18 = arith.constant dense<0.000000e+00> : vector<128x8xf32>
    %15 = tpu.matmul %13, %14, %cst_18 {dimension_numbers = #tpu.dot_dimension_numbers<[1], [0], [0], [1], [0, 0, 1, 1], [], []>} : vector<128x256xf32>, vector<256x8xf32>, vector<128x8xf32> -> vector<128x8xf32>
    %16 = arith.addf %11, %15 : vector<128x8xf32>
    %c2 = arith.constant 2 : index
    %c0_19 = arith.constant 0 : index
    %c0_20 = arith.constant 0 : index
    %17 = vector.load %arg2[%c2, %c0_19, %c0_20] : memref<3x128x256xf32, #tpu.memory_space<vmem>>, vector<1x128x256xf32>
    %18 = vector.shape_cast %17 : vector<1x128x256xf32> to vector<128x256xf32>
    %c0_21 = arith.constant 0 : index
    %c2_22 = arith.constant 2 : index
    %19 = vector.load %arg20[%c0_21, %c2_22] : memref<256x258xf32, #tpu.memory_space<vmem>>, vector<256x8xf32>
    %cst_23 = arith.constant dense<0.000000e+00> : vector<128x8xf32>
    %20 = tpu.matmul %18, %19, %cst_23 {dimension_numbers = #tpu.dot_dimension_numbers<[1], [0], [0], [1], [0, 0, 1, 1], [], []>} : vector<128x256xf32>, vector<256x8xf32>, vector<128x8xf32> -> vector<128x8xf32>
    %21 = arith.addf %16, %20 : vector<128x8xf32>
    %c0_24 = arith.constant 0 : index
    %c0_25 = arith.constant 0 : index
    %22 = vector.load %arg3[%c0_24, %c0_25] : memref<128x1xf32, #tpu.memory_space<vmem>>, vector<128x1xf32>
    %23 = vector.broadcast %22 : vector<128x1xf32> to vector<128x8xf32>
    %24 = arith.addf %21, %23 : vector<128x8xf32>
    %cst_26 = arith.constant 0.000000e+00 : f32
    %25 = vector.broadcast %cst_26 : f32 to vector<128x8xf32>
    %26 = arith.cmpf ogt, %24, %25 : vector<128x8xf32>
    %cst_27 = arith.constant 0.00999999977 : f32
    %27 = vector.broadcast %cst_27 : f32 to vector<128x8xf32>
    %28 = arith.mulf %27, %24 : vector<128x8xf32>
    %29 = arith.select %26, %24, %28 : vector<128x8xi1>, vector<128x8xf32>
    %cst_28 = arith.constant 0.000000e+00 : f32
    %30 = vector.broadcast %cst_28 : f32 to vector<128x1xf32>
    %c0_29 = arith.constant 0 : index
    %c0_30 = arith.constant 0 : index
    %31 = vector.load %arg20[%c0_29, %c0_30] : memref<256x258xf32, #tpu.memory_space<vmem>>, vector<128x1xf32>
    tpu.vector_store %arg20[%c0_29, %c0_30], %30 {strides = array<i32>} : memref<256x258xf32, #tpu.memory_space<vmem>>, vector<128x1xf32>,
    %c0_31 = arith.constant 0 : index
    %c9_32 = arith.constant 9 : index
    %32 = vector.load %arg20[%c0_31, %c9_32] : memref<256x258xf32, #tpu.memory_space<vmem>>, vector<128x1xf32>
    tpu.vector_store %arg20[%c0_31, %c9_32], %30 {strides = array<i32>} : memref<256x258xf32, #tpu.memory_space<vmem>>, vector<128x1xf32>,
    %c0_33 = arith.constant 0 : index
    %c1_34 = arith.constant 1 : index
    %33 = vector.load %arg20[%c0_33, %c1_34] : memref<256x258xf32, #tpu.memory_space<vmem>>, vector<128x8xf32>
    tpu.vector_store %arg20[%c0_33, %c1_34], %29 {strides = array<i32>} : memref<256x258xf32, #tpu.memory_space<vmem>>, vector<128x8xf32>,
    %cst_35 = arith.constant 0.000000e+00 : f32
    %34 = vector.broadcast %cst_35 : f32 to vector<64x8xf32>
    %c0_36 = arith.constant 0 : index
    %c0_37 = arith.constant 0 : index
    %c0_38 = arith.constant 0 : index
    %35 = vector.load %arg4[%c0_36, %c0_37, %c0_38] : memref<3x64x128xf32, #tpu.memory_space<vmem>>, vector<1x64x128xf32>
    %36 = vector.shape_cast %35 : vector<1x64x128xf32> to vector<64x128xf32>
    %c0_39 = arith.constant 0 : index
    %c0_40 = arith.constant 0 : index
    %37 = vector.load %arg20[%c0_39, %c0_40] : memref<256x258xf32, #tpu.memory_space<vmem>>, vector<128x8xf32>
    %cst_41 = arith.constant dense<0.000000e+00> : vector<64x8xf32>
    %38 = tpu.matmul %36, %37, %cst_41 {dimension_numbers = #tpu.dot_dimension_numbers<[1], [0], [0], [1], [0, 0, 1, 1], [], []>} : vector<64x128xf32>, vector<128x8xf32>, vector<64x8xf32> -> vector<64x8xf32>
    %39 = arith.addf %34, %38 : vector<64x8xf32>
    %c1_42 = arith.constant 1 : index
    %c0_43 = arith.constant 0 : index
    %c0_44 = arith.constant 0 : index
    %40 = vector.load %arg4[%c1_42, %c0_43, %c0_44] : memref<3x64x128xf32, #tpu.memory_space<vmem>>, vector<1x64x128xf32>
    %41 = vector.shape_cast %40 : vector<1x64x128xf32> to vector<64x128xf32>
    %c0_45 = arith.constant 0 : index
    %c1_46 = arith.constant 1 : index
    %42 = vector.load %arg20[%c0_45, %c1_46] : memref<256x258xf32, #tpu.memory_space<vmem>>, vector<128x8xf32>
    %cst_47 = arith.constant dense<0.000000e+00> : vector<64x8xf32>
    %43 = tpu.matmul %41, %42, %cst_47 {dimension_numbers = #tpu.dot_dimension_numbers<[1], [0], [0], [1], [0, 0, 1, 1], [], []>} : vector<64x128xf32>, vector<128x8xf32>, vector<64x8xf32> -> vector<64x8xf32>
    %44 = arith.addf %39, %43 : vector<64x8xf32>
    %c2_48 = arith.constant 2 : index
    %c0_49 = arith.constant 0 : index
    %c0_50 = arith.constant 0 : index
    %45 = vector.load %arg4[%c2_48, %c0_49, %c0_50] : memref<3x64x128xf32, #tpu.memory_space<vmem>>, vector<1x64x128xf32>
    %46 = vector.shape_cast %45 : vector<1x64x128xf32> to vector<64x128xf32>
    %c0_51 = arith.constant 0 : index
    %c2_52 = arith.constant 2 : index
    %47 = vector.load %arg20[%c0_51, %c2_52] : memref<256x258xf32, #tpu.memory_space<vmem>>, vector<128x8xf32>
    %cst_53 = arith.constant dense<0.000000e+00> : vector<64x8xf32>
    %48 = tpu.matmul %46, %47, %cst_53 {dimension_numbers = #tpu.dot_dimension_numbers<[1], [0], [0], [1], [0, 0, 1, 1], [], []>} : vector<64x128xf32>, vector<128x8xf32>, vector<64x8xf32> -> vector<64x8xf32>
    %49 = arith.addf %44, %48 : vector<64x8xf32>
    %c0_54 = arith.constant 0 : index
    %c0_55 = arith.constant 0 : index
    %50 = vector.load %arg5[%c0_54, %c0_55] : memref<64x1xf32, #tpu.memory_space<vmem>>, vector<64x1xf32>
    %51 = vector.broadcast %50 : vector<64x1xf32> to vector<64x8xf32>
    %52 = arith.addf %49, %51 : vector<64x8xf32>
    %cst_56 = arith.constant 0.000000e+00 : f32
    %53 = vector.broadcast %cst_56 : f32 to vector<64x8xf32>
    %54 = arith.cmpf ogt, %52, %53 : vector<64x8xf32>
    %cst_57 = arith.constant 0.00999999977 : f32
    %55 = vector.broadcast %cst_57 : f32 to vector<64x8xf32>
    %56 = arith.mulf %55, %52 : vector<64x8xf32>
    %57 = arith.select %54, %52, %56 : vector<64x8xi1>, vector<64x8xf32>
    %c0_58 = arith.constant 0 : index
    %c0_59 = arith.constant 0 : index
    %58 = vector.load %arg16[%c0_58, %c0_59] : memref<8x16xf32, #tpu.memory_space<vmem>>, vector<8x16xf32>
    %cst_60 = arith.constant dense<0.000000e+00> : vector<64x16xf32>
    %59 = tpu.matmul %57, %58, %cst_60 {dimension_numbers = #tpu.dot_dimension_numbers<[1], [0], [0], [1], [0, 0, 1, 1], [], []>} : vector<64x8xf32>, vector<8x16xf32>, vector<64x16xf32> -> vector<64x16xf32>
    %cst_61 = arith.constant 0.000000e+00 : f32
    %60 = vector.broadcast %cst_61 : f32 to vector<64x1xf32>
    %c0_62 = arith.constant 0 : index
    %c0_63 = arith.constant 0 : index
    %61 = vector.load %arg20[%c0_62, %c0_63] : memref<256x258xf32, #tpu.memory_space<vmem>>, vector<64x1xf32>
    tpu.vector_store %arg20[%c0_62, %c0_63], %60 {strides = array<i32>} : memref<256x258xf32, #tpu.memory_space<vmem>>, vector<64x1xf32>,
    %c0_64 = arith.constant 0 : index
    %c17 = arith.constant 17 : index
    %62 = vector.load %arg20[%c0_64, %c17] : memref<256x258xf32, #tpu.memory_space<vmem>>, vector<64x1xf32>
    tpu.vector_store %arg20[%c0_64, %c17], %60 {strides = array<i32>} : memref<256x258xf32, #tpu.memory_space<vmem>>, vector<64x1xf32>,
    %c0_65 = arith.constant 0 : index
    %c1_66 = arith.constant 1 : index
    %63 = vector.load %arg20[%c0_65, %c1_66] : memref<256x258xf32, #tpu.memory_space<vmem>>, vector<64x16xf32>
    tpu.vector_store %arg20[%c0_65, %c1_66], %59 {strides = array<i32>} : memref<256x258xf32, #tpu.memory_space<vmem>>, vector<64x16xf32>,
    %cst_67 = arith.constant 0.000000e+00 : f32
    %64 = vector.broadcast %cst_67 : f32 to vector<32x16xf32>
    %c0_68 = arith.constant 0 : index
    %c0_69 = arith.constant 0 : index
    %c0_70 = arith.constant 0 : index
    %65 = vector.load %arg6[%c0_68, %c0_69, %c0_70] : memref<3x32x64xf32, #tpu.memory_space<vmem>>, vector<1x32x64xf32>
    %66 = vector.shape_cast %65 : vector<1x32x64xf32> to vector<32x64xf32>
    %c0_71 = arith.constant 0 : index
    %c0_72 = arith.constant 0 : index
    %67 = vector.load %arg20[%c0_71, %c0_72] : memref<256x258xf32, #tpu.memory_space<vmem>>, vector<64x16xf32>
    %cst_73 = arith.constant dense<0.000000e+00> : vector<32x16xf32>
    %68 = tpu.matmul %66, %67, %cst_73 {dimension_numbers = #tpu.dot_dimension_numbers<[1], [0], [0], [1], [0, 0, 1, 1], [], []>} : vector<32x64xf32>, vector<64x16xf32>, vector<32x16xf32> -> vector<32x16xf32>
    %69 = arith.addf %64, %68 : vector<32x16xf32>
    %c1_74 = arith.constant 1 : index
    %c0_75 = arith.constant 0 : index
    %c0_76 = arith.constant 0 : index
    %70 = vector.load %arg6[%c1_74, %c0_75, %c0_76] : memref<3x32x64xf32, #tpu.memory_space<vmem>>, vector<1x32x64xf32>
    %71 = vector.shape_cast %70 : vector<1x32x64xf32> to vector<32x64xf32>
    %c0_77 = arith.constant 0 : index
    %c1_78 = arith.constant 1 : index
    %72 = vector.load %arg20[%c0_77, %c1_78] : memref<256x258xf32, #tpu.memory_space<vmem>>, vector<64x16xf32>
    %cst_79 = arith.constant dense<0.000000e+00> : vector<32x16xf32>
    %73 = tpu.matmul %71, %72, %cst_79 {dimension_numbers = #tpu.dot_dimension_numbers<[1], [0], [0], [1], [0, 0, 1, 1], [], []>} : vector<32x64xf32>, vector<64x16xf32>, vector<32x16xf32> -> vector<32x16xf32>
    %74 = arith.addf %69, %73 : vector<32x16xf32>
    %c2_80 = arith.constant 2 : index
    %c0_81 = arith.constant 0 : index
    %c0_82 = arith.constant 0 : index
    %75 = vector.load %arg6[%c2_80, %c0_81, %c0_82] : memref<3x32x64xf32, #tpu.memory_space<vmem>>, vector<1x32x64xf32>
    %76 = vector.shape_cast %75 : vector<1x32x64xf32> to vector<32x64xf32>
    %c0_83 = arith.constant 0 : index
    %c2_84 = arith.constant 2 : index
    %77 = vector.load %arg20[%c0_83, %c2_84] : memref<256x258xf32, #tpu.memory_space<vmem>>, vector<64x16xf32>
    %cst_85 = arith.constant dense<0.000000e+00> : vector<32x16xf32>
    %78 = tpu.matmul %76, %77, %cst_85 {dimension_numbers = #tpu.dot_dimension_numbers<[1], [0], [0], [1], [0, 0, 1, 1], [], []>} : vector<32x64xf32>, vector<64x16xf32>, vector<32x16xf32> -> vector<32x16xf32>
    %79 = arith.addf %74, %78 : vector<32x16xf32>
    %c0_86 = arith.constant 0 : index
    %c0_87 = arith.constant 0 : index
    %80 = vector.load %arg7[%c0_86, %c0_87] : memref<32x1xf32, #tpu.memory_space<vmem>>, vector<32x1xf32>
    %81 = vector.broadcast %80 : vector<32x1xf32> to vector<32x16xf32>
    %82 = arith.addf %79, %81 : vector<32x16xf32>
    %cst_88 = arith.constant 0.000000e+00 : f32
    %83 = vector.broadcast %cst_88 : f32 to vector<32x16xf32>
    %84 = arith.cmpf ogt, %82, %83 : vector<32x16xf32>
    %cst_89 = arith.constant 0.00999999977 : f32
    %85 = vector.broadcast %cst_89 : f32 to vector<32x16xf32>
    %86 = arith.mulf %85, %82 : vector<32x16xf32>
    %87 = arith.select %84, %82, %86 : vector<32x16xi1>, vector<32x16xf32>
    %cst_90 = arith.constant 0.000000e+00 : f32
    %88 = vector.broadcast %cst_90 : f32 to vector<32x1xf32>
    %c0_91 = arith.constant 0 : index
    %c0_92 = arith.constant 0 : index
    %89 = vector.load %arg20[%c0_91, %c0_92] : memref<256x258xf32, #tpu.memory_space<vmem>>, vector<32x1xf32>
    tpu.vector_store %arg20[%c0_91, %c0_92], %88 {strides = array<i32>} : memref<256x258xf32, #tpu.memory_space<vmem>>, vector<32x1xf32>,
    %c0_93 = arith.constant 0 : index
    %c17_94 = arith.constant 17 : index
    %90 = vector.load %arg20[%c0_93, %c17_94] : memref<256x258xf32, #tpu.memory_space<vmem>>, vector<32x1xf32>
    tpu.vector_store %arg20[%c0_93, %c17_94], %88 {strides = array<i32>} : memref<256x258xf32, #tpu.memory_space<vmem>>, vector<32x1xf32>,
    %c0_95 = arith.constant 0 : index
    %c1_96 = arith.constant 1 : index
    %91 = vector.load %arg20[%c0_95, %c1_96] : memref<256x258xf32, #tpu.memory_space<vmem>>, vector<32x16xf32>
    tpu.vector_store %arg20[%c0_95, %c1_96], %87 {strides = array<i32>} : memref<256x258xf32, #tpu.memory_space<vmem>>, vector<32x16xf32>,
    %cst_97 = arith.constant 0.000000e+00 : f32
    %92 = vector.broadcast %cst_97 : f32 to vector<16x16xf32>
    %c0_98 = arith.constant 0 : index
    %c0_99 = arith.constant 0 : index
    %c0_100 = arith.constant 0 : index
    %93 = vector.load %arg8[%c0_98, %c0_99, %c0_100] : memref<3x16x32xf32, #tpu.memory_space<vmem>>, vector<1x16x32xf32>
    %94 = vector.shape_cast %93 : vector<1x16x32xf32> to vector<16x32xf32>
    %c0_101 = arith.constant 0 : index
    %c0_102 = arith.constant 0 : index
    %95 = vector.load %arg20[%c0_101, %c0_102] : memref<256x258xf32, #tpu.memory_space<vmem>>, vector<32x16xf32>
    %cst_103 = arith.constant dense<0.000000e+00> : vector<16x16xf32>
    %96 = tpu.matmul %94, %95, %cst_103 {dimension_numbers = #tpu.dot_dimension_numbers<[1], [0], [0], [1], [0, 0, 1, 1], [], []>} : vector<16x32xf32>, vector<32x16xf32>, vector<16x16xf32> -> vector<16x16xf32>
    %97 = arith.addf %92, %96 : vector<16x16xf32>
    %c1_104 = arith.constant 1 : index
    %c0_105 = arith.constant 0 : index
    %c0_106 = arith.constant 0 : index
    %98 = vector.load %arg8[%c1_104, %c0_105, %c0_106] : memref<3x16x32xf32, #tpu.memory_space<vmem>>, vector<1x16x32xf32>
    %99 = vector.shape_cast %98 : vector<1x16x32xf32> to vector<16x32xf32>
    %c0_107 = arith.constant 0 : index
    %c1_108 = arith.constant 1 : index
    %100 = vector.load %arg20[%c0_107, %c1_108] : memref<256x258xf32, #tpu.memory_space<vmem>>, vector<32x16xf32>
    %cst_109 = arith.constant dense<0.000000e+00> : vector<16x16xf32>
    %101 = tpu.matmul %99, %100, %cst_109 {dimension_numbers = #tpu.dot_dimension_numbers<[1], [0], [0], [1], [0, 0, 1, 1], [], []>} : vector<16x32xf32>, vector<32x16xf32>, vector<16x16xf32> -> vector<16x16xf32>
    %102 = arith.addf %97, %101 : vector<16x16xf32>
    %c2_110 = arith.constant 2 : index
    %c0_111 = arith.constant 0 : index
    %c0_112 = arith.constant 0 : index
    %103 = vector.load %arg8[%c2_110, %c0_111, %c0_112] : memref<3x16x32xf32, #tpu.memory_space<vmem>>, vector<1x16x32xf32>
    %104 = vector.shape_cast %103 : vector<1x16x32xf32> to vector<16x32xf32>
    %c0_113 = arith.constant 0 : index
    %c2_114 = arith.constant 2 : index
    %105 = vector.load %arg20[%c0_113, %c2_114] : memref<256x258xf32, #tpu.memory_space<vmem>>, vector<32x16xf32>
    %cst_115 = arith.constant dense<0.000000e+00> : vector<16x16xf32>
    %106 = tpu.matmul %104, %105, %cst_115 {dimension_numbers = #tpu.dot_dimension_numbers<[1], [0], [0], [1], [0, 0, 1, 1], [], []>} : vector<16x32xf32>, vector<32x16xf32>, vector<16x16xf32> -> vector<16x16xf32>
    %107 = arith.addf %102, %106 : vector<16x16xf32>
    %c0_116 = arith.constant 0 : index
    %c0_117 = arith.constant 0 : index
    %108 = vector.load %arg9[%c0_116, %c0_117] : memref<16x1xf32, #tpu.memory_space<vmem>>, vector<16x1xf32>
    %109 = vector.broadcast %108 : vector<16x1xf32> to vector<16x16xf32>
    %110 = arith.addf %107, %109 : vector<16x16xf32>
    %cst_118 = arith.constant 0.000000e+00 : f32
    %111 = vector.broadcast %cst_118 : f32 to vector<16x16xf32>
    %112 = arith.cmpf ogt, %110, %111 : vector<16x16xf32>
    %cst_119 = arith.constant 0.00999999977 : f32
    %113 = vector.broadcast %cst_119 : f32 to vector<16x16xf32>
    %114 = arith.mulf %113, %110 : vector<16x16xf32>
    %115 = arith.select %112, %110, %114 : vector<16x16xi1>, vector<16x16xf32>
    %c0_120 = arith.constant 0 : index
    %c0_121 = arith.constant 0 : index
    %116 = vector.load %arg17[%c0_120, %c0_121] : memref<16x64xf32, #tpu.memory_space<vmem>>, vector<16x64xf32>
    %cst_122 = arith.constant dense<0.000000e+00> : vector<16x64xf32>
    %117 = tpu.matmul %115, %116, %cst_122 {dimension_numbers = #tpu.dot_dimension_numbers<[1], [0], [0], [1], [0, 0, 1, 1], [], []>} : vector<16x16xf32>, vector<16x64xf32>, vector<16x64xf32> -> vector<16x64xf32>
    %cst_123 = arith.constant 0.000000e+00 : f32
    %118 = vector.broadcast %cst_123 : f32 to vector<16x1xf32>
    %c0_124 = arith.constant 0 : index
    %c0_125 = arith.constant 0 : index
    %119 = vector.load %arg20[%c0_124, %c0_125] : memref<256x258xf32, #tpu.memory_space<vmem>>, vector<16x1xf32>
    tpu.vector_store %arg20[%c0_124, %c0_125], %118 {strides = array<i32>} : memref<256x258xf32, #tpu.memory_space<vmem>>, vector<16x1xf32>,
    %c0_126 = arith.constant 0 : index
    %c65 = arith.constant 65 : index
    %120 = vector.load %arg20[%c0_126, %c65] : memref<256x258xf32, #tpu.memory_space<vmem>>, vector<16x1xf32>
    tpu.vector_store %arg20[%c0_126, %c65], %118 {strides = array<i32>} : memref<256x258xf32, #tpu.memory_space<vmem>>, vector<16x1xf32>,
    %c0_127 = arith.constant 0 : index
    %c1_128 = arith.constant 1 : index
    %121 = vector.load %arg20[%c0_127, %c1_128] : memref<256x258xf32, #tpu.memory_space<vmem>>, vector<16x64xf32>
    tpu.vector_store %arg20[%c0_127, %c1_128], %117 {strides = array<i32>} : memref<256x258xf32, #tpu.memory_space<vmem>>, vector<16x64xf32>,
    %cst_129 = arith.constant 0.000000e+00 : f32
    %122 = vector.broadcast %cst_129 : f32 to vector<8x64xf32>
    %c0_130 = arith.constant 0 : index
    %c0_131 = arith.constant 0 : index
    %c0_132 = arith.constant 0 : index
    %123 = vector.load %arg10[%c0_130, %c0_131, %c0_132] : memref<3x8x16xf32, #tpu.memory_space<vmem>>, vector<1x8x16xf32>
    %124 = vector.shape_cast %123 : vector<1x8x16xf32> to vector<8x16xf32>
    %c0_133 = arith.constant 0 : index
    %c0_134 = arith.constant 0 : index
    %125 = vector.load %arg20[%c0_133, %c0_134] : memref<256x258xf32, #tpu.memory_space<vmem>>, vector<16x64xf32>
    %cst_135 = arith.constant dense<0.000000e+00> : vector<8x64xf32>
    %126 = tpu.matmul %124, %125, %cst_135 {dimension_numbers = #tpu.dot_dimension_numbers<[1], [0], [0], [1], [0, 0, 1, 1], [], []>} : vector<8x16xf32>, vector<16x64xf32>, vector<8x64xf32> -> vector<8x64xf32>
    %127 = arith.addf %122, %126 : vector<8x64xf32>
    %c1_136 = arith.constant 1 : index
    %c0_137 = arith.constant 0 : index
    %c0_138 = arith.constant 0 : index
    %128 = vector.load %arg10[%c1_136, %c0_137, %c0_138] : memref<3x8x16xf32, #tpu.memory_space<vmem>>, vector<1x8x16xf32>
    %129 = vector.shape_cast %128 : vector<1x8x16xf32> to vector<8x16xf32>
    %c0_139 = arith.constant 0 : index
    %c1_140 = arith.constant 1 : index
    %130 = vector.load %arg20[%c0_139, %c1_140] : memref<256x258xf32, #tpu.memory_space<vmem>>, vector<16x64xf32>
    %cst_141 = arith.constant dense<0.000000e+00> : vector<8x64xf32>
    %131 = tpu.matmul %129, %130, %cst_141 {dimension_numbers = #tpu.dot_dimension_numbers<[1], [0], [0], [1], [0, 0, 1, 1], [], []>} : vector<8x16xf32>, vector<16x64xf32>, vector<8x64xf32> -> vector<8x64xf32>
    %132 = arith.addf %127, %131 : vector<8x64xf32>
    %c2_142 = arith.constant 2 : index
    %c0_143 = arith.constant 0 : index
    %c0_144 = arith.constant 0 : index
    %133 = vector.load %arg10[%c2_142, %c0_143, %c0_144] : memref<3x8x16xf32, #tpu.memory_space<vmem>>, vector<1x8x16xf32>
    %134 = vector.shape_cast %133 : vector<1x8x16xf32> to vector<8x16xf32>
    %c0_145 = arith.constant 0 : index
    %c2_146 = arith.constant 2 : index
    %135 = vector.load %arg20[%c0_145, %c2_146] : memref<256x258xf32, #tpu.memory_space<vmem>>, vector<16x64xf32>
    %cst_147 = arith.constant dense<0.000000e+00> : vector<8x64xf32>
    %136 = tpu.matmul %134, %135, %cst_147 {dimension_numbers = #tpu.dot_dimension_numbers<[1], [0], [0], [1], [0, 0, 1, 1], [], []>} : vector<8x16xf32>, vector<16x64xf32>, vector<8x64xf32> -> vector<8x64xf32>
    %137 = arith.addf %132, %136 : vector<8x64xf32>
    %c0_148 = arith.constant 0 : index
    %c0_149 = arith.constant 0 : index
    %138 = vector.load %arg11[%c0_148, %c0_149] : memref<8x1xf32, #tpu.memory_space<vmem>>, vector<8x1xf32>
    %139 = vector.broadcast %138 : vector<8x1xf32> to vector<8x64xf32>
    %140 = arith.addf %137, %139 : vector<8x64xf32>
    %cst_150 = arith.constant 0.000000e+00 : f32
    %141 = vector.broadcast %cst_150 : f32 to vector<8x64xf32>
    %142 = arith.cmpf ogt, %140, %141 : vector<8x64xf32>
    %cst_151 = arith.constant 0.00999999977 : f32
    %143 = vector.broadcast %cst_151 : f32 to vector<8x64xf32>
    %144 = arith.mulf %143, %140 : vector<8x64xf32>
    %145 = arith.select %142, %140, %144 : vector<8x64xi1>, vector<8x64xf32>
    %cst_152 = arith.constant 0.000000e+00 : f32
    %146 = vector.broadcast %cst_152 : f32 to vector<8x1xf32>
    %c0_153 = arith.constant 0 : index
    %c0_154 = arith.constant 0 : index
    %147 = vector.load %arg20[%c0_153, %c0_154] : memref<256x258xf32, #tpu.memory_space<vmem>>, vector<8x1xf32>
    tpu.vector_store %arg20[%c0_153, %c0_154], %146 {strides = array<i32>} : memref<256x258xf32, #tpu.memory_space<vmem>>, vector<8x1xf32>,
    %c0_155 = arith.constant 0 : index
    %c65_156 = arith.constant 65 : index
    %148 = vector.load %arg20[%c0_155, %c65_156] : memref<256x258xf32, #tpu.memory_space<vmem>>, vector<8x1xf32>
    tpu.vector_store %arg20[%c0_155, %c65_156], %146 {strides = array<i32>} : memref<256x258xf32, #tpu.memory_space<vmem>>, vector<8x1xf32>,
    %c0_157 = arith.constant 0 : index
    %c1_158 = arith.constant 1 : index
    %149 = vector.load %arg20[%c0_157, %c1_158] : memref<256x258xf32, #tpu.memory_space<vmem>>, vector<8x64xf32>
    tpu.vector_store %arg20[%c0_157, %c1_158], %145 {strides = array<i32>} : memref<256x258xf32, #tpu.memory_space<vmem>>, vector<8x64xf32>,
    %cst_159 = arith.constant 0.000000e+00 : f32
    %150 = vector.broadcast %cst_159 : f32 to vector<4x64xf32>
    %c0_160 = arith.constant 0 : index
    %c0_161 = arith.constant 0 : index
    %c0_162 = arith.constant 0 : index
    %151 = vector.load %arg12[%c0_160, %c0_161, %c0_162] : memref<3x4x8xf32, #tpu.memory_space<vmem>>, vector<1x4x8xf32>
    %152 = vector.shape_cast %151 : vector<1x4x8xf32> to vector<4x8xf32>
    %c0_163 = arith.constant 0 : index
    %c0_164 = arith.constant 0 : index
    %153 = vector.load %arg20[%c0_163, %c0_164] : memref<256x258xf32, #tpu.memory_space<vmem>>, vector<8x64xf32>
    %cst_165 = arith.constant dense<0.000000e+00> : vector<4x64xf32>
    %154 = tpu.matmul %152, %153, %cst_165 {dimension_numbers = #tpu.dot_dimension_numbers<[1], [0], [0], [1], [0, 0, 1, 1], [], []>} : vector<4x8xf32>, vector<8x64xf32>, vector<4x64xf32> -> vector<4x64xf32>
    %155 = arith.addf %150, %154 : vector<4x64xf32>
    %c1_166 = arith.constant 1 : index
    %c0_167 = arith.constant 0 : index
    %c0_168 = arith.constant 0 : index
    %156 = vector.load %arg12[%c1_166, %c0_167, %c0_168] : memref<3x4x8xf32, #tpu.memory_space<vmem>>, vector<1x4x8xf32>
    %157 = vector.shape_cast %156 : vector<1x4x8xf32> to vector<4x8xf32>
    %c0_169 = arith.constant 0 : index
    %c1_170 = arith.constant 1 : index
    %158 = vector.load %arg20[%c0_169, %c1_170] : memref<256x258xf32, #tpu.memory_space<vmem>>, vector<8x64xf32>
    %cst_171 = arith.constant dense<0.000000e+00> : vector<4x64xf32>
    %159 = tpu.matmul %157, %158, %cst_171 {dimension_numbers = #tpu.dot_dimension_numbers<[1], [0], [0], [1], [0, 0, 1, 1], [], []>} : vector<4x8xf32>, vector<8x64xf32>, vector<4x64xf32> -> vector<4x64xf32>
    %160 = arith.addf %155, %159 : vector<4x64xf32>
    %c2_172 = arith.constant 2 : index
    %c0_173 = arith.constant 0 : index
    %c0_174 = arith.constant 0 : index
    %161 = vector.load %arg12[%c2_172, %c0_173, %c0_174] : memref<3x4x8xf32, #tpu.memory_space<vmem>>, vector<1x4x8xf32>
    %162 = vector.shape_cast %161 : vector<1x4x8xf32> to vector<4x8xf32>
    %c0_175 = arith.constant 0 : index
    %c2_176 = arith.constant 2 : index
    %163 = vector.load %arg20[%c0_175, %c2_176] : memref<256x258xf32, #tpu.memory_space<vmem>>, vector<8x64xf32>
    %cst_177 = arith.constant dense<0.000000e+00> : vector<4x64xf32>
    %164 = tpu.matmul %162, %163, %cst_177 {dimension_numbers = #tpu.dot_dimension_numbers<[1], [0], [0], [1], [0, 0, 1, 1], [], []>} : vector<4x8xf32>, vector<8x64xf32>, vector<4x64xf32> -> vector<4x64xf32>
    %165 = arith.addf %160, %164 : vector<4x64xf32>
    %c0_178 = arith.constant 0 : index
    %c0_179 = arith.constant 0 : index
    %166 = vector.load %arg13[%c0_178, %c0_179] : memref<4x1xf32, #tpu.memory_space<vmem>>, vector<4x1xf32>
    %167 = vector.broadcast %166 : vector<4x1xf32> to vector<4x64xf32>
    %168 = arith.addf %165, %167 : vector<4x64xf32>
    %cst_180 = arith.constant 0.000000e+00 : f32
    %169 = vector.broadcast %cst_180 : f32 to vector<4x64xf32>
    %170 = arith.cmpf ogt, %168, %169 : vector<4x64xf32>
    %cst_181 = arith.constant 0.00999999977 : f32
    %171 = vector.broadcast %cst_181 : f32 to vector<4x64xf32>
    %172 = arith.mulf %171, %168 : vector<4x64xf32>
    %173 = arith.select %170, %168, %172 : vector<4x64xi1>, vector<4x64xf32>
    %c0_182 = arith.constant 0 : index
    %c0_183 = arith.constant 0 : index
    %174 = vector.load %arg18[%c0_182, %c0_183] : memref<64x256xf32, #tpu.memory_space<vmem>>, vector<64x256xf32>
    %cst_184 = arith.constant dense<0.000000e+00> : vector<4x256xf32>
    %175 = tpu.matmul %173, %174, %cst_184 {dimension_numbers = #tpu.dot_dimension_numbers<[1], [0], [0], [1], [0, 0, 1, 1], [], []>} : vector<4x64xf32>, vector<64x256xf32>, vector<4x256xf32> -> vector<4x256xf32>
    %cst_185 = arith.constant 0.000000e+00 : f32
    %176 = vector.broadcast %cst_185 : f32 to vector<4x1xf32>
    %c0_186 = arith.constant 0 : index
    %c0_187 = arith.constant 0 : index
    %177 = vector.load %arg20[%c0_186, %c0_187] : memref<256x258xf32, #tpu.memory_space<vmem>>, vector<4x1xf32>
    tpu.vector_store %arg20[%c0_186, %c0_187], %176 {strides = array<i32>} : memref<256x258xf32, #tpu.memory_space<vmem>>, vector<4x1xf32>,
    %c0_188 = arith.constant 0 : index
    %c257 = arith.constant 257 : index
    %178 = vector.load %arg20[%c0_188, %c257] : memref<256x258xf32, #tpu.memory_space<vmem>>, vector<4x1xf32>
    tpu.vector_store %arg20[%c0_188, %c257], %176 {strides = array<i32>} : memref<256x258xf32, #tpu.memory_space<vmem>>, vector<4x1xf32>,
    %c0_189 = arith.constant 0 : index
    %c1_190 = arith.constant 1 : index
    %179 = vector.load %arg20[%c0_189, %c1_190] : memref<256x258xf32, #tpu.memory_space<vmem>>, vector<4x256xf32>
    tpu.vector_store %arg20[%c0_189, %c1_190], %175 {strides = array<i32>} : memref<256x258xf32, #tpu.memory_space<vmem>>, vector<4x256xf32>,
    %cst_191 = arith.constant 0.000000e+00 : f32
    %180 = vector.broadcast %cst_191 : f32 to vector<1x256xf32>
    %c0_192 = arith.constant 0 : index
    %c0_193 = arith.constant 0 : index
    %c0_194 = arith.constant 0 : index
    %181 = vector.load %arg14[%c0_192, %c0_193, %c0_194] : memref<3x1x4xf32, #tpu.memory_space<vmem>>, vector<1x1x4xf32>
    %182 = vector.shape_cast %181 : vector<1x1x4xf32> to vector<1x4xf32>
    %c0_195 = arith.constant 0 : index
    %c0_196 = arith.constant 0 : index
    %183 = vector.load %arg20[%c0_195, %c0_196] : memref<256x258xf32, #tpu.memory_space<vmem>>, vector<4x256xf32>
    %cst_197 = arith.constant dense<0.000000e+00> : vector<1x256xf32>
    %184 = tpu.matmul %182, %183, %cst_197 {dimension_numbers = #tpu.dot_dimension_numbers<[1], [0], [0], [1], [0, 0, 1, 1], [], []>} : vector<1x4xf32>, vector<4x256xf32>, vector<1x256xf32> -> vector<1x256xf32>
    %185 = arith.addf %180, %184 : vector<1x256xf32>
    %c1_198 = arith.constant 1 : index
    %c0_199 = arith.constant 0 : index
    %c0_200 = arith.constant 0 : index
    %186 = vector.load %arg14[%c1_198, %c0_199, %c0_200] : memref<3x1x4xf32, #tpu.memory_space<vmem>>, vector<1x1x4xf32>
    %187 = vector.shape_cast %186 : vector<1x1x4xf32> to vector<1x4xf32>
    %c0_201 = arith.constant 0 : index
    %c1_202 = arith.constant 1 : index
    %188 = vector.load %arg20[%c0_201, %c1_202] : memref<256x258xf32, #tpu.memory_space<vmem>>, vector<4x256xf32>
    %cst_203 = arith.constant dense<0.000000e+00> : vector<1x256xf32>
    %189 = tpu.matmul %187, %188, %cst_203 {dimension_numbers = #tpu.dot_dimension_numbers<[1], [0], [0], [1], [0, 0, 1, 1], [], []>} : vector<1x4xf32>, vector<4x256xf32>, vector<1x256xf32> -> vector<1x256xf32>
    %190 = arith.addf %185, %189 : vector<1x256xf32>
    %c2_204 = arith.constant 2 : index
    %c0_205 = arith.constant 0 : index
    %c0_206 = arith.constant 0 : index
    %191 = vector.load %arg14[%c2_204, %c0_205, %c0_206] : memref<3x1x4xf32, #tpu.memory_space<vmem>>, vector<1x1x4xf32>
    %192 = vector.shape_cast %191 : vector<1x1x4xf32> to vector<1x4xf32>
    %c0_207 = arith.constant 0 : index
    %c2_208 = arith.constant 2 : index
    %193 = vector.load %arg20[%c0_207, %c2_208] : memref<256x258xf32, #tpu.memory_space<vmem>>, vector<4x256xf32>
    %cst_209 = arith.constant dense<0.000000e+00> : vector<1x256xf32>
    %194 = tpu.matmul %192, %193, %cst_209 {dimension_numbers = #tpu.dot_dimension_numbers<[1], [0], [0], [1], [0, 0, 1, 1], [], []>} : vector<1x4xf32>, vector<4x256xf32>, vector<1x256xf32> -> vector<1x256xf32>
    %195 = arith.addf %190, %194 : vector<1x256xf32>
    %c0_210 = arith.constant 0 : index
    %c0_211 = arith.constant 0 : index
    %196 = vector.load %arg15[%c0_210, %c0_211] : memref<1x1xf32, #tpu.memory_space<vmem>>, vector<1x1xf32>
    %197 = vector.broadcast %196 : vector<1x1xf32> to vector<1x256xf32>
    %198 = arith.addf %195, %197 : vector<1x256xf32>
    %199 = math.tanh %198 : vector<1x256xf32>
    %c0_212 = arith.constant 0 : index
    %c0_213 = arith.constant 0 : index
    %c0_214 = arith.constant 0 : index
    %200 = vector.load %arg19[%c0_212, %c0_213, %c0_214] : memref<1x1x256xf32, #tpu.memory_space<vmem>>, vector<1x1x256xf32>
    %201 = vector.shape_cast %200 : vector<1x1x256xf32> to vector<1x256xf32>
    %202 = vector.shape_cast %199 : vector<1x256xf32> to vector<1x1x256xf32>
    tpu.vector_store %arg19[%c0_212, %c0_213, %c0_214], %202 {strides = array<i32>} : memref<1x1x256xf32, #tpu.memory_space<vmem>>, vector<1x1x256xf32>,
    return
  }
  func.func @transform_0(%arg0: i32) -> (i32, i32, i32) {
    %c0_i32 = arith.constant 0 : i32
    %c0_i32_0 = arith.constant 0 : i32
    %c0_i32_1 = arith.constant 0 : i32
    return %arg0, %c0_i32, %c0_i32_0 : i32, i32, i32
  }
  func.func @transform_1(%arg0: i32) -> (i32, i32, i32) {
    %c0_i32 = arith.constant 0 : i32
    %c0_i32_0 = arith.constant 0 : i32
    %c0_i32_1 = arith.constant 0 : i32
    %c0_i32_2 = arith.constant 0 : i32
    return %c0_i32, %c0_i32_0, %c0_i32_1 : i32, i32, i32
  }
  func.func @transform_2(%arg0: i32) -> (i32, i32) {
    %c0_i32 = arith.constant 0 : i32
    %c0_i32_0 = arith.constant 0 : i32
    %c0_i32_1 = arith.constant 0 : i32
    return %c0_i32, %c0_i32_0 : i32, i32
  }
  func.func @transform_3(%arg0: i32) -> (i32, i32, i32) {
    %c0_i32 = arith.constant 0 : i32
    %c0_i32_0 = arith.constant 0 : i32
    %c0_i32_1 = arith.constant 0 : i32
    %c0_i32_2 = arith.constant 0 : i32
    return %c0_i32, %c0_i32_0, %c0_i32_1 : i32, i32, i32
  }
  func.func @transform_4(%arg0: i32) -> (i32, i32) {
    %c0_i32 = arith.constant 0 : i32
    %c0_i32_0 = arith.constant 0 : i32
    %c0_i32_1 = arith.constant 0 : i32
    return %c0_i32, %c0_i32_0 : i32, i32
  }
  func.func @transform_5(%arg0: i32) -> (i32, i32, i32) {
    %c0_i32 = arith.constant 0 : i32
    %c0_i32_0 = arith.constant 0 : i32
    %c0_i32_1 = arith.constant 0 : i32
    %c0_i32_2 = arith.constant 0 : i32
    return %c0_i32, %c0_i32_0, %c0_i32_1 : i32, i32, i32
  }
  func.func @transform_6(%arg0: i32) -> (i32, i32) {
    %c0_i32 = arith.constant 0 : i32
    %c0_i32_0 = arith.constant 0 : i32
    %c0_i32_1 = arith.constant 0 : i32
    return %c0_i32, %c0_i32_0 : i32, i32
  }
  func.func @transform_7(%arg0: i32) -> (i32, i32, i32) {
    %c0_i32 = arith.constant 0 : i32
    %c0_i32_0 = arith.constant 0 : i32
    %c0_i32_1 = arith.constant 0 : i32
    %c0_i32_2 = arith.constant 0 : i32
    return %c0_i32, %c0_i32_0, %c0_i32_1 : i32, i32, i32
  }
  func.func @transform_8(%arg0: i32) -> (i32, i32) {
    %c0_i32 = arith.constant 0 : i32
    %c0_i32_0 = arith.constant 0 : i32
    %c0_i32_1 = arith.constant 0 : i32
    return %c0_i32, %c0_i32_0 : i32, i32
  }
  func.func @transform_9(%arg0: i32) -> (i32, i32, i32) {
    %c0_i32 = arith.constant 0 : i32
    %c0_i32_0 = arith.constant 0 : i32
    %c0_i32_1 = arith.constant 0 : i32
    %c0_i32_2 = arith.constant 0 : i32
    return %c0_i32, %c0_i32_0, %c0_i32_1 : i32, i32, i32
  }
  func.func @transform_10(%arg0: i32) -> (i32, i32) {
    %c0_i32 = arith.constant 0 : i32
    %c0_i32_0 = arith.constant 0 : i32
    %c0_i32_1 = arith.constant 0 : i32
    return %c0_i32, %c0_i32_0 : i32, i32
  }
  func.func @transform_11(%arg0: i32) -> (i32, i32, i32) {
    %c0_i32 = arith.constant 0 : i32
    %c0_i32_0 = arith.constant 0 : i32
    %c0_i32_1 = arith.constant 0 : i32
    %c0_i32_2 = arith.constant 0 : i32
    return %c0_i32, %c0_i32_0, %c0_i32_1 : i32, i32, i32
  }
  func.func @transform_12(%arg0: i32) -> (i32, i32) {
    %c0_i32 = arith.constant 0 : i32
    %c0_i32_0 = arith.constant 0 : i32
    %c0_i32_1 = arith.constant 0 : i32
    return %c0_i32, %c0_i32_0 : i32, i32
  }
  func.func @transform_13(%arg0: i32) -> (i32, i32, i32) {
    %c0_i32 = arith.constant 0 : i32
    %c0_i32_0 = arith.constant 0 : i32
    %c0_i32_1 = arith.constant 0 : i32
    %c0_i32_2 = arith.constant 0 : i32
    return %c0_i32, %c0_i32_0, %c0_i32_1 : i32, i32, i32
  }
  func.func @transform_14(%arg0: i32) -> (i32, i32) {
    %c0_i32 = arith.constant 0 : i32
    %c0_i32_0 = arith.constant 0 : i32
    %c0_i32_1 = arith.constant 0 : i32
    return %c0_i32, %c0_i32_0 : i32, i32
  }
  func.func @transform_15(%arg0: i32) -> (i32, i32) {
    %c0_i32 = arith.constant 0 : i32
    %c0_i32_0 = arith.constant 0 : i32
    %c0_i32_1 = arith.constant 0 : i32
    return %c0_i32, %c0_i32_0 : i32, i32
  }
  func.func @transform_16(%arg0: i32) -> (i32, i32) {
    %c0_i32 = arith.constant 0 : i32
    %c0_i32_0 = arith.constant 0 : i32
    %c0_i32_1 = arith.constant 0 : i32
    return %c0_i32, %c0_i32_0 : i32, i32
  }
  func.func @transform_17(%arg0: i32) -> (i32, i32) {
    %c0_i32 = arith.constant 0 : i32
    %c0_i32_0 = arith.constant 0 : i32
    %c0_i32_1 = arith.constant 0 : i32
    return %c0_i32, %c0_i32_0 : i32, i32
  }
  func.func @transform_18(%arg0: i32) -> (i32, i32, i32) {
    %c0_i32 = arith.constant 0 : i32
    %c0_i32_0 = arith.constant 0 : i32
    %c0_i32_1 = arith.constant 0 : i32
    return %arg0, %c0_i32, %c0_i32_0 : i32, i32, i32
  }
}

</mosaic_0001>

<bundles_post_ra>
// kernel: generator_forward.2
= control target key start
LH: loop header
LB: loop body
LE: loop exit
PB: predicated region body
PF: predicated region fallthrough
CT: control target
= control target key end

     0   :  { %12 = vsyncpa [#allocation3], 0  ;;  %s6514_s0 = inlined_call_operand.vmem [shape: f32[16,16], index: 0, kind: input, shape index: {}]   ;;  %s6515_s1 = inlined_call_operand.vmem [shape: f32[16,512], index: 1, kind: input, shape index: {}]   ;;  %s6516_s2 = inlined_call_operand.hbm [shape: f32[128,512], index: 2, kind: input, shape index: {}]   ;;  %s6517_s3 = inlined_call_operand.vmem [shape: f32[1,512], index: 3, kind: input, shape index: {}]   ;;  %s6518_s4 = inlined_call_operand.hbm [shape: f32[16,512], index: 4, kind: input, shape index: {}]   ;;  %s6519_s5 = inlined_call_operand.hbm [shape: f32[128,512], index: 5, kind: input, shape index: {}]   ;;  %s6520_s6 = inlined_call_operand.hbm [shape: f32[1,512], index: 6, kind: input, shape index: {}]   ;;  %s6521_s7 = inlined_call_operand.vmem [shape: f32[8,2,256], index: 7, kind: output, shape index: {}]  }
   0x1   :  { %13 = vsyncpa [#allocation5], 0 }
   0x2   :  { %14 = vsyncpa [#allocation8], 0  ;;  %s4346_s24 = smov [#allocation4]   ;;  %s4347_s26 = smov [#allocation2]  }
   0x3   :  { %s38_s25 = sshll.u32 %s4346_s24, 4  ;;  %s24_s27 = sshll.u32 %s4347_s26, 4  ;;  %s39_s25 = int_to_ptr.vmem [resolvable:$true] %s38_s25  ;;  %s25_s27 = int_to_ptr.vmem [resolvable:$true] %s24_s27 }
   0x4   :  { %s4268_s28 = scalar_lea.vmem %s39_s25, 1024  ;;  %p4273_p1 = scmp.lt.s32.totalorder %s39_s25, %s39_s25 }
   0x5   :  { %p4269_p0 = scmp.ne.s32.totalorder %s39_s25, %s4268_s28  ;;  %p4274_p2 = scmp.lt.s32.totalorder %s4268_s28, %s4268_s28 }
   0x7   :  { %p4275_p3 = por %p4274_p2, %p4273_p1 }
   0x9   :  { %p4276_p4 = pnand %p4275_p3, %p4269_p0 }
   0xb   :  { %4279 = shalt.err (!%p4276_p4)
}
   0xc   :  { %s4348_s29 = smov 512   ;;  %s4349_s30 = smov 32  }
   0xd   :  { %44 = dma.hbm_to_vmem [thread:$0]  %s6518_s4, 1024, %s39_s25, [#allocation5], %s4348_s29, %s4348_s29, %s4349_s30  }
   0xe   :  { %s4288_s10 = scalar_lea.vmem %s25_s27, 8192  ;;  %p4293_p6 = scmp.lt.s32.totalorder %s25_s27, %s25_s27 }
   0xf   :  { %p4289_p5 = scmp.ne.s32.totalorder %s25_s27, %s4288_s10  ;;  %p4294_p7 = scmp.lt.s32.totalorder %s4288_s10, %s4288_s10 }
  0x11   :  { %p4295_p8 = por %p4294_p7, %p4293_p6 }
  0x13   :  { %p4296_p9 = pnand %p4295_p8, %p4289_p5 }
  0x15   :  { %4299 = shalt.err (!%p4296_p9)
}
  0x16   :  { %30 = dma.hbm_to_vmem [thread:$0]  %s6516_s2, 8192, %s25_s27, [#allocation3], %s4348_s29, %s4348_s29, %s4349_s30  }
  0x17   :  { %s4350_s13 = smov [#allocation6]   ;;  %s4351_s15 = smov [#allocation7]  }
  0x18   :  { %s50_s14 = sshll.u32 %s4350_s13, 4  ;;  %s63_s16 = sshll.u32 %s4351_s15, 4  ;;  %s51_s14 = int_to_ptr.vmem [resolvable:$true] %s50_s14  ;;  %s64_s16 = int_to_ptr.vmem [resolvable:$true] %s63_s16 }
  0x19   :  { %s4308_s17 = scalar_lea.vmem %s51_s14, 8192  ;;  %p4313_p11 = scmp.lt.s32.totalorder %s51_s14, %s51_s14 }
  0x1a   :  { %p4309_p10 = scmp.ne.s32.totalorder %s51_s14, %s4308_s17  ;;  %p4314_p12 = scmp.lt.s32.totalorder %s4308_s17, %s4308_s17 }
  0x1c   :  { %p4315_p13 = por %p4314_p12, %p4313_p11 }
  0x1e   :  { %p4316_p0 = pnand %p4315_p13, %p4309_p10 }
  0x20   :  { %4319 = shalt.err (!%p4316_p0)
}
  0x21   :  { %56 = dma.hbm_to_vmem [thread:$0]  %s6519_s5, 8192, %s51_s14, [#allocation5], %s4348_s29, %s4348_s29, %s4349_s30  }
  0x22   :  { %s4328_s19 = scalar_lea.vmem %s64_s16, 64  ;;  %p4333_p2 = scmp.lt.s32.totalorder %s64_s16, %s64_s16 }
  0x23   :  { %p4329_p1 = scmp.ne.s32.totalorder %s64_s16, %s4328_s19  ;;  %p4334_p3 = scmp.lt.s32.totalorder %s4328_s19, %s4328_s19 }
  0x25   :  { %p4335_p4 = por %p4334_p3, %p4333_p2 }
  0x27   :  { %p4336_p5 = pnand %p4335_p4, %p4329_p1 }
  0x29   :  { %4339 = shalt.err (!%p4336_p5)
}
  0x2a   :  { %66 = dma.hbm_to_vmem [thread:$0]  %s6520_s6, 64, %s64_s16, [#allocation8]  }
  0x2b   :  { %4340 = dma.done.wait [#allocation3], 8192  }
  0x2c   :  { %4341 = vsyncadd [#allocation3], 4294959104 }
  0x2d   :  { %4342 = dma.done.wait [#allocation5], 9216  }
  0x2e   :  { %4343 = vsyncadd [#allocation5], 4294958080 }
  0x2f   :  { %4344 = dma.done.wait [#allocation8], 64  }
  0x30   :  { %4345 = vsyncadd [#allocation8], 4294967232  ;;  %v6522_v0 = vmov 0.0   ;;  %v86_v1 = vld [vmem:[%s6515_s1 + $0x28] sm:$0xff]  ;;  %v88_v2 = vld [vmem:[%s6515_s1 + $0x38] sm:$0xff]  ;;  %vm111_vm0 = vcmask 130048  }
  0x31   :  { %182 = vmatprep.mubr.f32.mxu0 %v6522_v0  ;;  %259 = vmatprep.mubr.f32.mxu1 %v6522_v0  ;;  %v85_v3 = vld [vmem:[%s6515_s1 + $0x20] sm:$0xff]  ;;  %v87_v4 = vld [vmem:[%s6515_s1 + $0x30] sm:$0xff]  ;;  %v82_v5 = vld [vmem:[%s6515_s1 + $0x8] sm:$0xff] }
  0x32   :  { %146 = vmatprep.subr.mxu0 %v86_v1  ;;  %223 = vmatprep.subr.mxu1 %v88_v2  ;;  %v84_v6 = vld [vmem:[%s6515_s1 + $0x18] sm:$0xff]  ;;  %v81_v7 = vld [vmem:[%s6515_s1] sm:$0xff]  ;;  %v83_v8 = vld [vmem:[%s6515_s1 + $0x10] sm:$0xff] }
  0x33   :  { %147 = vmatpush1.msra.mxu0 %v85_v3  ;;  %224 = vmatpush1.msra.mxu1 %v87_v4  ;;  %v79_v9 = vld [vmem:[%s6514_s0] sm:$0xff]  ;;  %v277_v10 = vld [vmem:[#allocation4 + $0x28] sm:$0xff]  ;;  %v279_v12 = vld [vmem:[#allocation4 + $0x38] sm:$0xff] }
  0x34   :  { %148 = vmatprep.subr.mxu0 %v82_v5  ;;  %225 = vmatprep.subr.mxu1 %v84_v6  ;;  %v276_v11 = vld [vmem:[#allocation4 + $0x20] sm:$0xff]  ;;  %v273_v13 = vld [vmem:[#allocation4 + $0x8] sm:$0xff]  ;;  %v278_v15 = vld [vmem:[#allocation4 + $0x30] sm:$0xff] }
  0x35   :  { %149 = vmatpush1.msra.mxu0 %v81_v7  ;;  %226 = vmatpush1.msra.mxu1 %v83_v8  ;;  %v4441_v14 = vld [vmem:[%s6514_s0 + $0x8] sm:$0xff]  ;;  %v272_v16 = vld [vmem:[#allocation4] sm:$0xff]  ;;  %v275_v17 = vld [vmem:[#allocation4 + $0x18] sm:$0xff] }
  0x36   :  { %3666 = vmatmul.mubr.msk.f32.vlgmr.msra.gmra.mxu0 %vm111_vm0, %v79_v9  ;;  %3668 = vmatmul.mubr.msk.f32.vlgmr.msra.gmra.mxu1 %vm111_vm0, %v79_v9  ;;  %v274_v18 = vld [vmem:[#allocation4 + $0x10] sm:$0xff]  ;;  %v4448_v19 = vld [vmem:[#allocation2 + $0x1e8] sm:$0xff]  ;;  %v4450_v20 = vld [vmem:[#allocation2 + $0x1f8] sm:$0xff] }
  0x37   :  { %330 = vmatprep.subr.mxu0 %v277_v10  ;;  %188 = vmatprep.mubr.f32.mxu0 %v6522_v0  ;;  %v4454_v21 = vld [vmem:[#allocation2 + $0x1e0] sm:$0xff]  ;;  %v4456_v22 = vld [vmem:[#allocation2 + $0x1f0] sm:$0xff]  ;;  %v4460_v23 = vld [vmem:[#allocation2 + $0x1c8] sm:$0xff] }
  0x38   :  { %331 = vmatpush1.msra.mxu0 %v276_v11  ;;  %265 = vmatprep.mubr.f32.mxu1 %v6522_v0  ;;  %v4462_v24 = vld [vmem:[#allocation2 + $0x1d8] sm:$0xff]  ;;  %v4466_v25 = vld [vmem:[#allocation2 + $0x1c0] sm:$0xff]  ;;  %v4468_v26 = vld [vmem:[#allocation2 + $0x1d0] sm:$0xff] }
  0x39   :  { %407 = vmatprep.subr.mxu1 %v279_v12  ;;  %332 = vmatprep.subr.mxu0 %v273_v13  ;;  %v4472_v27 = vld [vmem:[#allocation2 + $0x1a8] sm:$0xff]  ;;  %v4474_v28 = vld [vmem:[#allocation2 + $0x1b8] sm:$0xff]  ;;  %v4478_v29 = vld [vmem:[#allocation2 + $0x1a0] sm:$0xff] }
  0x3a   :  { %3667 = vmatmul.mubr.msk.f32.gmra.mxu0 %vm111_vm0, %v4441_v14  ;;  %3669 = vmatmul.mubr.msk.f32.gmra.mxu1 %vm111_vm0, %v4441_v14  ;;  %v4480_v30 = vld [vmem:[#allocation2 + $0x1b0] sm:$0xff]  ;;  %v4484_v31 = vld [vmem:[#allocation2 + $0x188] sm:$0xff]  ;;  %v4486_v32 = vld [vmem:[#allocation2 + $0x198] sm:$0xff] }
  0x3b   :  { %408 = vmatpush1.msra.mxu1 %v278_v15  ;;  %333 = vmatpush1.msra.mxu0 %v272_v16  ;;  %v4490_v33 = vld [vmem:[#allocation2 + $0x180] sm:$0xff]  ;;  %v4492_v34 = vld [vmem:[#allocation2 + $0x190] sm:$0xff]  ;;  %v4496_v35 = vld [vmem:[#allocation2 + $0x168] sm:$0xff] }
  0x3c   :  { %409 = vmatprep.subr.mxu1 %v275_v17  ;;  %366 = vmatprep.mubr.f32.mxu0 %v6522_v0  ;;  %v4498_v36 = vld [vmem:[#allocation2 + $0x178] sm:$0xff]  ;;  %v4502_v37 = vld [vmem:[#allocation2 + $0x160] sm:$0xff]  ;;  %v4504_v38 = vld [vmem:[#allocation2 + $0x170] sm:$0xff] }
  0x3d   :  { %410 = vmatpush1.msra.mxu1 %v274_v18  ;;  %443 = vmatprep.mubr.f32.mxu1 %v6522_v0  ;;  %v4508_v39 = vld [vmem:[#allocation2 + $0x148] sm:$0xff]  ;;  %v4510_v40 = vld [vmem:[#allocation2 + $0x158] sm:$0xff]  ;;  %v4514_v41 = vld [vmem:[#allocation2 + $0x140] sm:$0xff] }
  0x3e   :  { %584 = vmatprep.subr.mxu0 %v4448_v19  ;;  %655 = vmatprep.subr.mxu1 %v4450_v20  ;;  %v4516_v42 = vld [vmem:[#allocation2 + $0x150] sm:$0xff]  ;;  %v4520_v43 = vld [vmem:[#allocation2 + $0x128] sm:$0xff]  ;;  %v4522_v44 = vld [vmem:[#allocation2 + $0x138] sm:$0xff] }
  0x3f   :  { %3670 = vmatmul.mubr.msk.f32.vlgmr.msra.gmra.mxu0 %vm111_vm0, %v79_v9  ;;  %3672 = vmatmul.mubr.msk.f32.vlgmr.msra.gmra.mxu1 %vm111_vm0, %v79_v9  ;;  %v4526_v45 = vld [vmem:[#allocation2 + $0x120] sm:$0xff]  ;;  %v4528_v46 = vld [vmem:[#allocation2 + $0x130] sm:$0xff]  ;;  %v4532_v47 = vld [vmem:[#allocation2 + $0x108] sm:$0xff] }
  0x40   :  { %585 = vmatpush1.msra.mxu0 %v4454_v21  ;;  %656 = vmatpush1.msra.mxu1 %v4456_v22  ;;  %v4534_v48 = vld [vmem:[#allocation2 + $0x118] sm:$0xff]  ;;  %v4538_v49 = vld [vmem:[#allocation2 + $0x100] sm:$0xff]  ;;  %v4540_v50 = vld [vmem:[#allocation2 + $0x110] sm:$0xff] }
  0x41   :  { %586 = vmatprep.subr.mxu0 %v4460_v23  ;;  %657 = vmatprep.subr.mxu1 %v4462_v24  ;;  %v4544_v51 = vld [vmem:[#allocation2 + $0xe8] sm:$0xff]  ;;  %v4546_v52 = vld [vmem:[#allocation2 + $0xf8] sm:$0xff]  ;;  %v4550_v53 = vld [vmem:[#allocation2 + $0xe0] sm:$0xff] }
  0x42   :  { %587 = vmatpush1.msra.mxu0 %v4466_v25  ;;  %658 = vmatpush1.msra.mxu1 %v4468_v26  ;;  %v4552_v54 = vld [vmem:[#allocation2 + $0xf0] sm:$0xff]  ;;  %v4556_v55 = vld [vmem:[#allocation2 + $0xc8] sm:$0xff]  ;;  %v4558_v56 = vld [vmem:[#allocation2 + $0xd8] sm:$0xff] }
  0x43   :  { %588 = vmatprep.subr.mxu0 %v4472_v27  ;;  %659 = vmatprep.subr.mxu1 %v4474_v28  ;;  %v4562_v57 = vld [vmem:[#allocation2 + $0xc0] sm:$0xff]  ;;  %v4564_v58 = vld [vmem:[#allocation2 + $0xd0] sm:$0xff]  ;;  %v4568_v59 = vld [vmem:[#allocation2 + $0xa8] sm:$0xff] }
  0x44   :  { %589 = vmatpush1.msra.mxu0 %v4478_v29  ;;  %660 = vmatpush1.msra.mxu1 %v4480_v30  ;;  %v4570_v60 = vld [vmem:[#allocation2 + $0xb8] sm:$0xff]  ;;  %v4574_v61 = vld [vmem:[#allocation2 + $0xa0] sm:$0xff]  ;;  %v4576_v62 = vld [vmem:[#allocation2 + $0xb0] sm:$0xff] }
  0x45   :  { %590 = vmatprep.subr.mxu0 %v4484_v31  ;;  %661 = vmatprep.subr.mxu1 %v4486_v32  ;;  %v4580_v63 = vld [vmem:[#allocation2 + $0x88] sm:$0xff]  ;;  %v4582_v1 = vld [vmem:[#allocation2 + $0x98] sm:$0xff]  ;;  %v4586_v2 = vld [vmem:[#allocation2 + $0x80] sm:$0xff] }
  0x46   :  { %591 = vmatpush1.msra.mxu0 %v4490_v33  ;;  %662 = vmatpush1.msra.mxu1 %v4492_v34  ;;  %v4588_v3 = vld [vmem:[#allocation2 + $0x90] sm:$0xff]  ;;  %v4592_v4 = vld [vmem:[#allocation2 + $0x68] sm:$0xff]  ;;  %v4594_v5 = vld [vmem:[#allocation2 + $0x78] sm:$0xff] }
  0x47   :  { %592 = vmatprep.subr.mxu0 %v4496_v35  ;;  %663 = vmatprep.subr.mxu1 %v4498_v36  ;;  %v4598_v6 = vld [vmem:[#allocation2 + $0x60] sm:$0xff]  ;;  %v4600_v7 = vld [vmem:[#allocation2 + $0x70] sm:$0xff]  ;;  %v4604_v8 = vld [vmem:[#allocation2 + $0x48] sm:$0xff] }
  0x48   :  { %593 = vmatpush1.msra.mxu0 %v4502_v37  ;;  %664 = vmatpush1.msra.mxu1 %v4504_v38  ;;  %6971 = vst [vmem:[#allocation12_spill] sm:$0xff] %v4598_v6  ;;  %6972 = vst [vmem:[#allocation13_spill] sm:$0xff] %v4600_v7  ;;  %v4606_v9 = vld [vmem:[#allocation2 + $0x58] sm:$0xff]  ;;  %v4612_v10 = vld [vmem:[#allocation2 + $0x40] sm:$0xff] }
  0x49   :  { %594 = vmatprep.subr.mxu0 %v4508_v39  ;;  %665 = vmatprep.subr.mxu1 %v4510_v40  ;;  %6973 = vst [vmem:[#allocation14_spill] sm:$0xff] %v4604_v8  ;;  %6974 = vst [vmem:[#allocation15_spill] sm:$0xff] %v4606_v9  ;;  %v4614_v11 = vld [vmem:[#allocation2 + $0x50] sm:$0xff]  ;;  %v4620_v12 = vld [vmem:[#allocation2 + $0x28] sm:$0xff] }
  0x4a   :  { %595 = vmatpush1.msra.mxu0 %v4514_v41  ;;  %666 = vmatpush1.msra.mxu1 %v4516_v42  ;;  %6975 = vst [vmem:[#allocation16_spill] sm:$0xff] %v4612_v10  ;;  %6976 = vst [vmem:[#allocation17_spill] sm:$0xff] %v4614_v11  ;;  %v4622_v13 = vld [vmem:[#allocation2 + $0x38] sm:$0xff]  ;;  %v4626_v15 = vld [vmem:[#allocation2 + $0x20] sm:$0xff] }
  0x4b   :  { %596 = vmatprep.subr.mxu0 %v4520_v43  ;;  %667 = vmatprep.subr.mxu1 %v4522_v44  ;;  %6977 = vst [vmem:[#allocation18_spill] sm:$0xff] %v4620_v12  ;;  %6978 = vst [vmem:[#allocation19_spill] sm:$0xff] %v4622_v13  ;;  %v4628_v16 = vld [vmem:[#allocation2 + $0x30] sm:$0xff]  ;;  %v4634_v17 = vld [vmem:[#allocation2 + $0x8] sm:$0xff] }
  0x4c   :  { %597 = vmatpush1.msra.mxu0 %v4526_v45  ;;  %668 = vmatpush1.msra.mxu1 %v4528_v46  ;;  %6979 = vst [vmem:[#allocation20_spill] sm:$0xff] %v4626_v15  ;;  %6980 = vst [vmem:[#allocation21_spill] sm:$0xff] %v4628_v16  ;;  %v4636_v18 = vld [vmem:[#allocation2 + $0x18] sm:$0xff] }
  0x4d   :  { %598 = vmatprep.subr.mxu0 %v4532_v47  ;;  %669 = vmatprep.subr.mxu1 %v4534_v48  ;;  %6981 = vst [vmem:[#allocation22_spill] sm:$0xff] %v4634_v17  ;;  %6982 = vst [vmem:[#allocation23_spill] sm:$0xff] %v4636_v18 }
  0x4e   :  { %599 = vmatpush1.msra.mxu0 %v4538_v49  ;;  %670 = vmatpush1.msra.mxu1 %v4540_v50 }
  0x4f   :  { %600 = vmatprep.subr.mxu0 %v4544_v51  ;;  %671 = vmatprep.subr.mxu1 %v4546_v52 }
  0x50   :  { %601 = vmatpush1.msra.mxu0 %v4550_v53  ;;  %672 = vmatpush1.msra.mxu1 %v4552_v54 }
  0x51   :  { %602 = vmatprep.subr.mxu0 %v4556_v55  ;;  %673 = vmatprep.subr.mxu1 %v4558_v56 }
  0x52   :  { %603 = vmatpush1.msra.mxu0 %v4562_v57  ;;  %674 = vmatpush1.msra.mxu1 %v4564_v58 }
  0x53   :  { %604 = vmatprep.subr.mxu0 %v4568_v59  ;;  %675 = vmatprep.subr.mxu1 %v4570_v60 }
  0x54   :  { %605 = vmatpush1.msra.mxu0 %v4574_v61  ;;  %676 = vmatpush1.msra.mxu1 %v4576_v62 }
  0x55   :  { %606 = vmatprep.subr.mxu0 %v4580_v63  ;;  %677 = vmatprep.subr.mxu1 %v4582_v1 }
  0x56   :  { %607 = vmatpush1.msra.mxu0 %v4586_v2  ;;  %678 = vmatpush1.msra.mxu1 %v4588_v3 }
  0x57   :  { %608 = vmatprep.subr.mxu0 %v4592_v4  ;;  %679 = vmatprep.subr.mxu1 %v4594_v5 }
  0x58   :  { %609 = vmatpush1.msra.mxu0 %v4598_v6  ;;  %680 = vmatpush1.msra.mxu1 %v4600_v7 }
  0x59   :  { %610 = vmatprep.subr.mxu0 %v4604_v8  ;;  %681 = vmatprep.subr.mxu1 %v4606_v9  ;;  %v4676_v9 = vld [vmem:[#allocation6 + $0x1b8] sm:$0xff]  ;;  %v4680_v8 = vld [vmem:[#allocation6 + $0x1a0] sm:$0xff] }
  0x5a   :  { %372 = vmatprep.mubr.f32.mxu0 %v6522_v0  ;;  %449 = vmatprep.mubr.f32.mxu1 %v6522_v0  ;;  %v4640_v0 = vld [vmem:[#allocation2] sm:$0xff]  ;;  %6995 = vst [vmem:[#allocation35_spill] sm:$0xff] %v4676_v9  ;;  %6996 = vst [vmem:[#allocation36_spill] sm:$0xff] %v4680_v8 }
  0x5b   :  { %611 = vmatpush1.msra.mxu0 %v4612_v10  ;;  %682 = vmatpush1.msra.mxu1 %v4614_v11  ;;  %6983 = vst [vmem:[#allocation24_spill] sm:$0xff] %v4640_v0  ;;  %v4644_v11 = vld [vmem:[#allocation2 + $0x10] sm:$0xff]  ;;  %v4650_v10 = vld [vmem:[#allocation6 + $0x1e8] sm:$0xff] }
  0x5c   :  { %3671 = vmatmul.mubr.msk.f32.gmra.mxu0 %vm111_vm0, %v4441_v14  ;;  %3673 = vmatmul.mubr.msk.f32.gmra.mxu1 %vm111_vm0, %v4441_v14  ;;  %6984 = vst [vmem:[#allocation25_spill] sm:$0xff] %v4644_v11  ;;  %v6985_v14 = vmov 0.0   ;;  %6986 = vst [vmem:[#allocation26_spill] sm:$0xff] %v4650_v10 }
  0x5d   :  { %612 = vmatprep.subr.mxu0 %v4620_v12  ;;  %683 = vmatprep.subr.mxu1 %v4622_v13  ;;  %v4652_v12 = vld [vmem:[#allocation6 + $0x1f8] sm:$0xff]  ;;  %v4674_v13 = vld [vmem:[#allocation6 + $0x1a8] sm:$0xff] }
  0x5e   :  { %613 = vmatpush1.msra.mxu0 %v4626_v15  ;;  %684 = vmatpush1.msra.mxu1 %v4628_v16  ;;  %6987 = vst [vmem:[#allocation27_spill] sm:$0xff] %v4652_v12  ;;  %v4656_v15 = vld [vmem:[#allocation6 + $0x1e0] sm:$0xff]  ;;  %v4658_v16 = vld [vmem:[#allocation6 + $0x1f0] sm:$0xff]  ;;  %6994 = vst [vmem:[#allocation34_spill] sm:$0xff] %v4674_v13 }
  0x5f   :  { %614 = vmatprep.subr.mxu0 %v4634_v17  ;;  %685 = vmatprep.subr.mxu1 %v4636_v18  ;;  %6988 = vst [vmem:[#allocation28_spill] sm:$0xff] %v4656_v15  ;;  %6989 = vst [vmem:[#allocation29_spill] sm:$0xff] %v4658_v16  ;;  %v4662_v18 = vld [vmem:[#allocation6 + $0x1c8] sm:$0xff]  ;;  %v4668_v17 = vld [vmem:[#allocation6 + $0x1c0] sm:$0xff] }
  0x60   :  { %615 = vmatpush1.msra.mxu0 %v4640_v0  ;;  %648 = vmatprep.mubr.f32.mxu0 %v6985_v14  ;;  %6990 = vst [vmem:[#allocation30_spill] sm:$0xff] %v4662_v18  ;;  %v4664_v0 = vld [vmem:[#allocation6 + $0x1d8] sm:$0xff]  ;;  %6992 = vst [vmem:[#allocation32_spill] sm:$0xff] %v4668_v17 }
  0x61   :  { %686 = vmatpush1.msra.mxu1 %v4644_v11  ;;  %719 = vmatprep.mubr.f32.mxu1 %v6985_v14  ;;  %6991 = vst [vmem:[#allocation31_spill] sm:$0xff] %v4664_v0  ;;  %v4670_v11 = vld [vmem:[#allocation6 + $0x1d0] sm:$0xff] }
  0x62   :  { %649 = vmatmul.mubr.f32.vlgmr.msra.gmra.mxu0 %v6985_v14  ;;  %720 = vmatmul.mubr.f32.vlgmr.msra.gmra.mxu1 %v6985_v14  ;;  %6993 = vst [vmem:[#allocation33_spill] sm:$0xff] %v4670_v11 }
  0x63   :  { %730 = vmatprep.subr.mxu0 %v4650_v10  ;;  %801 = vmatprep.subr.mxu1 %v4652_v12  ;;  %v4682_v10 = vld [vmem:[#allocation6 + $0x1b0] sm:$0xff]  ;;  %v4686_v12 = vld [vmem:[#allocation6 + $0x188] sm:$0xff] }
  0x64   :  { %731 = vmatpush1.msra.mxu0 %v4656_v15  ;;  %802 = vmatpush1.msra.mxu1 %v4658_v16  ;;  %6997 = vst [vmem:[#allocation37_spill] sm:$0xff] %v4682_v10  ;;  %6998 = vst [vmem:[#allocation38_spill] sm:$0xff] %v4686_v12  ;;  %v4688_v15 = vld [vmem:[#allocation6 + $0x198] sm:$0xff]  ;;  %v4692_v16 = vld [vmem:[#allocation6 + $0x180] sm:$0xff] }
  0x65   :  { %732 = vmatprep.subr.mxu0 %v4662_v18  ;;  %803 = vmatprep.subr.mxu1 %v4664_v0  ;;  %6999 = vst [vmem:[#allocation39_spill] sm:$0xff] %v4688_v15  ;;  %7000 = vst [vmem:[#allocation40_spill] sm:$0xff] %v4692_v16  ;;  %v4694_v18 = vld [vmem:[#allocation6 + $0x190] sm:$0xff]  ;;  %v4698_v0 = vld [vmem:[#allocation6 + $0x168] sm:$0xff] }
  0x66   :  { %733 = vmatpush1.msra.mxu0 %v4668_v17  ;;  %804 = vmatpush1.msra.mxu1 %v4670_v11  ;;  %7001 = vst [vmem:[#allocation41_spill] sm:$0xff] %v4694_v18  ;;  %7002 = vst [vmem:[#allocation42_spill] sm:$0xff] %v4698_v0  ;;  %v4700_v17 = vld [vmem:[#allocation6 + $0x178] sm:$0xff]  ;;  %v4704_v11 = vld [vmem:[#allocation6 + $0x160] sm:$0xff] }
  0x67   :  { %734 = vmatprep.subr.mxu0 %v4674_v13  ;;  %805 = vmatprep.subr.mxu1 %v4676_v9  ;;  %7003 = vst [vmem:[#allocation43_spill] sm:$0xff] %v4700_v17  ;;  %7004 = vst [vmem:[#allocation44_spill] sm:$0xff] %v4704_v11  ;;  %v4706_v13 = vld [vmem:[#allocation6 + $0x170] sm:$0xff]  ;;  %v4710_v9 = vld [vmem:[#allocation6 + $0x148] sm:$0xff] }
  0x68   :  { %735 = vmatpush1.msra.mxu0 %v4680_v8  ;;  %806 = vmatpush1.msra.mxu1 %v4682_v10  ;;  %7005 = vst [vmem:[#allocation45_spill] sm:$0xff] %v4706_v13  ;;  %7006 = vst [vmem:[#allocation46_spill] sm:$0xff] %v4710_v9  ;;  %v4712_v8 = vld [vmem:[#allocation6 + $0x158] sm:$0xff]  ;;  %v4716_v10 = vld [vmem:[#allocation6 + $0x140] sm:$0xff] }
  0x69   :  { %736 = vmatprep.subr.mxu0 %v4686_v12  ;;  %807 = vmatprep.subr.mxu1 %v4688_v15  ;;  %7007 = vst [vmem:[#allocation47_spill] sm:$0xff] %v4712_v8  ;;  %7008 = vst [vmem:[#allocation48_spill] sm:$0xff] %v4716_v10  ;;  %v4718_v12 = vld [vmem:[#allocation6 + $0x150] sm:$0xff]  ;;  %v4722_v15 = vld [vmem:[#allocation6 + $0x128] sm:$0xff] }
  0x6a   :  { %737 = vmatpush1.msra.mxu0 %v4692_v16  ;;  %808 = vmatpush1.msra.mxu1 %v4694_v18  ;;  %7009 = vst [vmem:[#allocation49_spill] sm:$0xff] %v4718_v12  ;;  %7010 = vst [vmem:[#allocation50_spill] sm:$0xff] %v4722_v15  ;;  %v4724_v16 = vld [vmem:[#allocation6 + $0x138] sm:$0xff]  ;;  %v4728_v18 = vld [vmem:[#allocation6 + $0x120] sm:$0xff] }
  0x6b   :  { %738 = vmatprep.subr.mxu0 %v4698_v0  ;;  %809 = vmatprep.subr.mxu1 %v4700_v17  ;;  %7011 = vst [vmem:[#allocation51_spill] sm:$0xff] %v4724_v16  ;;  %7012 = vst [vmem:[#allocation52_spill] sm:$0xff] %v4728_v18  ;;  %v4730_v0 = vld [vmem:[#allocation6 + $0x130] sm:$0xff]  ;;  %v4734_v17 = vld [vmem:[#allocation6 + $0x108] sm:$0xff] }
  0x6c   :  { %739 = vmatpush1.msra.mxu0 %v4704_v11  ;;  %810 = vmatpush1.msra.mxu1 %v4706_v13  ;;  %7013 = vst [vmem:[#allocation53_spill] sm:$0xff] %v4730_v0  ;;  %7014 = vst [vmem:[#allocation54_spill] sm:$0xff] %v4734_v17  ;;  %v4736_v11 = vld [vmem:[#allocation6 + $0x118] sm:$0xff]  ;;  %v4740_v13 = vld [vmem:[#allocation6 + $0x100] sm:$0xff] }
  0x6d   :  { %740 = vmatprep.subr.mxu0 %v4710_v9  ;;  %811 = vmatprep.subr.mxu1 %v4712_v8  ;;  %7015 = vst [vmem:[#allocation55_spill] sm:$0xff] %v4736_v11  ;;  %7016 = vst [vmem:[#allocation56_spill] sm:$0xff] %v4740_v13  ;;  %v4742_v9 = vld [vmem:[#allocation6 + $0x110] sm:$0xff]  ;;  %v4746_v8 = vld [vmem:[#allocation6 + $0xe8] sm:$0xff] }
  0x6e   :  { %741 = vmatpush1.msra.mxu0 %v4716_v10  ;;  %812 = vmatpush1.msra.mxu1 %v4718_v12  ;;  %7017 = vst [vmem:[#allocation57_spill] sm:$0xff] %v4742_v9  ;;  %7018 = vst [vmem:[#allocation58_spill] sm:$0xff] %v4746_v8  ;;  %v4748_v10 = vld [vmem:[#allocation6 + $0xf8] sm:$0xff]  ;;  %v4752_v12 = vld [vmem:[#allocation6 + $0xe0] sm:$0xff] }
  0x6f   :  { %742 = vmatprep.subr.mxu0 %v4722_v15  ;;  %813 = vmatprep.subr.mxu1 %v4724_v16  ;;  %7019 = vst [vmem:[#allocation59_spill] sm:$0xff] %v4748_v10  ;;  %7020 = vst [vmem:[#allocation60_spill] sm:$0xff] %v4752_v12  ;;  %v4754_v15 = vld [vmem:[#allocation6 + $0xf0] sm:$0xff]  ;;  %v4758_v16 = vld [vmem:[#allocation6 + $0xc8] sm:$0xff] }
  0x70   :  { %743 = vmatpush1.msra.mxu0 %v4728_v18  ;;  %814 = vmatpush1.msra.mxu1 %v4730_v0  ;;  %7021 = vst [vmem:[#allocation61_spill] sm:$0xff] %v4754_v15  ;;  %7022 = vst [vmem:[#allocation62_spill] sm:$0xff] %v4758_v16  ;;  %v4760_v18 = vld [vmem:[#allocation6 + $0xd8] sm:$0xff]  ;;  %v4764_v0 = vld [vmem:[#allocation6 + $0xc0] sm:$0xff] }
  0x71   :  { %744 = vmatprep.subr.mxu0 %v4734_v17  ;;  %815 = vmatprep.subr.mxu1 %v4736_v11  ;;  %7023 = vst [vmem:[#allocation63_spill] sm:$0xff] %v4760_v18  ;;  %7024 = vst [vmem:[#allocation64_spill] sm:$0xff] %v4764_v0  ;;  %v4766_v17 = vld [vmem:[#allocation6 + $0xd0] sm:$0xff]  ;;  %v4770_v11 = vld [vmem:[#allocation6 + $0xa8] sm:$0xff] }
  0x72   :  { %745 = vmatpush1.msra.mxu0 %v4740_v13  ;;  %816 = vmatpush1.msra.mxu1 %v4742_v9  ;;  %7025 = vst [vmem:[#allocation65_spill] sm:$0xff] %v4766_v17  ;;  %7026 = vst [vmem:[#allocation66_spill] sm:$0xff] %v4770_v11  ;;  %v4772_v13 = vld [vmem:[#allocation6 + $0xb8] sm:$0xff]  ;;  %v4776_v9 = vld [vmem:[#allocation6 + $0xa0] sm:$0xff] }
  0x73   :  { %746 = vmatprep.subr.mxu0 %v4746_v8  ;;  %817 = vmatprep.subr.mxu1 %v4748_v10  ;;  %7027 = vst [vmem:[#allocation67_spill] sm:$0xff] %v4772_v13  ;;  %7028 = vst [vmem:[#allocation68_spill] sm:$0xff] %v4776_v9  ;;  %v4778_v8 = vld [vmem:[#allocation6 + $0xb0] sm:$0xff]  ;;  %v4782_v10 = vld [vmem:[#allocation6 + $0x88] sm:$0xff] }
  0x74   :  { %747 = vmatpush1.msra.mxu0 %v4752_v12  ;;  %818 = vmatpush1.msra.mxu1 %v4754_v15  ;;  %7029 = vst [vmem:[#allocation69_spill] sm:$0xff] %v4778_v8  ;;  %7030 = vst [vmem:[#allocation70_spill] sm:$0xff] %v4782_v10  ;;  %v4784_v12 = vld [vmem:[#allocation6 + $0x98] sm:$0xff]  ;;  %v4788_v15 = vld [vmem:[#allocation6 + $0x80] sm:$0xff] }
  0x75   :  { %748 = vmatprep.subr.mxu0 %v4758_v16  ;;  %819 = vmatprep.subr.mxu1 %v4760_v18  ;;  %7031 = vst [vmem:[#allocation71_spill] sm:$0xff] %v4784_v12  ;;  %7032 = vst [vmem:[#allocation72_spill] sm:$0xff] %v4788_v15  ;;  %v4790_v16 = vld [vmem:[#allocation6 + $0x90] sm:$0xff]  ;;  %v4794_v18 = vld [vmem:[#allocation6 + $0x68] sm:$0xff] }
  0x76   :  { %749 = vmatpush1.msra.mxu0 %v4764_v0  ;;  %820 = vmatpush1.msra.mxu1 %v4766_v17  ;;  %7033 = vst [vmem:[#allocation73_spill] sm:$0xff] %v4790_v16  ;;  %7034 = vst [vmem:[#allocation74_spill] sm:$0xff] %v4794_v18  ;;  %v4796_v0 = vld [vmem:[#allocation6 + $0x78] sm:$0xff]  ;;  %v4800_v17 = vld [vmem:[#allocation6 + $0x60] sm:$0xff] }
  0x77   :  { %750 = vmatprep.subr.mxu0 %v4770_v11  ;;  %821 = vmatprep.subr.mxu1 %v4772_v13  ;;  %7035 = vst [vmem:[#allocation75_spill] sm:$0xff] %v4796_v0  ;;  %7036 = vst [vmem:[#allocation76_spill] sm:$0xff] %v4800_v17  ;;  %v4802_v11 = vld [vmem:[#allocation6 + $0x70] sm:$0xff]  ;;  %v4806_v13 = vld [vmem:[#allocation6 + $0x48] sm:$0xff] }
  0x78   :  { %751 = vmatpush1.msra.mxu0 %v4776_v9  ;;  %822 = vmatpush1.msra.mxu1 %v4778_v8  ;;  %7037 = vst [vmem:[#allocation77_spill] sm:$0xff] %v4802_v11  ;;  %v4808_v9 = vld [vmem:[#allocation6 + $0x58] sm:$0xff]  ;;  %v4812_v8 = vld [vmem:[#allocation6 + $0x40] sm:$0xff] }
  0x79   :  { %752 = vmatprep.subr.mxu0 %v4782_v10  ;;  %823 = vmatprep.subr.mxu1 %v4784_v12  ;;  %7038 = vst [vmem:[#allocation78_spill] sm:$0xff] %v4808_v9  ;;  %v4814_v10 = vld [vmem:[#allocation6 + $0x50] sm:$0xff]  ;;  %v4818_v12 = vld [vmem:[#allocation6 + $0x28] sm:$0xff] }
  0x7a   :  { %753 = vmatpush1.msra.mxu0 %v4788_v15  ;;  %824 = vmatpush1.msra.mxu1 %v4790_v16  ;;  %v4820_v15 = vld [vmem:[#allocation6 + $0x38] sm:$0xff]  ;;  %v4824_v16 = vld [vmem:[#allocation6 + $0x20] sm:$0xff] }
  0x7b   :  { %754 = vmatprep.subr.mxu0 %v4794_v18  ;;  %825 = vmatprep.subr.mxu1 %v4796_v0  ;;  %7039 = vst [vmem:[#allocation79_spill] sm:$0xff] %v4820_v15  ;;  %7040 = vst [vmem:[#allocation80_spill] sm:$0xff] %v4824_v16  ;;  %v4826_v18 = vld [vmem:[#allocation6 + $0x30] sm:$0xff]  ;;  %v4830_v0 = vld [vmem:[#allocation6 + $0x8] sm:$0xff] }
  0x7c   :  { %755 = vmatpush1.msra.mxu0 %v4800_v17  ;;  %826 = vmatpush1.msra.mxu1 %v4802_v11  ;;  %7041 = vst [vmem:[#allocation81_spill] sm:$0xff] %v4826_v18  ;;  %7042 = vst [vmem:[#allocation82_spill] sm:$0xff] %v4830_v0  ;;  %v4832_v17 = vld [vmem:[#allocation6 + $0x18] sm:$0xff]  ;;  %v4836_v11 = vld [vmem:[#allocation6] sm:$0xff] }
  0x7d   :  { %756 = vmatprep.subr.mxu0 %v4806_v13  ;;  %827 = vmatprep.subr.mxu1 %v4808_v9  ;;  %7043 = vst [vmem:[#allocation83_spill] sm:$0xff] %v4832_v17  ;;  %7044 = vst [vmem:[#allocation84_spill] sm:$0xff] %v4836_v11  ;;  %v4840_v9 = vld [vmem:[#allocation6 + $0x10] sm:$0xff] }
  0x7e   :  { %757 = vmatpush1.msra.mxu0 %v4812_v8  ;;  %828 = vmatpush1.msra.mxu1 %v4814_v10  ;;  %7045 = vst [vmem:[#allocation85_spill] sm:$0xff] %v4840_v9 }
  0x7f   :  { %758 = vmatprep.subr.mxu0 %v4818_v12  ;;  %829 = vmatprep.subr.mxu1 %v4820_v15 }
  0x80   :  { %759 = vmatpush1.msra.mxu0 %v4824_v16  ;;  %830 = vmatpush1.msra.mxu1 %v4826_v18 }
  0x81   :  { %760 = vmatprep.subr.mxu0 %v4830_v0  ;;  %831 = vmatprep.subr.mxu1 %v4832_v17 }
  0x82   :  { %761 = vmatpush1.msra.mxu0 %v4836_v11  ;;  %794 = vmatprep.mubr.f32.mxu0 %v6985_v14 }
  0x83   :  { %832 = vmatpush1.msra.mxu1 %v4840_v9  ;;  %865 = vmatprep.mubr.f32.mxu1 %v6985_v14 }
  0x84   :  { %795 = vmatmul.mubr.f32.vlgmr.msra.gmra.mxu0 %v6985_v14  ;;  %866 = vmatmul.mubr.f32.vlgmr.msra.gmra.mxu1 %v6985_v14 }
  0x85   :  { %950 = vmatprep.subr.mxu0 %v4448_v19  ;;  %1021 = vmatprep.subr.mxu1 %v4450_v20  ;;  %v7046_v19 = vld [vmem:[#allocation14_spill] sm:$0xff]  ;;  %v7047_v20 = vld [vmem:[#allocation15_spill] sm:$0xff] }
  0x86   :  { %951 = vmatpush1.msra.mxu0 %v4454_v21  ;;  %1022 = vmatpush1.msra.mxu1 %v4456_v22  ;;  %v7048_v21 = vld [vmem:[#allocation16_spill] sm:$0xff]  ;;  %v7049_v22 = vld [vmem:[#allocation17_spill] sm:$0xff] }
  0x87   :  { %952 = vmatprep.subr.mxu0 %v4460_v23  ;;  %1023 = vmatprep.subr.mxu1 %v4462_v24  ;;  %v7050_v23 = vld [vmem:[#allocation18_spill] sm:$0xff]  ;;  %v7051_v24 = vld [vmem:[#allocation19_spill] sm:$0xff] }
  0x88   :  { %953 = vmatpush1.msra.mxu0 %v4466_v25  ;;  %1024 = vmatpush1.msra.mxu1 %v4468_v26  ;;  %v7052_v25 = vld [vmem:[#allocation20_spill] sm:$0xff]  ;;  %v7053_v26 = vld [vmem:[#allocation21_spill] sm:$0xff] }
  0x89   :  { %954 = vmatprep.subr.mxu0 %v4472_v27  ;;  %1025 = vmatprep.subr.mxu1 %v4474_v28  ;;  %v7054_v27 = vld [vmem:[#allocation22_spill] sm:$0xff]  ;;  %v7055_v28 = vld [vmem:[#allocation23_spill] sm:$0xff] }
  0x8a   :  { %955 = vmatpush1.msra.mxu0 %v4478_v29  ;;  %1026 = vmatpush1.msra.mxu1 %v4480_v30  ;;  %v7056_v29 = vld [vmem:[#allocation24_spill] sm:$0xff]  ;;  %v7057_v30 = vld [vmem:[#allocation25_spill] sm:$0xff] }
  0x8b   :  { %956 = vmatprep.subr.mxu0 %v4484_v31  ;;  %1027 = vmatprep.subr.mxu1 %v4486_v32  ;;  %v7058_v31 = vld [vmem:[#allocation26_spill] sm:$0xff]  ;;  %v7059_v32 = vld [vmem:[#allocation27_spill] sm:$0xff] }
  0x8c   :  { %957 = vmatpush1.msra.mxu0 %v4490_v33  ;;  %1028 = vmatpush1.msra.mxu1 %v4492_v34  ;;  %v91_v33 = vlaneseq }
  0x8d   :  { %958 = vmatprep.subr.mxu0 %v4496_v35  ;;  %1029 = vmatprep.subr.mxu1 %v4498_v36 }
  0x8e   :  { %959 = vmatpush1.msra.mxu0 %v4502_v37  ;;  %1030 = vmatpush1.msra.mxu1 %v4504_v38  ;;  %v4918_v34 = vshrl.u32 %v91_v33, 7  ;;  %v89_v37 = vld [vmem:[%s6517_s3] sm:$0xf] }
  0x8f   :  { %960 = vmatprep.subr.mxu0 %v4508_v39  ;;  %1031 = vmatprep.subr.mxu1 %v4510_v40 }
  0x90   :  { %961 = vmatpush1.msra.mxu0 %v4514_v41  ;;  %1032 = vmatpush1.msra.mxu1 %v4516_v42  ;;  %v93_v35 = vsub.s32 0, %v4918_v34  ;;  %v101_v36 = vsub.s32 2, %v4918_v34  ;;  %v97_v40 = vsub.s32 1, %v4918_v34  ;;  %v105_v41 = vsub.s32 3, %v4918_v34 }
  0x91   :  { %962 = vmatprep.subr.mxu0 %v4520_v43  ;;  %1033 = vmatprep.subr.mxu1 %v4522_v44 }
  0x92   :  { %963 = vmatpush1.msra.mxu0 %v4526_v45  ;;  %1034 = vmatpush1.msra.mxu1 %v4528_v46  ;;  %v94_v44 = vrot.slane %v89_v37, %v93_v35  ;;  %v280_v45 = vld [vmem:[#allocation7] sm:$0xf]  ;;  %v102_v46 = vrot.slane %v89_v37, %v101_v36 }
  0x93   :  { %964 = vmatprep.subr.mxu0 %v4532_v47  ;;  %1035 = vmatprep.subr.mxu1 %v4534_v48 }
  0x94   :  { %965 = vmatpush1.msra.mxu0 %v4538_v49  ;;  %1036 = vmatpush1.msra.mxu1 %v4540_v50 }
  0x95   :  { %966 = vmatprep.subr.mxu0 %v4544_v51  ;;  %1037 = vmatprep.subr.mxu1 %v4546_v52 }
  0x96   :  { %967 = vmatpush1.msra.mxu0 %v4550_v53  ;;  %1038 = vmatpush1.msra.mxu1 %v4552_v54 }
  0x97   :  { %968 = vmatprep.subr.mxu0 %v4556_v55  ;;  %1039 = vmatprep.subr.mxu1 %v4558_v56 }
  0x98   :  { %969 = vmatpush1.msra.mxu0 %v4562_v57  ;;  %1040 = vmatpush1.msra.mxu1 %v4564_v58 }
  0x99   :  { %970 = vmatprep.subr.mxu0 %v4568_v59  ;;  %1041 = vmatprep.subr.mxu1 %v4570_v60 }
  0x9a   :  { %971 = vmatpush1.msra.mxu0 %v4574_v61  ;;  %1042 = vmatpush1.msra.mxu1 %v4576_v62 }
  0x9b   :  { %972 = vmatprep.subr.mxu0 %v4580_v63  ;;  %1043 = vmatprep.subr.mxu1 %v4582_v1 }
  0x9c   :  { %973 = vmatpush1.msra.mxu0 %v4586_v2  ;;  %1044 = vmatpush1.msra.mxu1 %v4588_v3 }
  0x9d   :  { %974 = vmatprep.subr.mxu0 %v4592_v4  ;;  %1045 = vmatprep.subr.mxu1 %v4594_v5 }
  0x9e   :  { %975 = vmatpush1.msra.mxu0 %v4598_v6  ;;  %1046 = vmatpush1.msra.mxu1 %v4600_v7 }
  0x9f   :  { %976 = vmatprep.subr.mxu0 %v7046_v19  ;;  %1047 = vmatprep.subr.mxu1 %v7047_v20  ;;  %v4937_v20 = vrot.slane %v280_v45, %v105_v41 }
  0xa0   :  { %977 = vmatpush1.msra.mxu0 %v7048_v21  ;;  %1048 = vmatpush1.msra.mxu1 %v7049_v22  ;;  %v289_v21 = vrot.slane %v280_v45, %v97_v40 }
  0xa1   :  { %978 = vmatprep.subr.mxu0 %v7050_v23  ;;  %1049 = vmatprep.subr.mxu1 %v7051_v24  ;;  %v4931_v24 = vrot.slane %v280_v45, %v101_v36 }
  0xa2   :  { %979 = vmatpush1.msra.mxu0 %v7052_v25  ;;  %1050 = vmatpush1.msra.mxu1 %v7053_v26  ;;  %v285_v26 = vrot.slane %v280_v45, %v93_v35 }
  0xa3   :  { %980 = vmatprep.subr.mxu0 %v7054_v27  ;;  %1051 = vmatprep.subr.mxu1 %v7055_v28 }
  0xa4   :  { %981 = vmatpush1.msra.mxu0 %v7056_v29  ;;  %1014 = vmatprep.mubr.f32.mxu0 %v6985_v14  ;;  %v106_v29 = vrot.slane %v89_v37, %v105_v41 }
  0xa5   :  { %1052 = vmatpush1.msra.mxu1 %v7057_v30  ;;  %1085 = vmatprep.mubr.f32.mxu1 %v6985_v14 }
  0xa6   :  { %1110 = vmatprep.subr.mxu0 %v7058_v31  ;;  %1181 = vmatprep.subr.mxu1 %v7059_v32  ;;  %v98_v31 = vrot.slane %v89_v37, %v97_v40 }
  0xf6   :  { %v184_v38 = vpop.f32.mrf.mxu0  ;;  %v261_v39 = vpop.f32.mrf.mxu1 }
  0xf7   :  { %v4949_v40 = vadd.f32 %v184_v38, %v94_v44 }
  0xf8   :  { %v186_v42 = vpop.f32.mrf.mxu0  ;;  %v263_v43 = vpop.f32.mrf.mxu1 }
  0xf9   :  { %v4951_v45 = vadd.f32 %v186_v42, %v98_v31 }
  0xfa   :  { %v190_v33 = vpop.f32.mrf.mxu0  ;;  %v267_v32 = vpop.f32.mrf.mxu1 }
  0xfb   :  { %v4927_v30 = vadd.f32 %v190_v33, %v94_v44  ;;  %v4929_v28 = vadd.f32 %v267_v32, %v102_v46  ;;  %v4958_v44 = vadd.f32 %v261_v39, %v102_v46 }
  0xfc   :  { %v192_v27 = vpop.f32.mrf.mxu0  ;;  %v269_v25 = vpop.f32.mrf.mxu1 }
  0xfd   :  { %7060 = vst [vmem:[#allocation86_spill] sm:$0xff] %v4927_v30  ;;  %7061 = vst [vmem:[#allocation87_spill] sm:$0xff] %v4929_v28  ;;  %v4933_v23 = vadd.f32 %v192_v27, %v98_v31  ;;  %v4935_v22 = vadd.f32 %v269_v25, %v106_v29 }
  0xfe   :  { %7069 = vst [vmem:[#allocation95_spill] sm:$0xff] %v4958_v44 }
  0xff   :  { %7062 = vst [vmem:[#allocation88_spill] sm:$0xff] %v4933_v23  ;;  %7063 = vst [vmem:[#allocation89_spill] sm:$0xff] %v4935_v22  ;;  %v368_v19 = vpop.f32.mrf.mxu0  ;;  %v445_v7 = vpop.f32.mrf.mxu1 }
 0x100   :  { %v4939_v6 = vadd.f32 %v368_v19, %v285_v26  ;;  %v4942_v37 = vadd.f32 %v445_v7, %v4931_v24 }
 0x101   :  { %v370_v32 = vpop.f32.mrf.mxu0  ;;  %v447_v33 = vpop.f32.mrf.mxu1 }
 0x102   :  { %7064 = vst [vmem:[#allocation90_spill] sm:$0xff] %v4939_v6  ;;  %7065 = vst [vmem:[#allocation91_spill] sm:$0xff] %v4942_v37  ;;  %v4944_v35 = vadd.f32 %v370_v32, %v289_v21  ;;  %v4947_v36 = vadd.f32 %v447_v33, %v4937_v20 }
 0x104   :  { %7066 = vst [vmem:[#allocation92_spill] sm:$0xff] %v4944_v35  ;;  %7067 = vst [vmem:[#allocation93_spill] sm:$0xff] %v4947_v36  ;;  %v4955_v36 = vadd.f32 %v263_v43, %v106_v29 }
 0x106   :  { %7068 = vst [vmem:[#allocation94_spill] sm:$0xff] %v4955_v36 }
 0x11c   :  { %v374_v27 = vpop.f32.mrf.mxu0  ;;  %v451_v28 = vpop.f32.mrf.mxu1 }
 0x11d   :  { %v4961_v43 = vadd.f32 %v374_v27, %v285_v26 }
 0x11e   :  { %v376_v25 = vpop.f32.mrf.mxu0  ;;  %v453_v19 = vpop.f32.mrf.mxu1 }
 0x11f   :  { %v4963_v46 = vadd.f32 %v376_v25, %v289_v21  ;;  %v4971_v25 = vadd.f32 %v453_v19, %v4937_v20  ;;  %v7070_v20 = vld [vmem:[#allocation28_spill] sm:$0xff]  ;;  %v7073_v19 = vld [vmem:[#allocation31_spill] sm:$0xff] }
 0x122   :  { %v650_v41 = vpop.f32.mrf.mxu0  ;;  %v721_v32 = vpop.f32.mrf.mxu1 }
 0x123   :  { %v726_v6 = vadd.f32 %v650_v41, %v4949_v40  ;;  %v728_v23 = vadd.f32 %v721_v32, %v4958_v44 }
 0x124   :  { %v652_v7 = vpop.f32.mrf.mxu0  ;;  %v723_v33 = vpop.f32.mrf.mxu1 }
 0x125   :  { %v3674_v37 = vmul.f32 -1.442695, %v726_v6  ;;  %v727_v22 = vadd.f32 %v652_v7, %v4951_v45  ;;  %v729_v38 = vadd.f32 %v723_v33, %v4955_v36 }
 0x127   :  { %3748 = vpow2.f32 %v3674_v37  ;;  %v3675_v35 = vmul.f32 -1.442695, %v727_v22  ;;  %v3676_v31 = vmul.f32 -1.442695, %v729_v38 }
 0x129   :  { %3750 = vpow2.f32 %v3675_v35 }
 0x12a   :  { %3752 = vpow2.f32 %v3676_v31 }
 0x134   :  { %v3749_v42 = vpop.eup %3748 }
 0x135   :  { %v891_v41 = vadd.f32 1.0, %v3749_v42 }
 0x136   :  { %v3751_v30 = vpop.eup %3750 }
 0x137   :  { %3754 = vrcp.f32 %v891_v41  ;;  %v897_v6 = vadd.f32 1.0, %v3751_v30  ;;  %v3753_v22 = vpop.eup %3752 }
 0x138   :  { %3756 = vtanh.f32 %v728_v23  ;;  %v904_v33 = vadd.f32 1.0, %v3753_v22 }
 0x139   :  { %3758 = vrcp.f32 %v897_v6 }
 0x13a   :  { %3760 = vrcp.f32 %v904_v33 }
 0x144   :  { %v3755_v37 = vpop.eup %3754  ;;  %v796_v35 = vpop.f32.mrf.mxu0 }
 0x145   :  { %v3757_v29 = vpop.eup %3756  ;;  %v876_v7 = vrot.slane %v796_v35, 2  ;;  %v867_v41 = vpop.f32.mrf.mxu1  ;;  %v4975_v35 = vadd.f32 %v451_v28, %v4931_v24  ;;  %v7071_v24 = vld [vmem:[#allocation29_spill] sm:$0xff]  ;;  %v7072_v28 = vld [vmem:[#allocation30_spill] sm:$0xff] }
 0x146   :  { %v3759_v39 = vpop.eup %3758  ;;  %v798_v38 = vpop.f32.mrf.mxu0  ;;  %v908_v42 = vmul.f32 %v3757_v29, %v3755_v37  ;;  %v878_v37 = vrot.slane %v867_v41, 2  ;;  %v7074_v41 = vld [vmem:[#allocation32_spill] sm:$0xff] }
 0x147   :  { %v907_v32 = vmul.f32 0.0, %v3759_v39  ;;  %v884_v31 = vadd.f32 %v876_v7, %v4961_v43  ;;  %v877_v30 = vrot.slane %v798_v38, 2  ;;  %v869_v27 = vpop.f32.mrf.mxu1  ;;  %v3761_v7 = vpop.eup %3760 }
 0x148   :  { %v879_v21 = vrot.slane %v869_v27, 2  ;;  %v886_v39 = vadd.f32 %v878_v37, %v4975_v35  ;;  %v7078_v27 = vld [vmem:[#allocation36_spill] sm:$0xff]  ;;  %v7081_v37 = vld [vmem:[#allocation39_spill] sm:$0xff] }
 0x149   :  { %v4966_v23 = vadd.f32 %v908_v42, %v907_v32  ;;  %v3677_v6 = vmul.f32 -1.442695, %v884_v31  ;;  %v885_v44 = vadd.f32 %v877_v30, %v4963_v46  ;;  %v7075_v30 = vld [vmem:[#allocation33_spill] sm:$0xff] }
 0x14a   :  { %v887_v22 = vadd.f32 %v879_v21, %v4971_v25  ;;  %v7079_v21 = vld [vmem:[#allocation37_spill] sm:$0xff] }
 0x14b   :  { %3762 = vtanh.f32 %v4966_v23  ;;  %v3678_v26 = vmul.f32 -1.442695, %v885_v44 }
 0x14c   :  { %3764 = vpow2.f32 %v3677_v6  ;;  %v3679_v29 = vmul.f32 -1.442695, %v887_v22  ;;  %v7076_v6 = vld [vmem:[#allocation34_spill] sm:$0xff] }
 0x14d   :  { %3766 = vpow2.f32 %v3678_v26  ;;  %v7077_v26 = vld [vmem:[#allocation35_spill] sm:$0xff]  ;;  %v7080_v22 = vld [vmem:[#allocation38_spill] sm:$0xff] }
 0x14e   :  { %3768 = vpow2.f32 %v3679_v29  ;;  %v7082_v29 = vld [vmem:[#allocation40_spill] sm:$0xff] }
 0x14f   :  { %3770 = vtanh.f32 %v886_v39  ;;  %v7084_v39 = vld [vmem:[#allocation42_spill] sm:$0xff] }
 0x158   :  { %v3763_v33 = vpop.eup %3762 }
 0x159   :  { %v3765_v38 = vpop.eup %3764  ;;  %v911_v44 = vmul.f32 %v3763_v33, %v3761_v7  ;;  %v7083_v7 = vld [vmem:[#allocation41_spill] sm:$0xff]  ;;  %v7085_v33 = vld [vmem:[#allocation43_spill] sm:$0xff] }
 0x15a   :  { %v3767_v32 = vpop.eup %3766  ;;  %v915_v42 = vadd.f32 1.0, %v3765_v38  ;;  %v7086_v38 = vld [vmem:[#allocation44_spill] sm:$0xff] }
 0x15b   :  { %v921_v31 = vadd.f32 1.0, %v3767_v32  ;;  %936 = vst [vmem:[%s6521_s7] sm:$0x3] %v911_v44  ;;  %1015 = vmatmul.mubr.f32.vlgmr.msra.gmra.mxu0 %v911_v44  ;;  %1086 = vmatmul.mubr.f32.vlgmr.msra.gmra.mxu1 %v911_v44  ;;  %v7087_v44 = vld [vmem:[#allocation45_spill] sm:$0xff]  ;;  %v7088_v32 = vld [vmem:[#allocation46_spill] sm:$0xff] }
 0x15c   :  { %3772 = vrcp.f32 %v915_v42  ;;  %1111 = vmatpush1.msra.mxu0 %v7070_v20  ;;  %1182 = vmatpush1.msra.mxu1 %v7071_v24  ;;  %v7089_v42 = vld [vmem:[#allocation47_spill] sm:$0xff]  ;;  %v7091_v20 = vld [vmem:[#allocation49_spill] sm:$0xff]  ;;  %v3769_v24 = vpop.eup %3768 }
 0x15d   :  { %3774 = vrcp.f32 %v921_v31  ;;  %1112 = vmatprep.subr.mxu0 %v7072_v28  ;;  %1183 = vmatprep.subr.mxu1 %v7073_v19  ;;  %v7090_v31 = vld [vmem:[#allocation48_spill] sm:$0xff]  ;;  %v7092_v28 = vld [vmem:[#allocation50_spill] sm:$0xff]  ;;  %v7093_v19 = vld [vmem:[#allocation51_spill] sm:$0xff] }
 0x15e   :  { %1113 = vmatpush1.msra.mxu0 %v7074_v41  ;;  %1184 = vmatpush1.msra.mxu1 %v7075_v30  ;;  %v3771_v41 = vpop.eup %3770  ;;  %v7094_v30 = vld [vmem:[#allocation52_spill] sm:$0xff] }
 0x15f   :  { %1114 = vmatprep.subr.mxu0 %v7076_v6  ;;  %1185 = vmatprep.subr.mxu1 %v7077_v26  ;;  %v7095_v6 = vld [vmem:[#allocation53_spill] sm:$0xff] }
 0x160   :  { %1115 = vmatpush1.msra.mxu0 %v7078_v27  ;;  %1186 = vmatpush1.msra.mxu1 %v7079_v21  ;;  %v7096_v27 = vld [vmem:[#allocation54_spill] sm:$0xff]  ;;  %v7097_v21 = vld [vmem:[#allocation55_spill] sm:$0xff] }
 0x161   :  { %1116 = vmatprep.subr.mxu0 %v7080_v22  ;;  %1187 = vmatprep.subr.mxu1 %v7081_v37  ;;  %v928_v37 = vadd.f32 1.0, %v3769_v24  ;;  %v7106_v24 = vld [vmem:[#allocation64_spill] sm:$0xff] }
 0x162   :  { %1117 = vmatpush1.msra.mxu0 %v7082_v29  ;;  %1188 = vmatpush1.msra.mxu1 %v7083_v7  ;;  %v7098_v29 = vld [vmem:[#allocation56_spill] sm:$0xff]  ;;  %v7099_v7 = vld [vmem:[#allocation57_spill] sm:$0xff] }
 0x163   :  { %1118 = vmatprep.subr.mxu0 %v7084_v39  ;;  %1189 = vmatprep.subr.mxu1 %v7085_v33  ;;  %3776 = vrcp.f32 %v928_v37  ;;  %v7115_v37 = vld [vmem:[#allocation73_spill] sm:$0xff] }
 0x164   :  { %1119 = vmatpush1.msra.mxu0 %v7086_v38  ;;  %1190 = vmatpush1.msra.mxu1 %v7087_v44  ;;  %v7100_v38 = vld [vmem:[#allocation58_spill] sm:$0xff]  ;;  %v7101_v44 = vld [vmem:[#allocation59_spill] sm:$0xff] }
 0x165   :  { %1120 = vmatprep.subr.mxu0 %v7088_v32  ;;  %1191 = vmatprep.subr.mxu1 %v7089_v42  ;;  %v7102_v32 = vld [vmem:[#allocation60_spill] sm:$0xff]  ;;  %v7103_v42 = vld [vmem:[#allocation61_spill] sm:$0xff] }
 0x166   :  { %1121 = vmatpush1.msra.mxu0 %v7090_v31  ;;  %1192 = vmatpush1.msra.mxu1 %v7091_v20  ;;  %v7104_v20 = vld [vmem:[#allocation62_spill] sm:$0xff] }
 0x167   :  { %1122 = vmatprep.subr.mxu0 %v7092_v28  ;;  %1193 = vmatprep.subr.mxu1 %v7093_v19  ;;  %v7105_v28 = vld [vmem:[#allocation63_spill] sm:$0xff]  ;;  %v7107_v19 = vld [vmem:[#allocation65_spill] sm:$0xff] }
 0x168   :  { %1123 = vmatpush1.msra.mxu0 %v7094_v30  ;;  %1194 = vmatpush1.msra.mxu1 %v7095_v6  ;;  %v7109_v30 = vld [vmem:[#allocation67_spill] sm:$0xff]  ;;  %v7110_v6 = vld [vmem:[#allocation68_spill] sm:$0xff] }
 0x169   :  { %v3773_v26 = vpop.eup %3772  ;;  %1124 = vmatprep.subr.mxu0 %v7096_v27  ;;  %1195 = vmatprep.subr.mxu1 %v7097_v21  ;;  %v7112_v27 = vld [vmem:[#allocation70_spill] sm:$0xff]  ;;  %v7113_v21 = vld [vmem:[#allocation71_spill] sm:$0xff] }
 0x16a   :  { %v3775_v22 = vpop.eup %3774  ;;  %1125 = vmatpush1.msra.mxu0 %v7098_v29  ;;  %1196 = vmatpush1.msra.mxu1 %v7099_v7  ;;  %v932_v33 = vmul.f32 %v3773_v26, %v3771_v41  ;;  %v7108_v41 = vld [vmem:[#allocation66_spill] sm:$0xff]  ;;  %v7111_v26 = vld [vmem:[#allocation69_spill] sm:$0xff]  ;;  %v7117_v7 = vld [vmem:[#allocation75_spill] sm:$0xff] }
 0x16b   :  { %v931_v39 = vmul.f32 0.0, %v3775_v22  ;;  %1126 = vmatprep.subr.mxu0 %v7100_v38  ;;  %1197 = vmatprep.subr.mxu1 %v7101_v44  ;;  %v7114_v22 = vld [vmem:[#allocation72_spill] sm:$0xff]  ;;  %v7116_v29 = vld [vmem:[#allocation74_spill] sm:$0xff]  ;;  %v4353_v38 = vmov 1983009808  }
 0x16c   :  { %1127 = vmatpush1.msra.mxu0 %v7102_v32  ;;  %1198 = vmatpush1.msra.mxu1 %v7103_v42  ;;  %v940_v44 = vunpack.c.l.s4 %v4353_v38  ;;  %v7120_v32 = vld [vmem:[#allocation78_spill] sm:$0xff]  ;;  %v5048_v38 = vld [vmem:[#allocation2 + $0x1e8] sm:$0xff] }
 0x16d   :  { %v5015_v31 = vadd.f32 %v932_v33, %v931_v39  ;;  %1128 = vmatprep.subr.mxu0 %v7104_v20  ;;  %1199 = vmatprep.subr.mxu1 %v7105_v28  ;;  %v7118_v39 = vld [vmem:[#allocation76_spill] sm:$0xff]  ;;  %v7119_v33 = vld [vmem:[#allocation77_spill] sm:$0xff]  ;;  %7121 = vst [vmem:[#allocation28_spill] sm:$0xff] %v5048_v38 }
 0x16e   :  { %1129 = vmatpush1.msra.mxu0 %v7106_v24  ;;  %1200 = vmatpush1.msra.mxu1 %v7107_v19  ;;  %v941_v42 = vunpack.c.0.s8 %v940_v44 }
 0x16f   :  { %3778 = vtanh.f32 %v5015_v31  ;;  %1130 = vmatprep.subr.mxu0 %v7108_v41  ;;  %1201 = vmatprep.subr.mxu1 %v7109_v30 }
 0x170   :  { %1131 = vmatpush1.msra.mxu0 %v7110_v6  ;;  %1202 = vmatpush1.msra.mxu1 %v7111_v26  ;;  %v3777_v20 = vpop.eup %3776  ;;  %v5055_v44 = vsub.s32 %v941_v42, %v4918_v34  ;;  %v5067_v34 = vld [vmem:[#allocation2 + $0x1d8] sm:$0xff]  ;;  %v5085_v42 = vld [vmem:[#allocation2 + $0x1a0] sm:$0xff] }
 0x171   :  { %1132 = vmatprep.subr.mxu0 %v7112_v27  ;;  %1203 = vmatprep.subr.mxu1 %v7113_v21  ;;  %7126 = vst [vmem:[#allocation33_spill] sm:$0xff] %v5085_v42 }
 0x172   :  { %1133 = vmatpush1.msra.mxu0 %v7114_v22  ;;  %1204 = vmatpush1.msra.mxu1 %v7115_v37  ;;  %7123 = vst [vmem:[#allocation30_spill] sm:$0xff] %v5055_v44 }
 0x173   :  { %1134 = vmatprep.subr.mxu0 %v7116_v29  ;;  %1205 = vmatprep.subr.mxu1 %v7117_v7 }
 0x174   :  { %1135 = vmatpush1.msra.mxu0 %v7118_v39  ;;  %1206 = vmatpush1.msra.mxu1 %v7119_v33 }
 0x175   :  { %1136 = vmatprep.subr.mxu0 %v4806_v13  ;;  %1207 = vmatprep.subr.mxu1 %v7120_v32 }
 0x176   :  { %1137 = vmatpush1.msra.mxu0 %v4812_v8  ;;  %1208 = vmatpush1.msra.mxu1 %v4814_v10 }
 0x177   :  { %1138 = vmatprep.subr.mxu0 %v4818_v12  ;;  %1209 = vmatprep.subr.mxu1 %v4820_v15  ;;  %v5061_v15 = vld [vmem:[#allocation2 + $0x1f0] sm:$0xff] }
 0x178   :  { %1139 = vmatpush1.msra.mxu0 %v4824_v16  ;;  %1210 = vmatpush1.msra.mxu1 %v4826_v18  ;;  %v5051_v18 = vld [vmem:[#allocation2 + $0x1f8] sm:$0xff] }
 0x179   :  { %1140 = vmatprep.subr.mxu0 %v4830_v0  ;;  %1211 = vmatprep.subr.mxu1 %v4832_v17  ;;  %7122 = vst [vmem:[#allocation29_spill] sm:$0xff] %v5051_v18 }
 0x17a   :  { %1141 = vmatpush1.msra.mxu0 %v4836_v11  ;;  %1174 = vmatprep.mubr.f32.mxu0 %v6985_v14 }
 0x17b   :  { %1212 = vmatpush1.msra.mxu1 %v4840_v9  ;;  %1245 = vmatprep.mubr.f32.mxu1 %v6985_v14  ;;  %v5058_v9 = vld [vmem:[#allocation2 + $0x1e0] sm:$0xff] }
 0x17c   :  { %v3779_v28 = vpop.eup %3778  ;;  %1348 = vmatprep.subr.mxu0 %v5048_v38  ;;  %1419 = vmatprep.subr.mxu1 %v5051_v18  ;;  %v5064_v18 = vld [vmem:[#allocation2 + $0x1c8] sm:$0xff] }
 0x17d   :  { %v935_v11 = vmul.f32 %v3779_v28, %v3777_v20  ;;  %v5088_v20 = vld [vmem:[#allocation2 + $0x1b0] sm:$0xff]  ;;  %v5091_v28 = vld [vmem:[#allocation2 + $0x188] sm:$0xff] }
 0x17e   :  { %7127 = vst [vmem:[#allocation34_spill] sm:$0xff] %v5088_v20  ;;  %7128 = vst [vmem:[#allocation35_spill] sm:$0xff] %v5091_v28 }
 0x17f   :  { %v938_v17 = vcombine.high %v935_v11, %v935_v11  ;;  %v1108_v0 = vrot.slane %v935_v11, 6  ;;  %v5070_v11 = vld [vmem:[#allocation2 + $0x1c0] sm:$0xff] }
 0x181   :  { %v945_v16 = vrot.slane %v938_v17, %v5055_v44  ;;  %1175 = vmatmul.mubr.f32.vlgmr.msra.gmra.mxu0 %v1108_v0  ;;  %1246 = vmatmul.mubr.f32.vlgmr.msra.gmra.mxu1 %v1108_v0  ;;  %v5073_v0 = vld [vmem:[#allocation2 + $0x1d0] sm:$0xff]  ;;  %v5082_v17 = vld [vmem:[#allocation2 + $0x1b8] sm:$0xff] }
 0x182   :  { %1349 = vmatpush1.msra.mxu0 %v5058_v9  ;;  %1420 = vmatpush1.msra.mxu1 %v5061_v15  ;;  %7125 = vst [vmem:[#allocation32_spill] sm:$0xff] %v5082_v17 }
 0x183   :  { %v946_v38 = vcombine.high %v945_v16, %v945_v16  ;;  %1350 = vmatprep.subr.mxu0 %v5064_v18  ;;  %1421 = vmatprep.subr.mxu1 %v5067_v34  ;;  %v5079_v16 = vld [vmem:[#allocation2 + $0x1a8] sm:$0xff] }
 0x184   :  { %1351 = vmatpush1.msra.mxu0 %v5070_v11  ;;  %1422 = vmatpush1.msra.mxu1 %v5073_v0  ;;  %7124 = vst [vmem:[#allocation31_spill] sm:$0xff] %v5079_v16 }
 0x185   :  { %3680 = vst [vmem:[%s6521_s7 + $0x1e] sm:$0x3] %v946_v38  ;;  %1352 = vmatprep.subr.mxu0 %v5079_v16  ;;  %1423 = vmatprep.subr.mxu1 %v5082_v17  ;;  %v5094_v38 = vld [vmem:[#allocation2 + $0x198] sm:$0xff]  ;;  %v5097_v16 = vld [vmem:[#allocation2 + $0x180] sm:$0xff]  ;;  %v5100_v17 = vld [vmem:[#allocation2 + $0x190] sm:$0xff] }
 0x186   :  { %1353 = vmatpush1.msra.mxu0 %v5085_v42  ;;  %1424 = vmatpush1.msra.mxu1 %v5088_v20  ;;  %7129 = vst [vmem:[#allocation36_spill] sm:$0xff] %v5094_v38  ;;  %7130 = vst [vmem:[#allocation37_spill] sm:$0xff] %v5097_v16  ;;  %v5103_v42 = vld [vmem:[#allocation2 + $0x168] sm:$0xff]  ;;  %v5106_v20 = vld [vmem:[#allocation2 + $0x178] sm:$0xff] }
 0x187   :  { %1354 = vmatprep.subr.mxu0 %v5091_v28  ;;  %1425 = vmatprep.subr.mxu1 %v5094_v38  ;;  %7131 = vst [vmem:[#allocation38_spill] sm:$0xff] %v5100_v17  ;;  %7132 = vst [vmem:[#allocation39_spill] sm:$0xff] %v5103_v42  ;;  %v5109_v28 = vld [vmem:[#allocation2 + $0x160] sm:$0xff]  ;;  %v5112_v38 = vld [vmem:[#allocation2 + $0x170] sm:$0xff] }
 0x188   :  { %1355 = vmatpush1.msra.mxu0 %v5097_v16  ;;  %1426 = vmatpush1.msra.mxu1 %v5100_v17  ;;  %7133 = vst [vmem:[#allocation40_spill] sm:$0xff] %v5106_v20  ;;  %7134 = vst [vmem:[#allocation41_spill] sm:$0xff] %v5109_v28  ;;  %v5115_v16 = vld [vmem:[#allocation2 + $0x148] sm:$0xff]  ;;  %v5118_v17 = vld [vmem:[#allocation2 + $0x158] sm:$0xff] }
 0x189   :  { %1356 = vmatprep.subr.mxu0 %v5103_v42  ;;  %1427 = vmatprep.subr.mxu1 %v5106_v20  ;;  %7135 = vst [vmem:[#allocation42_spill] sm:$0xff] %v5112_v38  ;;  %7136 = vst [vmem:[#allocation43_spill] sm:$0xff] %v5115_v16  ;;  %v5121_v42 = vld [vmem:[#allocation2 + $0x140] sm:$0xff]  ;;  %v5124_v20 = vld [vmem:[#allocation2 + $0x150] sm:$0xff] }
 0x18a   :  { %1357 = vmatpush1.msra.mxu0 %v5109_v28  ;;  %1428 = vmatpush1.msra.mxu1 %v5112_v38  ;;  %7137 = vst [vmem:[#allocation44_spill] sm:$0xff] %v5118_v17  ;;  %7138 = vst [vmem:[#allocation45_spill] sm:$0xff] %v5121_v42  ;;  %v5127_v28 = vld [vmem:[#allocation2 + $0x128] sm:$0xff]  ;;  %v5130_v38 = vld [vmem:[#allocation2 + $0x138] sm:$0xff] }
 0x18b   :  { %1358 = vmatprep.subr.mxu0 %v5115_v16  ;;  %1429 = vmatprep.subr.mxu1 %v5118_v17  ;;  %7139 = vst [vmem:[#allocation46_spill] sm:$0xff] %v5124_v20  ;;  %7140 = vst [vmem:[#allocation47_spill] sm:$0xff] %v5127_v28  ;;  %v5133_v16 = vld [vmem:[#allocation2 + $0x120] sm:$0xff]  ;;  %v5136_v17 = vld [vmem:[#allocation2 + $0x130] sm:$0xff] }
 0x18c   :  { %1359 = vmatpush1.msra.mxu0 %v5121_v42  ;;  %1430 = vmatpush1.msra.mxu1 %v5124_v20  ;;  %7141 = vst [vmem:[#allocation48_spill] sm:$0xff] %v5130_v38  ;;  %7142 = vst [vmem:[#allocation49_spill] sm:$0xff] %v5133_v16 }
 0x18d   :  { %1360 = vmatprep.subr.mxu0 %v5127_v28  ;;  %1431 = vmatprep.subr.mxu1 %v5130_v38  ;;  %7143 = vst [vmem:[#allocation50_spill] sm:$0xff] %v5136_v17 }
 0x18e   :  { %1361 = vmatpush1.msra.mxu0 %v5133_v16  ;;  %1432 = vmatpush1.msra.mxu1 %v5136_v17 }
 0x18f   :  { %1362 = vmatprep.subr.mxu0 %v4532_v47  ;;  %1433 = vmatprep.subr.mxu1 %v4534_v48  ;;  %v7144_v47 = vld [vmem:[#allocation12_spill] sm:$0xff]  ;;  %v7145_v48 = vld [vmem:[#allocation13_spill] sm:$0xff] }
 0x190   :  { %1363 = vmatpush1.msra.mxu0 %v4538_v49  ;;  %1434 = vmatpush1.msra.mxu1 %v4540_v50  ;;  %v7146_v49 = vld [vmem:[#allocation14_spill] sm:$0xff]  ;;  %v7147_v50 = vld [vmem:[#allocation15_spill] sm:$0xff] }
 0x191   :  { %1364 = vmatprep.subr.mxu0 %v4544_v51  ;;  %1435 = vmatprep.subr.mxu1 %v4546_v52  ;;  %v7148_v51 = vld [vmem:[#allocation16_spill] sm:$0xff]  ;;  %v7149_v52 = vld [vmem:[#allocation17_spill] sm:$0xff] }
 0x192   :  { %1365 = vmatpush1.msra.mxu0 %v4550_v53  ;;  %1436 = vmatpush1.msra.mxu1 %v4552_v54  ;;  %v7150_v53 = vld [vmem:[#allocation18_spill] sm:$0xff]  ;;  %v7151_v54 = vld [vmem:[#allocation19_spill] sm:$0xff] }
 0x193   :  { %1366 = vmatprep.subr.mxu0 %v4556_v55  ;;  %1437 = vmatprep.subr.mxu1 %v4558_v56  ;;  %v7152_v55 = vld [vmem:[#allocation20_spill] sm:$0xff]  ;;  %v7153_v56 = vld [vmem:[#allocation21_spill] sm:$0xff] }
 0x194   :  { %1367 = vmatpush1.msra.mxu0 %v4562_v57  ;;  %1438 = vmatpush1.msra.mxu1 %v4564_v58  ;;  %v7154_v57 = vld [vmem:[#allocation22_spill] sm:$0xff]  ;;  %v7155_v58 = vld [vmem:[#allocation23_spill] sm:$0xff] }
 0x195   :  { %1368 = vmatprep.subr.mxu0 %v4568_v59  ;;  %1439 = vmatprep.subr.mxu1 %v4570_v60  ;;  %v7156_v59 = vld [vmem:[#allocation24_spill] sm:$0xff]  ;;  %v7157_v60 = vld [vmem:[#allocation25_spill] sm:$0xff] }
 0x196   :  { %1369 = vmatpush1.msra.mxu0 %v4574_v61  ;;  %1440 = vmatpush1.msra.mxu1 %v4576_v62  ;;  %v7158_v61 = vld [vmem:[#allocation26_spill] sm:$0xff]  ;;  %v7159_v62 = vld [vmem:[#allocation27_spill] sm:$0xff] }
 0x197   :  { %1370 = vmatprep.subr.mxu0 %v4580_v63  ;;  %1441 = vmatprep.subr.mxu1 %v4582_v1 }
 0x198   :  { %1371 = vmatpush1.msra.mxu0 %v4586_v2  ;;  %1442 = vmatpush1.msra.mxu1 %v4588_v3 }
 0x199   :  { %1372 = vmatprep.subr.mxu0 %v4592_v4  ;;  %1443 = vmatprep.subr.mxu1 %v4594_v5 }
 0x19a   :  { %1373 = vmatpush1.msra.mxu0 %v7144_v47  ;;  %1444 = vmatpush1.msra.mxu1 %v7145_v48 }
 0x19b   :  { %1374 = vmatprep.subr.mxu0 %v7146_v49  ;;  %1445 = vmatprep.subr.mxu1 %v7147_v50 }
 0x19c   :  { %1375 = vmatpush1.msra.mxu0 %v7148_v51  ;;  %1446 = vmatpush1.msra.mxu1 %v7149_v52 }
 0x19d   :  { %1376 = vmatprep.subr.mxu0 %v7150_v53  ;;  %1447 = vmatprep.subr.mxu1 %v7151_v54 }
 0x19e   :  { %1377 = vmatpush1.msra.mxu0 %v7152_v55  ;;  %1448 = vmatpush1.msra.mxu1 %v7153_v56  ;;  %v7160_v56 = vld [vmem:[#allocation95_spill] sm:$0xff] }
 0x19f   :  { %1378 = vmatprep.subr.mxu0 %v7154_v57  ;;  %1449 = vmatprep.subr.mxu1 %v7155_v58 }
 0x1a0   :  { %1379 = vmatpush1.msra.mxu0 %v7156_v59  ;;  %1412 = vmatprep.mubr.f32.mxu0 %v6985_v14 }
 0x1a1   :  { %1450 = vmatpush1.msra.mxu1 %v7157_v60  ;;  %1483 = vmatprep.mubr.f32.mxu1 %v6985_v14 }
 0x1a2   :  { %1508 = vmatprep.subr.mxu0 %v7158_v61  ;;  %1579 = vmatprep.subr.mxu1 %v7159_v62 }
 0x21b   :  { %v1016_v63 = vpop.f32.mrf.mxu0  ;;  %v1087_v4 = vpop.f32.mrf.mxu1 }
 0x21c   :  { %v1096_v1 = vrot.slane %v1016_v63, 6  ;;  %v1098_v53 = vrot.slane %v1087_v4, 6 }
 0x21d   :  { %v1018_v2 = vpop.f32.mrf.mxu0  ;;  %v1089_v50 = vpop.f32.mrf.mxu1 }
 0x21e   :  { %v1104_v3 = vadd.f32 %v1096_v1, %v4949_v40  ;;  %v1097_v5 = vrot.slane %v1018_v2, 6  ;;  %v1099_v51 = vrot.slane %v1089_v50, 6  ;;  %v1106_v57 = vadd.f32 %v1098_v53, %v7160_v56 }
 0x21f   :  { %v1288_v1 = vrot.slane %v4966_v23, 6 }
 0x220   :  { %v3681_v47 = vmul.f32 -1.442695, %v1104_v3  ;;  %v1105_v48 = vadd.f32 %v1097_v5, %v4951_v45  ;;  %v1107_v52 = vadd.f32 %v1099_v51, %v4955_v36 }
 0x222   :  { %3780 = vpow2.f32 %v3681_v47  ;;  %v3682_v49 = vmul.f32 -1.442695, %v1105_v48  ;;  %v3683_v54 = vmul.f32 -1.442695, %v1107_v52 }
 0x224   :  { %3782 = vpow2.f32 %v3682_v49 }
 0x225   :  { %3784 = vpow2.f32 %v3683_v54 }
 0x22f   :  { %v3781_v55 = vpop.eup %3780 }
 0x230   :  { %v1271_v58 = vadd.f32 1.0, %v3781_v55 }
 0x231   :  { %v3783_v59 = vpop.eup %3782 }
 0x232   :  { %3786 = vrcp.f32 %v1271_v58  ;;  %v1277_v60 = vadd.f32 1.0, %v3783_v59  ;;  %v3785_v61 = vpop.eup %3784 }
 0x233   :  { %3788 = vtanh.f32 %v1106_v57  ;;  %v1284_v47 = vadd.f32 1.0, %v3785_v61 }
 0x234   :  { %3790 = vrcp.f32 %v1277_v60 }
 0x235   :  { %3792 = vrcp.f32 %v1284_v47 }
 0x23f   :  { %v3787_v62 = vpop.eup %3786 }
 0x240   :  { %v3789_v63 = vpop.eup %3788 }
 0x241   :  { %v3791_v2 = vpop.eup %3790  ;;  %v1176_v3 = vpop.f32.mrf.mxu0  ;;  %v1291_v5 = vmul.f32 %v3789_v63, %v3787_v62 }
 0x242   :  { %v1290_v4 = vmul.f32 %v3791_v2, %v1288_v1  ;;  %v1256_v48 = vrot.slane %v1176_v3, 4  ;;  %v1247_v52 = vpop.f32.mrf.mxu1  ;;  %v3793_v61 = vpop.eup %3792 }
 0x243   :  { %v1178_v49 = vpop.f32.mrf.mxu0  ;;  %v1258_v60 = vrot.slane %v1247_v52, 4  ;;  %v5192_v52 = vld [vmem:[#allocation6 + $0x1e0] sm:$0xff] }
 0x244   :  { %v5184_v50 = vadd.f32 %v1291_v5, %v1290_v4  ;;  %v1264_v51 = vadd.f32 %v1256_v48, %v4961_v43  ;;  %v1257_v53 = vrot.slane %v1178_v49, 4  ;;  %v1249_v57 = vpop.f32.mrf.mxu1 }
 0x245   :  { %v1259_v58 = vrot.slane %v1249_v57, 4  ;;  %v1266_v2 = vadd.f32 %v1258_v60, %v4975_v35  ;;  %v5210_v57 = vld [vmem:[#allocation6 + $0x1d0] sm:$0xff]  ;;  %v5219_v60 = vld [vmem:[#allocation6 + $0x1a0] sm:$0xff] }
 0x246   :  { %v3684_v54 = vmul.f32 -1.442695, %v1264_v51  ;;  %v1265_v55 = vadd.f32 %v1257_v53, %v4963_v46  ;;  %3794 = vtanh.f32 %v5184_v50  ;;  %v5195_v53 = vld [vmem:[#allocation6 + $0x1f0] sm:$0xff] }
 0x247   :  { %v1267_v59 = vadd.f32 %v1259_v58, %v4971_v25  ;;  %v5213_v58 = vld [vmem:[#allocation6 + $0x1a8] sm:$0xff] }
 0x248   :  { %3796 = vpow2.f32 %v3684_v54  ;;  %v3685_v23 = vmul.f32 -1.442695, %v1265_v55  ;;  %v5201_v54 = vld [vmem:[#allocation6 + $0x1c8] sm:$0xff]  ;;  %v5204_v55 = vld [vmem:[#allocation6 + $0x1d8] sm:$0xff] }
 0x249   :  { %v3686_v62 = vmul.f32 -1.442695, %v1267_v59  ;;  %v5216_v59 = vld [vmem:[#allocation6 + $0x1b8] sm:$0xff] }
 0x24a   :  { %3798 = vpow2.f32 %v3685_v23  ;;  %v5207_v23 = vld [vmem:[#allocation6 + $0x1c0] sm:$0xff] }
 0x24b   :  { %3800 = vpow2.f32 %v3686_v62  ;;  %v5225_v62 = vld [vmem:[#allocation6 + $0x188] sm:$0xff] }
 0x24c   :  { %7161 = vst [vmem:[#allocation51_spill] sm:$0xff] %v5225_v62 }
 0x253   :  { %v3795_v63 = vpop.eup %3794 }
 0x254   :  { %v1294_v3 = vmul.f32 %v3795_v63, %v3793_v61  ;;  %v5222_v61 = vld [vmem:[#allocation6 + $0x1b0] sm:$0xff]  ;;  %v5228_v63 = vld [vmem:[#allocation6 + $0x198] sm:$0xff] }
 0x255   :  { %v3797_v1 = vpop.eup %3796  ;;  %7162 = vst [vmem:[#allocation52_spill] sm:$0xff] %v5228_v63 }
 0x256   :  { %v1298_v5 = vadd.f32 1.0, %v3797_v1  ;;  %v1329_v47 = vrot.slane %v1294_v3, %v5055_v44  ;;  %v1346_v48 = vrot.slane %v1294_v3, 2  ;;  %v5231_v1 = vld [vmem:[#allocation6 + $0x180] sm:$0xff]  ;;  %v5237_v3 = vld [vmem:[#allocation6 + $0x168] sm:$0xff] }
 0x257   :  { %v3799_v4 = vpop.eup %3798  ;;  %7163 = vst [vmem:[#allocation53_spill] sm:$0xff] %v5231_v1  ;;  %7165 = vst [vmem:[#allocation55_spill] sm:$0xff] %v5237_v3  ;;  %v5255_v44 = vld [vmem:[#allocation6 + $0x140] sm:$0xff] }
 0x258   :  { %3802 = vrcp.f32 %v1298_v5  ;;  %v1304_v49 = vadd.f32 1.0, %v3799_v4  ;;  %v1330_v51 = vcombine.high %v1329_v47, %v1329_v47  ;;  %1413 = vmatmul.mubr.f32.vlgmr.msra.gmra.mxu0 %v1346_v48  ;;  %1484 = vmatmul.mubr.f32.vlgmr.msra.gmra.mxu1 %v1346_v48  ;;  %v5240_v5 = vld [vmem:[#allocation6 + $0x178] sm:$0xff]  ;;  %v5243_v4 = vld [vmem:[#allocation6 + $0x160] sm:$0xff]  ;;  %v5246_v47 = vld [vmem:[#allocation6 + $0x170] sm:$0xff]  ;;  %7171 = vst [vmem:[#allocation61_spill] sm:$0xff] %v5255_v44 }
 0x259   :  { %3804 = vtanh.f32 %v1266_v2  ;;  %1509 = vmatpush1.msra.mxu0 %v5192_v52  ;;  %1580 = vmatpush1.msra.mxu1 %v5195_v53  ;;  %v5234_v2 = vld [vmem:[#allocation6 + $0x190] sm:$0xff]  ;;  %7166 = vst [vmem:[#allocation56_spill] sm:$0xff] %v5240_v5  ;;  %7167 = vst [vmem:[#allocation57_spill] sm:$0xff] %v5243_v4  ;;  %v5249_v48 = vld [vmem:[#allocation6 + $0x148] sm:$0xff] }
 0x25a   :  { %3806 = vrcp.f32 %v1304_v49  ;;  %3687 = vst [vmem:[%s6521_s7 + $0x4] sm:$0x3] %v1330_v51  ;;  %1510 = vmatprep.subr.mxu0 %v5201_v54  ;;  %1581 = vmatprep.subr.mxu1 %v5204_v55  ;;  %7164 = vst [vmem:[#allocation54_spill] sm:$0xff] %v5234_v2  ;;  %v5252_v49 = vld [vmem:[#allocation6 + $0x158] sm:$0xff]  ;;  %v3801_v51 = vpop.eup %3800 }
 0x25b   :  { %1511 = vmatpush1.msra.mxu0 %v5207_v23  ;;  %1582 = vmatpush1.msra.mxu1 %v5210_v57  ;;  %7168 = vst [vmem:[#allocation58_spill] sm:$0xff] %v5246_v47  ;;  %7169 = vst [vmem:[#allocation59_spill] sm:$0xff] %v5249_v48 }
 0x25c   :  { %1512 = vmatprep.subr.mxu0 %v5213_v58  ;;  %1583 = vmatprep.subr.mxu1 %v5216_v59  ;;  %7170 = vst [vmem:[#allocation60_spill] sm:$0xff] %v5252_v49 }
 0x25d   :  { %1513 = vmatpush1.msra.mxu0 %v5219_v60  ;;  %1584 = vmatpush1.msra.mxu1 %v5222_v61 }
 0x25e   :  { %1514 = vmatprep.subr.mxu0 %v5225_v62  ;;  %1585 = vmatprep.subr.mxu1 %v5228_v63  ;;  %v5274_v63 = vld [vmem:[#allocation6 + $0x108] sm:$0xff]  ;;  %v5280_v62 = vld [vmem:[#allocation6 + $0x100] sm:$0xff] }
 0x25f   :  { %1515 = vmatpush1.msra.mxu0 %v5231_v1  ;;  %1586 = vmatpush1.msra.mxu1 %v5234_v2  ;;  %v5268_v2 = vld [vmem:[#allocation6 + $0x120] sm:$0xff]  ;;  %v1311_v1 = vadd.f32 1.0, %v3801_v51  ;;  %7177 = vst [vmem:[#allocation67_spill] sm:$0xff] %v5274_v63  ;;  %v5289_v51 = vld [vmem:[#allocation6 + $0xf8] sm:$0xff] }
 0x260   :  { %1516 = vmatprep.subr.mxu0 %v5237_v3  ;;  %1587 = vmatprep.subr.mxu1 %v5240_v5  ;;  %v5258_v5 = vld [vmem:[#allocation6 + $0x150] sm:$0xff]  ;;  %v5261_v3 = vld [vmem:[#allocation6 + $0x128] sm:$0xff]  ;;  %7175 = vst [vmem:[#allocation65_spill] sm:$0xff] %v5268_v2 }
 0x261   :  { %1517 = vmatpush1.msra.mxu0 %v5243_v4  ;;  %1588 = vmatpush1.msra.mxu1 %v5246_v47  ;;  %7172 = vst [vmem:[#allocation62_spill] sm:$0xff] %v5258_v5  ;;  %7173 = vst [vmem:[#allocation63_spill] sm:$0xff] %v5261_v3  ;;  %v5264_v47 = vld [vmem:[#allocation6 + $0x138] sm:$0xff]  ;;  %3808 = vrcp.f32 %v1311_v1  ;;  %v7193_v1 = vld [vmem:[#allocation36_spill] sm:$0xff] }
 0x262   :  { %1518 = vmatprep.subr.mxu0 %v5249_v48  ;;  %1589 = vmatprep.subr.mxu1 %v5252_v49  ;;  %7174 = vst [vmem:[#allocation64_spill] sm:$0xff] %v5264_v47  ;;  %v1315_v49 = vrot.slane %v5015_v31, 2 }
 0x263   :  { %1519 = vmatpush1.msra.mxu0 %v5255_v44  ;;  %1590 = vmatpush1.msra.mxu1 %v5258_v5  ;;  %v5271_v44 = vld [vmem:[#allocation6 + $0x130] sm:$0xff] }
 0x264   :  { %1520 = vmatprep.subr.mxu0 %v5261_v3  ;;  %1591 = vmatprep.subr.mxu1 %v5264_v47  ;;  %7176 = vst [vmem:[#allocation66_spill] sm:$0xff] %v5271_v44  ;;  %v5277_v3 = vld [vmem:[#allocation6 + $0x118] sm:$0xff] }
 0x265   :  { %v3803_v4 = vpop.eup %3802  ;;  %1521 = vmatpush1.msra.mxu0 %v5268_v2  ;;  %1592 = vmatpush1.msra.mxu1 %v5271_v44  ;;  %v5283_v2 = vld [vmem:[#allocation6 + $0x110] sm:$0xff]  ;;  %v5286_v44 = vld [vmem:[#allocation6 + $0xe8] sm:$0xff] }
 0x266   :  { %v3805_v48 = vpop.eup %3804  ;;  %1522 = vmatprep.subr.mxu0 %v5274_v63  ;;  %1593 = vmatprep.subr.mxu1 %v5277_v3 }
 0x267   :  { %v3807_v5 = vpop.eup %3806  ;;  %v1318_v47 = vmul.f32 %v3805_v48, %v3803_v4  ;;  %1523 = vmatpush1.msra.mxu0 %v5280_v62  ;;  %1594 = vmatpush1.msra.mxu1 %v5283_v2  ;;  %v5294_v4 = vld [vmem:[#allocation6 + $0xe0] sm:$0xff]  ;;  %v5300_v48 = vld [vmem:[#allocation6 + $0xc8] sm:$0xff] }
 0x268   :  { %v1317_v31 = vmul.f32 %v3807_v5, %v1315_v49  ;;  %1524 = vmatprep.subr.mxu0 %v5286_v44  ;;  %1595 = vmatprep.subr.mxu1 %v5289_v51  ;;  %v5297_v5 = vld [vmem:[#allocation6 + $0xf0] sm:$0xff]  ;;  %v5303_v49 = vld [vmem:[#allocation6 + $0xd8] sm:$0xff] }
 0x269   :  { %1525 = vmatpush1.msra.mxu0 %v5294_v4  ;;  %1596 = vmatpush1.msra.mxu1 %v5297_v5  ;;  %7178 = vst [vmem:[#allocation68_spill] sm:$0xff] %v5303_v49 }
 0x26a   :  { %v5292_v63 = vadd.f32 %v1318_v47, %v1317_v31  ;;  %1526 = vmatprep.subr.mxu0 %v5300_v48  ;;  %1597 = vmatprep.subr.mxu1 %v5303_v49  ;;  %v7194_v47 = vld [vmem:[#allocation37_spill] sm:$0xff]  ;;  %v7195_v31 = vld [vmem:[#allocation38_spill] sm:$0xff] }
 0x26b   :  { %1527 = vmatpush1.msra.mxu0 %v7106_v24  ;;  %1598 = vmatpush1.msra.mxu1 %v7107_v19  ;;  %v7179_v24 = vld [vmem:[#allocation79_spill] sm:$0xff]  ;;  %v7180_v19 = vld [vmem:[#allocation80_spill] sm:$0xff] }
 0x26c   :  { %3810 = vtanh.f32 %v5292_v63  ;;  %1528 = vmatprep.subr.mxu0 %v7108_v41  ;;  %1599 = vmatprep.subr.mxu1 %v7109_v30  ;;  %v7181_v41 = vld [vmem:[#allocation81_spill] sm:$0xff]  ;;  %v7182_v30 = vld [vmem:[#allocation82_spill] sm:$0xff] }
 0x26d   :  { %1529 = vmatpush1.msra.mxu0 %v7110_v6  ;;  %1600 = vmatpush1.msra.mxu1 %v7111_v26  ;;  %v7183_v6 = vld [vmem:[#allocation83_spill] sm:$0xff] }
 0x26e   :  { %1530 = vmatprep.subr.mxu0 %v7112_v27  ;;  %1601 = vmatprep.subr.mxu1 %v7113_v21  ;;  %v3809_v26 = vpop.eup %3808  ;;  %v7185_v27 = vld [vmem:[#allocation85_spill] sm:$0xff] }
 0x26f   :  { %1531 = vmatpush1.msra.mxu0 %v7114_v22  ;;  %1602 = vmatpush1.msra.mxu1 %v7115_v37  ;;  %v7187_v21 = vld [vmem:[#allocation29_spill] sm:$0xff] }
 0x270   :  { %1532 = vmatprep.subr.mxu0 %v7116_v29  ;;  %1603 = vmatprep.subr.mxu1 %v7117_v7  ;;  %v7188_v29 = vld [vmem:[#allocation31_spill] sm:$0xff]  ;;  %v7189_v7 = vld [vmem:[#allocation32_spill] sm:$0xff] }
 0x271   :  { %1533 = vmatpush1.msra.mxu0 %v7118_v39  ;;  %1604 = vmatpush1.msra.mxu1 %v7119_v33  ;;  %v7190_v39 = vld [vmem:[#allocation33_spill] sm:$0xff]  ;;  %v7191_v33 = vld [vmem:[#allocation34_spill] sm:$0xff] }
 0x272   :  { %1534 = vmatprep.subr.mxu0 %v4806_v13  ;;  %1605 = vmatprep.subr.mxu1 %v7120_v32  ;;  %v7184_v13 = vld [vmem:[#allocation84_spill] sm:$0xff]  ;;  %v7192_v32 = vld [vmem:[#allocation35_spill] sm:$0xff] }
 0x273   :  { %1535 = vmatpush1.msra.mxu0 %v4812_v8  ;;  %1606 = vmatpush1.msra.mxu1 %v4814_v10 }
 0x274   :  { %1536 = vmatprep.subr.mxu0 %v4818_v12  ;;  %1607 = vmatprep.subr.mxu1 %v7179_v24  ;;  %v7186_v12 = vld [vmem:[#allocation28_spill] sm:$0xff]  ;;  %v7196_v24 = vld [vmem:[#allocation39_spill] sm:$0xff] }
 0x275   :  { %1537 = vmatpush1.msra.mxu0 %v7180_v19  ;;  %1608 = vmatpush1.msra.mxu1 %v7181_v41  ;;  %v7197_v19 = vld [vmem:[#allocation40_spill] sm:$0xff]  ;;  %v7198_v41 = vld [vmem:[#allocation41_spill] sm:$0xff] }
 0x276   :  { %1538 = vmatprep.subr.mxu0 %v7182_v30  ;;  %1609 = vmatprep.subr.mxu1 %v7183_v6  ;;  %v7199_v30 = vld [vmem:[#allocation42_spill] sm:$0xff]  ;;  %v7200_v6 = vld [vmem:[#allocation43_spill] sm:$0xff] }
 0x277   :  { %1539 = vmatpush1.msra.mxu0 %v7184_v13  ;;  %1572 = vmatprep.mubr.f32.mxu0 %v6985_v14  ;;  %v5366_v13 = vld [vmem:[#allocation2 + $0x108] sm:$0xff] }
 0x278   :  { %1610 = vmatpush1.msra.mxu1 %v7185_v27  ;;  %1643 = vmatprep.mubr.f32.mxu1 %v6985_v14  ;;  %7202 = vst [vmem:[#allocation69_spill] sm:$0xff] %v5366_v13  ;;  %v5372_v27 = vld [vmem:[#allocation2 + $0x100] sm:$0xff] }
 0x279   :  { %v3811_v8 = vpop.eup %3810  ;;  %1746 = vmatprep.subr.mxu0 %v7186_v12  ;;  %1817 = vmatprep.subr.mxu1 %v7187_v21  ;;  %7204 = vst [vmem:[#allocation71_spill] sm:$0xff] %v5372_v27 }
 0x27a   :  { %v1321_v10 = vmul.f32 %v3811_v8, %v3809_v26  ;;  %v7201_v26 = vld [vmem:[#allocation44_spill] sm:$0xff]  ;;  %v5369_v8 = vld [vmem:[#allocation2 + $0x118] sm:$0xff] }
 0x27b   :  { %7203 = vst [vmem:[#allocation70_spill] sm:$0xff] %v5369_v8 }
 0x27c   :  { %v1335_v22 = vcombine.high %v1321_v10, %v1321_v10  ;;  %v1506_v37 = vrot.slane %v1321_v10, 4  ;;  %v5375_v10 = vld [vmem:[#allocation2 + $0x110] sm:$0xff] }
 0x27d   :  { %7205 = vst [vmem:[#allocation72_spill] sm:$0xff] %v5375_v10 }
 0x27e   :  { %3736 = vst.sshfl [vmem:[%s6521_s7 + $0x1a] sm:$0x3 pattern:$0x76325410] %v1335_v22  ;;  %1573 = vmatmul.mubr.f32.vlgmr.msra.gmra.mxu0 %v1506_v37  ;;  %1644 = vmatmul.mubr.f32.vlgmr.msra.gmra.mxu1 %v1506_v37  ;;  %v5378_v22 = vld [vmem:[#allocation2 + $0xe8] sm:$0xff]  ;;  %v5381_v37 = vld [vmem:[#allocation2 + $0xf8] sm:$0xff] }
 0x27f   :  { %1747 = vmatpush1.msra.mxu0 %v5058_v9  ;;  %1818 = vmatpush1.msra.mxu1 %v5061_v15  ;;  %7206 = vst [vmem:[#allocation73_spill] sm:$0xff] %v5378_v22  ;;  %7207 = vst [vmem:[#allocation74_spill] sm:$0xff] %v5381_v37 }
 0x280   :  { %1748 = vmatprep.subr.mxu0 %v5064_v18  ;;  %1819 = vmatprep.subr.mxu1 %v5067_v34 }
 0x281   :  { %1749 = vmatpush1.msra.mxu0 %v5070_v11  ;;  %1820 = vmatpush1.msra.mxu1 %v5073_v0 }
 0x282   :  { %1750 = vmatprep.subr.mxu0 %v7188_v29  ;;  %1821 = vmatprep.subr.mxu1 %v7189_v7 }
 0x283   :  { %1751 = vmatpush1.msra.mxu0 %v7190_v39  ;;  %1822 = vmatpush1.msra.mxu1 %v7191_v33 }
 0x284   :  { %1752 = vmatprep.subr.mxu0 %v7192_v32  ;;  %1823 = vmatprep.subr.mxu1 %v7193_v1 }
 0x285   :  { %1753 = vmatpush1.msra.mxu0 %v7194_v47  ;;  %1824 = vmatpush1.msra.mxu1 %v7195_v31 }
 0x286   :  { %1754 = vmatprep.subr.mxu0 %v7196_v24  ;;  %1825 = vmatprep.subr.mxu1 %v7197_v19 }
 0x287   :  { %1755 = vmatpush1.msra.mxu0 %v7198_v41  ;;  %1826 = vmatpush1.msra.mxu1 %v7199_v30 }
 0x288   :  { %1756 = vmatprep.subr.mxu0 %v7200_v6  ;;  %1827 = vmatprep.subr.mxu1 %v7201_v26 }
 0x289   :  { %1757 = vmatpush1.msra.mxu0 %v5121_v42  ;;  %1828 = vmatpush1.msra.mxu1 %v5124_v20 }
 0x28a   :  { %1758 = vmatprep.subr.mxu0 %v5127_v28  ;;  %1829 = vmatprep.subr.mxu1 %v5130_v38 }
 0x28b   :  { %1759 = vmatpush1.msra.mxu0 %v5133_v16  ;;  %1830 = vmatpush1.msra.mxu1 %v5136_v17 }
 0x28c   :  { %1760 = vmatprep.subr.mxu0 %v5366_v13  ;;  %1831 = vmatprep.subr.mxu1 %v5369_v8  ;;  %v5384_v13 = vld [vmem:[#allocation2 + $0xe0] sm:$0xff]  ;;  %v5387_v8 = vld [vmem:[#allocation2 + $0xf0] sm:$0xff] }
 0x28d   :  { %1761 = vmatpush1.msra.mxu0 %v5372_v27  ;;  %1832 = vmatpush1.msra.mxu1 %v5375_v10  ;;  %7208 = vst [vmem:[#allocation75_spill] sm:$0xff] %v5384_v13  ;;  %7209 = vst [vmem:[#allocation76_spill] sm:$0xff] %v5387_v8  ;;  %v5390_v27 = vld [vmem:[#allocation2 + $0xc8] sm:$0xff]  ;;  %v5393_v10 = vld [vmem:[#allocation2 + $0xd8] sm:$0xff] }
 0x28e   :  { %1762 = vmatprep.subr.mxu0 %v5378_v22  ;;  %1833 = vmatprep.subr.mxu1 %v5381_v37  ;;  %7210 = vst [vmem:[#allocation77_spill] sm:$0xff] %v5390_v27  ;;  %7211 = vst [vmem:[#allocation78_spill] sm:$0xff] %v5393_v10  ;;  %v5396_v22 = vld [vmem:[#allocation2 + $0xc0] sm:$0xff]  ;;  %v5399_v37 = vld [vmem:[#allocation2 + $0xd0] sm:$0xff] }
 0x28f   :  { %1763 = vmatpush1.msra.mxu0 %v5384_v13  ;;  %1834 = vmatpush1.msra.mxu1 %v5387_v8  ;;  %7212 = vst [vmem:[#allocation12_spill] sm:$0xff] %v5396_v22  ;;  %7213 = vst [vmem:[#allocation13_spill] sm:$0xff] %v5399_v37  ;;  %v5402_v13 = vld [vmem:[#allocation2 + $0xa8] sm:$0xff]  ;;  %v5405_v8 = vld [vmem:[#allocation2 + $0xb8] sm:$0xff] }
 0x290   :  { %1764 = vmatprep.subr.mxu0 %v5390_v27  ;;  %1835 = vmatprep.subr.mxu1 %v5393_v10  ;;  %7214 = vst [vmem:[#allocation14_spill] sm:$0xff] %v5402_v13  ;;  %7215 = vst [vmem:[#allocation15_spill] sm:$0xff] %v5405_v8  ;;  %v5408_v27 = vld [vmem:[#allocation2 + $0xa0] sm:$0xff]  ;;  %v5411_v10 = vld [vmem:[#allocation2 + $0xb0] sm:$0xff] }
 0x291   :  { %1765 = vmatpush1.msra.mxu0 %v5396_v22  ;;  %1836 = vmatpush1.msra.mxu1 %v5399_v37  ;;  %7216 = vst [vmem:[#allocation16_spill] sm:$0xff] %v5408_v27  ;;  %7217 = vst [vmem:[#allocation17_spill] sm:$0xff] %v5411_v10  ;;  %v5414_v22 = vld [vmem:[#allocation2 + $0x88] sm:$0xff]  ;;  %v5417_v37 = vld [vmem:[#allocation2 + $0x98] sm:$0xff] }
 0x292   :  { %1766 = vmatprep.subr.mxu0 %v5402_v13  ;;  %1837 = vmatprep.subr.mxu1 %v5405_v8  ;;  %7218 = vst [vmem:[#allocation18_spill] sm:$0xff] %v5414_v22  ;;  %7219 = vst [vmem:[#allocation19_spill] sm:$0xff] %v5417_v37  ;;  %v5420_v13 = vld [vmem:[#allocation2 + $0x80] sm:$0xff]  ;;  %v5423_v8 = vld [vmem:[#allocation2 + $0x90] sm:$0xff] }
 0x293   :  { %1767 = vmatpush1.msra.mxu0 %v5408_v27  ;;  %1838 = vmatpush1.msra.mxu1 %v5411_v10  ;;  %7220 = vst [vmem:[#allocation20_spill] sm:$0xff] %v5420_v13  ;;  %7221 = vst [vmem:[#allocation21_spill] sm:$0xff] %v5423_v8  ;;  %v5426_v27 = vld [vmem:[#allocation2 + $0x68] sm:$0xff]  ;;  %v5429_v10 = vld [vmem:[#allocation2 + $0x78] sm:$0xff] }
 0x294   :  { %1768 = vmatprep.subr.mxu0 %v5414_v22  ;;  %1839 = vmatprep.subr.mxu1 %v5417_v37  ;;  %7222 = vst [vmem:[#allocation22_spill] sm:$0xff] %v5426_v27  ;;  %7223 = vst [vmem:[#allocation23_spill] sm:$0xff] %v5429_v10  ;;  %v5432_v22 = vld [vmem:[#allocation2 + $0x60] sm:$0xff]  ;;  %v5435_v37 = vld [vmem:[#allocation2 + $0x70] sm:$0xff] }
 0x295   :  { %1769 = vmatpush1.msra.mxu0 %v5420_v13  ;;  %1840 = vmatpush1.msra.mxu1 %v5423_v8  ;;  %7224 = vst [vmem:[#allocation24_spill] sm:$0xff] %v5432_v22  ;;  %7225 = vst [vmem:[#allocation25_spill] sm:$0xff] %v5435_v37  ;;  %v5438_v13 = vld [vmem:[#allocation2 + $0x48] sm:$0xff]  ;;  %v5441_v8 = vld [vmem:[#allocation2 + $0x58] sm:$0xff] }
 0x296   :  { %1770 = vmatprep.subr.mxu0 %v5426_v27  ;;  %1841 = vmatprep.subr.mxu1 %v5429_v10  ;;  %7226 = vst [vmem:[#allocation26_spill] sm:$0xff] %v5438_v13  ;;  %7227 = vst [vmem:[#allocation27_spill] sm:$0xff] %v5441_v8  ;;  %v5444_v27 = vld [vmem:[#allocation2 + $0x40] sm:$0xff]  ;;  %v5447_v10 = vld [vmem:[#allocation2 + $0x50] sm:$0xff] }
 0x297   :  { %1771 = vmatpush1.msra.mxu0 %v5432_v22  ;;  %1842 = vmatpush1.msra.mxu1 %v5435_v37  ;;  %7228 = vst [vmem:[#allocation95_spill] sm:$0xff] %v5444_v27  ;;  %7229 = vst [vmem:[#allocation79_spill] sm:$0xff] %v5447_v10  ;;  %v5450_v22 = vld [vmem:[#allocation2 + $0x28] sm:$0xff]  ;;  %v5453_v37 = vld [vmem:[#allocation2 + $0x38] sm:$0xff] }
 0x298   :  { %1772 = vmatprep.subr.mxu0 %v5438_v13  ;;  %1843 = vmatprep.subr.mxu1 %v5441_v8  ;;  %7230 = vst [vmem:[#allocation80_spill] sm:$0xff] %v5450_v22  ;;  %7231 = vst [vmem:[#allocation81_spill] sm:$0xff] %v5453_v37  ;;  %v5456_v13 = vld [vmem:[#allocation2 + $0x20] sm:$0xff]  ;;  %v5459_v8 = vld [vmem:[#allocation2 + $0x30] sm:$0xff] }
 0x299   :  { %1773 = vmatpush1.msra.mxu0 %v5444_v27  ;;  %1844 = vmatpush1.msra.mxu1 %v5447_v10  ;;  %7232 = vst [vmem:[#allocation82_spill] sm:$0xff] %v5456_v13  ;;  %7233 = vst [vmem:[#allocation83_spill] sm:$0xff] %v5459_v8  ;;  %v5462_v27 = vld [vmem:[#allocation2 + $0x8] sm:$0xff]  ;;  %v5465_v10 = vld [vmem:[#allocation2 + $0x18] sm:$0xff] }
 0x29a   :  { %1774 = vmatprep.subr.mxu0 %v5450_v22  ;;  %1845 = vmatprep.subr.mxu1 %v5453_v37  ;;  %7234 = vst [vmem:[#allocation84_spill] sm:$0xff] %v5462_v27  ;;  %7235 = vst [vmem:[#allocation85_spill] sm:$0xff] %v5465_v10  ;;  %v5468_v22 = vld [vmem:[#allocation2] sm:$0xff]  ;;  %v5472_v37 = vld [vmem:[#allocation2 + $0x10] sm:$0xff] }
 0x29b   :  { %1775 = vmatpush1.msra.mxu0 %v5456_v13  ;;  %1846 = vmatpush1.msra.mxu1 %v5459_v8  ;;  %7236 = vst [vmem:[#allocation28_spill] sm:$0xff] %v5468_v22  ;;  %7237 = vst [vmem:[#allocation29_spill] sm:$0xff] %v5472_v37  ;;  %v5476_v8 = vld [vmem:[#allocation6 + $0x1e8] sm:$0xff] }
 0x29c   :  { %1776 = vmatprep.subr.mxu0 %v5462_v27  ;;  %1847 = vmatprep.subr.mxu1 %v5465_v10  ;;  %7238 = vst [vmem:[#allocation31_spill] sm:$0xff] %v5476_v8  ;;  %v5479_v27 = vld [vmem:[#allocation6 + $0x1f8] sm:$0xff] }
 0x29d   :  { %1777 = vmatpush1.msra.mxu0 %v5468_v22  ;;  %1810 = vmatprep.mubr.f32.mxu0 %v6985_v14  ;;  %7239 = vst [vmem:[#allocation32_spill] sm:$0xff] %v5479_v27 }
 0x29e   :  { %1848 = vmatpush1.msra.mxu1 %v5472_v37  ;;  %1881 = vmatprep.mubr.f32.mxu1 %v6985_v14 }
 0x29f   :  { %1906 = vmatprep.subr.mxu0 %v5476_v8  ;;  %1977 = vmatprep.subr.mxu1 %v5479_v27 }
 0x318   :  { %v1414_v10 = vpop.f32.mrf.mxu0  ;;  %v1485_v16 = vpop.f32.mrf.mxu1 }
 0x319   :  { %v1494_v13 = vrot.slane %v1414_v10, 4  ;;  %v1496_v6 = vrot.slane %v1485_v16, 4 }
 0x31a   :  { %v1416_v17 = vpop.f32.mrf.mxu0  ;;  %v1487_v42 = vpop.f32.mrf.mxu1 }
 0x31b   :  { %v1502_v22 = vadd.f32 %v1494_v13, %v4949_v40  ;;  %v1495_v38 = vrot.slane %v1416_v17, 4  ;;  %v1497_v26 = vrot.slane %v1487_v42, 4  ;;  %v1504_v10 = vadd.f32 %v1496_v6, %v7160_v56 }
 0x31d   :  { %v3689_v28 = vmul.f32 -1.442695, %v1502_v22  ;;  %v1503_v37 = vadd.f32 %v1495_v38, %v4951_v45  ;;  %v1505_v8 = vadd.f32 %v1497_v26, %v4955_v36 }
 0x31f   :  { %3812 = vpow2.f32 %v3689_v28  ;;  %v3690_v20 = vmul.f32 -1.442695, %v1503_v37  ;;  %v3691_v30 = vmul.f32 -1.442695, %v1505_v8 }
 0x321   :  { %3814 = vpow2.f32 %v3690_v20  ;;  %v1686_v20 = vrot.slane %v5184_v50, 6 }
 0x322   :  { %3816 = vpow2.f32 %v3691_v30 }
 0x32c   :  { %v3813_v27 = vpop.eup %3812 }
 0x32d   :  { %v1669_v41 = vadd.f32 1.0, %v3813_v27 }
 0x32e   :  { %v3815_v19 = vpop.eup %3814 }
 0x32f   :  { %3818 = vrcp.f32 %v1669_v41  ;;  %v1675_v17 = vadd.f32 1.0, %v3815_v19  ;;  %v3817_v38 = vpop.eup %3816 }
 0x330   :  { %3820 = vtanh.f32 %v1504_v10  ;;  %v1682_v26 = vadd.f32 1.0, %v3817_v38 }
 0x331   :  { %3822 = vrcp.f32 %v1675_v17 }
 0x332   :  { %3824 = vrcp.f32 %v1682_v26 }
 0x33c   :  { %v3819_v28 = vpop.eup %3818 }
 0x33d   :  { %v3821_v13 = vpop.eup %3820 }
 0x33e   :  { %v1574_v42 = vpop.f32.mrf.mxu0  ;;  %v3823_v22 = vpop.eup %3822  ;;  %v1689_v8 = vmul.f32 %v3821_v13, %v3819_v28 }
 0x33f   :  { %v1654_v16 = vrot.slane %v1574_v42, 6  ;;  %v1688_v37 = vmul.f32 %v3823_v22, %v1686_v20  ;;  %v1645_v27 = vpop.f32.mrf.mxu1  ;;  %v3825_v20 = vpop.eup %3824 }
 0x340   :  { %v1576_v36 = vpop.f32.mrf.mxu0  ;;  %v1656_v13 = vrot.slane %v1645_v27, 6  ;;  %v7240_v27 = vld [vmem:[#allocation51_spill] sm:$0xff] }
 0x341   :  { %v1662_v6 = vadd.f32 %v1654_v16, %v4961_v43  ;;  %v1655_v30 = vrot.slane %v1576_v36, 6  ;;  %v5488_v41 = vadd.f32 %v1689_v8, %v1688_v37  ;;  %v1647_v17 = vpop.f32.mrf.mxu1 }
 0x342   :  { %v1657_v38 = vrot.slane %v1647_v17, 6  ;;  %v1664_v16 = vadd.f32 %v1656_v13, %v4975_v35  ;;  %v7243_v17 = vld [vmem:[#allocation54_spill] sm:$0xff]  ;;  %v7246_v13 = vld [vmem:[#allocation57_spill] sm:$0xff] }
 0x343   :  { %v3692_v19 = vmul.f32 -1.442695, %v1662_v6  ;;  %v1663_v10 = vadd.f32 %v1655_v30, %v4963_v46  ;;  %3826 = vtanh.f32 %v5488_v41 }
 0x344   :  { %v1665_v28 = vadd.f32 %v1657_v38, %v4971_v25  ;;  %v7244_v38 = vld [vmem:[#allocation55_spill] sm:$0xff] }
 0x345   :  { %3828 = vpow2.f32 %v3692_v19  ;;  %v3693_v50 = vmul.f32 -1.442695, %v1663_v10  ;;  %v7241_v10 = vld [vmem:[#allocation52_spill] sm:$0xff] }
 0x346   :  { %v3694_v42 = vmul.f32 -1.442695, %v1665_v28  ;;  %v7245_v28 = vld [vmem:[#allocation56_spill] sm:$0xff] }
 0x347   :  { %3830 = vpow2.f32 %v3693_v50  ;;  %v7242_v50 = vld [vmem:[#allocation53_spill] sm:$0xff] }
 0x348   :  { %3832 = vpow2.f32 %v3694_v42  ;;  %v7248_v42 = vld [vmem:[#allocation59_spill] sm:$0xff] }
 0x350   :  { %v3827_v22 = vpop.eup %3826 }
 0x351   :  { %v1692_v26 = vmul.f32 %v3827_v22, %v3825_v20  ;;  %v7247_v20 = vld [vmem:[#allocation58_spill] sm:$0xff]  ;;  %v7249_v22 = vld [vmem:[#allocation60_spill] sm:$0xff] }
 0x352   :  { %v3829_v36 = vpop.eup %3828 }
 0x353   :  { %v1696_v8 = vadd.f32 1.0, %v3829_v36  ;;  %v1721_v6 = vcombine.high %v1692_v26, %v1692_v26  ;;  %v1744_v30 = vrot.slane %v1692_v26, 4  ;;  %v7251_v26 = vld [vmem:[#allocation62_spill] sm:$0xff] }
 0x354   :  { %v3831_v37 = vpop.eup %3830 }
 0x355   :  { %3834 = vrcp.f32 %v1696_v8  ;;  %v1702_v19 = vadd.f32 1.0, %v3831_v37  ;;  %3737 = vst.sshfl [vmem:[%s6521_s7 + $0x8] sm:$0x3 pattern:$0x76325410] %v1721_v6  ;;  %1811 = vmatmul.mubr.f32.vlgmr.msra.gmra.mxu0 %v1744_v30  ;;  %1882 = vmatmul.mubr.f32.vlgmr.msra.gmra.mxu1 %v1744_v30  ;;  %v3833_v36 = vpop.eup %3832  ;;  %v7252_v37 = vld [vmem:[#allocation63_spill] sm:$0xff] }
 0x356   :  { %3836 = vtanh.f32 %v1664_v16  ;;  %1907 = vmatpush1.msra.mxu0 %v5192_v52  ;;  %1978 = vmatpush1.msra.mxu1 %v5195_v53  ;;  %v7250_v16 = vld [vmem:[#allocation61_spill] sm:$0xff]  ;;  %v7253_v6 = vld [vmem:[#allocation64_spill] sm:$0xff] }
 0x357   :  { %3838 = vrcp.f32 %v1702_v19  ;;  %1908 = vmatprep.subr.mxu0 %v5201_v54  ;;  %1979 = vmatprep.subr.mxu1 %v5204_v55  ;;  %v1713_v19 = vrot.slane %v5292_v63, 2 }
 0x358   :  { %1909 = vmatpush1.msra.mxu0 %v5207_v23  ;;  %1980 = vmatpush1.msra.mxu1 %v5210_v57 }
 0x359   :  { %1910 = vmatprep.subr.mxu0 %v5213_v58  ;;  %1981 = vmatprep.subr.mxu1 %v5216_v59 }
 0x35a   :  { %1911 = vmatpush1.msra.mxu0 %v5219_v60  ;;  %1982 = vmatpush1.msra.mxu1 %v5222_v61 }
 0x35b   :  { %1912 = vmatprep.subr.mxu0 %v7240_v27  ;;  %1983 = vmatprep.subr.mxu1 %v7241_v10 }
 0x35c   :  { %1913 = vmatpush1.msra.mxu0 %v7242_v50  ;;  %1984 = vmatpush1.msra.mxu1 %v7243_v17 }
 0x35d   :  { %1914 = vmatprep.subr.mxu0 %v7244_v38  ;;  %1985 = vmatprep.subr.mxu1 %v7245_v28  ;;  %v1709_v28 = vadd.f32 1.0, %v3833_v36  ;;  %v5539_v36 = vld [vmem:[#allocation6 + $0xd0] sm:$0xff] }
 0x35e   :  { %1915 = vmatpush1.msra.mxu0 %v7246_v13  ;;  %1986 = vmatpush1.msra.mxu1 %v7247_v20  ;;  %v7254_v13 = vld [vmem:[#allocation65_spill] sm:$0xff]  ;;  %v7255_v20 = vld [vmem:[#allocation66_spill] sm:$0xff]  ;;  %7258 = vst [vmem:[#allocation34_spill] sm:$0xff] %v5539_v36 }
 0x35f   :  { %1916 = vmatprep.subr.mxu0 %v7248_v42  ;;  %1987 = vmatprep.subr.mxu1 %v7249_v22  ;;  %v7256_v22 = vld [vmem:[#allocation67_spill] sm:$0xff]  ;;  %3840 = vrcp.f32 %v1709_v28 }
 0x360   :  { %1917 = vmatpush1.msra.mxu0 %v7250_v16  ;;  %1988 = vmatpush1.msra.mxu1 %v7251_v26  ;;  %v5549_v28 = vld [vmem:[#allocation6 + $0xa0] sm:$0xff] }
 0x361   :  { %1918 = vmatprep.subr.mxu0 %v7252_v37  ;;  %1989 = vmatprep.subr.mxu1 %v7253_v6  ;;  %7261 = vst [vmem:[#allocation37_spill] sm:$0xff] %v5549_v28 }
 0x362   :  { %v3835_v8 = vpop.eup %3834  ;;  %1919 = vmatpush1.msra.mxu0 %v7254_v13  ;;  %1990 = vmatpush1.msra.mxu1 %v7255_v20 }
 0x363   :  { %v3837_v30 = vpop.eup %3836  ;;  %1920 = vmatprep.subr.mxu0 %v7256_v22  ;;  %1991 = vmatprep.subr.mxu1 %v5277_v3 }
 0x364   :  { %v3839_v42 = vpop.eup %3838  ;;  %v1716_v16 = vmul.f32 %v3837_v30, %v3835_v8  ;;  %1921 = vmatpush1.msra.mxu0 %v5280_v62  ;;  %1992 = vmatpush1.msra.mxu1 %v5283_v2  ;;  %v5552_v8 = vld [vmem:[#allocation6 + $0xb0] sm:$0xff]  ;;  %v5555_v30 = vld [vmem:[#allocation6 + $0x88] sm:$0xff] }
 0x365   :  { %v1715_v26 = vmul.f32 %v3839_v42, %v1713_v19  ;;  %1922 = vmatprep.subr.mxu0 %v5286_v44  ;;  %1993 = vmatprep.subr.mxu1 %v5289_v51  ;;  %v5536_v42 = vld [vmem:[#allocation6 + $0xc0] sm:$0xff]  ;;  %7262 = vst [vmem:[#allocation38_spill] sm:$0xff] %v5552_v8  ;;  %7263 = vst [vmem:[#allocation39_spill] sm:$0xff] %v5555_v30  ;;  %v5558_v19 = vld [vmem:[#allocation6 + $0x98] sm:$0xff] }
 0x366   :  { %1923 = vmatpush1.msra.mxu0 %v5294_v4  ;;  %1994 = vmatpush1.msra.mxu1 %v5297_v5  ;;  %7257 = vst [vmem:[#allocation33_spill] sm:$0xff] %v5536_v42  ;;  %7264 = vst [vmem:[#allocation51_spill] sm:$0xff] %v5558_v19 }
 0x367   :  { %v5530_v63 = vadd.f32 %v1716_v16, %v1715_v26  ;;  %1924 = vmatprep.subr.mxu0 %v5300_v48  ;;  %1995 = vmatprep.subr.mxu1 %v5303_v49  ;;  %v5543_v16 = vld [vmem:[#allocation6 + $0xa8] sm:$0xff]  ;;  %v5546_v26 = vld [vmem:[#allocation6 + $0xb8] sm:$0xff] }
 0x368   :  { %1925 = vmatpush1.msra.mxu0 %v5536_v42  ;;  %1996 = vmatpush1.msra.mxu1 %v5539_v36  ;;  %7259 = vst [vmem:[#allocation35_spill] sm:$0xff] %v5543_v16  ;;  %7260 = vst [vmem:[#allocation36_spill] sm:$0xff] %v5546_v26  ;;  %v5609_v36 = vld [vmem:[#allocation6] sm:$0xff] }
 0x369   :  { %3842 = vtanh.f32 %v5530_v63  ;;  %1926 = vmatprep.subr.mxu0 %v5543_v16  ;;  %1997 = vmatprep.subr.mxu1 %v5546_v26  ;;  %v5561_v16 = vld [vmem:[#allocation6 + $0x80] sm:$0xff]  ;;  %v5564_v26 = vld [vmem:[#allocation6 + $0x90] sm:$0xff] }
 0x36a   :  { %1927 = vmatpush1.msra.mxu0 %v5549_v28  ;;  %1998 = vmatpush1.msra.mxu1 %v5552_v8  ;;  %7265 = vst [vmem:[#allocation52_spill] sm:$0xff] %v5561_v16  ;;  %7266 = vst [vmem:[#allocation53_spill] sm:$0xff] %v5564_v26  ;;  %v5567_v28 = vld [vmem:[#allocation6 + $0x68] sm:$0xff]  ;;  %v5570_v8 = vld [vmem:[#allocation6 + $0x78] sm:$0xff] }
 0x36b   :  { %1928 = vmatprep.subr.mxu0 %v5555_v30  ;;  %1999 = vmatprep.subr.mxu1 %v5558_v19  ;;  %7267 = vst [vmem:[#allocation54_spill] sm:$0xff] %v5567_v28  ;;  %7268 = vst [vmem:[#allocation55_spill] sm:$0xff] %v5570_v8  ;;  %v5573_v30 = vld [vmem:[#allocation6 + $0x60] sm:$0xff]  ;;  %v5576_v19 = vld [vmem:[#allocation6 + $0x70] sm:$0xff] }
 0x36c   :  { %1929 = vmatpush1.msra.mxu0 %v5561_v16  ;;  %2000 = vmatpush1.msra.mxu1 %v5564_v26  ;;  %7269 = vst [vmem:[#allocation63_spill] sm:$0xff] %v5573_v30  ;;  %7270 = vst [vmem:[#allocation64_spill] sm:$0xff] %v5576_v19  ;;  %v5579_v16 = vld [vmem:[#allocation6 + $0x48] sm:$0xff]  ;;  %v5582_v26 = vld [vmem:[#allocation6 + $0x58] sm:$0xff] }
 0x36d   :  { %1930 = vmatprep.subr.mxu0 %v5567_v28  ;;  %2001 = vmatprep.subr.mxu1 %v5570_v8  ;;  %7271 = vst [vmem:[#allocation65_spill] sm:$0xff] %v5579_v16  ;;  %7272 = vst [vmem:[#allocation66_spill] sm:$0xff] %v5582_v26  ;;  %v5585_v28 = vld [vmem:[#allocation6 + $0x40] sm:$0xff]  ;;  %v5588_v8 = vld [vmem:[#allocation6 + $0x50] sm:$0xff] }
 0x36e   :  { %1931 = vmatpush1.msra.mxu0 %v5573_v30  ;;  %2002 = vmatpush1.msra.mxu1 %v5576_v19  ;;  %7273 = vst [vmem:[#allocation67_spill] sm:$0xff] %v5585_v28  ;;  %7274 = vst [vmem:[#allocation96_spill] sm:$0xff] %v5588_v8  ;;  %v5591_v30 = vld [vmem:[#allocation6 + $0x28] sm:$0xff]  ;;  %v5594_v19 = vld [vmem:[#allocation6 + $0x38] sm:$0xff] }
 0x36f   :  { %1932 = vmatprep.subr.mxu0 %v5579_v16  ;;  %2003 = vmatprep.subr.mxu1 %v5582_v26  ;;  %7275 = vst [vmem:[#allocation97_spill] sm:$0xff] %v5591_v30  ;;  %7276 = vst [vmem:[#allocation98_spill] sm:$0xff] %v5594_v19  ;;  %v5597_v16 = vld [vmem:[#allocation6 + $0x20] sm:$0xff]  ;;  %v5600_v26 = vld [vmem:[#allocation6 + $0x30] sm:$0xff] }
 0x370   :  { %1933 = vmatpush1.msra.mxu0 %v5585_v28  ;;  %2004 = vmatpush1.msra.mxu1 %v5588_v8  ;;  %7277 = vst [vmem:[#allocation99_spill] sm:$0xff] %v5597_v16  ;;  %7278 = vst [vmem:[#allocation100_spill] sm:$0xff] %v5600_v26  ;;  %v5603_v28 = vld [vmem:[#allocation6 + $0x8] sm:$0xff]  ;;  %v5606_v8 = vld [vmem:[#allocation6 + $0x18] sm:$0xff] }
 0x371   :  { %1934 = vmatprep.subr.mxu0 %v5591_v30  ;;  %2005 = vmatprep.subr.mxu1 %v5594_v19  ;;  %7279 = vst [vmem:[#allocation101_spill] sm:$0xff] %v5603_v28  ;;  %7280 = vst [vmem:[#allocation102_spill] sm:$0xff] %v5606_v8  ;;  %v3841_v30 = vpop.eup %3840  ;;  %v5613_v19 = vld [vmem:[#allocation6 + $0x10] sm:$0xff] }
 0x372   :  { %1935 = vmatpush1.msra.mxu0 %v5597_v16  ;;  %2006 = vmatpush1.msra.mxu1 %v5600_v26 }
 0x373   :  { %1936 = vmatprep.subr.mxu0 %v5603_v28  ;;  %2007 = vmatprep.subr.mxu1 %v5606_v8  ;;  %v7281_v8 = vld [vmem:[#allocation30_spill] sm:$0xff] }
 0x374   :  { %1937 = vmatpush1.msra.mxu0 %v5609_v36  ;;  %1970 = vmatprep.mubr.f32.mxu0 %v6985_v14 }
 0x375   :  { %2008 = vmatpush1.msra.mxu1 %v5613_v19  ;;  %2041 = vmatprep.mubr.f32.mxu1 %v6985_v14 }
 0x376   :  { %v3843_v16 = vpop.eup %3842  ;;  %2123 = vmatprep.subr.mxu0 %v7186_v12  ;;  %2194 = vmatprep.subr.mxu1 %v7187_v21  ;;  %v7289_v12 = vld [vmem:[#allocation47_spill] sm:$0xff]  ;;  %v7290_v21 = vld [vmem:[#allocation48_spill] sm:$0xff] }
 0x377   :  { %v1719_v26 = vmul.f32 %v3843_v16, %v3841_v30  ;;  %v7301_v16 = vld [vmem:[#allocation77_spill] sm:$0xff] }
 0x378   :  { %v7304_v30 = vld [vmem:[#allocation13_spill] sm:$0xff] }
 0x379   :  { %v1739_v28 = vrot.slane %v1719_v26, %v7281_v8  ;;  %v1904_v42 = vrot.slane %v1719_v26, 2  ;;  %v7302_v26 = vld [vmem:[#allocation78_spill] sm:$0xff] }
 0x37b   :  { %v1740_v49 = vcombine.high %v1739_v28, %v1739_v28  ;;  %1971 = vmatmul.mubr.f32.vlgmr.msra.gmra.mxu0 %v1904_v42  ;;  %2042 = vmatmul.mubr.f32.vlgmr.msra.gmra.mxu1 %v1904_v42  ;;  %v7300_v42 = vld [vmem:[#allocation76_spill] sm:$0xff] }
 0x37c   :  { %2124 = vmatpush1.msra.mxu0 %v5058_v9  ;;  %2195 = vmatpush1.msra.mxu1 %v5061_v15  ;;  %v7282_v9 = vld [vmem:[#allocation40_spill] sm:$0xff]  ;;  %v7283_v15 = vld [vmem:[#allocation41_spill] sm:$0xff] }
 0x37d   :  { %3696 = vst [vmem:[%s6521_s7 + $0x16] sm:$0x3] %v1740_v49  ;;  %2125 = vmatprep.subr.mxu0 %v5064_v18  ;;  %2196 = vmatprep.subr.mxu1 %v5067_v34  ;;  %v7284_v18 = vld [vmem:[#allocation42_spill] sm:$0xff]  ;;  %v7285_v34 = vld [vmem:[#allocation43_spill] sm:$0xff]  ;;  %v7303_v28 = vld [vmem:[#allocation12_spill] sm:$0xff] }
 0x37e   :  { %2126 = vmatpush1.msra.mxu0 %v5070_v11  ;;  %2197 = vmatpush1.msra.mxu1 %v5073_v0  ;;  %v7286_v11 = vld [vmem:[#allocation44_spill] sm:$0xff]  ;;  %v7287_v0 = vld [vmem:[#allocation45_spill] sm:$0xff]  ;;  %v7288_v49 = vld [vmem:[#allocation46_spill] sm:$0xff] }
 0x37f   :  { %2127 = vmatprep.subr.mxu0 %v7188_v29  ;;  %2198 = vmatprep.subr.mxu1 %v7189_v7  ;;  %v7291_v29 = vld [vmem:[#allocation49_spill] sm:$0xff]  ;;  %v7292_v7 = vld [vmem:[#allocation50_spill] sm:$0xff] }
 0x380   :  { %2128 = vmatpush1.msra.mxu0 %v7190_v39  ;;  %2199 = vmatpush1.msra.mxu1 %v7191_v33  ;;  %v7293_v39 = vld [vmem:[#allocation69_spill] sm:$0xff]  ;;  %v7294_v33 = vld [vmem:[#allocation70_spill] sm:$0xff] }
 0x381   :  { %2129 = vmatprep.subr.mxu0 %v7192_v32  ;;  %2200 = vmatprep.subr.mxu1 %v7193_v1  ;;  %v7295_v32 = vld [vmem:[#allocation71_spill] sm:$0xff]  ;;  %v7296_v1 = vld [vmem:[#allocation72_spill] sm:$0xff] }
 0x382   :  { %2130 = vmatpush1.msra.mxu0 %v7194_v47  ;;  %2201 = vmatpush1.msra.mxu1 %v7195_v31  ;;  %v7297_v47 = vld [vmem:[#allocation73_spill] sm:$0xff]  ;;  %v7298_v31 = vld [vmem:[#allocation74_spill] sm:$0xff] }
 0x383   :  { %2131 = vmatprep.subr.mxu0 %v7196_v24  ;;  %2202 = vmatprep.subr.mxu1 %v7282_v9  ;;  %v7299_v24 = vld [vmem:[#allocation75_spill] sm:$0xff]  ;;  %v7305_v9 = vld [vmem:[#allocation14_spill] sm:$0xff] }
 0x384   :  { %2132 = vmatpush1.msra.mxu0 %v7283_v15  ;;  %2203 = vmatpush1.msra.mxu1 %v7284_v18  ;;  %v7306_v15 = vld [vmem:[#allocation15_spill] sm:$0xff]  ;;  %v7307_v18 = vld [vmem:[#allocation16_spill] sm:$0xff] }
 0x385   :  { %2133 = vmatprep.subr.mxu0 %v7285_v34  ;;  %2204 = vmatprep.subr.mxu1 %v7286_v11  ;;  %v7308_v34 = vld [vmem:[#allocation17_spill] sm:$0xff]  ;;  %v7309_v11 = vld [vmem:[#allocation18_spill] sm:$0xff] }
 0x386   :  { %2134 = vmatpush1.msra.mxu0 %v7287_v0  ;;  %2205 = vmatpush1.msra.mxu1 %v7288_v49  ;;  %v7310_v0 = vld [vmem:[#allocation19_spill] sm:$0xff]  ;;  %v7311_v49 = vld [vmem:[#allocation20_spill] sm:$0xff] }
 0x387   :  { %2135 = vmatprep.subr.mxu0 %v7289_v12  ;;  %2206 = vmatprep.subr.mxu1 %v7290_v21  ;;  %v7312_v12 = vld [vmem:[#allocation21_spill] sm:$0xff]  ;;  %v7313_v21 = vld [vmem:[#allocation22_spill] sm:$0xff] }
 0x388   :  { %2136 = vmatpush1.msra.mxu0 %v7291_v29  ;;  %2207 = vmatpush1.msra.mxu1 %v7292_v7  ;;  %v7314_v29 = vld [vmem:[#allocation23_spill] sm:$0xff]  ;;  %v7315_v7 = vld [vmem:[#allocation24_spill] sm:$0xff] }
 0x389   :  { %2137 = vmatprep.subr.mxu0 %v7293_v39  ;;  %2208 = vmatprep.subr.mxu1 %v7294_v33 }
 0x38a   :  { %2138 = vmatpush1.msra.mxu0 %v7295_v32  ;;  %2209 = vmatpush1.msra.mxu1 %v7296_v1 }
 0x38b   :  { %2139 = vmatprep.subr.mxu0 %v7297_v47  ;;  %2210 = vmatprep.subr.mxu1 %v7298_v31 }
 0x38c   :  { %2140 = vmatpush1.msra.mxu0 %v7299_v24  ;;  %2211 = vmatpush1.msra.mxu1 %v7300_v42 }
 0x38d   :  { %2141 = vmatprep.subr.mxu0 %v7301_v16  ;;  %2212 = vmatprep.subr.mxu1 %v7302_v26  ;;  %v7331_v26 = vld [vmem:[#allocation94_spill] sm:$0xff] }
 0x38e   :  { %2142 = vmatpush1.msra.mxu0 %v7303_v28  ;;  %2213 = vmatpush1.msra.mxu1 %v7304_v30 }
 0x38f   :  { %2143 = vmatprep.subr.mxu0 %v7305_v9  ;;  %2214 = vmatprep.subr.mxu1 %v7306_v15  ;;  %v7316_v9 = vld [vmem:[#allocation25_spill] sm:$0xff]  ;;  %v7317_v15 = vld [vmem:[#allocation26_spill] sm:$0xff] }
 0x390   :  { %2144 = vmatpush1.msra.mxu0 %v7307_v18  ;;  %2215 = vmatpush1.msra.mxu1 %v7308_v34  ;;  %v7318_v18 = vld [vmem:[#allocation27_spill] sm:$0xff] }
 0x391   :  { %2145 = vmatprep.subr.mxu0 %v7309_v11  ;;  %2216 = vmatprep.subr.mxu1 %v7310_v0  ;;  %v7319_v34 = vld [vmem:[#allocation95_spill] sm:$0xff]  ;;  %v7321_v0 = vld [vmem:[#allocation80_spill] sm:$0xff] }
 0x392   :  { %2146 = vmatpush1.msra.mxu0 %v7311_v49  ;;  %2217 = vmatpush1.msra.mxu1 %v7312_v12  ;;  %v7320_v11 = vld [vmem:[#allocation79_spill] sm:$0xff]  ;;  %v7322_v49 = vld [vmem:[#allocation81_spill] sm:$0xff]  ;;  %v7323_v12 = vld [vmem:[#allocation82_spill] sm:$0xff] }
 0x393   :  { %2147 = vmatprep.subr.mxu0 %v7313_v21  ;;  %2218 = vmatprep.subr.mxu1 %v7314_v29  ;;  %v7324_v21 = vld [vmem:[#allocation83_spill] sm:$0xff]  ;;  %v7325_v29 = vld [vmem:[#allocation84_spill] sm:$0xff] }
 0x394   :  { %2148 = vmatpush1.msra.mxu0 %v7315_v7  ;;  %2219 = vmatpush1.msra.mxu1 %v7316_v9  ;;  %v7326_v7 = vld [vmem:[#allocation85_spill] sm:$0xff]  ;;  %v7327_v9 = vld [vmem:[#allocation28_spill] sm:$0xff] }
 0x395   :  { %2149 = vmatprep.subr.mxu0 %v7317_v15  ;;  %2220 = vmatprep.subr.mxu1 %v7318_v18  ;;  %v7328_v18 = vld [vmem:[#allocation29_spill] sm:$0xff] }
 0x396   :  { %2150 = vmatpush1.msra.mxu0 %v7319_v34  ;;  %2221 = vmatpush1.msra.mxu1 %v7320_v11  ;;  %v7329_v11 = vld [vmem:[#allocation31_spill] sm:$0xff] }
 0x397   :  { %2151 = vmatprep.subr.mxu0 %v7321_v0  ;;  %2222 = vmatprep.subr.mxu1 %v7322_v49  ;;  %v7330_v0 = vld [vmem:[#allocation32_spill] sm:$0xff] }
 0x398   :  { %2152 = vmatpush1.msra.mxu0 %v7323_v12  ;;  %2223 = vmatpush1.msra.mxu1 %v7324_v21 }
 0x399   :  { %2153 = vmatprep.subr.mxu0 %v7325_v29  ;;  %2224 = vmatprep.subr.mxu1 %v7326_v7 }
 0x39a   :  { %2154 = vmatpush1.msra.mxu0 %v7327_v9  ;;  %2187 = vmatprep.mubr.f32.mxu0 %v6985_v14 }
 0x39b   :  { %2225 = vmatpush1.msra.mxu1 %v7328_v18  ;;  %2258 = vmatprep.mubr.f32.mxu1 %v6985_v14 }
 0x39c   :  { %2269 = vmatprep.subr.mxu0 %v7329_v11  ;;  %2340 = vmatprep.subr.mxu1 %v7330_v0 }
 0x415   :  { %v1812_v49 = vpop.f32.mrf.mxu0  ;;  %v1883_v34 = vpop.f32.mrf.mxu1 }
 0x416   :  { %v1892_v12 = vrot.slane %v1812_v49, 2  ;;  %v1894_v11 = vrot.slane %v1883_v34, 2 }
 0x417   :  { %v1814_v21 = vpop.f32.mrf.mxu0  ;;  %v1885_v30 = vpop.f32.mrf.mxu1 }
 0x418   :  { %v1900_v29 = vadd.f32 %v1892_v12, %v4949_v40  ;;  %v1893_v15 = vrot.slane %v1814_v21, 2  ;;  %v1895_v18 = vrot.slane %v1885_v30, 2  ;;  %v1902_v49 = vadd.f32 %v1894_v11, %v7160_v56 }
 0x41a   :  { %v3697_v7 = vmul.f32 -1.442695, %v1900_v29  ;;  %v1901_v9 = vadd.f32 %v1893_v15, %v4951_v45  ;;  %v1903_v16 = vadd.f32 %v1895_v18, %v7331_v26 }
 0x41c   :  { %3844 = vpow2.f32 %v3697_v7  ;;  %v3698_v28 = vmul.f32 -1.442695, %v1901_v9  ;;  %v3699_v42 = vmul.f32 -1.442695, %v1903_v16 }
 0x41e   :  { %3846 = vpow2.f32 %v3698_v28  ;;  %v2072_v28 = vrot.slane %v5488_v41, 6 }
 0x41f   :  { %3848 = vpow2.f32 %v3699_v42 }
 0x429   :  { %v3845_v0 = vpop.eup %3844 }
 0x42a   :  { %v2055_v24 = vadd.f32 1.0, %v3845_v0 }
 0x42b   :  { %v3847_v31 = vpop.eup %3846 }
 0x42c   :  { %3850 = vrcp.f32 %v2055_v24  ;;  %v2061_v40 = vadd.f32 1.0, %v3847_v31  ;;  %v3849_v45 = vpop.eup %3848 }
 0x42d   :  { %3852 = vtanh.f32 %v1902_v49  ;;  %v2068_v30 = vadd.f32 1.0, %v3849_v45 }
 0x42e   :  { %3854 = vrcp.f32 %v2061_v40 }
 0x42f   :  { %3856 = vrcp.f32 %v2068_v30 }
 0x439   :  { %v3851_v15 = vpop.eup %3850 }
 0x43a   :  { %v3853_v12 = vpop.eup %3852 }
 0x43b   :  { %v1972_v9 = vpop.f32.mrf.mxu0  ;;  %v3855_v26 = vpop.eup %3854  ;;  %v2075_v18 = vmul.f32 %v3853_v12, %v3851_v15 }
 0x43c   :  { %v2048_v16 = vadd.f32 %v1972_v9, %v4961_v43  ;;  %v2074_v34 = vmul.f32 %v3855_v26, %v2072_v28  ;;  %v2043_v31 = vpop.f32.mrf.mxu1  ;;  %v3857_v43 = vpop.eup %3856  ;;  %v7353_v26 = vld [vmem:[#allocation64_spill] sm:$0xff] }
 0x43d   :  { %v1974_v56 = vpop.f32.mrf.mxu0  ;;  %v2050_v49 = vadd.f32 %v2043_v31, %v4975_v35  ;;  %v7332_v35 = vld [vmem:[#allocation56_spill] sm:$0xff] }
 0x43e   :  { %v3700_v11 = vmul.f32 -1.442695, %v2048_v16  ;;  %v2049_v42 = vadd.f32 %v1974_v56, %v4963_v46  ;;  %v5696_v24 = vadd.f32 %v2075_v18, %v2074_v34  ;;  %v2045_v41 = vpop.f32.mrf.mxu1  ;;  %v7354_v16 = vld [vmem:[#allocation65_spill] sm:$0xff]  ;;  %v7355_v18 = vld [vmem:[#allocation66_spill] sm:$0xff]  ;;  %v7356_v34 = vld [vmem:[#allocation67_spill] sm:$0xff] }
 0x43f   :  { %v2051_v21 = vadd.f32 %v2045_v41, %v4971_v25  ;;  %v7357_v56 = vld [vmem:[#allocation96_spill] sm:$0xff] }
 0x440   :  { %3858 = vpow2.f32 %v3700_v11  ;;  %v3701_v0 = vmul.f32 -1.442695, %v2049_v42  ;;  %v7358_v11 = vld [vmem:[#allocation97_spill] sm:$0xff]  ;;  %v7359_v42 = vld [vmem:[#allocation98_spill] sm:$0xff]  ;;  %v7361_v41 = vld [vmem:[#allocation100_spill] sm:$0xff] }
 0x441   :  { %3860 = vtanh.f32 %v5696_v24  ;;  %v3702_v29 = vmul.f32 -1.442695, %v2051_v21 }
 0x442   :  { %3862 = vpow2.f32 %v3701_v0  ;;  %v7360_v0 = vld [vmem:[#allocation99_spill] sm:$0xff] }
 0x443   :  { %3864 = vpow2.f32 %v3702_v29  ;;  %v7362_v29 = vld [vmem:[#allocation101_spill] sm:$0xff] }
 0x44d   :  { %v3859_v7 = vpop.eup %3858 }
 0x44e   :  { %v3861_v40 = vpop.eup %3860  ;;  %v2082_v45 = vadd.f32 1.0, %v3859_v7 }
 0x44f   :  { %v3863_v46 = vpop.eup %3862  ;;  %v2078_v15 = vmul.f32 %v3861_v40, %v3857_v43  ;;  %v7363_v43 = vld [vmem:[#allocation102_spill] sm:$0xff] }
 0x450   :  { %3866 = vrcp.f32 %v2082_v45  ;;  %v2088_v12 = vadd.f32 1.0, %v3863_v46  ;;  %v5779_v40 = vld [vmem:[#allocation2 + $0x1f8] sm:$0xff]  ;;  %v5782_v45 = vld [vmem:[#allocation2 + $0x1e0] sm:$0xff]  ;;  %v5785_v46 = vld [vmem:[#allocation2 + $0x1f0] sm:$0xff] }
 0x451   :  { %3868 = vtanh.f32 %v2050_v49  ;;  %v2107_v28 = vcombine.high %v2078_v15, %v2078_v15  ;;  %v2121_v30 = vrot.slane %v2078_v15, 6  ;;  %v5776_v49 = vld [vmem:[#allocation2 + $0x1e8] sm:$0xff] }
 0x452   :  { %3870 = vrcp.f32 %v2088_v12  ;;  %v5788_v15 = vld [vmem:[#allocation2 + $0x1c8] sm:$0xff]  ;;  %v5791_v12 = vld [vmem:[#allocation2 + $0x1d8] sm:$0xff] }
 0x453   :  { %v2114_v9 = vrot.slane %v2107_v28, %v7281_v8  ;;  %2188 = vmatmul.mubr.f32.vlgmr.msra.gmra.mxu0 %v2121_v30  ;;  %2259 = vmatmul.mubr.f32.vlgmr.msra.gmra.mxu1 %v2121_v30  ;;  %v5794_v28 = vld [vmem:[#allocation2 + $0x1c0] sm:$0xff]  ;;  %v5797_v30 = vld [vmem:[#allocation2 + $0x1d0] sm:$0xff] }
 0x454   :  { %2270 = vmatpush1.msra.mxu0 %v5192_v52  ;;  %2341 = vmatpush1.msra.mxu1 %v5195_v53  ;;  %v3865_v52 = vpop.eup %3864  ;;  %v7333_v53 = vld [vmem:[#allocation57_spill] sm:$0xff] }
 0x455   :  { %v2115_v25 = vcombine.high %v2114_v9, %v2114_v9  ;;  %2271 = vmatprep.subr.mxu0 %v5201_v54  ;;  %2342 = vmatprep.subr.mxu1 %v5204_v55  ;;  %v7334_v54 = vld [vmem:[#allocation58_spill] sm:$0xff]  ;;  %v5800_v9 = vld [vmem:[#allocation2 + $0x1a8] sm:$0xff] }
 0x456   :  { %2272 = vmatpush1.msra.mxu0 %v5207_v23  ;;  %2343 = vmatpush1.msra.mxu1 %v5210_v57  ;;  %v7335_v23 = vld [vmem:[#allocation59_spill] sm:$0xff]  ;;  %v7336_v57 = vld [vmem:[#allocation60_spill] sm:$0xff] }
 0x457   :  { %3703 = vst [vmem:[%s6521_s7 + $0xc] sm:$0x3] %v2115_v25  ;;  %2273 = vmatprep.subr.mxu0 %v5213_v58  ;;  %2344 = vmatprep.subr.mxu1 %v5216_v59  ;;  %v2099_v59 = vrot.slane %v5530_v63, 2  ;;  %v7352_v63 = vld [vmem:[#allocation63_spill] sm:$0xff] }
 0x458   :  { %2274 = vmatpush1.msra.mxu0 %v5219_v60  ;;  %2345 = vmatpush1.msra.mxu1 %v5222_v61  ;;  %v7337_v60 = vld [vmem:[#allocation61_spill] sm:$0xff]  ;;  %v7338_v61 = vld [vmem:[#allocation62_spill] sm:$0xff] }
 0x459   :  { %2275 = vmatprep.subr.mxu0 %v7240_v27  ;;  %2346 = vmatprep.subr.mxu1 %v7241_v10  ;;  %v2095_v10 = vadd.f32 1.0, %v3865_v52  ;;  %v5803_v25 = vld [vmem:[#allocation2 + $0x1b8] sm:$0xff]  ;;  %v5809_v52 = vld [vmem:[#allocation2 + $0x1b0] sm:$0xff] }
 0x45a   :  { %2276 = vmatpush1.msra.mxu0 %v7242_v50  ;;  %2347 = vmatpush1.msra.mxu1 %v7243_v17 }
 0x45b   :  { %2277 = vmatprep.subr.mxu0 %v7244_v38  ;;  %2348 = vmatprep.subr.mxu1 %v7332_v35  ;;  %3872 = vrcp.f32 %v2095_v10  ;;  %v5806_v35 = vld [vmem:[#allocation2 + $0x1a0] sm:$0xff] }
 0x45c   :  { %2278 = vmatpush1.msra.mxu0 %v7333_v53  ;;  %2349 = vmatpush1.msra.mxu1 %v7334_v54  ;;  %v5812_v53 = vld [vmem:[#allocation2 + $0x188] sm:$0xff]  ;;  %v5815_v54 = vld [vmem:[#allocation2 + $0x198] sm:$0xff]  ;;  %v5842_v10 = vld [vmem:[#allocation2 + $0x140] sm:$0xff] }
 0x45d   :  { %v3867_v55 = vpop.eup %3866  ;;  %2279 = vmatprep.subr.mxu0 %v7335_v23  ;;  %2350 = vmatprep.subr.mxu1 %v7336_v57  ;;  %7364 = vst [vmem:[#allocation40_spill] sm:$0xff] %v5815_v54  ;;  %v5821_v23 = vld [vmem:[#allocation2 + $0x190] sm:$0xff]  ;;  %v5824_v57 = vld [vmem:[#allocation2 + $0x168] sm:$0xff]  ;;  %7373 = vst [vmem:[#allocation49_spill] sm:$0xff] %v5842_v10 }
 0x45e   :  { %v3869_v58 = vpop.eup %3868  ;;  %2280 = vmatpush1.msra.mxu0 %v7337_v60  ;;  %2351 = vmatpush1.msra.mxu1 %v7338_v61  ;;  %7366 = vst [vmem:[#allocation42_spill] sm:$0xff] %v5821_v23  ;;  %7367 = vst [vmem:[#allocation43_spill] sm:$0xff] %v5824_v57  ;;  %v5833_v60 = vld [vmem:[#allocation2 + $0x170] sm:$0xff]  ;;  %v5836_v61 = vld [vmem:[#allocation2 + $0x148] sm:$0xff] }
 0x45f   :  { %v3871_v27 = vpop.eup %3870  ;;  %2281 = vmatprep.subr.mxu0 %v7252_v37  ;;  %2352 = vmatprep.subr.mxu1 %v7253_v6  ;;  %v2102_v50 = vmul.f32 %v3869_v58, %v3867_v55  ;;  %v7350_v37 = vld [vmem:[#allocation54_spill] sm:$0xff]  ;;  %v7351_v6 = vld [vmem:[#allocation55_spill] sm:$0xff]  ;;  %7370 = vst [vmem:[#allocation46_spill] sm:$0xff] %v5833_v60  ;;  %7371 = vst [vmem:[#allocation47_spill] sm:$0xff] %v5836_v61 }
 0x460   :  { %v2101_v17 = vmul.f32 %v3871_v27, %v2099_v59  ;;  %2282 = vmatpush1.msra.mxu0 %v7254_v13  ;;  %2353 = vmatpush1.msra.mxu1 %v7255_v20  ;;  %v7340_v13 = vld [vmem:[#allocation33_spill] sm:$0xff]  ;;  %v7343_v20 = vld [vmem:[#allocation36_spill] sm:$0xff]  ;;  %v5827_v58 = vld [vmem:[#allocation2 + $0x178] sm:$0xff] }
 0x461   :  { %2283 = vmatprep.subr.mxu0 %v7256_v22  ;;  %2354 = vmatprep.subr.mxu1 %v5277_v3  ;;  %v7339_v3 = vld [vmem:[#allocation68_spill] sm:$0xff]  ;;  %7368 = vst [vmem:[#allocation44_spill] sm:$0xff] %v5827_v58  ;;  %v5839_v27 = vld [vmem:[#allocation2 + $0x158] sm:$0xff] }
 0x462   :  { %v5734_v38 = vadd.f32 %v2102_v50, %v2101_v17  ;;  %2284 = vmatpush1.msra.mxu0 %v5280_v62  ;;  %2355 = vmatpush1.msra.mxu1 %v5283_v2  ;;  %v7341_v62 = vld [vmem:[#allocation34_spill] sm:$0xff]  ;;  %v7342_v2 = vld [vmem:[#allocation35_spill] sm:$0xff]  ;;  %v7348_v22 = vld [vmem:[#allocation52_spill] sm:$0xff]  ;;  %7372 = vst [vmem:[#allocation48_spill] sm:$0xff] %v5839_v27 }
 0x463   :  { %2285 = vmatprep.subr.mxu0 %v5286_v44  ;;  %2356 = vmatprep.subr.mxu1 %v5289_v51  ;;  %v7344_v44 = vld [vmem:[#allocation37_spill] sm:$0xff]  ;;  %v7345_v51 = vld [vmem:[#allocation38_spill] sm:$0xff]  ;;  %v5818_v55 = vld [vmem:[#allocation2 + $0x180] sm:$0xff] }
 0x464   :  { %2286 = vmatpush1.msra.mxu0 %v5294_v4  ;;  %2357 = vmatpush1.msra.mxu1 %v5297_v5  ;;  %3874 = vtanh.f32 %v5734_v38  ;;  %v7346_v4 = vld [vmem:[#allocation39_spill] sm:$0xff]  ;;  %7365 = vst [vmem:[#allocation41_spill] sm:$0xff] %v5818_v55  ;;  %v5845_v50 = vld [vmem:[#allocation2 + $0x150] sm:$0xff]  ;;  %v5848_v17 = vld [vmem:[#allocation2 + $0x128] sm:$0xff] }
 0x465   :  { %2287 = vmatprep.subr.mxu0 %v5300_v48  ;;  %2358 = vmatprep.subr.mxu1 %v7339_v3  ;;  %v7347_v5 = vld [vmem:[#allocation51_spill] sm:$0xff]  ;;  %v7349_v48 = vld [vmem:[#allocation53_spill] sm:$0xff]  ;;  %7374 = vst [vmem:[#allocation50_spill] sm:$0xff] %v5845_v50  ;;  %7375 = vst [vmem:[#allocation69_spill] sm:$0xff] %v5848_v17 }
 0x466   :  { %2288 = vmatpush1.msra.mxu0 %v7340_v13  ;;  %2359 = vmatpush1.msra.mxu1 %v7341_v62  ;;  %v5830_v59 = vld [vmem:[#allocation2 + $0x160] sm:$0xff]  ;;  %v5851_v3 = vld [vmem:[#allocation2 + $0x138] sm:$0xff] }
 0x467   :  { %2289 = vmatprep.subr.mxu0 %v7342_v2  ;;  %2360 = vmatprep.subr.mxu1 %v7343_v20  ;;  %7369 = vst [vmem:[#allocation45_spill] sm:$0xff] %v5830_v59  ;;  %7376 = vst [vmem:[#allocation70_spill] sm:$0xff] %v5851_v3 }
 0x468   :  { %2290 = vmatpush1.msra.mxu0 %v7344_v44  ;;  %2361 = vmatpush1.msra.mxu1 %v7345_v51  ;;  %v3873_v31 = vpop.eup %3872 }
 0x469   :  { %2291 = vmatprep.subr.mxu0 %v7346_v4  ;;  %2362 = vmatprep.subr.mxu1 %v7347_v5 }
 0x46a   :  { %2292 = vmatpush1.msra.mxu0 %v7348_v22  ;;  %2363 = vmatpush1.msra.mxu1 %v7349_v48 }
 0x46b   :  { %2293 = vmatprep.subr.mxu0 %v7350_v37  ;;  %2364 = vmatprep.subr.mxu1 %v7351_v6 }
 0x46c   :  { %2294 = vmatpush1.msra.mxu0 %v7352_v63  ;;  %2365 = vmatpush1.msra.mxu1 %v7353_v26 }
 0x46d   :  { %2295 = vmatprep.subr.mxu0 %v7354_v16  ;;  %2366 = vmatprep.subr.mxu1 %v7355_v18 }
 0x46e   :  { %2296 = vmatpush1.msra.mxu0 %v7356_v34  ;;  %2367 = vmatpush1.msra.mxu1 %v7357_v56 }
 0x46f   :  { %2297 = vmatprep.subr.mxu0 %v7358_v11  ;;  %2368 = vmatprep.subr.mxu1 %v7359_v42 }
 0x470   :  { %2298 = vmatpush1.msra.mxu0 %v7360_v0  ;;  %2369 = vmatpush1.msra.mxu1 %v7361_v41 }
 0x471   :  { %v3875_v21 = vpop.eup %3874  ;;  %2299 = vmatprep.subr.mxu0 %v7362_v29  ;;  %2370 = vmatprep.subr.mxu1 %v7363_v43 }
 0x472   :  { %2300 = vmatpush1.msra.mxu0 %v5609_v36  ;;  %2333 = vmatprep.mubr.f32.mxu0 %v6985_v14  ;;  %v2105_v7 = vmul.f32 %v3875_v21, %v3873_v31  ;;  %v5854_v31 = vld [vmem:[#allocation2 + $0x120] sm:$0xff]  ;;  %v5857_v21 = vld [vmem:[#allocation2 + $0x130] sm:$0xff] }
 0x473   :  { %2371 = vmatpush1.msra.mxu1 %v5613_v19  ;;  %2404 = vmatprep.mubr.f32.mxu1 %v6985_v14  ;;  %7377 = vst [vmem:[#allocation71_spill] sm:$0xff] %v5854_v31  ;;  %7378 = vst [vmem:[#allocation72_spill] sm:$0xff] %v5857_v21 }
 0x474   :  { %3704 = vst [vmem:[%s6521_s7 + $0x12] sm:$0x3] %v2105_v7  ;;  %2334 = vmatmul.mubr.f32.vlgmr.msra.gmra.mxu0 %v2105_v7  ;;  %2405 = vmatmul.mubr.f32.vlgmr.msra.gmra.mxu1 %v2105_v7  ;;  %v7379_v7 = vld [vmem:[#allocation74_spill] sm:$0xff] }
 0x475   :  { %2494 = vmatprep.subr.mxu0 %v5776_v49  ;;  %2565 = vmatprep.subr.mxu1 %v5779_v40 }
 0x476   :  { %2495 = vmatpush1.msra.mxu0 %v5782_v45  ;;  %2566 = vmatpush1.msra.mxu1 %v5785_v46 }
 0x477   :  { %2496 = vmatprep.subr.mxu0 %v5788_v15  ;;  %2567 = vmatprep.subr.mxu1 %v5791_v12 }
 0x478   :  { %2497 = vmatpush1.msra.mxu0 %v5794_v28  ;;  %2568 = vmatpush1.msra.mxu1 %v5797_v30 }
 0x479   :  { %2498 = vmatprep.subr.mxu0 %v5800_v9  ;;  %2569 = vmatprep.subr.mxu1 %v5803_v25 }
 0x47a   :  { %2499 = vmatpush1.msra.mxu0 %v5806_v35  ;;  %2570 = vmatpush1.msra.mxu1 %v5809_v52 }
 0x47b   :  { %2500 = vmatprep.subr.mxu0 %v5812_v53  ;;  %2571 = vmatprep.subr.mxu1 %v5815_v54 }
 0x47c   :  { %2501 = vmatpush1.msra.mxu0 %v5818_v55  ;;  %2572 = vmatpush1.msra.mxu1 %v5821_v23 }
 0x47d   :  { %2502 = vmatprep.subr.mxu0 %v5824_v57  ;;  %2573 = vmatprep.subr.mxu1 %v5827_v58  ;;  %v7415_v58 = vld [vmem:[#allocation87_spill] sm:$0xff] }
 0x47e   :  { %2503 = vmatpush1.msra.mxu0 %v5830_v59  ;;  %2574 = vmatpush1.msra.mxu1 %v5833_v60 }
 0x47f   :  { %2504 = vmatprep.subr.mxu0 %v5836_v61  ;;  %2575 = vmatprep.subr.mxu1 %v5839_v27  ;;  %v7414_v61 = vld [vmem:[#allocation89_spill] sm:$0xff] }
 0x480   :  { %2505 = vmatpush1.msra.mxu0 %v5842_v10  ;;  %2576 = vmatpush1.msra.mxu1 %v5845_v50  ;;  %v7383_v50 = vld [vmem:[#allocation78_spill] sm:$0xff] }
 0x481   :  { %2506 = vmatprep.subr.mxu0 %v5848_v17  ;;  %2577 = vmatprep.subr.mxu1 %v5851_v3  ;;  %v7380_v3 = vld [vmem:[#allocation75_spill] sm:$0xff]  ;;  %v7381_v17 = vld [vmem:[#allocation76_spill] sm:$0xff] }
 0x482   :  { %2507 = vmatpush1.msra.mxu0 %v5854_v31  ;;  %2578 = vmatpush1.msra.mxu1 %v5857_v21  ;;  %v7382_v31 = vld [vmem:[#allocation77_spill] sm:$0xff]  ;;  %v7384_v21 = vld [vmem:[#allocation12_spill] sm:$0xff] }
 0x483   :  { %2508 = vmatprep.subr.mxu0 %v7293_v39  ;;  %2579 = vmatprep.subr.mxu1 %v7294_v33  ;;  %v7385_v39 = vld [vmem:[#allocation13_spill] sm:$0xff]  ;;  %v7386_v33 = vld [vmem:[#allocation14_spill] sm:$0xff] }
 0x484   :  { %2509 = vmatpush1.msra.mxu0 %v7295_v32  ;;  %2580 = vmatpush1.msra.mxu1 %v7296_v1  ;;  %v7387_v32 = vld [vmem:[#allocation15_spill] sm:$0xff]  ;;  %v7388_v1 = vld [vmem:[#allocation16_spill] sm:$0xff] }
 0x485   :  { %2510 = vmatprep.subr.mxu0 %v7297_v47  ;;  %2581 = vmatprep.subr.mxu1 %v7379_v7  ;;  %v7389_v47 = vld [vmem:[#allocation17_spill] sm:$0xff]  ;;  %v7390_v7 = vld [vmem:[#allocation18_spill] sm:$0xff] }
 0x486   :  { %2511 = vmatpush1.msra.mxu0 %v7380_v3  ;;  %2582 = vmatpush1.msra.mxu1 %v7381_v17  ;;  %v7391_v3 = vld [vmem:[#allocation19_spill] sm:$0xff]  ;;  %v7392_v17 = vld [vmem:[#allocation20_spill] sm:$0xff] }
 0x487   :  { %2512 = vmatprep.subr.mxu0 %v7382_v31  ;;  %2583 = vmatprep.subr.mxu1 %v7383_v50  ;;  %v7393_v31 = vld [vmem:[#allocation21_spill] sm:$0xff]  ;;  %v7394_v50 = vld [vmem:[#allocation22_spill] sm:$0xff] }
 0x488   :  { %2513 = vmatpush1.msra.mxu0 %v7384_v21  ;;  %2584 = vmatpush1.msra.mxu1 %v7385_v39  ;;  %v7395_v21 = vld [vmem:[#allocation23_spill] sm:$0xff]  ;;  %v7396_v39 = vld [vmem:[#allocation24_spill] sm:$0xff] }
 0x489   :  { %2514 = vmatprep.subr.mxu0 %v7386_v33  ;;  %2585 = vmatprep.subr.mxu1 %v7387_v32  ;;  %v7397_v33 = vld [vmem:[#allocation25_spill] sm:$0xff]  ;;  %v7398_v32 = vld [vmem:[#allocation26_spill] sm:$0xff] }
 0x48a   :  { %2515 = vmatpush1.msra.mxu0 %v7388_v1  ;;  %2586 = vmatpush1.msra.mxu1 %v7389_v47  ;;  %v7399_v1 = vld [vmem:[#allocation27_spill] sm:$0xff] }
 0x48b   :  { %2516 = vmatprep.subr.mxu0 %v7390_v7  ;;  %2587 = vmatprep.subr.mxu1 %v7391_v3  ;;  %v7400_v47 = vld [vmem:[#allocation95_spill] sm:$0xff]  ;;  %v7402_v3 = vld [vmem:[#allocation80_spill] sm:$0xff] }
 0x48c   :  { %2517 = vmatpush1.msra.mxu0 %v7392_v17  ;;  %2588 = vmatpush1.msra.mxu1 %v7393_v31  ;;  %v7401_v7 = vld [vmem:[#allocation79_spill] sm:$0xff]  ;;  %v7403_v17 = vld [vmem:[#allocation81_spill] sm:$0xff]  ;;  %v7404_v31 = vld [vmem:[#allocation82_spill] sm:$0xff] }
 0x48d   :  { %2518 = vmatprep.subr.mxu0 %v7394_v50  ;;  %2589 = vmatprep.subr.mxu1 %v7395_v21  ;;  %v7405_v50 = vld [vmem:[#allocation83_spill] sm:$0xff]  ;;  %v7406_v21 = vld [vmem:[#allocation84_spill] sm:$0xff] }
 0x48e   :  { %2519 = vmatpush1.msra.mxu0 %v7396_v39  ;;  %2590 = vmatpush1.msra.mxu1 %v7397_v33  ;;  %v7407_v39 = vld [vmem:[#allocation85_spill] sm:$0xff]  ;;  %v7408_v33 = vld [vmem:[#allocation28_spill] sm:$0xff] }
 0x48f   :  { %2520 = vmatprep.subr.mxu0 %v7398_v32  ;;  %2591 = vmatprep.subr.mxu1 %v7399_v1  ;;  %v7409_v32 = vld [vmem:[#allocation29_spill] sm:$0xff]  ;;  %v7410_v1 = vld [vmem:[#allocation31_spill] sm:$0xff] }
 0x490   :  { %2521 = vmatpush1.msra.mxu0 %v7400_v47  ;;  %2592 = vmatpush1.msra.mxu1 %v7401_v7  ;;  %v7411_v47 = vld [vmem:[#allocation32_spill] sm:$0xff] }
 0x491   :  { %2522 = vmatprep.subr.mxu0 %v7402_v3  ;;  %2593 = vmatprep.subr.mxu1 %v7403_v17  ;;  %v7412_v3 = vld [vmem:[#allocation86_spill] sm:$0xff] }
 0x492   :  { %2523 = vmatpush1.msra.mxu0 %v7404_v31  ;;  %2594 = vmatpush1.msra.mxu1 %v7405_v50 }
 0x493   :  { %2524 = vmatprep.subr.mxu0 %v7406_v21  ;;  %2595 = vmatprep.subr.mxu1 %v7407_v39  ;;  %v7413_v21 = vld [vmem:[#allocation88_spill] sm:$0xff] }
 0x494   :  { %2525 = vmatpush1.msra.mxu0 %v7408_v33  ;;  %2558 = vmatprep.mubr.f32.mxu0 %v6985_v14 }
 0x495   :  { %2596 = vmatpush1.msra.mxu1 %v7409_v32  ;;  %2629 = vmatprep.mubr.f32.mxu1 %v6985_v14 }
 0x496   :  { %2654 = vmatprep.subr.mxu0 %v7410_v1  ;;  %2725 = vmatprep.subr.mxu1 %v7411_v47 }
 0x513   :  { %v2189_v7 = vpop.f32.mrf.mxu0  ;;  %v2260_v39 = vpop.f32.mrf.mxu1 }
 0x514   :  { %v2265_v17 = vadd.f32 %v2189_v7, %v7412_v3  ;;  %v2267_v1 = vadd.f32 %v2260_v39, %v7415_v58 }
 0x515   :  { %v2191_v31 = vpop.f32.mrf.mxu0  ;;  %v2262_v27 = vpop.f32.mrf.mxu1 }
 0x516   :  { %v3705_v50 = vmul.f32 -1.442695, %v2265_v17  ;;  %v2266_v10 = vadd.f32 %v2191_v31, %v7413_v21  ;;  %v2268_v32 = vadd.f32 %v2262_v27, %v7414_v61  ;;  %v7416_v61 = vld [vmem:[#allocation90_spill] sm:$0xff] }
 0x518   :  { %3876 = vpow2.f32 %v3705_v50  ;;  %v3706_v33 = vmul.f32 -1.442695, %v2266_v10  ;;  %v3707_v60 = vmul.f32 -1.442695, %v2268_v32 }
 0x51a   :  { %3878 = vpow2.f32 %v3706_v33  ;;  %v2447_v33 = vrot.slane %v5696_v24, 6 }
 0x51b   :  { %3880 = vpow2.f32 %v3707_v60 }
 0x525   :  { %v3877_v59 = vpop.eup %3876 }
 0x526   :  { %v2430_v57 = vadd.f32 1.0, %v3877_v59 }
 0x527   :  { %v3879_v47 = vpop.eup %3878 }
 0x528   :  { %3882 = vrcp.f32 %v2430_v57  ;;  %v2436_v7 = vadd.f32 1.0, %v3879_v47  ;;  %v3881_v17 = vpop.eup %3880  ;;  %v7417_v47 = vld [vmem:[#allocation92_spill] sm:$0xff] }
 0x529   :  { %3884 = vtanh.f32 %v2267_v1  ;;  %v2443_v3 = vadd.f32 1.0, %v3881_v17  ;;  %v7418_v17 = vld [vmem:[#allocation93_spill] sm:$0xff] }
 0x52a   :  { %3886 = vrcp.f32 %v2436_v7 }
 0x52b   :  { %3888 = vrcp.f32 %v2443_v3 }
 0x534   :  { %v2335_v31 = vpop.f32.mrf.mxu0  ;;  %v2406_v39 = vpop.f32.mrf.mxu1 }
 0x535   :  { %v3883_v21 = vpop.eup %3882  ;;  %v2415_v50 = vrot.slane %v2335_v31, 2 }
 0x536   :  { %v3885_v10 = vpop.eup %3884  ;;  %v2337_v27 = vpop.f32.mrf.mxu0 }
 0x537   :  { %v3887_v32 = vpop.eup %3886  ;;  %v2423_v23 = vadd.f32 %v2415_v50, %v7416_v61  ;;  %v2416_v59 = vrot.slane %v2337_v27, 2  ;;  %v2450_v60 = vmul.f32 %v3885_v10, %v3883_v21  ;;  %v2408_v55 = vpop.f32.mrf.mxu1  ;;  %v2417_v50 = vrot.slane %v2406_v39, 2  ;;  %v7419_v10 = vld [vmem:[#allocation91_spill] sm:$0xff] }
 0x538   :  { %v2449_v58 = vmul.f32 %v3887_v32, %v2447_v33  ;;  %v2418_v24 = vrot.slane %v2408_v55, 2  ;;  %v3889_v27 = vpop.eup %3888  ;;  %v5918_v55 = vld [vmem:[#allocation6 + $0x1f0] sm:$0xff]  ;;  %v5924_v39 = vld [vmem:[#allocation6 + $0x1d8] sm:$0xff] }
 0x539   :  { %v3708_v57 = vmul.f32 -1.442695, %v2423_v23  ;;  %v2424_v1 = vadd.f32 %v2416_v59, %v7417_v47  ;;  %v2425_v23 = vadd.f32 %v2417_v50, %v7419_v10  ;;  %v5942_v50 = vld [vmem:[#allocation6 + $0x1b0] sm:$0xff] }
 0x53a   :  { %v5907_v7 = vadd.f32 %v2450_v60, %v2449_v58  ;;  %v2426_v54 = vadd.f32 %v2418_v24, %v7418_v17  ;;  %v5927_v60 = vld [vmem:[#allocation6 + $0x1c0] sm:$0xff]  ;;  %7423 = vst [vmem:[#allocation57_spill] sm:$0xff] %v5942_v50 }
 0x53b   :  { %3890 = vpow2.f32 %v3708_v57  ;;  %v3709_v31 = vmul.f32 -1.442695, %v2424_v1  ;;  %v5930_v57 = vld [vmem:[#allocation6 + $0x1d0] sm:$0xff]  ;;  %v5933_v1 = vld [vmem:[#allocation6 + $0x1a8] sm:$0xff]  ;;  %v5939_v24 = vld [vmem:[#allocation6 + $0x1a0] sm:$0xff] }
 0x53c   :  { %3892 = vtanh.f32 %v5907_v7  ;;  %v3710_v61 = vmul.f32 -1.442695, %v2426_v54  ;;  %v5915_v54 = vld [vmem:[#allocation6 + $0x1e0] sm:$0xff]  ;;  %7420 = vst [vmem:[#allocation73_spill] sm:$0xff] %v5933_v1  ;;  %7422 = vst [vmem:[#allocation56_spill] sm:$0xff] %v5939_v24 }
 0x53d   :  { %3894 = vpow2.f32 %v3709_v31  ;;  %v5936_v31 = vld [vmem:[#allocation6 + $0x1b8] sm:$0xff] }
 0x53e   :  { %3896 = vpow2.f32 %v3710_v61  ;;  %v5921_v61 = vld [vmem:[#allocation6 + $0x1c8] sm:$0xff]  ;;  %7421 = vst [vmem:[#allocation94_spill] sm:$0xff] %v5936_v31 }
 0x548   :  { %v3891_v21 = vpop.eup %3890 }
 0x549   :  { %v3893_v33 = vpop.eup %3892  ;;  %v2457_v32 = vadd.f32 1.0, %v3891_v21  ;;  %v5948_v21 = vld [vmem:[#allocation6 + $0x198] sm:$0xff] }
 0x54a   :  { %v3895_v58 = vpop.eup %3894  ;;  %v2453_v3 = vmul.f32 %v3893_v33, %v3889_v27  ;;  %v5945_v27 = vld [vmem:[#allocation6 + $0x188] sm:$0xff]  ;;  %7425 = vst [vmem:[#allocation59_spill] sm:$0xff] %v5948_v21  ;;  %v5954_v33 = vld [vmem:[#allocation6 + $0x190] sm:$0xff] }
 0x54b   :  { %3898 = vrcp.f32 %v2457_v32  ;;  %v2463_v59 = vadd.f32 1.0, %v3895_v58  ;;  %7424 = vst [vmem:[#allocation58_spill] sm:$0xff] %v5945_v27  ;;  %7427 = vst [vmem:[#allocation61_spill] sm:$0xff] %v5954_v33  ;;  %v5957_v32 = vld [vmem:[#allocation6 + $0x168] sm:$0xff]  ;;  %v5960_v58 = vld [vmem:[#allocation6 + $0x178] sm:$0xff] }
 0x54c   :  { %3900 = vtanh.f32 %v2425_v23  ;;  %3711 = vst [vmem:[%s6521_s7 + $0x10] sm:$0x3] %v2453_v3  ;;  %2559 = vmatmul.mubr.f32.vlgmr.msra.gmra.mxu0 %v2453_v3  ;;  %2630 = vmatmul.mubr.f32.vlgmr.msra.gmra.mxu1 %v2453_v3  ;;  %v5951_v23 = vld [vmem:[#allocation6 + $0x180] sm:$0xff]  ;;  %7428 = vst [vmem:[#allocation62_spill] sm:$0xff] %v5957_v32 }
 0x54d   :  { %3902 = vrcp.f32 %v2463_v59  ;;  %2655 = vmatpush1.msra.mxu0 %v5915_v54  ;;  %2726 = vmatpush1.msra.mxu1 %v5918_v55  ;;  %7426 = vst [vmem:[#allocation60_spill] sm:$0xff] %v5951_v23  ;;  %7429 = vst [vmem:[#allocation68_spill] sm:$0xff] %v5960_v58  ;;  %v5963_v3 = vld [vmem:[#allocation6 + $0x160] sm:$0xff]  ;;  %v5966_v59 = vld [vmem:[#allocation6 + $0x170] sm:$0xff] }
 0x54e   :  { %2656 = vmatprep.subr.mxu0 %v5921_v61  ;;  %2727 = vmatprep.subr.mxu1 %v5924_v39  ;;  %7430 = vst [vmem:[#allocation33_spill] sm:$0xff] %v5963_v3  ;;  %7431 = vst [vmem:[#allocation34_spill] sm:$0xff] %v5966_v59 }
 0x54f   :  { %2657 = vmatpush1.msra.mxu0 %v5927_v60  ;;  %2728 = vmatpush1.msra.mxu1 %v5930_v57 }
 0x550   :  { %2658 = vmatprep.subr.mxu0 %v5933_v1  ;;  %2729 = vmatprep.subr.mxu1 %v5936_v31  ;;  %v5994_v31 = vld [vmem:[#allocation6 + $0x108] sm:$0xff]  ;;  %v6000_v1 = vld [vmem:[#allocation6 + $0x100] sm:$0xff] }
 0x551   :  { %2659 = vmatpush1.msra.mxu0 %v5939_v24  ;;  %2730 = vmatpush1.msra.mxu1 %v5942_v50  ;;  %v5988_v50 = vld [vmem:[#allocation6 + $0x120] sm:$0xff]  ;;  %7440 = vst [vmem:[#allocation54_spill] sm:$0xff] %v5994_v31 }
 0x552   :  { %2660 = vmatprep.subr.mxu0 %v5945_v27  ;;  %2731 = vmatprep.subr.mxu1 %v5948_v21  ;;  %v5975_v21 = vld [vmem:[#allocation6 + $0x140] sm:$0xff]  ;;  %v5981_v27 = vld [vmem:[#allocation6 + $0x128] sm:$0xff]  ;;  %7438 = vst [vmem:[#allocation52_spill] sm:$0xff] %v5988_v50 }
 0x553   :  { %2661 = vmatpush1.msra.mxu0 %v5951_v23  ;;  %2732 = vmatpush1.msra.mxu1 %v5954_v33  ;;  %v5969_v23 = vld [vmem:[#allocation6 + $0x148] sm:$0xff]  ;;  %v5972_v33 = vld [vmem:[#allocation6 + $0x158] sm:$0xff]  ;;  %7434 = vst [vmem:[#allocation37_spill] sm:$0xff] %v5975_v21  ;;  %7436 = vst [vmem:[#allocation39_spill] sm:$0xff] %v5981_v27 }
 0x554   :  { %2662 = vmatprep.subr.mxu0 %v5957_v32  ;;  %2733 = vmatprep.subr.mxu1 %v5960_v58  ;;  %7432 = vst [vmem:[#allocation35_spill] sm:$0xff] %v5969_v23  ;;  %7433 = vst [vmem:[#allocation36_spill] sm:$0xff] %v5972_v33  ;;  %v3897_v32 = vpop.eup %3896  ;;  %v5978_v58 = vld [vmem:[#allocation6 + $0x150] sm:$0xff] }
 0x555   :  { %2663 = vmatpush1.msra.mxu0 %v5963_v3  ;;  %2734 = vmatpush1.msra.mxu1 %v5966_v59  ;;  %7435 = vst [vmem:[#allocation38_spill] sm:$0xff] %v5978_v58  ;;  %v5984_v59 = vld [vmem:[#allocation6 + $0x138] sm:$0xff]  ;;  %v2470_v24 = vadd.f32 1.0, %v3897_v32 }
 0x556   :  { %2664 = vmatprep.subr.mxu0 %v5969_v23  ;;  %2735 = vmatprep.subr.mxu1 %v5972_v33  ;;  %7437 = vst [vmem:[#allocation51_spill] sm:$0xff] %v5984_v59  ;;  %v2474_v33 = vrot.slane %v5734_v38, 2  ;;  %v6009_v32 = vld [vmem:[#allocation6 + $0xf8] sm:$0xff] }
 0x557   :  { %2665 = vmatpush1.msra.mxu0 %v5975_v21  ;;  %2736 = vmatpush1.msra.mxu1 %v5978_v58  ;;  %v5991_v21 = vld [vmem:[#allocation6 + $0x130] sm:$0xff]  ;;  %3904 = vrcp.f32 %v2470_v24  ;;  %v6099_v24 = vld [vmem:[#allocation2 + $0xe8] sm:$0xff] }
 0x558   :  { %v3899_v3 = vpop.eup %3898  ;;  %2666 = vmatprep.subr.mxu0 %v5981_v27  ;;  %2737 = vmatprep.subr.mxu1 %v5984_v59  ;;  %7439 = vst [vmem:[#allocation53_spill] sm:$0xff] %v5991_v21  ;;  %v5997_v27 = vld [vmem:[#allocation6 + $0x118] sm:$0xff]  ;;  %7460 = vst [vmem:[#allocation66_spill] sm:$0xff] %v6099_v24 }
 0x559   :  { %v3901_v23 = vpop.eup %3900  ;;  %2667 = vmatpush1.msra.mxu0 %v5988_v50  ;;  %2738 = vmatpush1.msra.mxu1 %v5991_v21  ;;  %v6003_v50 = vld [vmem:[#allocation6 + $0x110] sm:$0xff]  ;;  %v6006_v21 = vld [vmem:[#allocation6 + $0xe8] sm:$0xff] }
 0x55a   :  { %v3903_v58 = vpop.eup %3902  ;;  %2668 = vmatprep.subr.mxu0 %v5994_v31  ;;  %2739 = vmatprep.subr.mxu1 %v5997_v27  ;;  %v2477_v59 = vmul.f32 %v3901_v23, %v3899_v3  ;;  %v6014_v23 = vld [vmem:[#allocation6 + $0xe0] sm:$0xff]  ;;  %v6023_v3 = vld [vmem:[#allocation6 + $0xd8] sm:$0xff] }
 0x55b   :  { %v2476_v38 = vmul.f32 %v3903_v58, %v2474_v33  ;;  %2669 = vmatpush1.msra.mxu0 %v6000_v1  ;;  %2740 = vmatpush1.msra.mxu1 %v6003_v50  ;;  %v6017_v33 = vld [vmem:[#allocation6 + $0xf0] sm:$0xff]  ;;  %v6020_v58 = vld [vmem:[#allocation6 + $0xc8] sm:$0xff] }
 0x55c   :  { %2670 = vmatprep.subr.mxu0 %v6006_v21  ;;  %2741 = vmatprep.subr.mxu1 %v6009_v32 }
 0x55d   :  { %v6012_v31 = vadd.f32 %v2477_v59, %v2476_v38  ;;  %2671 = vmatpush1.msra.mxu0 %v6014_v23  ;;  %2742 = vmatpush1.msra.mxu1 %v6017_v33  ;;  %v6102_v59 = vld [vmem:[#allocation2 + $0xf8] sm:$0xff]  ;;  %v6105_v38 = vld [vmem:[#allocation2 + $0xe0] sm:$0xff] }
 0x55e   :  { %2672 = vmatprep.subr.mxu0 %v6020_v58  ;;  %2743 = vmatprep.subr.mxu1 %v6023_v3  ;;  %7461 = vst [vmem:[#allocation67_spill] sm:$0xff] %v6102_v59  ;;  %7462 = vst [vmem:[#allocation96_spill] sm:$0xff] %v6105_v38 }
 0x55f   :  { %2673 = vmatpush1.msra.mxu0 %v7340_v13  ;;  %2744 = vmatpush1.msra.mxu1 %v7341_v62  ;;  %3906 = vtanh.f32 %v6012_v31 }
 0x560   :  { %2674 = vmatprep.subr.mxu0 %v7342_v2  ;;  %2745 = vmatprep.subr.mxu1 %v7343_v20 }
 0x561   :  { %2675 = vmatpush1.msra.mxu0 %v7344_v44  ;;  %2746 = vmatpush1.msra.mxu1 %v7345_v51 }
 0x562   :  { %2676 = vmatprep.subr.mxu0 %v7346_v4  ;;  %2747 = vmatprep.subr.mxu1 %v7347_v5  ;;  %v7442_v4 = vld [vmem:[#allocation41_spill] sm:$0xff]  ;;  %v7443_v5 = vld [vmem:[#allocation42_spill] sm:$0xff] }
 0x563   :  { %2677 = vmatpush1.msra.mxu0 %v7348_v22  ;;  %2748 = vmatpush1.msra.mxu1 %v7349_v48  ;;  %v7444_v22 = vld [vmem:[#allocation43_spill] sm:$0xff]  ;;  %v7445_v48 = vld [vmem:[#allocation44_spill] sm:$0xff] }
 0x564   :  { %2678 = vmatprep.subr.mxu0 %v7350_v37  ;;  %2749 = vmatprep.subr.mxu1 %v7351_v6  ;;  %v3905_v13 = vpop.eup %3904  ;;  %v7446_v37 = vld [vmem:[#allocation45_spill] sm:$0xff]  ;;  %v7447_v6 = vld [vmem:[#allocation46_spill] sm:$0xff] }
 0x565   :  { %2679 = vmatpush1.msra.mxu0 %v7352_v63  ;;  %2750 = vmatpush1.msra.mxu1 %v7353_v26  ;;  %v7448_v63 = vld [vmem:[#allocation47_spill] sm:$0xff]  ;;  %v7449_v26 = vld [vmem:[#allocation48_spill] sm:$0xff] }
 0x566   :  { %2680 = vmatprep.subr.mxu0 %v7354_v16  ;;  %2751 = vmatprep.subr.mxu1 %v7355_v18  ;;  %v7450_v16 = vld [vmem:[#allocation49_spill] sm:$0xff]  ;;  %v7451_v18 = vld [vmem:[#allocation50_spill] sm:$0xff] }
 0x567   :  { %2681 = vmatpush1.msra.mxu0 %v7356_v34  ;;  %2752 = vmatpush1.msra.mxu1 %v7357_v56  ;;  %v7452_v34 = vld [vmem:[#allocation69_spill] sm:$0xff]  ;;  %v7453_v56 = vld [vmem:[#allocation70_spill] sm:$0xff] }
 0x568   :  { %2682 = vmatprep.subr.mxu0 %v7358_v11  ;;  %2753 = vmatprep.subr.mxu1 %v7359_v42  ;;  %v7454_v11 = vld [vmem:[#allocation71_spill] sm:$0xff]  ;;  %v7455_v42 = vld [vmem:[#allocation72_spill] sm:$0xff] }
 0x569   :  { %2683 = vmatpush1.msra.mxu0 %v7360_v0  ;;  %2754 = vmatpush1.msra.mxu1 %v7361_v41  ;;  %v6087_v0 = vld [vmem:[#allocation2 + $0x108] sm:$0xff]  ;;  %v6090_v41 = vld [vmem:[#allocation2 + $0x118] sm:$0xff] }
 0x56a   :  { %2684 = vmatprep.subr.mxu0 %v7362_v29  ;;  %2755 = vmatprep.subr.mxu1 %v7363_v43  ;;  %7456 = vst [vmem:[#allocation55_spill] sm:$0xff] %v6087_v0  ;;  %7457 = vst [vmem:[#allocation63_spill] sm:$0xff] %v6090_v41  ;;  %v6093_v29 = vld [vmem:[#allocation2 + $0x100] sm:$0xff]  ;;  %v6096_v43 = vld [vmem:[#allocation2 + $0x110] sm:$0xff] }
 0x56b   :  { %2685 = vmatpush1.msra.mxu0 %v5609_v36  ;;  %2718 = vmatprep.mubr.f32.mxu0 %v6985_v14  ;;  %7458 = vst [vmem:[#allocation64_spill] sm:$0xff] %v6093_v29  ;;  %7459 = vst [vmem:[#allocation65_spill] sm:$0xff] %v6096_v43 }
 0x56c   :  { %v3907_v62 = vpop.eup %3906  ;;  %2756 = vmatpush1.msra.mxu1 %v5613_v19  ;;  %2789 = vmatprep.mubr.f32.mxu1 %v6985_v14  ;;  %v7441_v19 = vld [vmem:[#allocation40_spill] sm:$0xff] }
 0x56d   :  { %v2480_v2 = vmul.f32 %v3907_v62, %v3905_v13  ;;  %2890 = vmatprep.subr.mxu0 %v5776_v49  ;;  %2961 = vmatprep.subr.mxu1 %v5779_v40  ;;  %v6108_v13 = vld [vmem:[#allocation2 + $0xf0] sm:$0xff]  ;;  %v6111_v62 = vld [vmem:[#allocation2 + $0xc8] sm:$0xff] }
 0x56e   :  { %7463 = vst [vmem:[#allocation97_spill] sm:$0xff] %v6108_v13  ;;  %7464 = vst [vmem:[#allocation98_spill] sm:$0xff] %v6111_v62 }
 0x56f   :  { %v2483_v20 = vcombine.high %v2480_v2, %v2480_v2  ;;  %v2652_v44 = vrot.slane %v2480_v2, 6  ;;  %v6114_v2 = vld [vmem:[#allocation2 + $0xd8] sm:$0xff] }
 0x570   :  { %7465 = vst [vmem:[#allocation99_spill] sm:$0xff] %v6114_v2 }
 0x571   :  { %v2490_v51 = vrot.slane %v2483_v20, %v7281_v8  ;;  %2719 = vmatmul.mubr.f32.vlgmr.msra.gmra.mxu0 %v2652_v44  ;;  %2790 = vmatmul.mubr.f32.vlgmr.msra.gmra.mxu1 %v2652_v44  ;;  %v6117_v20 = vld [vmem:[#allocation2 + $0xc0] sm:$0xff]  ;;  %v6120_v44 = vld [vmem:[#allocation2 + $0xd0] sm:$0xff] }
 0x572   :  { %2891 = vmatpush1.msra.mxu0 %v5782_v45  ;;  %2962 = vmatpush1.msra.mxu1 %v5785_v46  ;;  %7466 = vst [vmem:[#allocation100_spill] sm:$0xff] %v6117_v20  ;;  %7467 = vst [vmem:[#allocation101_spill] sm:$0xff] %v6120_v44 }
 0x573   :  { %v2491_v36 = vcombine.high %v2490_v51, %v2490_v51  ;;  %2892 = vmatprep.subr.mxu0 %v5788_v15  ;;  %2963 = vmatprep.subr.mxu1 %v5791_v12  ;;  %v6123_v51 = vld [vmem:[#allocation2 + $0xa8] sm:$0xff] }
 0x574   :  { %2893 = vmatpush1.msra.mxu0 %v5794_v28  ;;  %2964 = vmatpush1.msra.mxu1 %v5797_v30  ;;  %7468 = vst [vmem:[#allocation102_spill] sm:$0xff] %v6123_v51 }
 0x575   :  { %3712 = vst [vmem:[%s6521_s7 + $0xe] sm:$0x3] %v2491_v36  ;;  %2894 = vmatprep.subr.mxu0 %v5800_v9  ;;  %2965 = vmatprep.subr.mxu1 %v5803_v25  ;;  %v6126_v36 = vld [vmem:[#allocation2 + $0xb8] sm:$0xff] }
 0x576   :  { %2895 = vmatpush1.msra.mxu0 %v5806_v35  ;;  %2966 = vmatpush1.msra.mxu1 %v5809_v52  ;;  %7469 = vst [vmem:[#allocation74_spill] sm:$0xff] %v6126_v36 }
 0x577   :  { %2896 = vmatprep.subr.mxu0 %v5812_v53  ;;  %2967 = vmatprep.subr.mxu1 %v7441_v19 }
 0x578   :  { %2897 = vmatpush1.msra.mxu0 %v7442_v4  ;;  %2968 = vmatpush1.msra.mxu1 %v7443_v5 }
 0x579   :  { %2898 = vmatprep.subr.mxu0 %v7444_v22  ;;  %2969 = vmatprep.subr.mxu1 %v7445_v48 }
 0x57a   :  { %2899 = vmatpush1.msra.mxu0 %v7446_v37  ;;  %2970 = vmatpush1.msra.mxu1 %v7447_v6 }
 0x57b   :  { %2900 = vmatprep.subr.mxu0 %v7448_v63  ;;  %2971 = vmatprep.subr.mxu1 %v7449_v26 }
 0x57c   :  { %2901 = vmatpush1.msra.mxu0 %v7450_v16  ;;  %2972 = vmatpush1.msra.mxu1 %v7451_v18  ;;  %v7497_v18 = vld [vmem:[#allocation87_spill] sm:$0xff] }
 0x57d   :  { %2902 = vmatprep.subr.mxu0 %v7452_v34  ;;  %2973 = vmatprep.subr.mxu1 %v7453_v56 }
 0x57e   :  { %2903 = vmatpush1.msra.mxu0 %v7454_v11  ;;  %2974 = vmatpush1.msra.mxu1 %v7455_v42 }
 0x57f   :  { %2904 = vmatprep.subr.mxu0 %v6087_v0  ;;  %2975 = vmatprep.subr.mxu1 %v6090_v41 }
 0x580   :  { %2905 = vmatpush1.msra.mxu0 %v6093_v29  ;;  %2976 = vmatpush1.msra.mxu1 %v6096_v43  ;;  %v7495_v29 = vld [vmem:[#allocation88_spill] sm:$0xff] }
 0x581   :  { %2906 = vmatprep.subr.mxu0 %v6099_v24  ;;  %2977 = vmatprep.subr.mxu1 %v6102_v59 }
 0x582   :  { %2907 = vmatpush1.msra.mxu0 %v6105_v38  ;;  %2978 = vmatpush1.msra.mxu1 %v6108_v13 }
 0x583   :  { %2908 = vmatprep.subr.mxu0 %v6111_v62  ;;  %2979 = vmatprep.subr.mxu1 %v6114_v2  ;;  %v6129_v62 = vld [vmem:[#allocation2 + $0xa0] sm:$0xff]  ;;  %v6132_v2 = vld [vmem:[#allocation2 + $0xb0] sm:$0xff] }
 0x584   :  { %2909 = vmatpush1.msra.mxu0 %v6117_v20  ;;  %2980 = vmatpush1.msra.mxu1 %v6120_v44  ;;  %7470 = vst [vmem:[#allocation75_spill] sm:$0xff] %v6129_v62  ;;  %7471 = vst [vmem:[#allocation76_spill] sm:$0xff] %v6132_v2  ;;  %v6135_v20 = vld [vmem:[#allocation2 + $0x88] sm:$0xff]  ;;  %v6138_v44 = vld [vmem:[#allocation2 + $0x98] sm:$0xff] }
 0x585   :  { %2910 = vmatprep.subr.mxu0 %v6123_v51  ;;  %2981 = vmatprep.subr.mxu1 %v6126_v36  ;;  %7472 = vst [vmem:[#allocation77_spill] sm:$0xff] %v6135_v20  ;;  %7473 = vst [vmem:[#allocation78_spill] sm:$0xff] %v6138_v44  ;;  %v6141_v51 = vld [vmem:[#allocation2 + $0x80] sm:$0xff]  ;;  %v6144_v36 = vld [vmem:[#allocation2 + $0x90] sm:$0xff] }
 0x586   :  { %2911 = vmatpush1.msra.mxu0 %v6129_v62  ;;  %2982 = vmatpush1.msra.mxu1 %v6132_v2  ;;  %7474 = vst [vmem:[#allocation12_spill] sm:$0xff] %v6141_v51  ;;  %7475 = vst [vmem:[#allocation13_spill] sm:$0xff] %v6144_v36  ;;  %v6147_v62 = vld [vmem:[#allocation2 + $0x68] sm:$0xff]  ;;  %v6150_v2 = vld [vmem:[#allocation2 + $0x78] sm:$0xff] }
 0x587   :  { %2912 = vmatprep.subr.mxu0 %v6135_v20  ;;  %2983 = vmatprep.subr.mxu1 %v6138_v44  ;;  %7476 = vst [vmem:[#allocation14_spill] sm:$0xff] %v6147_v62  ;;  %7477 = vst [vmem:[#allocation15_spill] sm:$0xff] %v6150_v2  ;;  %v6153_v20 = vld [vmem:[#allocation2 + $0x60] sm:$0xff]  ;;  %v6156_v44 = vld [vmem:[#allocation2 + $0x70] sm:$0xff] }
 0x588   :  { %2913 = vmatpush1.msra.mxu0 %v6141_v51  ;;  %2984 = vmatpush1.msra.mxu1 %v6144_v36  ;;  %7478 = vst [vmem:[#allocation16_spill] sm:$0xff] %v6153_v20  ;;  %7479 = vst [vmem:[#allocation17_spill] sm:$0xff] %v6156_v44  ;;  %v6159_v51 = vld [vmem:[#allocation2 + $0x48] sm:$0xff]  ;;  %v6162_v36 = vld [vmem:[#allocation2 + $0x58] sm:$0xff] }
 0x589   :  { %2914 = vmatprep.subr.mxu0 %v6147_v62  ;;  %2985 = vmatprep.subr.mxu1 %v6150_v2  ;;  %7480 = vst [vmem:[#allocation18_spill] sm:$0xff] %v6159_v51  ;;  %7481 = vst [vmem:[#allocation19_spill] sm:$0xff] %v6162_v36  ;;  %v6165_v62 = vld [vmem:[#allocation2 + $0x40] sm:$0xff]  ;;  %v6168_v2 = vld [vmem:[#allocation2 + $0x50] sm:$0xff] }
 0x58a   :  { %2915 = vmatpush1.msra.mxu0 %v6153_v20  ;;  %2986 = vmatpush1.msra.mxu1 %v6156_v44  ;;  %7482 = vst [vmem:[#allocation20_spill] sm:$0xff] %v6165_v62  ;;  %7483 = vst [vmem:[#allocation21_spill] sm:$0xff] %v6168_v2  ;;  %v6171_v20 = vld [vmem:[#allocation2 + $0x28] sm:$0xff]  ;;  %v6174_v44 = vld [vmem:[#allocation2 + $0x38] sm:$0xff] }
 0x58b   :  { %2916 = vmatprep.subr.mxu0 %v6159_v51  ;;  %2987 = vmatprep.subr.mxu1 %v6162_v36  ;;  %7484 = vst [vmem:[#allocation22_spill] sm:$0xff] %v6171_v20  ;;  %7485 = vst [vmem:[#allocation23_spill] sm:$0xff] %v6174_v44  ;;  %v6177_v51 = vld [vmem:[#allocation2 + $0x20] sm:$0xff]  ;;  %v6180_v36 = vld [vmem:[#allocation2 + $0x30] sm:$0xff] }
 0x58c   :  { %2917 = vmatpush1.msra.mxu0 %v6165_v62  ;;  %2988 = vmatpush1.msra.mxu1 %v6168_v2  ;;  %7486 = vst [vmem:[#allocation24_spill] sm:$0xff] %v6177_v51  ;;  %7487 = vst [vmem:[#allocation25_spill] sm:$0xff] %v6180_v36  ;;  %v6183_v62 = vld [vmem:[#allocation2 + $0x8] sm:$0xff]  ;;  %v6186_v2 = vld [vmem:[#allocation2 + $0x18] sm:$0xff] }
 0x58d   :  { %2918 = vmatprep.subr.mxu0 %v6171_v20  ;;  %2989 = vmatprep.subr.mxu1 %v6174_v44  ;;  %7488 = vst [vmem:[#allocation26_spill] sm:$0xff] %v6183_v62  ;;  %7489 = vst [vmem:[#allocation27_spill] sm:$0xff] %v6186_v2  ;;  %v6189_v20 = vld [vmem:[#allocation2] sm:$0xff]  ;;  %v6193_v44 = vld [vmem:[#allocation2 + $0x10] sm:$0xff] }
 0x58e   :  { %2919 = vmatpush1.msra.mxu0 %v6177_v51  ;;  %2990 = vmatpush1.msra.mxu1 %v6180_v36  ;;  %7490 = vst [vmem:[#allocation95_spill] sm:$0xff] %v6189_v20  ;;  %7491 = vst [vmem:[#allocation79_spill] sm:$0xff] %v6193_v44  ;;  %v6197_v36 = vld [vmem:[#allocation6 + $0x1e8] sm:$0xff] }
 0x58f   :  { %2920 = vmatprep.subr.mxu0 %v6183_v62  ;;  %2991 = vmatprep.subr.mxu1 %v6186_v2  ;;  %7492 = vst [vmem:[#allocation80_spill] sm:$0xff] %v6197_v36  ;;  %v6200_v62 = vld [vmem:[#allocation6 + $0x1f8] sm:$0xff] }
 0x590   :  { %2921 = vmatpush1.msra.mxu0 %v6189_v20  ;;  %2954 = vmatprep.mubr.f32.mxu0 %v6985_v14  ;;  %7493 = vst [vmem:[#allocation81_spill] sm:$0xff] %v6200_v62  ;;  %v7494_v20 = vld [vmem:[#allocation86_spill] sm:$0xff] }
 0x591   :  { %2992 = vmatpush1.msra.mxu1 %v6193_v44  ;;  %3025 = vmatprep.mubr.f32.mxu1 %v6985_v14 }
 0x592   :  { %3050 = vmatprep.subr.mxu0 %v6197_v36  ;;  %3121 = vmatprep.subr.mxu1 %v6200_v62  ;;  %v7496_v36 = vld [vmem:[#allocation89_spill] sm:$0xff] }
 0x60c   :  { %v2560_v2 = vpop.f32.mrf.mxu0  ;;  %v2631_v59 = vpop.f32.mrf.mxu1 }
 0x60d   :  { %v2640_v51 = vrot.slane %v2560_v2, 6  ;;  %v2642_v56 = vrot.slane %v2631_v59, 6 }
 0x60e   :  { %v2562_v13 = vpop.f32.mrf.mxu0  ;;  %v2633_v0 = vpop.f32.mrf.mxu1 }
 0x60f   :  { %v2648_v38 = vadd.f32 %v2640_v51, %v7494_v20  ;;  %v2641_v24 = vrot.slane %v2562_v13, 6  ;;  %v2643_v42 = vrot.slane %v2633_v0, 6  ;;  %v2650_v2 = vadd.f32 %v2642_v56, %v7497_v18  ;;  %v7498_v56 = vld [vmem:[#allocation90_spill] sm:$0xff] }
 0x611   :  { %v3713_v43 = vmul.f32 -1.442695, %v2648_v38  ;;  %v2649_v44 = vadd.f32 %v2641_v24, %v7495_v29  ;;  %v2651_v11 = vadd.f32 %v2643_v42, %v7496_v36 }
 0x613   :  { %3908 = vpow2.f32 %v3713_v43  ;;  %v3714_v41 = vmul.f32 -1.442695, %v2649_v44  ;;  %v3715_v34 = vmul.f32 -1.442695, %v2651_v11 }
 0x615   :  { %3910 = vpow2.f32 %v3714_v41  ;;  %v2832_v41 = vrot.slane %v5907_v7, 6 }
 0x616   :  { %3912 = vpow2.f32 %v3715_v34 }
 0x620   :  { %v3909_v62 = vpop.eup %3908 }
 0x621   :  { %v2815_v16 = vadd.f32 1.0, %v3909_v62 }
 0x622   :  { %v3911_v26 = vpop.eup %3910 }
 0x623   :  { %3914 = vrcp.f32 %v2815_v16  ;;  %v2821_v13 = vadd.f32 1.0, %v3911_v26  ;;  %v3913_v24 = vpop.eup %3912 }
 0x624   :  { %3916 = vtanh.f32 %v2650_v2  ;;  %v2828_v42 = vadd.f32 1.0, %v3913_v24 }
 0x625   :  { %3918 = vrcp.f32 %v2821_v13 }
 0x626   :  { %3920 = vrcp.f32 %v2828_v42 }
 0x630   :  { %v3915_v43 = vpop.eup %3914 }
 0x631   :  { %v3917_v38 = vpop.eup %3916  ;;  %v2720_v0 = vpop.f32.mrf.mxu0 }
 0x632   :  { %v3919_v44 = vpop.eup %3918  ;;  %v2800_v59 = vrot.slane %v2720_v0, 4  ;;  %v2835_v11 = vmul.f32 %v3917_v38, %v3915_v43  ;;  %v2791_v18 = vpop.f32.mrf.mxu1 }
 0x633   :  { %v2834_v51 = vmul.f32 %v3919_v44, %v2832_v41  ;;  %v2722_v36 = vpop.f32.mrf.mxu0  ;;  %v2802_v38 = vrot.slane %v2791_v18, 4  ;;  %v3921_v41 = vpop.eup %3920  ;;  %v7499_v18 = vld [vmem:[#allocation73_spill] sm:$0xff] }
 0x634   :  { %v2808_v62 = vadd.f32 %v2800_v59, %v7498_v56  ;;  %v2801_v34 = vrot.slane %v2722_v36, 4  ;;  %v2793_v13 = vpop.f32.mrf.mxu1 }
 0x635   :  { %v6209_v16 = vadd.f32 %v2835_v11, %v2834_v51  ;;  %v2803_v24 = vrot.slane %v2793_v13, 4  ;;  %v2810_v59 = vadd.f32 %v2802_v38, %v7419_v10  ;;  %v7501_v13 = vld [vmem:[#allocation56_spill] sm:$0xff]  ;;  %v7504_v38 = vld [vmem:[#allocation59_spill] sm:$0xff] }
 0x636   :  { %v3716_v26 = vmul.f32 -1.442695, %v2808_v62  ;;  %v2809_v2 = vadd.f32 %v2801_v34, %v7417_v47 }
 0x637   :  { %3922 = vtanh.f32 %v6209_v16  ;;  %v2811_v43 = vadd.f32 %v2803_v24, %v7418_v17  ;;  %v7502_v24 = vld [vmem:[#allocation57_spill] sm:$0xff] }
 0x638   :  { %3924 = vpow2.f32 %v3716_v26  ;;  %v3717_v7 = vmul.f32 -1.442695, %v2809_v2 }
 0x639   :  { %v3718_v0 = vmul.f32 -1.442695, %v2811_v43  ;;  %v7503_v43 = vld [vmem:[#allocation58_spill] sm:$0xff] }
 0x63a   :  { %3926 = vpow2.f32 %v3717_v7  ;;  %v7500_v7 = vld [vmem:[#allocation94_spill] sm:$0xff] }
 0x63b   :  { %3928 = vpow2.f32 %v3718_v0  ;;  %v7506_v0 = vld [vmem:[#allocation61_spill] sm:$0xff] }
 0x644   :  { %v3923_v44 = vpop.eup %3922 }
 0x645   :  { %v3925_v36 = vpop.eup %3924  ;;  %v2838_v42 = vmul.f32 %v3923_v44, %v3921_v41  ;;  %v7505_v41 = vld [vmem:[#allocation60_spill] sm:$0xff]  ;;  %v7507_v44 = vld [vmem:[#allocation62_spill] sm:$0xff] }
 0x646   :  { %v2842_v11 = vadd.f32 1.0, %v3925_v36  ;;  %v7508_v36 = vld [vmem:[#allocation68_spill] sm:$0xff] }
 0x647   :  { %v3927_v51 = vpop.eup %3926  ;;  %v2873_v62 = vrot.slane %v2838_v42, %v7281_v8  ;;  %v2888_v34 = vrot.slane %v2838_v42, 2  ;;  %v7510_v42 = vld [vmem:[#allocation34_spill] sm:$0xff]  ;;  %v7515_v8 = vld [vmem:[#allocation39_spill] sm:$0xff] }
 0x648   :  { %3930 = vrcp.f32 %v2842_v11  ;;  %v2848_v26 = vadd.f32 1.0, %v3927_v51  ;;  %v7511_v11 = vld [vmem:[#allocation35_spill] sm:$0xff]  ;;  %v7512_v51 = vld [vmem:[#allocation36_spill] sm:$0xff] }
 0x649   :  { %3932 = vtanh.f32 %v2810_v59  ;;  %v2874_v2 = vcombine.high %v2873_v62, %v2873_v62  ;;  %2955 = vmatmul.mubr.f32.vlgmr.msra.gmra.mxu0 %v2888_v34  ;;  %3026 = vmatmul.mubr.f32.vlgmr.msra.gmra.mxu1 %v2888_v34  ;;  %v7509_v59 = vld [vmem:[#allocation33_spill] sm:$0xff]  ;;  %v3929_v62 = vpop.eup %3928 }
 0x64a   :  { %3934 = vrcp.f32 %v2848_v26  ;;  %3051 = vmatpush1.msra.mxu0 %v5915_v54  ;;  %3122 = vmatpush1.msra.mxu1 %v5918_v55  ;;  %v7513_v34 = vld [vmem:[#allocation37_spill] sm:$0xff]  ;;  %v7514_v26 = vld [vmem:[#allocation38_spill] sm:$0xff] }
 0x64b   :  { %3719 = vst [vmem:[%s6521_s7 + $0x14] sm:$0x3] %v2874_v2  ;;  %3052 = vmatprep.subr.mxu0 %v5921_v61  ;;  %3123 = vmatprep.subr.mxu1 %v5924_v39 }
 0x64c   :  { %3053 = vmatpush1.msra.mxu0 %v5927_v60  ;;  %3124 = vmatpush1.msra.mxu1 %v5930_v57 }
 0x64d   :  { %3054 = vmatprep.subr.mxu0 %v7499_v18  ;;  %3125 = vmatprep.subr.mxu1 %v7500_v7 }
 0x64e   :  { %3055 = vmatpush1.msra.mxu0 %v7501_v13  ;;  %3126 = vmatpush1.msra.mxu1 %v7502_v24 }
 0x64f   :  { %3056 = vmatprep.subr.mxu0 %v7503_v43  ;;  %3127 = vmatprep.subr.mxu1 %v7504_v38 }
 0x650   :  { %3057 = vmatpush1.msra.mxu0 %v7505_v41  ;;  %3128 = vmatpush1.msra.mxu1 %v7506_v0  ;;  %v7516_v0 = vld [vmem:[#allocation51_spill] sm:$0xff]  ;;  %v2855_v41 = vadd.f32 1.0, %v3929_v62 }
 0x651   :  { %3058 = vmatprep.subr.mxu0 %v7507_v44  ;;  %3129 = vmatprep.subr.mxu1 %v7508_v36  ;;  %v2859_v36 = vrot.slane %v6012_v31, 2  ;;  %v6268_v62 = vld [vmem:[#allocation6 + $0xb8] sm:$0xff] }
 0x652   :  { %3059 = vmatpush1.msra.mxu0 %v7509_v59  ;;  %3130 = vmatpush1.msra.mxu1 %v7510_v42  ;;  %v7517_v59 = vld [vmem:[#allocation52_spill] sm:$0xff]  ;;  %v7518_v42 = vld [vmem:[#allocation53_spill] sm:$0xff]  ;;  %3936 = vrcp.f32 %v2855_v41  ;;  %7522 = vst [vmem:[#allocation84_spill] sm:$0xff] %v6268_v62 }
 0x653   :  { %3060 = vmatprep.subr.mxu0 %v7511_v11  ;;  %3131 = vmatprep.subr.mxu1 %v7512_v51  ;;  %v7519_v51 = vld [vmem:[#allocation54_spill] sm:$0xff]  ;;  %v6271_v41 = vld [vmem:[#allocation6 + $0xa0] sm:$0xff] }
 0x654   :  { %3061 = vmatpush1.msra.mxu0 %v7513_v34  ;;  %3132 = vmatpush1.msra.mxu1 %v7514_v26  ;;  %7523 = vst [vmem:[#allocation85_spill] sm:$0xff] %v6271_v41 }
 0x655   :  { %v3931_v2 = vpop.eup %3930  ;;  %3062 = vmatprep.subr.mxu0 %v7515_v8  ;;  %3133 = vmatprep.subr.mxu1 %v7516_v0 }
 0x656   :  { %v3933_v44 = vpop.eup %3932  ;;  %3063 = vmatpush1.msra.mxu0 %v7517_v59  ;;  %3134 = vmatpush1.msra.mxu1 %v7518_v42 }
 0x657   :  { %v3935_v11 = vpop.eup %3934  ;;  %3064 = vmatprep.subr.mxu0 %v7519_v51  ;;  %3135 = vmatprep.subr.mxu1 %v5997_v27  ;;  %v2862_v34 = vmul.f32 %v3933_v44, %v3931_v2  ;;  %v6258_v44 = vld [vmem:[#allocation6 + $0xc0] sm:$0xff]  ;;  %v6280_v2 = vld [vmem:[#allocation6 + $0x98] sm:$0xff] }
 0x658   :  { %v2861_v26 = vmul.f32 %v3935_v11, %v2859_v36  ;;  %3065 = vmatpush1.msra.mxu0 %v6000_v1  ;;  %3136 = vmatpush1.msra.mxu1 %v6003_v50  ;;  %v6261_v36 = vld [vmem:[#allocation6 + $0xd0] sm:$0xff]  ;;  %v6265_v11 = vld [vmem:[#allocation6 + $0xa8] sm:$0xff]  ;;  %7526 = vst [vmem:[#allocation31_spill] sm:$0xff] %v6280_v2 }
 0x659   :  { %3066 = vmatprep.subr.mxu0 %v6006_v21  ;;  %3137 = vmatprep.subr.mxu1 %v6009_v32  ;;  %7520 = vst [vmem:[#allocation82_spill] sm:$0xff] %v6261_v36  ;;  %7521 = vst [vmem:[#allocation83_spill] sm:$0xff] %v6265_v11 }
 0x65a   :  { %v6252_v31 = vadd.f32 %v2862_v34, %v2861_v26  ;;  %3067 = vmatpush1.msra.mxu0 %v6014_v23  ;;  %3138 = vmatpush1.msra.mxu1 %v6017_v33  ;;  %v6274_v34 = vld [vmem:[#allocation6 + $0xb0] sm:$0xff]  ;;  %v6277_v26 = vld [vmem:[#allocation6 + $0x88] sm:$0xff] }
 0x65b   :  { %3068 = vmatprep.subr.mxu0 %v6020_v58  ;;  %3139 = vmatprep.subr.mxu1 %v6023_v3  ;;  %7524 = vst [vmem:[#allocation28_spill] sm:$0xff] %v6274_v34  ;;  %7525 = vst [vmem:[#allocation29_spill] sm:$0xff] %v6277_v26 }
 0x65c   :  { %3069 = vmatpush1.msra.mxu0 %v6258_v44  ;;  %3140 = vmatpush1.msra.mxu1 %v6261_v36  ;;  %3938 = vtanh.f32 %v6252_v31  ;;  %v6331_v36 = vld [vmem:[#allocation6] sm:$0xff] }
 0x65d   :  { %3070 = vmatprep.subr.mxu0 %v6265_v11  ;;  %3141 = vmatprep.subr.mxu1 %v6268_v62  ;;  %v6283_v11 = vld [vmem:[#allocation6 + $0x80] sm:$0xff]  ;;  %v6286_v62 = vld [vmem:[#allocation6 + $0x90] sm:$0xff] }
 0x65e   :  { %3071 = vmatpush1.msra.mxu0 %v6271_v41  ;;  %3142 = vmatpush1.msra.mxu1 %v6274_v34  ;;  %7527 = vst [vmem:[#allocation32_spill] sm:$0xff] %v6283_v11  ;;  %7528 = vst [vmem:[#allocation92_spill] sm:$0xff] %v6286_v62  ;;  %v6289_v41 = vld [vmem:[#allocation6 + $0x68] sm:$0xff]  ;;  %v6292_v34 = vld [vmem:[#allocation6 + $0x78] sm:$0xff] }
 0x65f   :  { %3072 = vmatprep.subr.mxu0 %v6277_v26  ;;  %3143 = vmatprep.subr.mxu1 %v6280_v2  ;;  %7529 = vst [vmem:[#allocation93_spill] sm:$0xff] %v6289_v41  ;;  %7530 = vst [vmem:[#allocation91_spill] sm:$0xff] %v6292_v34  ;;  %v6295_v26 = vld [vmem:[#allocation6 + $0x60] sm:$0xff]  ;;  %v6298_v2 = vld [vmem:[#allocation6 + $0x70] sm:$0xff] }
 0x660   :  { %3073 = vmatpush1.msra.mxu0 %v6283_v11  ;;  %3144 = vmatpush1.msra.mxu1 %v6286_v62  ;;  %7531 = vst [vmem:[#allocation40_spill] sm:$0xff] %v6295_v26  ;;  %7532 = vst [vmem:[#allocation41_spill] sm:$0xff] %v6298_v2  ;;  %v6301_v11 = vld [vmem:[#allocation6 + $0x48] sm:$0xff]  ;;  %v6304_v62 = vld [vmem:[#allocation6 + $0x58] sm:$0xff] }
 0x661   :  { %3074 = vmatprep.subr.mxu0 %v6289_v41  ;;  %3145 = vmatprep.subr.mxu1 %v6292_v34  ;;  %7533 = vst [vmem:[#allocation42_spill] sm:$0xff] %v6301_v11  ;;  %7534 = vst [vmem:[#allocation43_spill] sm:$0xff] %v6304_v62  ;;  %v6307_v41 = vld [vmem:[#allocation6 + $0x40] sm:$0xff]  ;;  %v6310_v34 = vld [vmem:[#allocation6 + $0x50] sm:$0xff] }
 0x662   :  { %3075 = vmatpush1.msra.mxu0 %v6295_v26  ;;  %3146 = vmatpush1.msra.mxu1 %v6298_v2  ;;  %7535 = vst [vmem:[#allocation44_spill] sm:$0xff] %v6307_v41  ;;  %7536 = vst [vmem:[#allocation45_spill] sm:$0xff] %v6310_v34  ;;  %v6313_v26 = vld [vmem:[#allocation6 + $0x28] sm:$0xff]  ;;  %v6316_v2 = vld [vmem:[#allocation6 + $0x38] sm:$0xff] }
 0x663   :  { %3076 = vmatprep.subr.mxu0 %v6301_v11  ;;  %3147 = vmatprep.subr.mxu1 %v6304_v62  ;;  %7537 = vst [vmem:[#allocation46_spill] sm:$0xff] %v6313_v26  ;;  %7538 = vst [vmem:[#allocation47_spill] sm:$0xff] %v6316_v2  ;;  %v6319_v11 = vld [vmem:[#allocation6 + $0x20] sm:$0xff]  ;;  %v6322_v62 = vld [vmem:[#allocation6 + $0x30] sm:$0xff] }
 0x664   :  { %3077 = vmatpush1.msra.mxu0 %v6307_v41  ;;  %3148 = vmatpush1.msra.mxu1 %v6310_v34  ;;  %7539 = vst [vmem:[#allocation86_spill] sm:$0xff] %v6319_v11  ;;  %7540 = vst [vmem:[#allocation88_spill] sm:$0xff] %v6322_v62  ;;  %v6325_v41 = vld [vmem:[#allocation6 + $0x8] sm:$0xff]  ;;  %v6328_v34 = vld [vmem:[#allocation6 + $0x18] sm:$0xff] }
 0x665   :  { %3078 = vmatprep.subr.mxu0 %v6313_v26  ;;  %3149 = vmatprep.subr.mxu1 %v6316_v2  ;;  %7541 = vst [vmem:[#allocation90_spill] sm:$0xff] %v6325_v41  ;;  %7542 = vst [vmem:[#allocation73_spill] sm:$0xff] %v6328_v34  ;;  %v3937_v26 = vpop.eup %3936  ;;  %v6335_v2 = vld [vmem:[#allocation6 + $0x10] sm:$0xff] }
 0x666   :  { %3079 = vmatpush1.msra.mxu0 %v6319_v11  ;;  %3150 = vmatpush1.msra.mxu1 %v6322_v62 }
 0x667   :  { %3080 = vmatprep.subr.mxu0 %v6325_v41  ;;  %3151 = vmatprep.subr.mxu1 %v6328_v34 }
 0x668   :  { %3081 = vmatpush1.msra.mxu0 %v6331_v36  ;;  %3114 = vmatprep.mubr.f32.mxu0 %v6985_v14 }
 0x669   :  { %v3939_v11 = vpop.eup %3938  ;;  %3152 = vmatpush1.msra.mxu1 %v6335_v2  ;;  %3185 = vmatprep.mubr.f32.mxu1 %v6985_v14 }
 0x66a   :  { %v2865_v62 = vmul.f32 %v3939_v11, %v3937_v26  ;;  %3286 = vmatprep.subr.mxu0 %v5776_v49  ;;  %3357 = vmatprep.subr.mxu1 %v5779_v40  ;;  %v7543_v49 = vld [vmem:[#allocation48_spill] sm:$0xff]  ;;  %v7544_v40 = vld [vmem:[#allocation49_spill] sm:$0xff]  ;;  %v7564_v11 = vld [vmem:[#allocation75_spill] sm:$0xff] }
 0x66b   :  { %v7568_v26 = vld [vmem:[#allocation12_spill] sm:$0xff] }
 0x66c   :  { %v2878_v34 = vcombine.high %v2865_v62, %v2865_v62  ;;  %v3048_v41 = vrot.slane %v2865_v62, 4  ;;  %v7565_v62 = vld [vmem:[#allocation76_spill] sm:$0xff] }
 0x66e   :  { %3738 = vst.sshfl [vmem:[%s6521_s7 + $0xa] sm:$0x3 pattern:$0x76325410] %v2878_v34  ;;  %3115 = vmatmul.mubr.f32.vlgmr.msra.gmra.mxu0 %v3048_v41  ;;  %3186 = vmatmul.mubr.f32.vlgmr.msra.gmra.mxu1 %v3048_v41  ;;  %v7566_v41 = vld [vmem:[#allocation77_spill] sm:$0xff]  ;;  %v7567_v34 = vld [vmem:[#allocation78_spill] sm:$0xff] }
 0x66f   :  { %3287 = vmatpush1.msra.mxu0 %v5782_v45  ;;  %3358 = vmatpush1.msra.mxu1 %v5785_v46  ;;  %v7545_v45 = vld [vmem:[#allocation50_spill] sm:$0xff]  ;;  %v7546_v46 = vld [vmem:[#allocation69_spill] sm:$0xff] }
 0x670   :  { %3288 = vmatprep.subr.mxu0 %v5788_v15  ;;  %3359 = vmatprep.subr.mxu1 %v5791_v12  ;;  %v7547_v15 = vld [vmem:[#allocation70_spill] sm:$0xff]  ;;  %v7548_v12 = vld [vmem:[#allocation71_spill] sm:$0xff] }
 0x671   :  { %3289 = vmatpush1.msra.mxu0 %v5794_v28  ;;  %3360 = vmatpush1.msra.mxu1 %v5797_v30  ;;  %v7549_v28 = vld [vmem:[#allocation72_spill] sm:$0xff]  ;;  %v7550_v30 = vld [vmem:[#allocation55_spill] sm:$0xff] }
 0x672   :  { %3290 = vmatprep.subr.mxu0 %v5800_v9  ;;  %3361 = vmatprep.subr.mxu1 %v5803_v25  ;;  %v7551_v9 = vld [vmem:[#allocation63_spill] sm:$0xff]  ;;  %v7552_v25 = vld [vmem:[#allocation64_spill] sm:$0xff] }
 0x673   :  { %3291 = vmatpush1.msra.mxu0 %v5806_v35  ;;  %3362 = vmatpush1.msra.mxu1 %v5809_v52  ;;  %v7553_v35 = vld [vmem:[#allocation65_spill] sm:$0xff]  ;;  %v7554_v52 = vld [vmem:[#allocation66_spill] sm:$0xff] }
 0x674   :  { %3292 = vmatprep.subr.mxu0 %v5812_v53  ;;  %3363 = vmatprep.subr.mxu1 %v7441_v19  ;;  %v7555_v53 = vld [vmem:[#allocation67_spill] sm:$0xff]  ;;  %v7556_v19 = vld [vmem:[#allocation96_spill] sm:$0xff] }
 0x675   :  { %3293 = vmatpush1.msra.mxu0 %v7442_v4  ;;  %3364 = vmatpush1.msra.mxu1 %v7443_v5  ;;  %v7557_v4 = vld [vmem:[#allocation97_spill] sm:$0xff]  ;;  %v7558_v5 = vld [vmem:[#allocation98_spill] sm:$0xff] }
 0x676   :  { %3294 = vmatprep.subr.mxu0 %v7444_v22  ;;  %3365 = vmatprep.subr.mxu1 %v7445_v48  ;;  %v7559_v22 = vld [vmem:[#allocation99_spill] sm:$0xff]  ;;  %v7560_v48 = vld [vmem:[#allocation100_spill] sm:$0xff] }
 0x677   :  { %3295 = vmatpush1.msra.mxu0 %v7446_v37  ;;  %3366 = vmatpush1.msra.mxu1 %v7447_v6  ;;  %v7561_v37 = vld [vmem:[#allocation101_spill] sm:$0xff]  ;;  %v7562_v6 = vld [vmem:[#allocation102_spill] sm:$0xff] }
 0x678   :  { %3296 = vmatprep.subr.mxu0 %v7448_v63  ;;  %3367 = vmatprep.subr.mxu1 %v7543_v49  ;;  %v7563_v63 = vld [vmem:[#allocation74_spill] sm:$0xff]  ;;  %v7569_v49 = vld [vmem:[#allocation13_spill] sm:$0xff] }
 0x679   :  { %3297 = vmatpush1.msra.mxu0 %v7544_v40  ;;  %3368 = vmatpush1.msra.mxu1 %v7545_v45  ;;  %v7570_v40 = vld [vmem:[#allocation14_spill] sm:$0xff]  ;;  %v7571_v45 = vld [vmem:[#allocation15_spill] sm:$0xff] }
 0x67a   :  { %3298 = vmatprep.subr.mxu0 %v7546_v46  ;;  %3369 = vmatprep.subr.mxu1 %v7547_v15  ;;  %v7572_v46 = vld [vmem:[#allocation16_spill] sm:$0xff]  ;;  %v7573_v15 = vld [vmem:[#allocation17_spill] sm:$0xff] }
 0x67b   :  { %3299 = vmatpush1.msra.mxu0 %v7548_v12  ;;  %3370 = vmatpush1.msra.mxu1 %v7549_v28  ;;  %v7574_v12 = vld [vmem:[#allocation18_spill] sm:$0xff]  ;;  %v7575_v28 = vld [vmem:[#allocation19_spill] sm:$0xff] }
 0x67c   :  { %3300 = vmatprep.subr.mxu0 %v7550_v30  ;;  %3371 = vmatprep.subr.mxu1 %v7551_v9  ;;  %v7576_v30 = vld [vmem:[#allocation20_spill] sm:$0xff]  ;;  %v7577_v9 = vld [vmem:[#allocation21_spill] sm:$0xff] }
 0x67d   :  { %3301 = vmatpush1.msra.mxu0 %v7552_v25  ;;  %3372 = vmatpush1.msra.mxu1 %v7553_v35  ;;  %v7578_v25 = vld [vmem:[#allocation22_spill] sm:$0xff]  ;;  %v7579_v35 = vld [vmem:[#allocation23_spill] sm:$0xff] }
 0x67e   :  { %3302 = vmatprep.subr.mxu0 %v7554_v52  ;;  %3373 = vmatprep.subr.mxu1 %v7555_v53  ;;  %v7580_v52 = vld [vmem:[#allocation24_spill] sm:$0xff]  ;;  %v7581_v53 = vld [vmem:[#allocation25_spill] sm:$0xff] }
 0x67f   :  { %3303 = vmatpush1.msra.mxu0 %v7556_v19  ;;  %3374 = vmatpush1.msra.mxu1 %v7557_v4  ;;  %v7582_v19 = vld [vmem:[#allocation26_spill] sm:$0xff]  ;;  %v7583_v4 = vld [vmem:[#allocation27_spill] sm:$0xff] }
 0x680   :  { %3304 = vmatprep.subr.mxu0 %v7558_v5  ;;  %3375 = vmatprep.subr.mxu1 %v7559_v22  ;;  %v7584_v5 = vld [vmem:[#allocation95_spill] sm:$0xff] }
 0x681   :  { %3305 = vmatpush1.msra.mxu0 %v7560_v48  ;;  %3376 = vmatpush1.msra.mxu1 %v7561_v37  ;;  %v7585_v22 = vld [vmem:[#allocation79_spill] sm:$0xff]  ;;  %v7586_v48 = vld [vmem:[#allocation80_spill] sm:$0xff]  ;;  %v7587_v37 = vld [vmem:[#allocation81_spill] sm:$0xff] }
 0x682   :  { %3306 = vmatprep.subr.mxu0 %v7562_v6  ;;  %3377 = vmatprep.subr.mxu1 %v7563_v63 }
 0x683   :  { %3307 = vmatpush1.msra.mxu0 %v7564_v11  ;;  %3378 = vmatpush1.msra.mxu1 %v7565_v62 }
 0x684   :  { %3308 = vmatprep.subr.mxu0 %v7566_v41  ;;  %3379 = vmatprep.subr.mxu1 %v7567_v34 }
 0x685   :  { %3309 = vmatpush1.msra.mxu0 %v7568_v26  ;;  %3380 = vmatpush1.msra.mxu1 %v7569_v49 }
 0x686   :  { %3310 = vmatprep.subr.mxu0 %v7570_v40  ;;  %3381 = vmatprep.subr.mxu1 %v7571_v45 }
 0x687   :  { %3311 = vmatpush1.msra.mxu0 %v7572_v46  ;;  %3382 = vmatpush1.msra.mxu1 %v7573_v15  ;;  %v7588_v15 = vld [vmem:[#allocation89_spill] sm:$0xff] }
 0x688   :  { %3312 = vmatprep.subr.mxu0 %v7574_v12  ;;  %3383 = vmatprep.subr.mxu1 %v7575_v28 }
 0x689   :  { %3313 = vmatpush1.msra.mxu0 %v7576_v30  ;;  %3384 = vmatpush1.msra.mxu1 %v7577_v9 }
 0x68a   :  { %3314 = vmatprep.subr.mxu0 %v7578_v25  ;;  %3385 = vmatprep.subr.mxu1 %v7579_v35  ;;  %v7589_v25 = vld [vmem:[#allocation87_spill] sm:$0xff] }
 0x68b   :  { %3315 = vmatpush1.msra.mxu0 %v7580_v52  ;;  %3386 = vmatpush1.msra.mxu1 %v7581_v53 }
 0x68c   :  { %3316 = vmatprep.subr.mxu0 %v7582_v19  ;;  %3387 = vmatprep.subr.mxu1 %v7583_v4 }
 0x68d   :  { %3317 = vmatpush1.msra.mxu0 %v7584_v5  ;;  %3350 = vmatprep.mubr.f32.mxu0 %v6985_v14 }
 0x68e   :  { %3388 = vmatpush1.msra.mxu1 %v7585_v22  ;;  %3421 = vmatprep.mubr.f32.mxu1 %v6985_v14 }
 0x68f   :  { %3446 = vmatprep.subr.mxu0 %v7586_v48  ;;  %3517 = vmatprep.subr.mxu1 %v7587_v37  ;;  %v3228_v48 = vrot.slane %v6209_v16, 6 }
 0x709   :  { %v2956_v6 = vpop.f32.mrf.mxu0  ;;  %v3027_v41 = vpop.f32.mrf.mxu1 }
 0x70a   :  { %v3036_v63 = vrot.slane %v2956_v6, 4  ;;  %v3038_v28 = vrot.slane %v3027_v41, 4 }
 0x70b   :  { %v2958_v11 = vpop.f32.mrf.mxu0  ;;  %v3029_v45 = vpop.f32.mrf.mxu1 }
 0x70c   :  { %v3044_v62 = vadd.f32 %v3036_v63, %v7494_v20  ;;  %v3037_v34 = vrot.slane %v2958_v11, 4  ;;  %v3039_v46 = vrot.slane %v3029_v45, 4  ;;  %v3046_v35 = vadd.f32 %v3038_v28, %v7589_v25 }
 0x70e   :  { %v3721_v26 = vmul.f32 -1.442695, %v3044_v62  ;;  %v3045_v49 = vadd.f32 %v3037_v34, %v7495_v29  ;;  %v3047_v12 = vadd.f32 %v3039_v46, %v7588_v15 }
 0x710   :  { %3940 = vpow2.f32 %v3721_v26  ;;  %v3722_v40 = vmul.f32 -1.442695, %v3045_v49  ;;  %v3723_v30 = vmul.f32 -1.442695, %v3047_v12 }
 0x712   :  { %3942 = vpow2.f32 %v3722_v40 }
 0x713   :  { %3944 = vpow2.f32 %v3723_v30 }
 0x71d   :  { %v3941_v9 = vpop.eup %3940 }
 0x71e   :  { %v3211_v52 = vadd.f32 1.0, %v3941_v9 }
 0x71f   :  { %v3943_v53 = vpop.eup %3942 }
 0x720   :  { %3946 = vrcp.f32 %v3211_v52  ;;  %v3217_v19 = vadd.f32 1.0, %v3943_v53  ;;  %v3945_v4 = vpop.eup %3944 }
 0x721   :  { %3948 = vtanh.f32 %v3046_v35  ;;  %v3224_v63 = vadd.f32 1.0, %v3945_v4 }
 0x722   :  { %3950 = vrcp.f32 %v3217_v19 }
 0x723   :  { %3952 = vrcp.f32 %v3224_v63 }
 0x72d   :  { %v3947_v5 = vpop.eup %3946 }
 0x72e   :  { %v3949_v22 = vpop.eup %3948  ;;  %v3116_v37 = vpop.f32.mrf.mxu0 }
 0x72f   :  { %v3951_v6 = vpop.eup %3950  ;;  %v3196_v11 = vrot.slane %v3116_v37, 6  ;;  %v3231_v62 = vmul.f32 %v3949_v22, %v3947_v5  ;;  %v3187_v49 = vpop.f32.mrf.mxu1 }
 0x730   :  { %v3230_v41 = vmul.f32 %v3951_v6, %v3228_v48  ;;  %v3118_v34 = vpop.f32.mrf.mxu0  ;;  %v3198_v35 = vrot.slane %v3187_v49, 6  ;;  %v3953_v52 = vpop.eup %3952 }
 0x731   :  { %v3204_v26 = vadd.f32 %v3196_v11, %v7498_v56  ;;  %v3197_v40 = vrot.slane %v3118_v34, 6  ;;  %v3189_v28 = vpop.f32.mrf.mxu1 }
 0x732   :  { %v6416_v45 = vadd.f32 %v3231_v62, %v3230_v41  ;;  %v3199_v30 = vrot.slane %v3189_v28, 6  ;;  %v3206_v5 = vadd.f32 %v3198_v35, %v7419_v10  ;;  %v3255_v41 = vrot.slane %v6252_v31, 2  ;;  %v7613_v31 = vld [vmem:[#allocation42_spill] sm:$0xff]  ;;  %v7618_v28 = vld [vmem:[#allocation47_spill] sm:$0xff] }
 0x733   :  { %v3724_v46 = vmul.f32 -1.442695, %v3204_v26  ;;  %v3205_v12 = vadd.f32 %v3197_v40, %v7417_v47  ;;  %v7621_v35 = vld [vmem:[#allocation90_spill] sm:$0xff] }
 0x734   :  { %3954 = vtanh.f32 %v6416_v45  ;;  %v3207_v9 = vadd.f32 %v3199_v30, %v7418_v17  ;;  %v7619_v30 = vld [vmem:[#allocation86_spill] sm:$0xff] }
 0x735   :  { %3956 = vpow2.f32 %v3724_v46  ;;  %v3725_v16 = vmul.f32 -1.442695, %v3205_v12  ;;  %v7615_v46 = vld [vmem:[#allocation44_spill] sm:$0xff]  ;;  %v7616_v12 = vld [vmem:[#allocation45_spill] sm:$0xff] }
 0x736   :  { %v3726_v53 = vmul.f32 -1.442695, %v3207_v9  ;;  %v7620_v9 = vld [vmem:[#allocation88_spill] sm:$0xff] }
 0x737   :  { %3958 = vpow2.f32 %v3725_v16  ;;  %v7617_v16 = vld [vmem:[#allocation46_spill] sm:$0xff] }
 0x738   :  { %3960 = vpow2.f32 %v3726_v53 }
 0x741   :  { %v3955_v19 = vpop.eup %3954 }
 0x742   :  { %v3957_v4 = vpop.eup %3956  ;;  %v3234_v22 = vmul.f32 %v3955_v19, %v3953_v52  ;;  %v7622_v52 = vld [vmem:[#allocation73_spill] sm:$0xff] }
 0x743   :  { %v3238_v48 = vadd.f32 1.0, %v3957_v4 }
 0x744   :  { %v3959_v37 = vpop.eup %3958  ;;  %v3263_v6 = vcombine.high %v3234_v22, %v3234_v22  ;;  %v3284_v63 = vrot.slane %v3234_v22, 4 }
 0x745   :  { %3962 = vrcp.f32 %v3238_v48  ;;  %v3244_v11 = vadd.f32 1.0, %v3959_v37 }
 0x746   :  { %3964 = vtanh.f32 %v3206_v5  ;;  %3739 = vst.sshfl [vmem:[%s6521_s7 + $0x18] sm:$0x3 pattern:$0x76325410] %v3263_v6  ;;  %3351 = vmatmul.mubr.f32.vlgmr.msra.gmra.mxu0 %v3284_v63  ;;  %3422 = vmatmul.mubr.f32.vlgmr.msra.gmra.mxu1 %v3284_v63  ;;  %v7623_v5 = vld [vmem:[#allocation30_spill] sm:$0xff] }
 0x747   :  { %3966 = vrcp.f32 %v3244_v11  ;;  %3447 = vmatpush1.msra.mxu0 %v5915_v54  ;;  %3518 = vmatpush1.msra.mxu1 %v5918_v55  ;;  %v7590_v54 = vld [vmem:[#allocation60_spill] sm:$0xff]  ;;  %v7591_v55 = vld [vmem:[#allocation61_spill] sm:$0xff] }
 0x748   :  { %3448 = vmatprep.subr.mxu0 %v5921_v61  ;;  %3519 = vmatprep.subr.mxu1 %v5924_v39  ;;  %v7592_v61 = vld [vmem:[#allocation62_spill] sm:$0xff]  ;;  %v7593_v39 = vld [vmem:[#allocation68_spill] sm:$0xff] }
 0x749   :  { %3449 = vmatpush1.msra.mxu0 %v5927_v60  ;;  %3520 = vmatpush1.msra.mxu1 %v5930_v57  ;;  %v7594_v60 = vld [vmem:[#allocation33_spill] sm:$0xff]  ;;  %v7595_v57 = vld [vmem:[#allocation34_spill] sm:$0xff] }
 0x74a   :  { %3450 = vmatprep.subr.mxu0 %v7499_v18  ;;  %3521 = vmatprep.subr.mxu1 %v7500_v7  ;;  %v7596_v18 = vld [vmem:[#allocation35_spill] sm:$0xff]  ;;  %v7597_v7 = vld [vmem:[#allocation36_spill] sm:$0xff] }
 0x74b   :  { %3451 = vmatpush1.msra.mxu0 %v7501_v13  ;;  %3522 = vmatpush1.msra.mxu1 %v7502_v24  ;;  %v3961_v13 = vpop.eup %3960  ;;  %v7598_v24 = vld [vmem:[#allocation37_spill] sm:$0xff] }
 0x74c   :  { %3452 = vmatprep.subr.mxu0 %v7503_v43  ;;  %3523 = vmatprep.subr.mxu1 %v7504_v38  ;;  %v7599_v43 = vld [vmem:[#allocation38_spill] sm:$0xff]  ;;  %v3251_v26 = vadd.f32 1.0, %v3961_v13 }
 0x74d   :  { %3453 = vmatpush1.msra.mxu0 %v7590_v54  ;;  %3524 = vmatpush1.msra.mxu1 %v7591_v55 }
 0x74e   :  { %3454 = vmatprep.subr.mxu0 %v7592_v61  ;;  %3525 = vmatprep.subr.mxu1 %v7593_v39  ;;  %3968 = vrcp.f32 %v3251_v26 }
 0x74f   :  { %3455 = vmatpush1.msra.mxu0 %v7594_v60  ;;  %3526 = vmatpush1.msra.mxu1 %v7595_v57 }
 0x750   :  { %3456 = vmatprep.subr.mxu0 %v7596_v18  ;;  %3527 = vmatprep.subr.mxu1 %v7597_v7 }
 0x751   :  { %3457 = vmatpush1.msra.mxu0 %v7598_v24  ;;  %3528 = vmatpush1.msra.mxu1 %v7599_v43 }
 0x752   :  { %v3963_v38 = vpop.eup %3962  ;;  %3458 = vmatprep.subr.mxu0 %v7515_v8  ;;  %3529 = vmatprep.subr.mxu1 %v7516_v0  ;;  %v7609_v0 = vld [vmem:[#allocation93_spill] sm:$0xff] }
 0x753   :  { %v3965_v62 = vpop.eup %3964  ;;  %3459 = vmatpush1.msra.mxu0 %v7517_v59  ;;  %3530 = vmatpush1.msra.mxu1 %v7518_v42  ;;  %v7610_v59 = vld [vmem:[#allocation91_spill] sm:$0xff]  ;;  %v7611_v42 = vld [vmem:[#allocation40_spill] sm:$0xff] }
 0x754   :  { %v3967_v34 = vpop.eup %3966  ;;  %3460 = vmatprep.subr.mxu0 %v7519_v51  ;;  %3531 = vmatprep.subr.mxu1 %v5997_v27  ;;  %v3258_v49 = vmul.f32 %v3965_v62, %v3963_v38  ;;  %v7602_v27 = vld [vmem:[#allocation84_spill] sm:$0xff]  ;;  %v7612_v51 = vld [vmem:[#allocation41_spill] sm:$0xff] }
 0x755   :  { %v3257_v40 = vmul.f32 %v3967_v34, %v3255_v41  ;;  %3461 = vmatpush1.msra.mxu0 %v6000_v1  ;;  %3532 = vmatpush1.msra.mxu1 %v6003_v50  ;;  %v7600_v1 = vld [vmem:[#allocation82_spill] sm:$0xff]  ;;  %v7601_v50 = vld [vmem:[#allocation83_spill] sm:$0xff]  ;;  %v3612_v34 = vrot.slane %v6416_v45, 6 }
 0x756   :  { %3462 = vmatprep.subr.mxu0 %v6006_v21  ;;  %3533 = vmatprep.subr.mxu1 %v6009_v32  ;;  %v7603_v21 = vld [vmem:[#allocation85_spill] sm:$0xff]  ;;  %v7604_v32 = vld [vmem:[#allocation28_spill] sm:$0xff] }
 0x757   :  { %v6458_v8 = vadd.f32 %v3258_v49, %v3257_v40  ;;  %3463 = vmatpush1.msra.mxu0 %v6014_v23  ;;  %3534 = vmatpush1.msra.mxu1 %v6017_v33  ;;  %v7605_v23 = vld [vmem:[#allocation29_spill] sm:$0xff]  ;;  %v7606_v33 = vld [vmem:[#allocation31_spill] sm:$0xff] }
 0x758   :  { %3464 = vmatprep.subr.mxu0 %v6020_v58  ;;  %3535 = vmatprep.subr.mxu1 %v6023_v3  ;;  %v7607_v58 = vld [vmem:[#allocation32_spill] sm:$0xff] }
 0x759   :  { %3465 = vmatpush1.msra.mxu0 %v6258_v44  ;;  %3536 = vmatpush1.msra.mxu1 %v7600_v1  ;;  %3970 = vtanh.f32 %v6458_v8  ;;  %v7608_v3 = vld [vmem:[#allocation92_spill] sm:$0xff]  ;;  %v7614_v44 = vld [vmem:[#allocation43_spill] sm:$0xff] }
 0x75a   :  { %3466 = vmatprep.subr.mxu0 %v7601_v50  ;;  %3537 = vmatprep.subr.mxu1 %v7602_v27 }
 0x75b   :  { %3467 = vmatpush1.msra.mxu0 %v7603_v21  ;;  %3538 = vmatpush1.msra.mxu1 %v7604_v32  ;;  %v3969_v53 = vpop.eup %3968 }
 0x75c   :  { %3468 = vmatprep.subr.mxu0 %v7605_v23  ;;  %3539 = vmatprep.subr.mxu1 %v7606_v33 }
 0x75d   :  { %3469 = vmatpush1.msra.mxu0 %v7607_v58  ;;  %3540 = vmatpush1.msra.mxu1 %v7608_v3 }
 0x75e   :  { %3470 = vmatprep.subr.mxu0 %v7609_v0  ;;  %3541 = vmatprep.subr.mxu1 %v7610_v59 }
 0x75f   :  { %3471 = vmatpush1.msra.mxu0 %v7611_v42  ;;  %3542 = vmatpush1.msra.mxu1 %v7612_v51 }
 0x760   :  { %3472 = vmatprep.subr.mxu0 %v7613_v31  ;;  %3543 = vmatprep.subr.mxu1 %v7614_v44 }
 0x761   :  { %3473 = vmatpush1.msra.mxu0 %v7615_v46  ;;  %3544 = vmatpush1.msra.mxu1 %v7616_v12 }
 0x762   :  { %3474 = vmatprep.subr.mxu0 %v7617_v16  ;;  %3545 = vmatprep.subr.mxu1 %v7618_v28 }
 0x763   :  { %3475 = vmatpush1.msra.mxu0 %v7619_v30  ;;  %3546 = vmatpush1.msra.mxu1 %v7620_v9  ;;  %v3639_v30 = vrot.slane %v6458_v8, 2 }
 0x764   :  { %3476 = vmatprep.subr.mxu0 %v7621_v35  ;;  %3547 = vmatprep.subr.mxu1 %v7622_v52 }
 0x765   :  { %3477 = vmatpush1.msra.mxu0 %v6331_v36  ;;  %3510 = vmatprep.mubr.f32.mxu0 %v6985_v14 }
 0x766   :  { %v3971_v19 = vpop.eup %3970  ;;  %3548 = vmatpush1.msra.mxu1 %v6335_v2  ;;  %3581 = vmatprep.mubr.f32.mxu1 %v6985_v14 }
 0x767   :  { %v3261_v4 = vmul.f32 %v3971_v19, %v3969_v53 }
 0x769   :  { %v3280_v22 = vrot.slane %v3261_v4, %v7623_v5  ;;  %v3444_v48 = vrot.slane %v3261_v4, 2 }
 0x76b   :  { %v3281_v37 = vcombine.high %v3280_v22, %v3280_v22  ;;  %3511 = vmatmul.mubr.f32.vlgmr.msra.gmra.mxu0 %v3444_v48  ;;  %3582 = vmatmul.mubr.f32.vlgmr.msra.gmra.mxu1 %v3444_v48 }
 0x76d   :  { %3728 = vst [vmem:[%s6521_s7 + $0x6] sm:$0x3] %v3281_v37 }
 0x806   :  { %v3352_v6 = vpop.f32.mrf.mxu0  ;;  %v3423_v63 = vpop.f32.mrf.mxu1 }
 0x807   :  { %v3432_v36 = vrot.slane %v3352_v6, 2  ;;  %v3434_v18 = vrot.slane %v3423_v63, 2 }
 0x808   :  { %v3354_v11 = vpop.f32.mrf.mxu0  ;;  %v3425_v61 = vpop.f32.mrf.mxu1 }
 0x809   :  { %v3440_v54 = vadd.f32 %v3432_v36, %v7494_v20  ;;  %v3433_v2 = vrot.slane %v3354_v11, 2  ;;  %v3435_v60 = vrot.slane %v3425_v61, 2  ;;  %v3442_v24 = vadd.f32 %v3434_v18, %v7589_v25 }
 0x80b   :  { %v3729_v55 = vmul.f32 -1.442695, %v3440_v54  ;;  %v3441_v14 = vadd.f32 %v3433_v2, %v7495_v29  ;;  %v3443_v57 = vadd.f32 %v3435_v60, %v7588_v15 }
 0x80d   :  { %3972 = vpow2.f32 %v3729_v55  ;;  %v3730_v39 = vmul.f32 -1.442695, %v3441_v14  ;;  %v3731_v7 = vmul.f32 -1.442695, %v3443_v57 }
 0x80f   :  { %3974 = vpow2.f32 %v3730_v39 }
 0x810   :  { %3976 = vpow2.f32 %v3731_v7 }
 0x81a   :  { %v3973_v13 = vpop.eup %3972 }
 0x81b   :  { %v3595_v43 = vadd.f32 1.0, %v3973_v13 }
 0x81c   :  { %v3975_v38 = vpop.eup %3974 }
 0x81d   :  { %3978 = vrcp.f32 %v3595_v43  ;;  %v3601_v20 = vadd.f32 1.0, %v3975_v38  ;;  %v3977_v29 = vpop.eup %3976 }
 0x81e   :  { %3980 = vtanh.f32 %v3442_v24  ;;  %v3608_v26 = vadd.f32 1.0, %v3977_v29 }
 0x81f   :  { %3982 = vrcp.f32 %v3601_v20 }
 0x820   :  { %3984 = vrcp.f32 %v3608_v26 }
 0x82a   :  { %v3979_v62 = vpop.eup %3978 }
 0x82b   :  { %v3981_v41 = vpop.eup %3980  ;;  %v3512_v49 = vpop.f32.mrf.mxu0 }
 0x82c   :  { %v3983_v15 = vpop.eup %3982  ;;  %v3588_v40 = vadd.f32 %v3512_v49, %v7498_v56  ;;  %v3615_v1 = vmul.f32 %v3981_v41, %v3979_v62  ;;  %v3583_v23 = vpop.f32.mrf.mxu1 }
 0x82d   :  { %v3614_v50 = vmul.f32 %v3983_v15, %v3612_v34  ;;  %v3514_v25 = vpop.f32.mrf.mxu0  ;;  %v3985_v0 = vpop.eup %3984  ;;  %v3590_v56 = vadd.f32 %v3583_v23, %v7419_v10 }
 0x82e   :  { %v3732_v27 = vmul.f32 -1.442695, %v3588_v40  ;;  %v3589_v21 = vadd.f32 %v3514_v25, %v7417_v47  ;;  %v3585_v58 = vpop.f32.mrf.mxu1 }
 0x82f   :  { %v3616_v32 = vadd.f32 %v3615_v1, %v3614_v50  ;;  %v3591_v45 = vadd.f32 %v3585_v58, %v7418_v17 }
 0x830   :  { %3986 = vpow2.f32 %v3732_v27  ;;  %v3733_v33 = vmul.f32 -1.442695, %v3589_v21 }
 0x831   :  { %3988 = vtanh.f32 %v3616_v32  ;;  %v3734_v3 = vmul.f32 -1.442695, %v3591_v45 }
 0x832   :  { %3990 = vpow2.f32 %v3733_v33 }
 0x833   :  { %3992 = vpow2.f32 %v3734_v3 }
 0x83d   :  { %v3987_v59 = vpop.eup %3986 }
 0x83e   :  { %v3989_v42 = vpop.eup %3988  ;;  %v3622_v51 = vadd.f32 1.0, %v3987_v59 }
 0x83f   :  { %v3991_v31 = vpop.eup %3990  ;;  %v3618_v44 = vmul.f32 %v3989_v42, %v3985_v0 }
 0x840   :  { %3994 = vrcp.f32 %v3622_v51  ;;  %v3628_v47 = vadd.f32 1.0, %v3991_v31  ;;  %v3993_v17 = vpop.eup %3992 }
 0x841   :  { %v3647_v46 = vcombine.high %v3618_v44, %v3618_v44  ;;  %3996 = vtanh.f32 %v3590_v56  ;;  %v3635_v35 = vadd.f32 1.0, %v3993_v17 }
 0x842   :  { %3998 = vrcp.f32 %v3628_v47 }
 0x843   :  { %v3654_v12 = vrot.slane %v3647_v46, %v7623_v5  ;;  %4000 = vrcp.f32 %v3635_v35 }
 0x845   :  { %v3655_v16 = vcombine.high %v3654_v12, %v3654_v12 }
 0x847   :  { %3735 = vst [vmem:[%s6521_s7 + $0x1c] sm:$0x3] %v3655_v16 }
 0x84d   :  { %v3995_v28 = vpop.eup %3994 }
 0x84e   :  { %v3997_v10 = vpop.eup %3996 }
 0x84f   :  { %v3999_v9 = vpop.eup %3998  ;;  %v3642_v52 = vmul.f32 %v3997_v10, %v3995_v28 }
 0x850   :  { %v3641_v53 = vmul.f32 %v3999_v9, %v3639_v30  ;;  %v4001_v4 = vpop.eup %4000 }
 0x852   :  { %v3643_v19 = vadd.f32 %v3642_v52, %v3641_v53 }
 0x854   :  { %4002 = vtanh.f32 %v3643_v19 }
 0x861   :  { %v4003_v22 = vpop.eup %4002 }
 0x862   :  { %v3645_v5 = vmul.f32 %v4003_v22, %v4001_v4 }
 0x864   :  { %3658 = vst [vmem:[%s6521_s7 + $0x2] sm:$0x3] %v3645_v5 }
 0x865   :  { %3663 = vsyncpa [#allocation3], 1 }
 0x866   :  { %3664 = vsyncpa [#allocation5], 1 }
 0x867   :  { %3665 = vsyncpa [#allocation8], 1 }

// kernel: generator_forward.3
= control target key start
LH: loop header
LB: loop body
LE: loop exit
PB: predicated region body
PF: predicated region fallthrough
CT: control target
= control target key end

     0   :  { %s7234_s0 = inlined_call_operand.vmem [shape: f32[2,256,8], index: 0, kind: input, shape index: {}]   ;;  %s7235_s1 = inlined_call_operand.vmem [shape: f32[3,128,256], index: 1, kind: input, shape index: {}]   ;;  %s7236_s2 = inlined_call_operand.vmem [shape: f32[128,1], index: 2, kind: input, shape index: {}]   ;;  %s7237_s3 = inlined_call_operand.vmem [shape: f32[3,64,128], index: 3, kind: input, shape index: {}]   ;;  %s7238_s4 = inlined_call_operand.vmem [shape: f32[64,1], index: 4, kind: input, shape index: {}]   ;;  %s7239_s5 = inlined_call_operand.vmem [shape: f32[3,32,64], index: 5, kind: input, shape index: {}]   ;;  %s7240_s6 = inlined_call_operand.vmem [shape: f32[32,1], index: 6, kind: input, shape index: {}]   ;;  %s7241_s7 = inlined_call_operand.vmem [shape: f32[3,16,32], index: 7, kind: input, shape index: {}]   ;;  %s7242_s8 = inlined_call_operand.vmem [shape: f32[16,1], index: 8, kind: input, shape index: {}]   ;;  %s7243_s9 = inlined_call_operand.vmem [shape: f32[3,8,16], index: 9, kind: input, shape index: {}]   ;;  %s7244_s10 = inlined_call_operand.vmem [shape: f32[8,1], index: 10, kind: input, shape index: {}]   ;;  %s7245_s11 = inlined_call_operand.vmem [shape: f32[3,4,8], index: 11, kind: input, shape index: {}]   ;;  %s7246_s12 = inlined_call_operand.vmem [shape: f32[4,1], index: 12, kind: input, shape index: {}]   ;;  %s7247_s13 = inlined_call_operand.vmem [shape: f32[3,1,4], index: 13, kind: input, shape index: {}]   ;;  %s7248_s14 = inlined_call_operand.<no memory space> [shape: f32[1,1], index: 14, kind: input, shape index: {}]   ;;  %s7249_s15 = inlined_call_operand.vmem [shape: f32[8,16], index: 15, kind: input, shape index: {}]   ;;  %s7250_s16 = inlined_call_operand.vmem [shape: f32[16,64], index: 16, kind: input, shape index: {}]   ;;  %s7251_s17 = inlined_call_operand.vmem [shape: f32[64,256], index: 17, kind: input, shape index: {}]   ;;  %s7252_s18 = inlined_call_operand.hbm [shape: f32[2,1,256], index: 18, kind: output, shape index: {}]  }
   0x1   :  { %7271 = sst [smem:[#allocation31_spill]] %s7234_s0  ;;  %v23_v0 = vstv %s7248_s14 }
   0x2   :  { %7272 = sst [smem:[#allocation32_spill]] %s7235_s1  ;;  %24 = vst [vmem:[#allocation3] sm:$0x1] %v23_v0 }
   0x3   :  { %7273 = sst [smem:[#allocation33_spill]] %s7236_s2 }
   0x4   :  { %25 = vsyncpa [#allocation5], 0 }
   0x5   :  { %27 = vsyncpa [#allocation5 + $0x1], 0  ;;  %s5551_s29 = smov 0   ;;  %s5553_s30 = smov 0  }
   0x6   :  { %s5555_s0 = smov 0   ;;  %s5557_s19 = smov 0  }
   0x7 LB: > { %7274 = sst [smem:[#allocation7_spill]] %s5431_s29  ;;  %s5572_s14 = sadd.s32 4294967295, %s5443_s19   ;;  %s5443_s19 = sphi %s5557_s19, %s7328_s19   ;;  %s5439_s0 = sphi %s5555_s0, %s7330_s0   ;;  %s5435_s30 = sphi %s5553_s30, %s7332_s30   ;;  %s5431_s29 = sphi %s5551_s29, %s7331_s29  }
   0x8   : > { %7275 = sst [smem:[#allocation8_spill]] %s5439_s0  ;;  %s4493_s1 = sadd.s32 4294967294, %s5443_s19  }
   0x9   : > { %7276 = sst [smem:[#allocation9_spill]] %s5443_s19  ;;  %s5576_s20 = sadd.s32 1, %s5443_s19  }
   0xa   : > { %7277 = sst [smem:[#allocation10_spill]] %s5576_s20  ;;  %s423_s21 = sadd.s32 1, %s5439_s0 }
   0xb   : > { %s420_s22 = ssub.s32 %s5443_s19, %s5576_s20  ;;  %p433_p0 = scmp.ne.s32.totalorder %s5439_s0, %s5435_s30 }
   0xc   : > { %p421_p1 = scmp.eq.s32.totalorder %s420_s22, 0  ;;  %p434_p2 = scmp.eq.s32.totalorder %s5572_s14, 1 }
   0xd   : > { %p439_p3 = scmp.ne.s32.totalorder %s5435_s30, %s5431_s29  ;;  %p440_p4 = scmp.eq.s32.totalorder %s4493_s1, 1 }
   0xe   : > { %s5587_s2 = scalar_select %p421_p1, %s5439_s0, %s423_s21  }
   0xf   : > { %p5589_p5 = por %p434_p2, %p433_p0  ;;  %p5593_p6 = por %p440_p4, %p439_p3 }
  0x10   : > { %7278 = sst [smem:[#allocation11_spill]] %s5587_s2  ;;  %p4496_p7 = scmp.ge.s32.totalorder %s5443_s19, 1 }
  0x11   : > { %s7280_s24 = scalar_select %p5593_p6, 1, 0 }
  0x12   : > { %p517_p8 = scmp.lt.s32.totalorder %s5443_s19, 3 }
  0x13   : > { %7281 = sst [smem:[#allocation12_spill]] %s7280_s24 }
  0x14   : > { %p518_p9 = pnand %p4496_p7, %p517_p8 }
  0x16   : > { %521 = sbr.rel (%p518_p9) target bundleno = 4077 (0xfed), region = 92 }
  0x1b   : > { %p571_p10 = scmp.lt.s32.totalorder %s5572_s14, 1  ;;  %vm608_vm0 = vcmask 7168   ;;  %vm641_vm1 = vcmask 80968   ;;  %v7266_v1 = vmov 0.0   ;;  %s7282_s1 = sld [smem:[#allocation31_spill]]  ;;  %vm802_vm2 = vcmask 72712  }
  0x1c   : > { %640 = vst.msk [vmem:[#allocation2 + $0x2e8] sm:$0xff] %vm608_vm0, %v7266_v1  ;;  %609 = vst.msk [vmem:[#allocation2] sm:$0xff] %vm608_vm0, %v7266_v1  ;;  %s7255_s22 = smov 1   ;;  %s7283_s28 = sld [smem:[#allocation32_spill]] }
  0x1d   : > { %610 = vst.msk [vmem:[#allocation2 + $0x18] sm:$0xff] %vm608_vm0, %v7266_v1  ;;  %611 = vst.msk [vmem:[#allocation2 + $0x30] sm:$0xff] %vm608_vm0, %v7266_v1  ;;  %s5667_s25 = scalar_select %p571_p10, %s5572_s14, 1 }
  0x1e   : > { %612 = vst.msk [vmem:[#allocation2 + $0x48] sm:$0xff] %vm608_vm0, %v7266_v1  ;;  %613 = vst.msk [vmem:[#allocation2 + $0x60] sm:$0xff] %vm608_vm0, %v7266_v1  ;;  %s7322_s27 = smov 127  }
  0x1f   : > { %614 = vst.msk [vmem:[#allocation2 + $0x78] sm:$0xff] %vm608_vm0, %v7266_v1  ;;  %615 = vst.msk [vmem:[#allocation2 + $0x90] sm:$0xff] %vm608_vm0, %v7266_v1  ;;  %s4647_s26 = sshll.u32 %s5667_s25, 8  ;;  %s7260_s25 = smov 127  }
  0x20   : > { %616 = vst.msk [vmem:[#allocation2 + $0xa8] sm:$0xff] %vm608_vm0, %v7266_v1  ;;  %617 = vst.msk [vmem:[#allocation2 + $0xc0] sm:$0xff] %vm608_vm0, %v7266_v1 }
  0x21   : > { %618 = vst.msk [vmem:[#allocation2 + $0xd8] sm:$0xff] %vm608_vm0, %v7266_v1  ;;  %619 = vst.msk [vmem:[#allocation2 + $0xf0] sm:$0xff] %vm608_vm0, %v7266_v1  ;;  %s5737_s21 = scalar_lea.vmem %s7282_s1, %s4647_s26  ;;  %s7284_s26 = sld [smem:[#allocation33_spill]] }
  0x22   : > { %620 = vst.msk [vmem:[#allocation2 + $0x108] sm:$0xff] %vm608_vm0, %v7266_v1  ;;  %621 = vst.msk [vmem:[#allocation2 + $0x120] sm:$0xff] %vm608_vm0, %v7266_v1  ;;  %v607_v2 = vld [vmem:[%s5737_s21 + $0xf8] sm:$0xff]  ;;  %v606_v3 = vld [vmem:[%s5737_s21 + $0xf0] sm:$0xff]  ;;  %s7324_s1 = smov 126  }
  0x23   : > { %622 = vst.msk [vmem:[#allocation2 + $0x138] sm:$0xff] %vm608_vm0, %v7266_v1  ;;  %623 = vst.msk [vmem:[#allocation2 + $0x150] sm:$0xff] %vm608_vm0, %v7266_v1  ;;  %768 = vrot.lane.b32.xlu0 %v607_v2, %s7255_s22  ;;  %766 = vrot.lane.b32.xlu1 %v606_v3, %s7255_s22  ;;  %v591_v4 = vld [vmem:[%s5737_s21 + $0x78] sm:$0xff]  ;;  %v590_v5 = vld [vmem:[%s5737_s21 + $0x70] sm:$0xff] }
  0x24   : > { %624 = vst.msk [vmem:[#allocation2 + $0x168] sm:$0xff] %vm608_vm0, %v7266_v1  ;;  %625 = vst.msk [vmem:[#allocation2 + $0x180] sm:$0xff] %vm608_vm0, %v7266_v1  ;;  %v605_v6 = vld [vmem:[%s5737_s21 + $0xe8] sm:$0xff]  ;;  %v604_v8 = vld [vmem:[%s5737_s21 + $0xe0] sm:$0xff] }
  0x25   : > { %626 = vst.msk [vmem:[#allocation2 + $0x198] sm:$0xff] %vm608_vm0, %v7266_v1  ;;  %627 = vst.msk [vmem:[#allocation2 + $0x1b0] sm:$0xff] %vm608_vm0, %v7266_v1  ;;  %v589_v7 = vld [vmem:[%s5737_s21 + $0x68] sm:$0xff]  ;;  %v588_v9 = vld [vmem:[%s5737_s21 + $0x60] sm:$0xff] }
  0x26   : > { %628 = vst.msk [vmem:[#allocation2 + $0x1c8] sm:$0xff] %vm608_vm0, %v7266_v1  ;;  %629 = vst.msk [vmem:[#allocation2 + $0x1e0] sm:$0xff] %vm608_vm0, %v7266_v1  ;;  %v603_v10 = vld [vmem:[%s5737_s21 + $0xd8] sm:$0xff]  ;;  %v602_v12 = vld [vmem:[%s5737_s21 + $0xd0] sm:$0xff] }
  0x27   : > { %630 = vst.msk [vmem:[#allocation2 + $0x1f8] sm:$0xff] %vm608_vm0, %v7266_v1  ;;  %631 = vst.msk [vmem:[#allocation2 + $0x210] sm:$0xff] %vm608_vm0, %v7266_v1  ;;  %736 = vrot.lane.b32.xlu0 %v591_v4, %s7255_s22  ;;  %734 = vrot.lane.b32.xlu1 %v590_v5, %s7255_s22  ;;  %v587_v11 = vld [vmem:[%s5737_s21 + $0x58] sm:$0xff]  ;;  %v586_v13 = vld [vmem:[%s5737_s21 + $0x50] sm:$0xff] }
  0x28   : > { %632 = vst.msk [vmem:[#allocation2 + $0x228] sm:$0xff] %vm608_vm0, %v7266_v1  ;;  %633 = vst.msk [vmem:[#allocation2 + $0x240] sm:$0xff] %vm608_vm0, %v7266_v1  ;;  %v601_v14 = vld [vmem:[%s5737_s21 + $0xc8] sm:$0xff]  ;;  %v600_v16 = vld [vmem:[%s5737_s21 + $0xc0] sm:$0xff] }
  0x29   : > { %634 = vst.msk [vmem:[#allocation2 + $0x258] sm:$0xff] %vm608_vm0, %v7266_v1  ;;  %635 = vst.msk [vmem:[#allocation2 + $0x270] sm:$0xff] %vm608_vm0, %v7266_v1  ;;  %v585_v15 = vld [vmem:[%s5737_s21 + $0x48] sm:$0xff]  ;;  %v584_v17 = vld [vmem:[%s5737_s21 + $0x40] sm:$0xff] }
  0x2a   : > { %636 = vst.msk [vmem:[#allocation2 + $0x288] sm:$0xff] %vm608_vm0, %v7266_v1  ;;  %637 = vst.msk [vmem:[#allocation2 + $0x2a0] sm:$0xff] %vm608_vm0, %v7266_v1  ;;  %v599_v18 = vld [vmem:[%s5737_s21 + $0xb8] sm:$0xff]  ;;  %v598_v20 = vld [vmem:[%s5737_s21 + $0xb0] sm:$0xff] }
  0x2b   : > { %638 = vst.msk [vmem:[#allocation2 + $0x2b8] sm:$0xff] %vm608_vm0, %v7266_v1  ;;  %639 = vst.msk [vmem:[#allocation2 + $0x2d0] sm:$0xff] %vm608_vm0, %v7266_v1  ;;  %764 = vrot.lane.b32.xlu0 %v605_v6, %s7255_s22  ;;  %732 = vrot.lane.b32.xlu1 %v589_v7, %s7255_s22  ;;  %v583_v19 = vld [vmem:[%s5737_s21 + $0x38] sm:$0xff]  ;;  %v582_v21 = vld [vmem:[%s5737_s21 + $0x30] sm:$0xff] }
  0x2c   : > { %673 = vst.msk [vmem:[#allocation2 + $0x2e8] sm:$0xff] %vm641_vm1, %v7266_v1  ;;  %672 = vst.msk [vmem:[#allocation2 + $0x2d0] sm:$0xff] %vm641_vm1, %v7266_v1  ;;  %v597_v22 = vld [vmem:[%s5737_s21 + $0xa8] sm:$0xff]  ;;  %v596_v24 = vld [vmem:[%s5737_s21 + $0xa0] sm:$0xff] }
  0x2d   : > { %642 = vst.msk [vmem:[#allocation2] sm:$0xff] %vm641_vm1, %v7266_v1  ;;  %643 = vst.msk [vmem:[#allocation2 + $0x18] sm:$0xff] %vm641_vm1, %v7266_v1  ;;  %v581_v23 = vld [vmem:[%s5737_s21 + $0x28] sm:$0xff]  ;;  %v580_v25 = vld [vmem:[%s5737_s21 + $0x20] sm:$0xff] }
  0x2e   : > { %644 = vst.msk [vmem:[#allocation2 + $0x30] sm:$0xff] %vm641_vm1, %v7266_v1  ;;  %645 = vst.msk [vmem:[#allocation2 + $0x48] sm:$0xff] %vm641_vm1, %v7266_v1  ;;  %v595_v26 = vld [vmem:[%s5737_s21 + $0x98] sm:$0xff]  ;;  %v594_v28 = vld [vmem:[%s5737_s21 + $0x90] sm:$0xff] }
  0x2f   : > { %646 = vst.msk [vmem:[#allocation2 + $0x60] sm:$0xff] %vm641_vm1, %v7266_v1  ;;  %647 = vst.msk [vmem:[#allocation2 + $0x78] sm:$0xff] %vm641_vm1, %v7266_v1  ;;  %762 = vrot.lane.b32.xlu0 %v604_v8, %s7255_s22  ;;  %730 = vrot.lane.b32.xlu1 %v588_v9, %s7255_s22  ;;  %v579_v27 = vld [vmem:[%s5737_s21 + $0x18] sm:$0xff]  ;;  %v578_v29 = vld [vmem:[%s5737_s21 + $0x10] sm:$0xff] }
  0x30   : > { %648 = vst.msk [vmem:[#allocation2 + $0x90] sm:$0xff] %vm641_vm1, %v7266_v1  ;;  %649 = vst.msk [vmem:[#allocation2 + $0xa8] sm:$0xff] %vm641_vm1, %v7266_v1  ;;  %v593_v30 = vld [vmem:[%s5737_s21 + $0x88] sm:$0xff]  ;;  %v592_v32 = vld [vmem:[%s5737_s21 + $0x80] sm:$0xff] }
  0x31   : > { %650 = vst.msk [vmem:[#allocation2 + $0xc0] sm:$0xff] %vm641_vm1, %v7266_v1  ;;  %651 = vst.msk [vmem:[#allocation2 + $0xd8] sm:$0xff] %vm641_vm1, %v7266_v1  ;;  %v577_v31 = vld [vmem:[%s5737_s21 + $0x8] sm:$0xff]  ;;  %v576_v33 = vld [vmem:[%s5737_s21] sm:$0xff]  ;;  %s568_s21 = sand.u32 1, %s5435_s30  }
  0x32   : > { %652 = vst.msk [vmem:[#allocation2 + $0xf0] sm:$0xff] %vm641_vm1, %v7266_v1  ;;  %653 = vst.msk [vmem:[#allocation2 + $0x108] sm:$0xff] %vm641_vm1, %v7266_v1  ;;  %s4497_s19 = sshll.u32 %s568_s21, 1  ;;  %s4420_s2 = scalar_lea.sflag [#allocation5], %s568_s21 }
  0x33   : > { %654 = vst.msk [vmem:[#allocation2 + $0x120] sm:$0xff] %vm641_vm1, %v7266_v1  ;;  %655 = vst.msk [vmem:[#allocation2 + $0x138] sm:$0xff] %vm641_vm1, %v7266_v1  ;;  %760 = vrot.lane.b32.xlu0 %v603_v10, %s7255_s22  ;;  %728 = vrot.lane.b32.xlu1 %v587_v11, %s7255_s22 }
  0x34   : > { %656 = vst.msk [vmem:[#allocation2 + $0x150] sm:$0xff] %vm641_vm1, %v7266_v1  ;;  %657 = vst.msk [vmem:[#allocation2 + $0x168] sm:$0xff] %vm641_vm1, %v7266_v1 }
  0x35   : > { %658 = vst.msk [vmem:[#allocation2 + $0x180] sm:$0xff] %vm641_vm1, %v7266_v1  ;;  %659 = vst.msk [vmem:[#allocation2 + $0x198] sm:$0xff] %vm641_vm1, %v7266_v1 }
  0x36   : > { %660 = vst.msk [vmem:[#allocation2 + $0x1b0] sm:$0xff] %vm641_vm1, %v7266_v1  ;;  %661 = vst.msk [vmem:[#allocation2 + $0x1c8] sm:$0xff] %vm641_vm1, %v7266_v1 }
  0x37   : > { %662 = vst.msk [vmem:[#allocation2 + $0x1e0] sm:$0xff] %vm641_vm1, %v7266_v1  ;;  %663 = vst.msk [vmem:[#allocation2 + $0x1f8] sm:$0xff] %vm641_vm1, %v7266_v1  ;;  %758 = vrot.lane.b32.xlu0 %v602_v12, %s7255_s22  ;;  %726 = vrot.lane.b32.xlu1 %v586_v13, %s7255_s22 }
  0x38   : > { %664 = vst.msk [vmem:[#allocation2 + $0x210] sm:$0xff] %vm641_vm1, %v7266_v1  ;;  %665 = vst.msk [vmem:[#allocation2 + $0x228] sm:$0xff] %vm641_vm1, %v7266_v1 }
  0x39   : > { %666 = vst.msk [vmem:[#allocation2 + $0x240] sm:$0xff] %vm641_vm1, %v7266_v1  ;;  %667 = vst.msk [vmem:[#allocation2 + $0x258] sm:$0xff] %vm641_vm1, %v7266_v1 }
  0x3a   : > { %668 = vst.msk [vmem:[#allocation2 + $0x270] sm:$0xff] %vm641_vm1, %v7266_v1  ;;  %669 = vst.msk [vmem:[#allocation2 + $0x288] sm:$0xff] %vm641_vm1, %v7266_v1 }
  0x3b   : > { %670 = vst.msk [vmem:[#allocation2 + $0x2a0] sm:$0xff] %vm641_vm1, %v7266_v1  ;;  %671 = vst.msk [vmem:[#allocation2 + $0x2b8] sm:$0xff] %vm641_vm1, %v7266_v1  ;;  %756 = vrot.lane.b32.xlu0 %v601_v14, %s7255_s22  ;;  %724 = vrot.lane.b32.xlu1 %v585_v15, %s7255_s22 }
  0x3f   : > { %754 = vrot.lane.b32.xlu0 %v600_v16, %s7255_s22  ;;  %722 = vrot.lane.b32.xlu1 %v584_v17, %s7255_s22 }
  0x43   : > { %752 = vrot.lane.b32.xlu0 %v599_v18, %s7255_s22  ;;  %720 = vrot.lane.b32.xlu1 %v583_v19, %s7255_s22 }
  0x47   : > { %750 = vrot.lane.b32.xlu0 %v598_v20, %s7255_s22  ;;  %718 = vrot.lane.b32.xlu1 %v582_v21, %s7255_s22 }
  0x4b   : > { %748 = vrot.lane.b32.xlu0 %v597_v22, %s7255_s22  ;;  %716 = vrot.lane.b32.xlu1 %v581_v23, %s7255_s22 }
  0x4f   : > { %746 = vrot.lane.b32.xlu0 %v596_v24, %s7255_s22  ;;  %714 = vrot.lane.b32.xlu1 %v580_v25, %s7255_s22 }
  0x53   : > { %744 = vrot.lane.b32.xlu0 %v595_v26, %s7255_s22  ;;  %712 = vrot.lane.b32.xlu1 %v579_v27, %s7255_s22 }
  0x57   : > { %742 = vrot.lane.b32.xlu0 %v594_v28, %s7255_s22  ;;  %710 = vrot.lane.b32.xlu1 %v578_v29, %s7255_s22 }
  0x5b   : > { %740 = vrot.lane.b32.xlu0 %v593_v30, %s7255_s22  ;;  %708 = vrot.lane.b32.xlu1 %v577_v31, %s7255_s22  ;;  %v4501_v31 = vld [vmem:[%s7283_s28 + $0x108] sm:$0xff] }
  0x5c   : > { %1124 = vmatprep.mubr.f32.mxu0 %v4501_v31 }
  0x5f   : > { %738 = vrot.lane.b32.xlu0 %v592_v32, %s7255_s22  ;;  %706 = vrot.lane.b32.xlu1 %v576_v33, %s7255_s22  ;;  %v836_v32 = vld [vmem:[%s7283_s28 + $0x8] sm:$0xff]  ;;  %s7258_s22 = smov 126  }
  0x60   : > { %1269 = vmatprep.mubr.f32.mxu1 %v836_v32  ;;  %v1652_v32 = vld [vmem:[%s7284_s26 + $0x60] sm:$0xff] }
  0x95   : > { %v769_v34 = vpop.permute.xlu0 %768  ;;  %v767_v35 = vpop.permute.xlu1 %766 }
  0x96   : > { %834 = vst.msk [vmem:[#allocation2 + $0x2e8] sm:$0xff] %vm802_vm2, %v769_v34  ;;  %833 = vst.msk [vmem:[#allocation2 + $0x2d0] sm:$0xff] %vm802_vm2, %v767_v35 }
  0x99   : > { %v737_v36 = vpop.permute.xlu0 %736  ;;  %v735_v37 = vpop.permute.xlu1 %734 }
  0x9a   : > { %818 = vst.msk [vmem:[#allocation2 + $0x168] sm:$0xff] %vm802_vm2, %v737_v36  ;;  %817 = vst.msk [vmem:[#allocation2 + $0x150] sm:$0xff] %vm802_vm2, %v735_v37  ;;  %v835_v37 = vld [vmem:[%s7283_s28] sm:$0xff] }
  0x9d   : > { %v765_v38 = vpop.permute.xlu0 %764  ;;  %v5807_v39 = vld [vmem:[#allocation2 + $0x2e8] sm:$0xff]  ;;  %v733_v40 = vpop.permute.xlu1 %732  ;;  %v5814_v41 = vld [vmem:[#allocation2 + $0x2d0] sm:$0xff] }
  0x9e   : > { %832 = vst.msk [vmem:[#allocation2 + $0x2b8] sm:$0xff] %vm802_vm2, %v765_v38  ;;  %4729 = vmatprep.subr.mxu1 %v5807_v39  ;;  %1026 = vrot.lane.b32.xlu0 %v5807_v39, %s7260_s25  ;;  %816 = vst.msk [vmem:[#allocation2 + $0x138] sm:$0xff] %vm802_vm2, %v733_v40  ;;  %v838_v38 = vld [vmem:[%s7283_s28 + $0x18] sm:$0xff]  ;;  %v837_v40 = vld [vmem:[%s7283_s28 + $0x10] sm:$0xff] }
  0xa1   : > { %v763_v42 = vpop.permute.xlu0 %762  ;;  %v5816_v43 = vld [vmem:[#allocation2 + $0x168] sm:$0xff]  ;;  %v731_v44 = vpop.permute.xlu1 %730  ;;  %v5818_v45 = vld [vmem:[#allocation2 + $0x150] sm:$0xff] }
  0xa2   : > { %831 = vst.msk [vmem:[#allocation2 + $0x2a0] sm:$0xff] %vm802_vm2, %v763_v42  ;;  %1024 = vrot.lane.b32.xlu0 %v5814_v41, %s7260_s25  ;;  %4730 = vmatpush3.msra.mxu1 %v5816_v43  ;;  %815 = vst.msk [vmem:[#allocation2 + $0x120] sm:$0xff] %vm802_vm2, %v731_v44  ;;  %v840_v42 = vld [vmem:[%s7283_s28 + $0x28] sm:$0xff]  ;;  %v839_v44 = vld [vmem:[%s7283_s28 + $0x20] sm:$0xff] }
  0xa3   : > { %1815 = vst.msk [vmem:[#allocation2 + $0x168] sm:$0xff] %vm608_vm0, %v7266_v1  ;;  %1814 = vst.msk [vmem:[#allocation2 + $0x150] sm:$0xff] %vm608_vm0, %v7266_v1  ;;  %994 = vrot.lane.b32.xlu1 %v5816_v43, %s7260_s25  ;;  %4731 = vmatprep.subr.mxu1 %v5814_v41 }
  0xa4   : > { %1831 = vst.msk [vmem:[#allocation2 + $0x168] sm:$0xff] %vm641_vm1, %v7266_v1  ;;  %1830 = vst.msk [vmem:[#allocation2 + $0x150] sm:$0xff] %vm641_vm1, %v7266_v1  ;;  %4732 = vmatpush3.msra.mxu1 %v5818_v45 }
  0xa5   : > { %v761_v46 = vpop.permute.xlu0 %760  ;;  %v5837_v47 = vld [vmem:[#allocation2 + $0x2b8] sm:$0xff]  ;;  %v729_v48 = vpop.permute.xlu1 %728 }
  0xa6   : > { %v5839_v49 = vld [vmem:[#allocation2 + $0x138] sm:$0xff]  ;;  %830 = vst.msk [vmem:[#allocation2 + $0x288] sm:$0xff] %vm802_vm2, %v761_v46  ;;  %1022 = vrot.lane.b32.xlu0 %v5837_v47, %s7260_s25  ;;  %4733 = vmatprep.subr.mxu1 %v5837_v47  ;;  %814 = vst.msk [vmem:[#allocation2 + $0x108] sm:$0xff] %vm802_vm2, %v729_v48  ;;  %v841_v46 = vld [vmem:[%s7283_s28 + $0x30] sm:$0xff] }
  0xa7   : > { %1813 = vst.msk [vmem:[#allocation2 + $0x138] sm:$0xff] %vm608_vm0, %v7266_v1  ;;  %992 = vrot.lane.b32.xlu1 %v5818_v45, %s7260_s25  ;;  %4734 = vmatpush3.msra.mxu1 %v5839_v49  ;;  %v848_v48 = vld [vmem:[%s7283_s28 + $0x68] sm:$0xff] }
  0xa8   : > { %1829 = vst.msk [vmem:[#allocation2 + $0x138] sm:$0xff] %vm641_vm1, %v7266_v1 }
  0xa9   : > { %v759_v50 = vpop.permute.xlu0 %758  ;;  %v5853_v51 = vld [vmem:[#allocation2 + $0x2a0] sm:$0xff]  ;;  %v727_v52 = vpop.permute.xlu1 %726 }
  0xaa   : > { %v5855_v53 = vld [vmem:[#allocation2 + $0x120] sm:$0xff]  ;;  %829 = vst.msk [vmem:[#allocation2 + $0x270] sm:$0xff] %vm802_vm2, %v759_v50  ;;  %1020 = vrot.lane.b32.xlu0 %v5853_v51, %s7260_s25  ;;  %4735 = vmatprep.subr.mxu1 %v5853_v51  ;;  %813 = vst.msk [vmem:[#allocation2 + $0xf0] sm:$0xff] %vm802_vm2, %v727_v52  ;;  %v850_v50 = vld [vmem:[%s7283_s28 + $0x78] sm:$0xff] }
  0xab   : > { %1812 = vst.msk [vmem:[#allocation2 + $0x120] sm:$0xff] %vm608_vm0, %v7266_v1  ;;  %990 = vrot.lane.b32.xlu1 %v5839_v49, %s7260_s25  ;;  %4736 = vmatpush3.msra.mxu1 %v5855_v53  ;;  %v852_v52 = vld [vmem:[%s7283_s28 + $0x88] sm:$0xff] }
  0xac   : > { %1828 = vst.msk [vmem:[#allocation2 + $0x120] sm:$0xff] %vm641_vm1, %v7266_v1 }
  0xad   : > { %v757_v54 = vpop.permute.xlu0 %756  ;;  %v5869_v55 = vld [vmem:[#allocation2 + $0x288] sm:$0xff]  ;;  %v725_v56 = vpop.permute.xlu1 %724 }
  0xae   : > { %v5871_v57 = vld [vmem:[#allocation2 + $0x108] sm:$0xff]  ;;  %828 = vst.msk [vmem:[#allocation2 + $0x258] sm:$0xff] %vm802_vm2, %v757_v54  ;;  %1018 = vrot.lane.b32.xlu0 %v5869_v55, %s7260_s25  ;;  %4737 = vmatprep.subr.mxu1 %v5869_v55  ;;  %812 = vst.msk [vmem:[#allocation2 + $0xd8] sm:$0xff] %vm802_vm2, %v725_v56  ;;  %v854_v54 = vld [vmem:[%s7283_s28 + $0x98] sm:$0xff] }
  0xaf   : > { %1811 = vst.msk [vmem:[#allocation2 + $0x108] sm:$0xff] %vm608_vm0, %v7266_v1  ;;  %988 = vrot.lane.b32.xlu1 %v5855_v53, %s7260_s25  ;;  %4738 = vmatpush3.msra.mxu1 %v5871_v57  ;;  %v856_v56 = vld [vmem:[%s7283_s28 + $0xa8] sm:$0xff] }
  0xb0   : > { %1827 = vst.msk [vmem:[#allocation2 + $0x108] sm:$0xff] %vm641_vm1, %v7266_v1 }
  0xb1   : > { %v755_v58 = vpop.permute.xlu0 %754  ;;  %v5885_v59 = vld [vmem:[#allocation2 + $0x270] sm:$0xff]  ;;  %v723_v60 = vpop.permute.xlu1 %722 }
  0xb2   : > { %v5887_v61 = vld [vmem:[#allocation2 + $0xf0] sm:$0xff]  ;;  %827 = vst.msk [vmem:[#allocation2 + $0x240] sm:$0xff] %vm802_vm2, %v755_v58  ;;  %1016 = vrot.lane.b32.xlu0 %v5885_v59, %s7260_s25  ;;  %4739 = vmatprep.subr.mxu1 %v5885_v59  ;;  %811 = vst.msk [vmem:[#allocation2 + $0xc0] sm:$0xff] %vm802_vm2, %v723_v60  ;;  %v858_v58 = vld [vmem:[%s7283_s28 + $0xb8] sm:$0xff] }
  0xb3   : > { %1810 = vst.msk [vmem:[#allocation2 + $0xf0] sm:$0xff] %vm608_vm0, %v7266_v1  ;;  %986 = vrot.lane.b32.xlu1 %v5871_v57, %s7260_s25  ;;  %4740 = vmatpush3.msra.mxu1 %v5887_v61  ;;  %v860_v60 = vld [vmem:[%s7283_s28 + $0xc8] sm:$0xff] }
  0xb4   : > { %1826 = vst.msk [vmem:[#allocation2 + $0xf0] sm:$0xff] %vm641_vm1, %v7266_v1 }
  0xb5   : > { %v753_v62 = vpop.permute.xlu0 %752  ;;  %v5901_v63 = vld [vmem:[#allocation2 + $0x258] sm:$0xff]  ;;  %v721_v0 = vpop.permute.xlu1 %720 }
  0xb6   : > { %v5903_v2 = vld [vmem:[#allocation2 + $0xd8] sm:$0xff]  ;;  %826 = vst.msk [vmem:[#allocation2 + $0x228] sm:$0xff] %vm802_vm2, %v753_v62  ;;  %1014 = vrot.lane.b32.xlu0 %v5901_v63, %s7260_s25  ;;  %4741 = vmatprep.subr.mxu1 %v5901_v63  ;;  %810 = vst.msk [vmem:[#allocation2 + $0xa8] sm:$0xff] %vm802_vm2, %v721_v0  ;;  %v864_v0 = vld [vmem:[%s7283_s28 + $0xe8] sm:$0xff] }
  0xb7   : > { %1809 = vst.msk [vmem:[#allocation2 + $0xd8] sm:$0xff] %vm608_vm0, %v7266_v1  ;;  %984 = vrot.lane.b32.xlu1 %v5887_v61, %s7260_s25  ;;  %4742 = vmatpush3.msra.mxu1 %v5903_v2  ;;  %v862_v62 = vld [vmem:[%s7283_s28 + $0xd8] sm:$0xff] }
  0xb8   : > { %1825 = vst.msk [vmem:[#allocation2 + $0xd8] sm:$0xff] %vm641_vm1, %v7266_v1 }
  0xb9   : > { %v751_v3 = vpop.permute.xlu0 %750  ;;  %v5917_v4 = vld [vmem:[#allocation2 + $0x240] sm:$0xff]  ;;  %v719_v5 = vpop.permute.xlu1 %718 }
  0xba   : > { %v5919_v6 = vld [vmem:[#allocation2 + $0xc0] sm:$0xff]  ;;  %825 = vst.msk [vmem:[#allocation2 + $0x210] sm:$0xff] %vm802_vm2, %v751_v3  ;;  %1012 = vrot.lane.b32.xlu0 %v5917_v4, %s7260_s25  ;;  %4743 = vmatprep.subr.mxu1 %v5917_v4  ;;  %809 = vst.msk [vmem:[#allocation2 + $0x90] sm:$0xff] %vm802_vm2, %v719_v5 }
  0xbb   : > { %1808 = vst.msk [vmem:[#allocation2 + $0xc0] sm:$0xff] %vm608_vm0, %v7266_v1  ;;  %982 = vrot.lane.b32.xlu1 %v5903_v2, %s7260_s25  ;;  %4744 = vmatpush3.msra.mxu1 %v5919_v6  ;;  %v863_v3 = vld [vmem:[%s7283_s28 + $0xe0] sm:$0xff] }
  0xbc   : > { %1824 = vst.msk [vmem:[#allocation2 + $0xc0] sm:$0xff] %vm641_vm1, %v7266_v1 }
  0xbd   : > { %v749_v7 = vpop.permute.xlu0 %748  ;;  %v5933_v8 = vld [vmem:[#allocation2 + $0x228] sm:$0xff]  ;;  %v717_v9 = vpop.permute.xlu1 %716 }
  0xbe   : > { %v5935_v10 = vld [vmem:[#allocation2 + $0xa8] sm:$0xff]  ;;  %824 = vst.msk [vmem:[#allocation2 + $0x1f8] sm:$0xff] %vm802_vm2, %v749_v7  ;;  %1010 = vrot.lane.b32.xlu0 %v5933_v8, %s7260_s25  ;;  %4745 = vmatprep.subr.mxu1 %v5933_v8  ;;  %808 = vst.msk [vmem:[#allocation2 + $0x78] sm:$0xff] %vm802_vm2, %v717_v9  ;;  %v865_v7 = vld [vmem:[%s7283_s28 + $0xf0] sm:$0xff] }
  0xbf   : > { %1807 = vst.msk [vmem:[#allocation2 + $0xa8] sm:$0xff] %vm608_vm0, %v7266_v1  ;;  %980 = vrot.lane.b32.xlu1 %v5919_v6, %s7260_s25  ;;  %4746 = vmatpush3.msra.mxu1 %v5935_v10 }
  0xc0   : > { %1823 = vst.msk [vmem:[#allocation2 + $0xa8] sm:$0xff] %vm641_vm1, %v7266_v1 }
  0xc1   : > { %v747_v11 = vpop.permute.xlu0 %746  ;;  %v5949_v12 = vld [vmem:[#allocation2 + $0x210] sm:$0xff]  ;;  %v715_v13 = vpop.permute.xlu1 %714 }
  0xc2   : > { %v5951_v14 = vld [vmem:[#allocation2 + $0x90] sm:$0xff]  ;;  %823 = vst.msk [vmem:[#allocation2 + $0x1e0] sm:$0xff] %vm802_vm2, %v747_v11  ;;  %1008 = vrot.lane.b32.xlu0 %v5949_v12, %s7260_s25  ;;  %4747 = vmatprep.subr.mxu1 %v5949_v12  ;;  %807 = vst.msk [vmem:[#allocation2 + $0x60] sm:$0xff] %vm802_vm2, %v715_v13 }
  0xc3   : > { %1806 = vst.msk [vmem:[#allocation2 + $0x90] sm:$0xff] %vm608_vm0, %v7266_v1  ;;  %978 = vrot.lane.b32.xlu1 %v5935_v10, %s7260_s25  ;;  %4748 = vmatpush3.msra.mxu1 %v5951_v14 }
  0xc4   : > { %1822 = vst.msk [vmem:[#allocation2 + $0x90] sm:$0xff] %vm641_vm1, %v7266_v1 }
  0xc5   : > { %v745_v15 = vpop.permute.xlu0 %744  ;;  %v5965_v16 = vld [vmem:[#allocation2 + $0x1f8] sm:$0xff]  ;;  %v713_v17 = vpop.permute.xlu1 %712 }
  0xc6   : > { %v5967_v18 = vld [vmem:[#allocation2 + $0x78] sm:$0xff]  ;;  %822 = vst.msk [vmem:[#allocation2 + $0x1c8] sm:$0xff] %vm802_vm2, %v745_v15  ;;  %1006 = vrot.lane.b32.xlu0 %v5965_v16, %s7260_s25  ;;  %4749 = vmatprep.subr.mxu1 %v5965_v16  ;;  %806 = vst.msk [vmem:[#allocation2 + $0x48] sm:$0xff] %vm802_vm2, %v713_v17 }
  0xc7   : > { %1805 = vst.msk [vmem:[#allocation2 + $0x78] sm:$0xff] %vm608_vm0, %v7266_v1  ;;  %976 = vrot.lane.b32.xlu1 %v5951_v14, %s7260_s25  ;;  %4750 = vmatpush3.msra.mxu1 %v5967_v18 }
  0xc8   : > { %1821 = vst.msk [vmem:[#allocation2 + $0x78] sm:$0xff] %vm641_vm1, %v7266_v1 }
  0xc9   : > { %v743_v19 = vpop.permute.xlu0 %742  ;;  %v5981_v20 = vld [vmem:[#allocation2 + $0x1e0] sm:$0xff]  ;;  %v711_v21 = vpop.permute.xlu1 %710 }
  0xca   : > { %v5983_v22 = vld [vmem:[#allocation2 + $0x60] sm:$0xff]  ;;  %821 = vst.msk [vmem:[#allocation2 + $0x1b0] sm:$0xff] %vm802_vm2, %v743_v19  ;;  %1004 = vrot.lane.b32.xlu0 %v5981_v20, %s7260_s25  ;;  %4751 = vmatprep.subr.mxu1 %v5981_v20  ;;  %805 = vst.msk [vmem:[#allocation2 + $0x30] sm:$0xff] %vm802_vm2, %v711_v21 }
  0xcb   : > { %1804 = vst.msk [vmem:[#allocation2 + $0x60] sm:$0xff] %vm608_vm0, %v7266_v1  ;;  %974 = vrot.lane.b32.xlu1 %v5967_v18, %s7260_s25  ;;  %4752 = vmatpush3.msra.mxu1 %v5983_v22 }
  0xcc   : > { %1820 = vst.msk [vmem:[#allocation2 + $0x60] sm:$0xff] %vm641_vm1, %v7266_v1 }
  0xcd   : > { %v741_v23 = vpop.permute.xlu0 %740  ;;  %v5997_v24 = vld [vmem:[#allocation2 + $0x1c8] sm:$0xff]  ;;  %v709_v25 = vpop.permute.xlu1 %708 }
  0xce   : > { %v5999_v26 = vld [vmem:[#allocation2 + $0x48] sm:$0xff]  ;;  %820 = vst.msk [vmem:[#allocation2 + $0x198] sm:$0xff] %vm802_vm2, %v741_v23  ;;  %1002 = vrot.lane.b32.xlu0 %v5997_v24, %s7260_s25  ;;  %4753 = vmatprep.subr.mxu1 %v5997_v24  ;;  %804 = vst.msk [vmem:[#allocation2 + $0x18] sm:$0xff] %vm802_vm2, %v709_v25 }
  0xcf   : > { %1803 = vst.msk [vmem:[#allocation2 + $0x48] sm:$0xff] %vm608_vm0, %v7266_v1  ;;  %972 = vrot.lane.b32.xlu1 %v5983_v22, %s7260_s25  ;;  %4754 = vmatpush3.msra.mxu1 %v5999_v26 }
  0xd0   : > { %1819 = vst.msk [vmem:[#allocation2 + $0x48] sm:$0xff] %vm641_vm1, %v7266_v1 }
  0xd1   : > { %v739_v27 = vpop.permute.xlu0 %738  ;;  %v6013_v28 = vld [vmem:[#allocation2 + $0x1b0] sm:$0xff]  ;;  %v707_v29 = vpop.permute.xlu1 %706 }
  0xd2   : > { %v6015_v30 = vld [vmem:[#allocation2 + $0x30] sm:$0xff]  ;;  %819 = vst.msk [vmem:[#allocation2 + $0x180] sm:$0xff] %vm802_vm2, %v739_v27  ;;  %1000 = vrot.lane.b32.xlu0 %v6013_v28, %s7260_s25  ;;  %4755 = vmatprep.subr.mxu1 %v6013_v28  ;;  %803 = vst.msk [vmem:[#allocation2] sm:$0xff] %vm802_vm2, %v707_v29 }
  0xd3   : > { %1802 = vst.msk [vmem:[#allocation2 + $0x30] sm:$0xff] %vm608_vm0, %v7266_v1  ;;  %970 = vrot.lane.b32.xlu1 %v5999_v26, %s7260_s25  ;;  %4756 = vmatpush3.msra.mxu1 %v6015_v30 }
  0xd4   : > { %1818 = vst.msk [vmem:[#allocation2 + $0x30] sm:$0xff] %vm641_vm1, %v7266_v1 }
  0xd5   : > { %v6035_v33 = vld [vmem:[#allocation2 + $0x198] sm:$0xff] }
  0xd6   : > { %v6037_v34 = vld [vmem:[#allocation2 + $0x18] sm:$0xff]  ;;  %998 = vrot.lane.b32.xlu0 %v6035_v33, %s7260_s25  ;;  %4757 = vmatprep.subr.mxu1 %v6035_v33 }
  0xd7   : > { %1801 = vst.msk [vmem:[#allocation2 + $0x18] sm:$0xff] %vm608_vm0, %v7266_v1  ;;  %968 = vrot.lane.b32.xlu1 %v6015_v30, %s7260_s25  ;;  %4758 = vmatpush3.msra.mxu1 %v6037_v34 }
  0xd8   : > { %1817 = vst.msk [vmem:[#allocation2 + $0x18] sm:$0xff] %vm641_vm1, %v7266_v1 }
  0xd9   : > { %v6049_v35 = vld [vmem:[#allocation2 + $0x180] sm:$0xff] }
  0xda   : > { %v6051_v36 = vld [vmem:[#allocation2] sm:$0xff]  ;;  %996 = vrot.lane.b32.xlu0 %v6049_v35, %s7260_s25  ;;  %4759 = vmatprep.subr.mxu1 %v6049_v35 }
  0xdb   : > { %1800 = vst.msk [vmem:[#allocation2] sm:$0xff] %vm608_vm0, %v7266_v1  ;;  %966 = vrot.lane.b32.xlu1 %v6037_v34, %s7260_s25  ;;  %4760 = vmatpush3.msra.mxu1 %v6051_v36 }
  0xdc   : > { %1816 = vst.msk [vmem:[#allocation2] sm:$0xff] %vm641_vm1, %v7266_v1  ;;  %1270 = vmatmul.mubr.f32.vlgmr.msra.gmra.mxu1 %v835_v37  ;;  %v1653_v37 = vld [vmem:[%s7284_s26 + $0x68] sm:$0xff] }
  0xdd   : > { %1274 = vmatprep.mubr.f32.mxu1 %v838_v38 }
  0xde   : > { %1445 = vrot.lane.b32.xlu0 %v5807_v39, %s7258_s22  ;;  %v842_v39 = vld [vmem:[%s7283_s28 + $0x38] sm:$0xff] }
  0xdf   : > { %964 = vrot.lane.b32.xlu1 %v6051_v36, %s7260_s25 }
  0xe0   : > { %1275 = vmatmul.mubr.f32.gmra.mxu1 %v837_v40 }
  0xe1   : > { %1279 = vmatprep.mubr.f32.mxu1 %v840_v42  ;;  %v1648_v42 = vld [vmem:[%s7284_s26 + $0x40] sm:$0xff] }
  0xe2   : > { %1443 = vrot.lane.b32.xlu0 %v5814_v41, %s7258_s22  ;;  %v844_v41 = vld [vmem:[%s7283_s28 + $0x48] sm:$0xff] }
  0xe3   : > { %1413 = vrot.lane.b32.xlu1 %v5816_v43, %s7258_s22  ;;  %v843_v43 = vld [vmem:[%s7283_s28 + $0x40] sm:$0xff] }
  0xe4   : > { %1280 = vmatmul.mubr.f32.gmra.mxu1 %v839_v44  ;;  %v1651_v44 = vld [vmem:[%s7284_s26 + $0x58] sm:$0xff] }
  0xe5   : > { %1284 = vmatprep.mubr.f32.mxu1 %v842_v39 }
  0xe6   : > { %1441 = vrot.lane.b32.xlu0 %v5837_v47, %s7258_s22  ;;  %v846_v47 = vld [vmem:[%s7283_s28 + $0x58] sm:$0xff] }
  0xe7   : > { %1411 = vrot.lane.b32.xlu1 %v5818_v45, %s7258_s22  ;;  %v845_v45 = vld [vmem:[%s7283_s28 + $0x50] sm:$0xff] }
  0xe8   : > { %1285 = vmatmul.mubr.f32.gmra.mxu1 %v841_v46 }
  0xe9   : > { %1289 = vmatprep.mubr.f32.mxu1 %v844_v41  ;;  %v1646_v41 = vld [vmem:[%s7284_s26 + $0x30] sm:$0xff] }
  0xea   : > { %1439 = vrot.lane.b32.xlu0 %v5853_v51, %s7258_s22  ;;  %v849_v51 = vld [vmem:[%s7283_s28 + $0x70] sm:$0xff] }
  0xeb   : > { %1409 = vrot.lane.b32.xlu1 %v5839_v49, %s7258_s22  ;;  %v847_v49 = vld [vmem:[%s7283_s28 + $0x60] sm:$0xff] }
  0xec   : > { %1290 = vmatmul.mubr.f32.gmra.mxu1 %v843_v43  ;;  %v1649_v43 = vld [vmem:[%s7284_s26 + $0x48] sm:$0xff] }
  0xed   : > { %1294 = vmatprep.mubr.f32.mxu1 %v846_v47 }
  0xee   : > { %1437 = vrot.lane.b32.xlu0 %v5869_v55, %s7258_s22  ;;  %v853_v55 = vld [vmem:[%s7283_s28 + $0x90] sm:$0xff] }
  0xef   : > { %1407 = vrot.lane.b32.xlu1 %v5855_v53, %s7258_s22  ;;  %v851_v53 = vld [vmem:[%s7283_s28 + $0x80] sm:$0xff] }
  0xf0   : > { %1295 = vmatmul.mubr.f32.gmra.mxu1 %v845_v45  ;;  %v4500_v45 = vld [vmem:[%s7283_s28 + $0x100] sm:$0xff] }
  0xf1   : > { %1299 = vmatprep.mubr.f32.mxu1 %v848_v48 }
  0xf2   : > { %1435 = vrot.lane.b32.xlu0 %v5885_v59, %s7258_s22  ;;  %v857_v59 = vld [vmem:[%s7283_s28 + $0xb0] sm:$0xff] }
  0xf3   : > { %1405 = vrot.lane.b32.xlu1 %v5871_v57, %s7258_s22  ;;  %v855_v57 = vld [vmem:[%s7283_s28 + $0xa0] sm:$0xff] }
  0xf4   : > { %1300 = vmatmul.mubr.f32.gmra.mxu1 %v847_v49  ;;  %v4503_v49 = vld [vmem:[%s7283_s28 + $0x118] sm:$0xff] }
  0xf5   : > { %1304 = vmatprep.mubr.f32.mxu1 %v850_v50  ;;  %v1647_v50 = vld [vmem:[%s7284_s26 + $0x38] sm:$0xff] }
  0xf6   : > { %1433 = vrot.lane.b32.xlu0 %v5901_v63, %s7258_s22  ;;  %v861_v63 = vld [vmem:[%s7283_s28 + $0xd0] sm:$0xff] }
  0xf7   : > { %1403 = vrot.lane.b32.xlu1 %v5887_v61, %s7258_s22  ;;  %v859_v61 = vld [vmem:[%s7283_s28 + $0xc0] sm:$0xff] }
  0xf8   : > { %1305 = vmatmul.mubr.f32.gmra.mxu1 %v849_v51  ;;  %v1644_v51 = vld [vmem:[%s7284_s26 + $0x20] sm:$0xff] }
  0xf9   : > { %1309 = vmatprep.mubr.f32.mxu1 %v852_v52 }
  0xfa   : > { %1431 = vrot.lane.b32.xlu0 %v5917_v4, %s7258_s22  ;;  %v866_v4 = vld [vmem:[%s7283_s28 + $0xf8] sm:$0xff] }
  0xfb   : > { %1401 = vrot.lane.b32.xlu1 %v5903_v2, %s7258_s22 }
  0xfc   : > { %1310 = vmatmul.mubr.f32.gmra.mxu1 %v851_v53  ;;  %v4502_v53 = vld [vmem:[%s7283_s28 + $0x110] sm:$0xff] }
  0xfd   : > { %1314 = vmatprep.mubr.f32.mxu1 %v854_v54 }
  0xfe   : > { %1429 = vrot.lane.b32.xlu0 %v5933_v8, %s7258_s22 }
  0xff   : > { %1399 = vrot.lane.b32.xlu1 %v5919_v6, %s7258_s22 }
 0x100   : > { %1315 = vmatmul.mubr.f32.gmra.mxu1 %v853_v55  ;;  %v4505_v55 = vld [vmem:[%s7283_s28 + $0x128] sm:$0xff] }
 0x101   : > { %1319 = vmatprep.mubr.f32.mxu1 %v856_v56  ;;  %v1645_v56 = vld [vmem:[%s7284_s26 + $0x28] sm:$0xff] }
 0x102   : > { %1427 = vrot.lane.b32.xlu0 %v5949_v12, %s7258_s22 }
 0x103   : > { %1397 = vrot.lane.b32.xlu1 %v5935_v10, %s7258_s22 }
 0x104   : > { %1320 = vmatmul.mubr.f32.gmra.mxu1 %v855_v57  ;;  %v1642_v57 = vld [vmem:[%s7284_s26 + $0x10] sm:$0xff] }
 0x105   : > { %1324 = vmatprep.mubr.f32.mxu1 %v858_v58 }
 0x106   : > { %1425 = vrot.lane.b32.xlu0 %v5965_v16, %s7258_s22 }
 0x107   : > { %1395 = vrot.lane.b32.xlu1 %v5951_v14, %s7258_s22 }
 0x108   : > { %1325 = vmatmul.mubr.f32.gmra.mxu1 %v857_v59  ;;  %v4504_v59 = vld [vmem:[%s7283_s28 + $0x120] sm:$0xff] }
 0x109   : > { %1329 = vmatprep.mubr.f32.mxu1 %v860_v60 }
 0x10a   : > { %1423 = vrot.lane.b32.xlu0 %v5981_v20, %s7258_s22 }
 0x10b   : > { %1393 = vrot.lane.b32.xlu1 %v5967_v18, %s7258_s22 }
 0x10c   : > { %1330 = vmatmul.mubr.f32.gmra.mxu1 %v859_v61  ;;  %v4507_v61 = vld [vmem:[%s7283_s28 + $0x138] sm:$0xff] }
 0x10d   : > { %1334 = vmatprep.mubr.f32.mxu1 %v862_v62  ;;  %v1643_v62 = vld [vmem:[%s7284_s26 + $0x18] sm:$0xff] }
 0x10e   : > { %1421 = vrot.lane.b32.xlu0 %v5997_v24, %s7258_s22 }
 0x10f   : > { %1391 = vrot.lane.b32.xlu1 %v5983_v22, %s7258_s22 }
 0x110   : > { %v1027_v2 = vpop.permute.xlu0 %1026  ;;  %1335 = vmatmul.mubr.f32.gmra.mxu1 %v861_v63  ;;  %v1640_v63 = vld [vmem:[%s7284_s26] sm:$0xff] }
 0x111   : > { %4649 = vmatprep.subr.mxu0 %v1027_v2  ;;  %1339 = vmatprep.mubr.f32.mxu1 %v864_v0  ;;  %v4506_v2 = vld [vmem:[%s7283_s28 + $0x130] sm:$0xff] }
 0x112   : > { %1419 = vrot.lane.b32.xlu0 %v6013_v28, %s7258_s22  ;;  %v1655_v28 = vld [vmem:[%s7284_s26 + $0x78] sm:$0xff] }
 0x113   : > { %1389 = vrot.lane.b32.xlu1 %v5999_v26, %s7258_s22 }
 0x114   : > { %v1025_v5 = vpop.permute.xlu0 %1024  ;;  %1340 = vmatmul.mubr.f32.gmra.mxu1 %v863_v3 }
 0x115   : > { %v995_v6 = vpop.permute.xlu1 %994  ;;  %1344 = vmatprep.mubr.f32.mxu1 %v866_v4  ;;  %v4509_v4 = vld [vmem:[%s7283_s28 + $0x148] sm:$0xff] }
 0x116   : > { %4650 = vmatpush3.msra.mxu0 %v995_v6  ;;  %1417 = vrot.lane.b32.xlu0 %v6035_v33, %s7258_s22  ;;  %v1654_v33 = vld [vmem:[%s7284_s26 + $0x70] sm:$0xff] }
 0x117   : > { %1387 = vrot.lane.b32.xlu1 %v6015_v30, %s7258_s22  ;;  %4651 = vmatprep.subr.mxu0 %v1025_v5  ;;  %v5449_v30 = vmov 0   ;;  %v1641_v5 = vld [vmem:[%s7284_s26 + $0x8] sm:$0xff] }
 0x118   : > { %v1023_v8 = vpop.permute.xlu0 %1022  ;;  %1345 = vmatmul.mubr.f32.gmra.mxu1 %v865_v7  ;;  %5377 = vset.pattern.permute.xlu0 %v5449_v30  ;;  %v4508_v7 = vld [vmem:[%s7283_s28 + $0x140] sm:$0xff] }
 0x119   : > { %v993_v9 = vpop.permute.xlu1 %992  ;;  %5378 = vset.pattern.permute.xlu1 %v5449_v30 }
 0x11a   : > { %4652 = vmatpush3.msra.mxu0 %v993_v9  ;;  %1415 = vrot.lane.b32.xlu0 %v6049_v35, %s7258_s22  ;;  %v4511_v9 = vld [vmem:[%s7283_s28 + $0x158] sm:$0xff] }
 0x11b   : > { %1385 = vrot.lane.b32.xlu1 %v6037_v34, %s7258_s22  ;;  %4653 = vmatprep.subr.mxu0 %v1023_v8 }
 0x11c   : > { %v1021_v10 = vpop.permute.xlu0 %1020 }
 0x11d   : > { %v991_v11 = vpop.permute.xlu1 %990 }
 0x11e   : > { %4654 = vmatpush3.msra.mxu0 %v991_v11  ;;  %1733 = vperm.xlu0 %5377, %v1655_v28   ;;  %v4510_v11 = vld [vmem:[%s7283_s28 + $0x150] sm:$0xff] }
 0x11f   : > { %1383 = vrot.lane.b32.xlu1 %v6051_v36, %s7258_s22  ;;  %4655 = vmatprep.subr.mxu0 %v1021_v10  ;;  %v1650_v36 = vld [vmem:[%s7284_s26 + $0x50] sm:$0xff]  ;;  %s7307_s22 = smov 1   ;;  %s570_s26 = scalar_lea.vmem [#allocation4], %s4497_s19 }
 0x120   : > { %v1019_v12 = vpop.permute.xlu0 %1018  ;;  %s4434_s20 = sshll.u32 %s570_s26, 4  ;;  %s4435_s20 = int_to_ptr.vmem [resolvable:$true] %s4434_s20 }
 0x121   : > { %v989_v13 = vpop.permute.xlu1 %988 }
 0x122   : > { %4656 = vmatpush3.msra.mxu0 %v989_v13  ;;  %1718 = vperm.xlu0 %5377, %v1652_v32   ;;  %v4513_v13 = vld [vmem:[%s7283_s28 + $0x168] sm:$0xff] }
 0x123   : > { %4657 = vmatprep.subr.mxu0 %v1019_v12  ;;  %1728 = vperm.xlu1 %5378, %v1654_v33   ;;  %v4523_v33 = vld [vmem:[%s7283_s28 + $0x1b8] sm:$0xff] }
 0x124   : > { %v1017_v14 = vpop.permute.xlu0 %1016 }
 0x125   : > { %v987_v15 = vpop.permute.xlu1 %986 }
 0x126   : > { %4658 = vmatpush3.msra.mxu0 %v987_v15  ;;  %1708 = vperm.xlu0 %5377, %v1650_v36   ;;  %v4512_v15 = vld [vmem:[%s7283_s28 + $0x160] sm:$0xff] }
 0x127   : > { %4659 = vmatprep.subr.mxu0 %v1017_v14  ;;  %1723 = vperm.xlu1 %5378, %v1653_v37   ;;  %v4525_v37 = vld [vmem:[%s7283_s28 + $0x1c8] sm:$0xff] }
 0x128   : > { %v1015_v16 = vpop.permute.xlu0 %1014 }
 0x129   : > { %v985_v17 = vpop.permute.xlu1 %984 }
 0x12a   : > { %4660 = vmatpush3.msra.mxu0 %v985_v17  ;;  %1698 = vperm.xlu0 %5377, %v1648_v42   ;;  %v4515_v17 = vld [vmem:[%s7283_s28 + $0x178] sm:$0xff] }
 0x12b   : > { %4661 = vmatprep.subr.mxu0 %v1015_v16  ;;  %1713 = vperm.xlu1 %5378, %v1651_v44   ;;  %v4527_v44 = vld [vmem:[%s7283_s28 + $0x1d8] sm:$0xff] }
 0x12c   : > { %v1013_v18 = vpop.permute.xlu0 %1012 }
 0x12d   : > { %v983_v19 = vpop.permute.xlu1 %982 }
 0x12e   : > { %4662 = vmatpush3.msra.mxu0 %v983_v19  ;;  %1688 = vperm.xlu0 %5377, %v1646_v41   ;;  %v4514_v19 = vld [vmem:[%s7283_s28 + $0x170] sm:$0xff] }
 0x12f   : > { %4663 = vmatprep.subr.mxu0 %v1013_v18  ;;  %1703 = vperm.xlu1 %5378, %v1649_v43   ;;  %v4529_v43 = vld [vmem:[%s7283_s28 + $0x1e8] sm:$0xff] }
 0x130   : > { %v1011_v20 = vpop.permute.xlu0 %1010 }
 0x131   : > { %v981_v21 = vpop.permute.xlu1 %980 }
 0x132   : > { %4664 = vmatpush3.msra.mxu0 %v981_v21  ;;  %1678 = vperm.xlu0 %5377, %v1644_v51   ;;  %v4517_v21 = vld [vmem:[%s7283_s28 + $0x188] sm:$0xff]  ;;  %v4530_v51 = vld [vmem:[%s7283_s28 + $0x1f0] sm:$0xff] }
 0x133   : > { %4665 = vmatprep.subr.mxu0 %v1011_v20  ;;  %1693 = vperm.xlu1 %5378, %v1647_v50  }
 0x134   : > { %v1009_v22 = vpop.permute.xlu0 %1008 }
 0x135   : > { %v979_v23 = vpop.permute.xlu1 %978 }
 0x136   : > { %4666 = vmatpush3.msra.mxu0 %v979_v23  ;;  %1668 = vperm.xlu0 %5377, %v1642_v57   ;;  %v4516_v23 = vld [vmem:[%s7283_s28 + $0x180] sm:$0xff]  ;;  %v4534_v57 = vld [vmem:[%s7283_s28 + $0x210] sm:$0xff] }
 0x137   : > { %4667 = vmatprep.subr.mxu0 %v1009_v22  ;;  %1683 = vperm.xlu1 %5378, %v1645_v56   ;;  %v4535_v56 = vld [vmem:[%s7283_s28 + $0x218] sm:$0xff] }
 0x138   : > { %v1007_v24 = vpop.permute.xlu0 %1006 }
 0x139   : > { %v977_v25 = vpop.permute.xlu1 %976 }
 0x13a   : > { %4668 = vmatpush3.msra.mxu0 %v977_v25  ;;  %1658 = vperm.xlu0 %5377, %v1640_v63   ;;  %v4519_v25 = vld [vmem:[%s7283_s28 + $0x198] sm:$0xff]  ;;  %v4541_v63 = vld [vmem:[%s7283_s28 + $0x248] sm:$0xff] }
 0x13b   : > { %4669 = vmatprep.subr.mxu0 %v1007_v24  ;;  %1673 = vperm.xlu1 %5378, %v1643_v62  }
 0x13c   : > { %v1005_v26 = vpop.permute.xlu0 %1004 }
 0x13d   : > { %v975_v27 = vpop.permute.xlu1 %974 }
 0x13e   : > { %4670 = vmatpush3.msra.mxu0 %v975_v27  ;;  %v4518_v27 = vld [vmem:[%s7283_s28 + $0x190] sm:$0xff] }
 0x13f   : > { %4671 = vmatprep.subr.mxu0 %v1005_v26  ;;  %1663 = vperm.xlu1 %5378, %v1641_v5   ;;  %v4543_v5 = vld [vmem:[%s7283_s28 + $0x258] sm:$0xff] }
 0x140   : > { %v1003_v29 = vpop.permute.xlu0 %1002 }
 0x141   : > { %v973_v31 = vpop.permute.xlu1 %972 }
 0x142   : > { %4672 = vmatpush3.msra.mxu0 %v973_v31  ;;  %v4520_v31 = vld [vmem:[%s7283_s28 + $0x1a0] sm:$0xff] }
 0x143   : > { %4673 = vmatprep.subr.mxu0 %v1003_v29  ;;  %v4521_v29 = vld [vmem:[%s7283_s28 + $0x1a8] sm:$0xff] }
 0x144   : > { %v1001_v34 = vpop.permute.xlu0 %1000 }
 0x145   : > { %v971_v35 = vpop.permute.xlu1 %970 }
 0x146   : > { %4674 = vmatpush3.msra.mxu0 %v971_v35  ;;  %v4522_v35 = vld [vmem:[%s7283_s28 + $0x1b0] sm:$0xff] }
 0x147   : > { %4675 = vmatprep.subr.mxu0 %v1001_v34 }
 0x148   : > { %v999_v38 = vpop.permute.xlu0 %998 }
 0x149   : > { %v969_v40 = vpop.permute.xlu1 %968 }
 0x14a   : > { %4676 = vmatpush3.msra.mxu0 %v969_v40  ;;  %v4524_v40 = vld [vmem:[%s7283_s28 + $0x1c0] sm:$0xff] }
 0x14b   : > { %4677 = vmatprep.subr.mxu0 %v999_v38 }
 0x14c   : > { %v997_v39 = vpop.permute.xlu0 %996 }
 0x14d   : > { %v967_v46 = vpop.permute.xlu1 %966 }
 0x14e   : > { %4678 = vmatpush3.msra.mxu0 %v967_v46  ;;  %v4526_v46 = vld [vmem:[%s7283_s28 + $0x1d0] sm:$0xff] }
 0x14f   : > { %4679 = vmatprep.subr.mxu0 %v997_v39 }
 0x150   : > { %v1446_v47 = vpop.permute.xlu0 %1445 }
 0x151   : > { %v965_v48 = vpop.permute.xlu1 %964 }
 0x152   : > { %4680 = vmatpush3.msra.mxu0 %v965_v48 }
 0x153   : > { %1125 = vmatmul.mubr.f32.vlgmr.msra.gmra.mxu0 %v4500_v45  ;;  %4809 = vmatprep.subr.mxu0 %v1446_v47  ;;  %v4528_v45 = vld [vmem:[%s7283_s28 + $0x1e0] sm:$0xff] }
 0x154   : > { %v1444_v52 = vpop.permute.xlu0 %1443  ;;  %1129 = vmatprep.mubr.f32.mxu0 %v4503_v49  ;;  %v4531_v49 = vld [vmem:[%s7283_s28 + $0x1f8] sm:$0xff] }
 0x155   : > { %v1414_v54 = vpop.permute.xlu1 %1413 }
 0x156   : > { %4810 = vmatpush3.msra.mxu0 %v1414_v54  ;;  %v4532_v54 = vld [vmem:[%s7283_s28 + $0x200] sm:$0xff] }
 0x157   : > { %1130 = vmatmul.mubr.f32.gmra.mxu0 %v4502_v53  ;;  %4811 = vmatprep.subr.mxu0 %v1444_v52  ;;  %v4533_v53 = vld [vmem:[%s7283_s28 + $0x208] sm:$0xff] }
 0x158   : > { %v1442_v58 = vpop.permute.xlu0 %1441  ;;  %1134 = vmatprep.mubr.f32.mxu0 %v4505_v55 }
 0x159   : > { %v1412_v60 = vpop.permute.xlu1 %1411 }
 0x15a   : > { %4812 = vmatpush3.msra.mxu0 %v1412_v60  ;;  %v4539_v60 = vld [vmem:[%s7283_s28 + $0x238] sm:$0xff] }
 0x15b   : > { %1135 = vmatmul.mubr.f32.gmra.mxu0 %v4504_v59  ;;  %4813 = vmatprep.subr.mxu0 %v1442_v58  ;;  %v4537_v58 = vld [vmem:[%s7283_s28 + $0x228] sm:$0xff]  ;;  %v4536_v59 = vld [vmem:[%s7283_s28 + $0x220] sm:$0xff] }
 0x15c   : > { %v1440_v0 = vpop.permute.xlu0 %1439  ;;  %1139 = vmatprep.mubr.f32.mxu0 %v4507_v61  ;;  %v4538_v61 = vld [vmem:[%s7283_s28 + $0x230] sm:$0xff] }
 0x15d   : > { %v1410_v3 = vpop.permute.xlu1 %1409 }
 0x15e   : > { %4814 = vmatpush3.msra.mxu0 %v1410_v3  ;;  %v4540_v3 = vld [vmem:[%s7283_s28 + $0x240] sm:$0xff] }
 0x15f   : > { %1140 = vmatmul.mubr.f32.gmra.mxu0 %v4506_v2  ;;  %4815 = vmatprep.subr.mxu0 %v1440_v0 }
 0x160   : > { %v1438_v6 = vpop.permute.xlu0 %1437  ;;  %1144 = vmatprep.mubr.f32.mxu0 %v4509_v4 }
 0x161   : > { %v1408_v8 = vpop.permute.xlu1 %1407 }
 0x162   : > { %4816 = vmatpush3.msra.mxu0 %v1408_v8  ;;  %v4542_v8 = vld [vmem:[%s7283_s28 + $0x250] sm:$0xff] }
 0x163   : > { %1145 = vmatmul.mubr.f32.gmra.mxu0 %v4508_v7  ;;  %4817 = vmatprep.subr.mxu0 %v1438_v6 }
 0x164   : > { %v1436_v10 = vpop.permute.xlu0 %1435  ;;  %1149 = vmatprep.mubr.f32.mxu0 %v4511_v9 }
 0x165   : > { %v1406_v12 = vpop.permute.xlu1 %1405 }
 0x166   : > { %4818 = vmatpush3.msra.mxu0 %v1406_v12 }
 0x167   : > { %1150 = vmatmul.mubr.f32.gmra.mxu0 %v4510_v11  ;;  %4819 = vmatprep.subr.mxu0 %v1436_v10  ;;  %v4545_v10 = vld [vmem:[%s7283_s28 + $0x268] sm:$0xff] }
 0x168   : > { %v1434_v14 = vpop.permute.xlu0 %1433  ;;  %1154 = vmatprep.mubr.f32.mxu0 %v4513_v13  ;;  %v4544_v13 = vld [vmem:[%s7283_s28 + $0x260] sm:$0xff] }
 0x169   : > { %v1404_v16 = vpop.permute.xlu1 %1403 }
 0x16a   : > { %4820 = vmatpush3.msra.mxu0 %v1404_v16 }
 0x16b   : > { %1155 = vmatmul.mubr.f32.gmra.mxu0 %v4512_v15  ;;  %4821 = vmatprep.subr.mxu0 %v1434_v14  ;;  %v4547_v15 = vld [vmem:[%s7283_s28 + $0x278] sm:$0xff] }
 0x16c   : > { %v1432_v18 = vpop.permute.xlu0 %1431  ;;  %1159 = vmatprep.mubr.f32.mxu0 %v4515_v17 }
 0x16d   : > { %v1402_v20 = vpop.permute.xlu1 %1401 }
 0x16e   : > { %4822 = vmatpush3.msra.mxu0 %v1402_v20  ;;  %v4548_v20 = vld [vmem:[%s7283_s28 + $0x280] sm:$0xff] }
 0x16f   : > { %1160 = vmatmul.mubr.f32.gmra.mxu0 %v4514_v19  ;;  %4823 = vmatprep.subr.mxu0 %v1432_v18  ;;  %v4546_v18 = vld [vmem:[%s7283_s28 + $0x270] sm:$0xff]  ;;  %v4549_v19 = vld [vmem:[%s7283_s28 + $0x288] sm:$0xff] }
 0x170   : > { %v1430_v22 = vpop.permute.xlu0 %1429  ;;  %1164 = vmatprep.mubr.f32.mxu0 %v4517_v21  ;;  %v4551_v21 = vld [vmem:[%s7283_s28 + $0x298] sm:$0xff] }
 0x171   : > { %v1400_v24 = vpop.permute.xlu1 %1399 }
 0x172   : > { %4824 = vmatpush3.msra.mxu0 %v1400_v24  ;;  %v4552_v24 = vld [vmem:[%s7283_s28 + $0x2a0] sm:$0xff] }
 0x173   : > { %1165 = vmatmul.mubr.f32.gmra.mxu0 %v4516_v23  ;;  %4825 = vmatprep.subr.mxu0 %v1430_v22  ;;  %v4550_v22 = vld [vmem:[%s7283_s28 + $0x290] sm:$0xff]  ;;  %v4553_v23 = vld [vmem:[%s7283_s28 + $0x2a8] sm:$0xff] }
 0x174   : > { %v1428_v26 = vpop.permute.xlu0 %1427  ;;  %1169 = vmatprep.mubr.f32.mxu0 %v4519_v25  ;;  %v4555_v25 = vld [vmem:[%s7283_s28 + $0x2b8] sm:$0xff] }
 0x175   : > { %v1398_v28 = vpop.permute.xlu1 %1397 }
 0x176   : > { %4826 = vmatpush3.msra.mxu0 %v1398_v28  ;;  %v4556_v28 = vld [vmem:[%s7283_s28 + $0x2c0] sm:$0xff] }
 0x177   : > { %1170 = vmatmul.mubr.f32.gmra.mxu0 %v4518_v27  ;;  %4827 = vmatprep.subr.mxu0 %v1428_v26  ;;  %v4554_v26 = vld [vmem:[%s7283_s28 + $0x2b0] sm:$0xff]  ;;  %v4557_v27 = vld [vmem:[%s7283_s28 + $0x2c8] sm:$0xff] }
 0x178   : > { %v1426_v30 = vpop.permute.xlu0 %1425  ;;  %1174 = vmatprep.mubr.f32.mxu0 %v4521_v29  ;;  %v4559_v29 = vld [vmem:[%s7283_s28 + $0x2d8] sm:$0xff] }
 0x179   : > { %v1396_v32 = vpop.permute.xlu1 %1395 }
 0x17a   : > { %4828 = vmatpush3.msra.mxu0 %v1396_v32  ;;  %v4560_v32 = vld [vmem:[%s7283_s28 + $0x2e0] sm:$0xff] }
 0x17b   : > { %1175 = vmatmul.mubr.f32.gmra.mxu0 %v4520_v31  ;;  %4829 = vmatprep.subr.mxu0 %v1426_v30  ;;  %v4558_v30 = vld [vmem:[%s7283_s28 + $0x2d0] sm:$0xff]  ;;  %v4561_v31 = vld [vmem:[%s7283_s28 + $0x2e8] sm:$0xff] }
 0x17c   : > { %v1424_v34 = vpop.permute.xlu0 %1423  ;;  %1179 = vmatprep.mubr.f32.mxu0 %v4523_v33  ;;  %v4563_v33 = vld [vmem:[%s7283_s28 + $0x2f8] sm:$0xff] }
 0x17d   : > { %v1394_v36 = vpop.permute.xlu1 %1393 }
 0x17e   : > { %4830 = vmatpush3.msra.mxu0 %v1394_v36 }
 0x17f   : > { %1180 = vmatmul.mubr.f32.gmra.mxu0 %v4522_v35  ;;  %4831 = vmatprep.subr.mxu0 %v1424_v34  ;;  %v4562_v34 = vld [vmem:[%s7283_s28 + $0x2f0] sm:$0xff]  ;;  %s4648_s28 = sshll.u32 %s5572_s14, 5 }
 0x180   : > { %v1422_v38 = vpop.permute.xlu0 %1421  ;;  %1184 = vmatprep.mubr.f32.mxu0 %v4525_v37 }
 0x181   : > { %v1392_v42 = vpop.permute.xlu1 %1391 }
 0x182   : > { %4832 = vmatpush3.msra.mxu0 %v1392_v42 }
 0x183   : > { %1185 = vmatmul.mubr.f32.gmra.mxu0 %v4524_v40  ;;  %4833 = vmatprep.subr.mxu0 %v1422_v38 }
 0x184   : > { %v1420_v39 = vpop.permute.xlu0 %1419  ;;  %1189 = vmatprep.mubr.f32.mxu0 %v4527_v44 }
 0x185   : > { %v1390_v41 = vpop.permute.xlu1 %1389 }
 0x186   : > { %4834 = vmatpush3.msra.mxu0 %v1390_v41 }
 0x187   : > { %1190 = vmatmul.mubr.f32.gmra.mxu0 %v4526_v46  ;;  %4835 = vmatprep.subr.mxu0 %v1420_v39 }
 0x188   : > { %v1418_v47 = vpop.permute.xlu0 %1417  ;;  %1194 = vmatprep.mubr.f32.mxu0 %v4529_v43 }
 0x189   : > { %v1388_v48 = vpop.permute.xlu1 %1387 }
 0x18a   : > { %4836 = vmatpush3.msra.mxu0 %v1388_v48 }
 0x18b   : > { %1195 = vmatmul.mubr.f32.gmra.mxu0 %v4528_v45  ;;  %4837 = vmatprep.subr.mxu0 %v1418_v47 }
 0x18c   : > { %v1416_v50 = vpop.permute.xlu0 %1415  ;;  %1199 = vmatprep.mubr.f32.mxu0 %v4531_v49 }
 0x18d   : > { %v1386_v52 = vpop.permute.xlu1 %1385 }
 0x18e   : > { %4838 = vmatpush3.msra.mxu0 %v1386_v52 }
 0x18f   : > { %1200 = vmatmul.mubr.f32.gmra.mxu0 %v4530_v51  ;;  %4839 = vmatprep.subr.mxu0 %v1416_v50 }
 0x190   : > { %1543 = vmatprep.mubr.f32.mxu0 %v4533_v53 }
 0x191   : > { %v1384_v55 = vpop.permute.xlu1 %1383 }
 0x192   : > { %4840 = vmatpush3.msra.mxu0 %v1384_v55 }
 0x193   : > { %1544 = vmatmul.mubr.f32.vlgmr.msra.gmra.mxu0 %v4532_v54 }
 0x194   : > { %1548 = vmatprep.mubr.f32.mxu0 %v4535_v56 }
 0x197   : > { %1549 = vmatmul.mubr.f32.gmra.mxu0 %v4534_v57 }
 0x198   : > { %1553 = vmatprep.mubr.f32.mxu0 %v4537_v58 }
 0x19b   : > { %1554 = vmatmul.mubr.f32.gmra.mxu0 %v4536_v59 }
 0x19c   : > { %1558 = vmatprep.mubr.f32.mxu0 %v4539_v60  ;;  %v4761_v62 = vpop.f32.mrf.mxu1 }
 0x19e   : > { %v4762_v0 = vpop.f32.mrf.mxu1 }
 0x19f   : > { %1559 = vmatmul.mubr.f32.gmra.mxu0 %v4538_v61  ;;  %v4763_v2 = vadd.f32 %v4762_v0, %v4761_v62 }
 0x1a0   : > { %1563 = vmatprep.mubr.f32.mxu0 %v4541_v63  ;;  %v4764_v4 = vpop.f32.mrf.mxu1 }
 0x1a2   : > { %v4765_v6 = vpop.f32.mrf.mxu1 }
 0x1a3   : > { %1564 = vmatmul.mubr.f32.gmra.mxu0 %v4540_v3  ;;  %v4766_v7 = vadd.f32 %v4765_v6, %v4764_v4 }
 0x1a4   : > { %1568 = vmatprep.mubr.f32.mxu0 %v4543_v5  ;;  %v4767_v9 = vpop.f32.mrf.mxu1 }
 0x1a6   : > { %v4768_v11 = vpop.f32.mrf.mxu1 }
 0x1a7   : > { %1569 = vmatmul.mubr.f32.gmra.mxu0 %v4542_v8  ;;  %v4769_v12 = vadd.f32 %v4768_v11, %v4767_v9 }
 0x1a8   : > { %1573 = vmatprep.mubr.f32.mxu0 %v4545_v10  ;;  %v4770_v14 = vpop.f32.mrf.mxu1 }
 0x1aa   : > { %v4771_v16 = vpop.f32.mrf.mxu1 }
 0x1ab   : > { %1574 = vmatmul.mubr.f32.gmra.mxu0 %v4544_v13  ;;  %v4772_v17 = vadd.f32 %v4771_v16, %v4770_v14 }
 0x1ac   : > { %1578 = vmatprep.mubr.f32.mxu0 %v4547_v15  ;;  %v6467_v59 = vpop.f32.mrf.mxu1 }
 0x1ae   : > { %v6471_v63 = vpop.f32.mrf.mxu1 }
 0x1af   : > { %1579 = vmatmul.mubr.f32.gmra.mxu0 %v4546_v18 }
 0x1b0   : > { %1583 = vmatprep.mubr.f32.mxu0 %v4549_v19  ;;  %v6475_v4 = vpop.f32.mrf.mxu1 }
 0x1b1   : > { %7288 = vst [vmem:[#allocation16_spill] sm:$0xff] %v6475_v4 }
 0x1b2   : > { %v6479_v8 = vpop.f32.mrf.mxu1 }
 0x1b3   : > { %1584 = vmatmul.mubr.f32.gmra.mxu0 %v4548_v20  ;;  %7289 = vst [vmem:[#allocation17_spill] sm:$0xff] %v6479_v8 }
 0x1b4   : > { %1588 = vmatprep.mubr.f32.mxu0 %v4551_v21 }
 0x1b7   : > { %1589 = vmatmul.mubr.f32.gmra.mxu0 %v4550_v22 }
 0x1b8   : > { %1593 = vmatprep.mubr.f32.mxu0 %v4553_v23 }
 0x1bb   : > { %1594 = vmatmul.mubr.f32.gmra.mxu0 %v4552_v24 }
 0x1bc   : > { %1598 = vmatprep.mubr.f32.mxu0 %v4555_v25 }
 0x1bf   : > { %1599 = vmatmul.mubr.f32.gmra.mxu0 %v4554_v26 }
 0x1c0   : > { %1603 = vmatprep.mubr.f32.mxu0 %v4557_v27 }
 0x1c3   : > { %1604 = vmatmul.mubr.f32.gmra.mxu0 %v4556_v28 }
 0x1c4   : > { %1608 = vmatprep.mubr.f32.mxu0 %v4559_v29 }
 0x1c7   : > { %1609 = vmatmul.mubr.f32.gmra.mxu0 %v4558_v30 }
 0x1c8   : > { %1613 = vmatprep.mubr.f32.mxu0 %v4561_v31 }
 0x1cb   : > { %1614 = vmatmul.mubr.f32.gmra.mxu0 %v4560_v32 }
 0x1cc   : > { %1618 = vmatprep.mubr.f32.mxu0 %v4563_v33 }
 0x1cf   : > { %1619 = vmatmul.mubr.f32.gmra.mxu0 %v4562_v34 }
 0x213   : > { %v4681_v35 = vpop.f32.mrf.mxu0 }
 0x215   : > { %v4682_v36 = vpop.f32.mrf.mxu0 }
 0x216   : > { %v4683_v37 = vadd.f32 %v4682_v36, %v4681_v35 }
 0x217   : > { %v4684_v38 = vpop.f32.mrf.mxu0 }
 0x218   : > { %v1272_v40 = vadd.f32 %v4763_v2, %v4683_v37 }
 0x219   : > { %v4685_v42 = vpop.f32.mrf.mxu0 }
 0x21a   : > { %v4686_v44 = vadd.f32 %v4685_v42, %v4684_v38 }
 0x21b   : > { %v4687_v39 = vpop.f32.mrf.mxu0 }
 0x21c   : > { %v1277_v46 = vadd.f32 %v4766_v7, %v4686_v44 }
 0x21d   : > { %v4688_v41 = vpop.f32.mrf.mxu0 }
 0x21e   : > { %v4689_v43 = vadd.f32 %v4688_v41, %v4687_v39 }
 0x21f   : > { %v4690_v47 = vpop.f32.mrf.mxu0 }
 0x220   : > { %v6459_v45 = vadd.f32 %v4769_v12, %v4689_v43  ;;  %v6483_v12 = vpop.f32.mrf.mxu1 }
 0x221   : > { %v4691_v48 = vpop.f32.mrf.mxu0 }
 0x222   : > { %v4692_v49 = vadd.f32 %v4691_v48, %v4690_v47  ;;  %v6487_v16 = vpop.f32.mrf.mxu1 }
 0x223   : > { %v4693_v50 = vpop.f32.mrf.mxu0 }
 0x224   : > { %v6461_v51 = vadd.f32 %v4772_v17, %v4692_v49  ;;  %v6491_v20 = vpop.f32.mrf.mxu1 }
 0x225   : > { %v4694_v52 = vpop.f32.mrf.mxu0  ;;  %7291 = vst [vmem:[#allocation19_spill] sm:$0xff] %v6491_v20 }
 0x226   : > { %v6463_v53 = vadd.f32 %v4694_v52, %v4693_v50  ;;  %v6495_v24 = vpop.f32.mrf.mxu1 }
 0x227   : > { %v4696_v54 = vpop.f32.mrf.mxu0  ;;  %7292 = vst [vmem:[#allocation20_spill] sm:$0xff] %v6495_v24 }
 0x228   : > { %7285 = vst [vmem:[#allocation13_spill] sm:$0xff] %v6463_v53  ;;  %v6499_v28 = vpop.f32.mrf.mxu1 }
 0x229   : > { %v4697_v55 = vpop.f32.mrf.mxu0 }
 0x22a   : > { %v6465_v56 = vadd.f32 %v4697_v55, %v4696_v54  ;;  %v6505_v31 = vpop.f32.mrf.mxu1 }
 0x22b   : > { %v4699_v57 = vpop.f32.mrf.mxu0 }
 0x22c   : > { %7286 = vst [vmem:[#allocation14_spill] sm:$0xff] %v6465_v56  ;;  %v6507_v34 = vpop.f32.mrf.mxu1 }
 0x22d   : > { %v4700_v58 = vpop.f32.mrf.mxu0 }
 0x22e   : > { %v6469_v60 = vadd.f32 %v4700_v58, %v4699_v57  ;;  %v6511_v42 = vpop.f32.mrf.mxu1 }
 0x22f   : > { %v4702_v61 = vpop.f32.mrf.mxu0 }
 0x230   : > { %v4791_v47 = vpop.f32.mrf.mxu1 }
 0x231   : > { %v4703_v62 = vpop.f32.mrf.mxu0 }
 0x232   : > { %v6473_v0 = vadd.f32 %v4703_v62, %v4702_v61  ;;  %v4792_v54 = vpop.f32.mrf.mxu1 }
 0x233   : > { %v4705_v2 = vpop.f32.mrf.mxu0 }
 0x234   : > { %7287 = vst [vmem:[#allocation15_spill] sm:$0xff] %v6473_v0  ;;  %v4794_v61 = vpop.f32.mrf.mxu1  ;;  %v4793_v0 = vadd.f32 %v4792_v54, %v4791_v47  ;;  %v4787_v47 = vadd.f32 %v6505_v31, %v6499_v28 }
 0x235   : > { %v4706_v3 = vpop.f32.mrf.mxu0 }
 0x236   : > { %v6477_v5 = vadd.f32 %v4706_v3, %v4705_v2  ;;  %v4795_v2 = vpop.f32.mrf.mxu1 }
 0x237   : > { %v4708_v6 = vpop.f32.mrf.mxu0  ;;  %v4796_v54 = vadd.f32 %v4795_v2, %v4794_v61 }
 0x239   : > { %v4709_v7 = vpop.f32.mrf.mxu0 }
 0x23a   : > { %v6481_v9 = vadd.f32 %v4709_v7, %v4708_v6  ;;  %v4797_v6 = vpop.f32.mrf.mxu1 }
 0x23b   : > { %v4711_v10 = vpop.f32.mrf.mxu0 }
 0x23c   : > { %7290 = vst [vmem:[#allocation18_spill] sm:$0xff] %v6481_v9 }
 0x23d   : > { %v4712_v11 = vpop.f32.mrf.mxu0 }
 0x23e   : > { %v6485_v13 = vadd.f32 %v4712_v11, %v4711_v10  ;;  %v4798_v11 = vpop.f32.mrf.mxu1 }
 0x23f   : > { %v4714_v14 = vpop.f32.mrf.mxu0 }
 0x241   : > { %v4715_v15 = vpop.f32.mrf.mxu0 }
 0x242   : > { %v6489_v17 = vadd.f32 %v4715_v15, %v4714_v14  ;;  %v4800_v15 = vpop.f32.mrf.mxu1 }
 0x243   : > { %v4717_v18 = vpop.f32.mrf.mxu0 }
 0x245   : > { %v4718_v19 = vpop.f32.mrf.mxu0 }
 0x246   : > { %v6493_v21 = vadd.f32 %v4718_v19, %v4717_v18 }
 0x247   : > { %v4720_v22 = vpop.f32.mrf.mxu0 }
 0x249   : > { %v4721_v23 = vpop.f32.mrf.mxu0 }
 0x24a   : > { %v6497_v25 = vadd.f32 %v4721_v23, %v4720_v22  ;;  %v4801_v22 = vpop.f32.mrf.mxu1 }
 0x24b   : > { %v4723_v26 = vpop.f32.mrf.mxu0 }
 0x24d   : > { %v4724_v27 = vpop.f32.mrf.mxu0 }
 0x24f   : > { %v6501_v29 = vpop.f32.mrf.mxu0 }
 0x251   : > { %v6503_v30 = vpop.f32.mrf.mxu0 }
 0x253   : > { %v4841_v32 = vpop.f32.mrf.mxu0 }
 0x255   : > { %v4842_v33 = vpop.f32.mrf.mxu0 }
 0x256   : > { %v4843_v35 = vadd.f32 %v4842_v33, %v4841_v32  ;;  %v6541_v32 = vpop.permute.xlu0 %1733 }
 0x257   : > { %v4844_v36 = vpop.f32.mrf.mxu0 }
 0x258   : > { %v6509_v37 = vadd.f32 %v4843_v35, %v1272_v40  ;;  %v4803_v35 = vpop.f32.mrf.mxu1 }
 0x259   : > { %v4845_v38 = vpop.f32.mrf.mxu0 }
 0x25a   : > { %7293 = vst [vmem:[#allocation21_spill] sm:$0xff] %v6509_v37  ;;  %v4846_v44 = vadd.f32 %v4845_v38, %v4844_v36  ;;  %v1729_v38 = vpop.permute.xlu1 %1728 }
 0x25b   : > { %v4847_v39 = vpop.f32.mrf.mxu0 }
 0x25c   : > { %v6513_v41 = vadd.f32 %v4846_v44, %v1277_v46 }
 0x25d   : > { %v4848_v43 = vpop.f32.mrf.mxu0 }
 0x25e   : > { %7294 = vst [vmem:[#allocation22_spill] sm:$0xff] %v6513_v41  ;;  %v4849_v48 = vadd.f32 %v4848_v43, %v4847_v39  ;;  %v1719_v39 = vpop.permute.xlu0 %1718  ;;  %v4804_v43 = vpop.f32.mrf.mxu1 }
 0x25f   : > { %v4850_v49 = vpop.f32.mrf.mxu0  ;;  %v4805_v56 = vadd.f32 %v4804_v43, %v4803_v35 }
 0x260   : > { %v6516_v50 = vadd.f32 %v4849_v48, %v6459_v45 }
 0x261   : > { %v4851_v52 = vpop.f32.mrf.mxu0 }
 0x262   : > { %7295 = vst [vmem:[#allocation23_spill] sm:$0xff] %v6516_v50  ;;  %v4852_v55 = vadd.f32 %v4851_v52, %v4850_v49  ;;  %v4806_v52 = vpop.f32.mrf.mxu1  ;;  %v1709_v41 = vpop.permute.xlu0 %1708  ;;  %v4725_v50 = vadd.f32 %v4724_v27, %v4723_v26  ;;  %v4781_v27 = vadd.f32 %v6487_v16, %v6483_v12 }
 0x263   : > { %v6518_v57 = vpop.f32.mrf.mxu0 }
 0x264   : > { %7296 = vst [vmem:[#allocation24_spill] sm:$0xff] %v6518_v57  ;;  %v6521_v40 = vadd.f32 %v4852_v55, %v6461_v51  ;;  %v1724_v55 = vpop.permute.xlu1 %1723  ;;  %v1342_v53 = vadd.f32 %v4805_v56, %v4725_v50  ;;  %v1302_v28 = vadd.f32 %v4781_v27, %v6469_v60 }
 0x265   : > { %v6523_v58 = vpop.f32.mrf.mxu0 }
 0x266   : > { %7297 = vst [vmem:[#allocation25_spill] sm:$0xff] %v6521_v40  ;;  %7298 = vst [vmem:[#allocation26_spill] sm:$0xff] %v6523_v58  ;;  %v4799_v40 = vadd.f32 %v4798_v11, %v4797_v6  ;;  %v4728_v58 = vadd.f32 %v6503_v30, %v6501_v29  ;;  %v1699_v20 = vpop.permute.xlu0 %1698  ;;  %v4775_v29 = vadd.f32 %v6471_v63, %v6467_v59 }
 0x267   : > { %v6525_v46 = vpop.f32.mrf.mxu0  ;;  %v1327_v59 = vadd.f32 %v4796_v54, %v6489_v17  ;;  %v7303_v17 = vld [vmem:[#allocation13_spill] sm:$0xff] }
 0x268   : > { %7299 = vst [vmem:[#allocation27_spill] sm:$0xff] %v6525_v46  ;;  %v1332_v4 = vadd.f32 %v4799_v40, %v6493_v21  ;;  %v1322_v21 = vadd.f32 %v4793_v0, %v6485_v13  ;;  %v1312_v0 = vadd.f32 %v4787_v47, %v6477_v5  ;;  %v4790_v13 = vadd.f32 %v6511_v42, %v6507_v34 }
 0x269   : > { %v6527_v62 = vpop.f32.mrf.mxu0  ;;  %v1292_v2 = vadd.f32 %v4775_v29, %v7303_v17 }
 0x26a   : > { %7300 = vst [vmem:[#allocation28_spill] sm:$0xff] %v6527_v62  ;;  %v4807_v62 = vpop.f32.mrf.mxu1 }
 0x26b   : > { %v6529_v3 = vpop.f32.mrf.mxu0  ;;  %v4808_v57 = vadd.f32 %v4807_v62, %v4806_v52 }
 0x26d   : > { %v6531_v45 = vpop.f32.mrf.mxu0  ;;  %v1347_v56 = vadd.f32 %v4808_v57, %v4728_v58 }
 0x26f   : > { %v6533_v7 = vpop.f32.mrf.mxu0 }
 0x270   : > { %7301 = vst [vmem:[#allocation29_spill] sm:$0xff] %v6533_v7  ;;  %v1714_v7 = vpop.permute.xlu1 %1713 }
 0x271   : > { %v6535_v10 = vpop.f32.mrf.mxu0 }
 0x272   : > { %7302 = vst [vmem:[#allocation30_spill] sm:$0xff] %v6535_v10  ;;  %v4802_v10 = vadd.f32 %v4801_v22, %v4800_v15  ;;  %v7308_v15 = vld [vmem:[#allocation24_spill] sm:$0xff]  ;;  %v7309_v22 = vld [vmem:[#allocation26_spill] sm:$0xff] }
 0x273   : > { %v4865_v51 = vpop.f32.mrf.mxu0 }
 0x274   : > { %v1337_v30 = vadd.f32 %v4802_v10, %v6497_v25  ;;  %v1704_v63 = vpop.permute.xlu1 %1703  ;;  %v7304_v10 = vld [vmem:[#allocation19_spill] sm:$0xff] }
 0x275   : > { %v4866_v14 = vpop.f32.mrf.mxu0 }
 0x277   : > { %v6537_v18 = vpop.f32.mrf.mxu0 }
 0x279   : > { %v6539_v19 = vpop.f32.mrf.mxu0 }
 0x27a   : > { %v4870_v58 = vadd.f32 %v6539_v19, %v6537_v18  ;;  %v4855_v18 = vadd.f32 %v7309_v22, %v7308_v15 }
 0x27b   : > { %v4871_v23 = vpop.f32.mrf.mxu0 }
 0x27c   : > { %v1628_v47 = vadd.f32 %v4855_v18, %v1292_v2 }
 0x27d   : > { %v4872_v33 = vpop.f32.mrf.mxu0 }
 0x27e   : > { %v4873_v9 = vadd.f32 %v4872_v33, %v4871_v23  ;;  %v1694_v23 = vpop.permute.xlu1 %1693  ;;  %v7311_v33 = vld [vmem:[#allocation30_spill] sm:$0xff] }
 0x27f   : > { %v4874_v36 = vpop.f32.mrf.mxu0 }
 0x281   : > { %v4875_v44 = vpop.f32.mrf.mxu0 }
 0x283   : > { %v4877_v48 = vpop.f32.mrf.mxu0 }
 0x285   : > { %v4878_v49 = vpop.f32.mrf.mxu0 }
 0x286   : > { %v4879_v46 = vadd.f32 %v4878_v49, %v4877_v48 }
 0x287   : > { %v4880_v1 = vpop.f32.mrf.mxu0 }
 0x288   : > { %v1636_v6 = vadd.f32 %v4879_v46, %v1332_v4  ;;  %v4867_v4 = vadd.f32 %v4866_v14, %v4865_v51  ;;  %v7305_v51 = vld [vmem:[#allocation20_spill] sm:$0xff] }
 0x289   : > { %v4881_v37 = vpop.f32.mrf.mxu0  ;;  %v4784_v14 = vadd.f32 %v7305_v51, %v7304_v10 }
 0x28a   : > { %v4882_v11 = vadd.f32 %v4881_v37, %v4880_v1  ;;  %v1634_v1 = vadd.f32 %v4873_v9, %v1322_v21  ;;  %v1748_v37 = vadd.f32 %v1719_v39, %v1636_v6  ;;  %v4861_v9 = vadd.f32 %v6531_v45, %v6529_v3  ;;  %v7306_v3 = vld [vmem:[#allocation18_spill] sm:$0xff]  ;;  %v7313_v6 = vld [vmem:[#allocation17_spill] sm:$0xff]  ;;  %v7316_v21 = vld [vmem:[#allocation28_spill] sm:$0xff] }
 0x28b   : > { %v4883_v8 = vpop.f32.mrf.mxu0  ;;  %v1632_v57 = vadd.f32 %v4867_v4, %v1312_v0  ;;  %v1317_v45 = vadd.f32 %v4790_v13, %v7306_v3 }
 0x28c   : > { %v1637_v12 = vadd.f32 %v4882_v11, %v1337_v30  ;;  %v1746_v60 = vadd.f32 %v1709_v41, %v1634_v1  ;;  %v1780_v42 = vmul.f32 0.01, %v1748_v37  ;;  %vm1764_vm4 = vcmp.gt.f32.partialorder %v1748_v37, 0.0  ;;  %v7317_v1 = vld [vmem:[#allocation14_spill] sm:$0xff] }
 0x28d   : > { %v4884_v24 = vpop.f32.mrf.mxu0  ;;  %v1630_v41 = vadd.f32 %v4861_v9, %v1302_v28 }
 0x28e   : > { %v4885_v26 = vadd.f32 %v4884_v24, %v4883_v8  ;;  %v4876_v8 = vadd.f32 %v4875_v44, %v4874_v36  ;;  %v1749_v5 = vadd.f32 %v1724_v55, %v1637_v12  ;;  %v1744_v36 = vadd.f32 %v1699_v20, %v1632_v57  ;;  %v7312_v55 = vld [vmem:[#allocation16_spill] sm:$0xff]  ;;  %v7315_v20 = vld [vmem:[#allocation27_spill] sm:$0xff] }
 0x28f   : > { %v4886_v40 = vpop.f32.mrf.mxu0  ;;  %v1778_v44 = vmul.f32 0.01, %v1746_v60  ;;  %v1796_v49 = vsel %vm1764_vm4, %v1748_v37, %v1780_v42  ;;  %v4778_v11 = vadd.f32 %v7313_v6, %v7312_v55  ;;  %vm1762_vm6 = vcmp.gt.f32.partialorder %v1746_v60, 0.0  ;;  %v7320_v42 = vld [vmem:[#allocation25_spill] sm:$0xff] }
 0x290   : > { %v1638_v62 = vadd.f32 %v4885_v26, %v1342_v53  ;;  %v1689_v53 = vpop.permute.xlu0 %1688  ;;  %v1635_v61 = vadd.f32 %v4876_v8, %v1327_v59  ;;  %v1781_v52 = vmul.f32 0.01, %v1749_v5  ;;  %v7314_v26 = vld [vmem:[#allocation15_spill] sm:$0xff]  ;;  %vm1765_vm7 = vcmp.gt.f32.partialorder %v1749_v5, 0.0 }
 0x291   : > { %v4887_v24 = vpop.f32.mrf.mxu0  ;;  %v1307_v27 = vadd.f32 %v4784_v14, %v7314_v26  ;;  %v4858_v54 = vadd.f32 %v7316_v21, %v7315_v20  ;;  %v1776_v29 = vmul.f32 0.01, %v1744_v36  ;;  %v1297_v8 = vadd.f32 %v4778_v11, %v7317_v1 }
 0x292   : > { %v1750_v16 = vadd.f32 %v1729_v38, %v1638_v62  ;;  %v4888_v50 = vadd.f32 %v4887_v24, %v4886_v40  ;;  %v1633_v38 = vadd.f32 %v4870_v58, %v1317_v45  ;;  %v1747_v43 = vadd.f32 %v1714_v7, %v1635_v61  ;;  %v1684_v24 = vpop.permute.xlu1 %1683  ;;  %v7321_v45 = vld [vmem:[#allocation22_spill] sm:$0xff] }
 0x293   : > { %v1742_v40 = vadd.f32 %v1689_v53, %v1630_v41  ;;  %v1794_v62 = vsel %vm1762_vm6, %v1746_v60, %v1778_v44  ;;  %vm1760_vm8 = vcmp.gt.f32.partialorder %v1744_v36, 0.0  ;;  %v7318_v53 = vld [vmem:[#allocation23_spill] sm:$0xff] }
 0x294   : > { %v1639_v25 = vadd.f32 %v4888_v50, %v1347_v56  ;;  %vm1766_vm3 = vcmp.gt.f32.partialorder %v1750_v16, 0.0  ;;  %v1782_v31 = vmul.f32 0.01, %v1750_v16  ;;  %v1679_v39 = vpop.permute.xlu0 %1678  ;;  %v1745_v30 = vadd.f32 %v1704_v63, %v1633_v38 }
 0x295   : > { %v1797_v56 = vsel %vm1765_vm7, %v1749_v5, %v1781_v52  ;;  %v1779_v4 = vmul.f32 0.01, %v1747_v43  ;;  %vm1763_vm9 = vcmp.gt.f32.partialorder %v1747_v43, 0.0  ;;  %v1740_v12 = vadd.f32 %v1679_v39, %v1628_v47  ;;  %v7319_v5 = vld [vmem:[#allocation21_spill] sm:$0xff] }
 0x296   : > { %v1751_v46 = vadd.f32 %v6541_v32, %v1639_v25  ;;  %v1798_v34 = vsel %vm1766_vm3, %v1750_v16, %v1782_v31  ;;  %v7310_v32 = vld [vmem:[#allocation29_spill] sm:$0xff]  ;;  %v1629_v16 = vadd.f32 %v4858_v54, %v1297_v8  ;;  %v1774_v50 = vmul.f32 0.01, %v1742_v40  ;;  %v1674_v63 = vpop.permute.xlu1 %1673 }
 0x297   : > { %1876 = vrot.lane.b32.xlu0 %v1798_v34, %s7307_s22  ;;  %v4864_v35 = vadd.f32 %v7311_v33, %v7310_v32  ;;  %v1792_v0 = vsel %vm1760_vm8, %v1744_v36, %v1776_v29  ;;  %v1795_v13 = vsel %vm1763_vm9, %v1747_v43, %v1779_v4  ;;  %v1777_v59 = vmul.f32 0.01, %v1745_v30 }
 0x298   : > { %vm1767_vm5 = vcmp.gt.f32.partialorder %v1751_v46, 0.0  ;;  %v1783_v19 = vmul.f32 0.01, %v1751_v46  ;;  %v1669_v37 = vpop.permute.xlu0 %1668  ;;  %vm1758_vm10 = vcmp.gt.f32.partialorder %v1742_v40, 0.0  ;;  %vm1761_vm11 = vcmp.gt.f32.partialorder %v1745_v30, 0.0 }
 0x299   : > { %v1631_v7 = vadd.f32 %v4864_v35, %v1307_v27  ;;  %v1738_v9 = vadd.f32 %v1669_v37, %v7318_v53  ;;  %v1772_v25 = vmul.f32 0.01, %v1740_v12  ;;  %v1741_v57 = vadd.f32 %v1684_v24, %v1629_v16  ;;  %v4564_v24 = vld [vmem:[%s7237_s3 + $0x40] sm:$0xff] }
 0x29a   : > { %v1799_v48 = vsel %vm1767_vm5, %v1751_v46, %v1783_v19  ;;  %v1790_v58 = vsel %vm1758_vm10, %v1742_v40, %v1774_v50  ;;  %v1793_v60 = vsel %vm1761_vm11, %v1745_v30, %v1777_v59  ;;  %vm1756_vm12 = vcmp.gt.f32.partialorder %v1740_v12, 0.0  ;;  %v1664_v14 = vpop.permute.xlu1 %1663  ;;  %5075 = vmatprep.mubr.f32.mxu1 %v4564_v24  ;;  %v2390_v59 = vld [vmem:[%s7238_s4 + $0x8] sm:$0xff]  ;;  %v2389_v53 = vld [vmem:[%s7238_s4] sm:$0xff] }
 0x29b   : > { %1878 = vrot.lane.b32.xlu1 %v1799_v48, %s7307_s22  ;;  %1872 = vrot.lane.b32.xlu0 %v1796_v49, %s7307_s22  ;;  %v1743_v28 = vadd.f32 %v1694_v23, %v1631_v7  ;;  %v1770_v34 = vmul.f32 0.01, %v1738_v9  ;;  %v1739_v17 = vadd.f32 %v1674_v63, %v7320_v42  ;;  %v1788_v2 = vsel %vm1756_vm12, %v1740_v12, %v1772_v25  ;;  %v2392_v63 = vld [vmem:[%s7238_s4 + $0x18] sm:$0xff]  ;;  %v2391_v25 = vld [vmem:[%s7238_s4 + $0x10] sm:$0xff] }
 0x29c   : > { %v1659_v31 = vpop.permute.xlu0 %1658  ;;  %v1773_v51 = vmul.f32 0.01, %v1741_v57  ;;  %vm1754_vm14 = vcmp.gt.f32.partialorder %v1738_v9, 0.0  ;;  %vm1757_vm15 = vcmp.gt.f32.partialorder %v1741_v57, 0.0  ;;  %v1737_v15 = vadd.f32 %v1664_v14, %v7321_v45  ;;  %v4576_v24 = vld [vmem:[%s7237_s3 + $0xa0] sm:$0xff] }
 0x29d   : > { %v1775_v61 = vmul.f32 0.01, %v1743_v28  ;;  %vm1759_vm13 = vcmp.gt.f32.partialorder %v1743_v28, 0.0  ;;  %v1736_v46 = vadd.f32 %v1659_v31, %v7319_v5  ;;  %v1786_v22 = vsel %vm1754_vm14, %v1738_v9, %v1770_v34  ;;  %v2394_v9 = vld [vmem:[%s7238_s4 + $0x28] sm:$0xff]  ;;  %v2396_v31 = vld [vmem:[%s7238_s4 + $0x38] sm:$0xff] }
 0x29e   : > { %v1789_v18 = vsel %vm1757_vm15, %v1741_v57, %v1773_v51  ;;  %v1771_v41 = vmul.f32 0.01, %v1739_v17  ;;  %vm1755_vm3 = vcmp.gt.f32.partialorder %v1739_v17, 0.0  ;;  %v1769_v19 = vmul.f32 0.01, %v1737_v15  ;;  %v2393_v57 = vld [vmem:[%s7238_s4 + $0x20] sm:$0xff] }
 0x29f   : > { %1868 = vrot.lane.b32.xlu0 %v1794_v62, %s7307_s22  ;;  %1874 = vrot.lane.b32.xlu1 %v1797_v56, %s7307_s22  ;;  %v1791_v10 = vsel %vm1759_vm13, %v1743_v28, %v1775_v61  ;;  %v1768_v3 = vmul.f32 0.01, %v1736_v46  ;;  %vm1752_vm1 = vcmp.gt.f32.partialorder %v1736_v46, 0.0  ;;  %vm1753_vm4 = vcmp.gt.f32.partialorder %v1737_v15, 0.0 }
 0x2a0   : > { %v1787_v32 = vsel %vm1755_vm3, %v1739_v17, %v1771_v41  ;;  %v1785_v33 = vsel %vm1753_vm4, %v1737_v15, %v1769_v19  ;;  %v7323_v62 = vmov 0.0   ;;  %v4565_v19 = vld [vmem:[%s7237_s3 + $0x48] sm:$0xff]  ;;  %vm2608_vm13 = vcmask 146568  }
 0x2a1   : > { %v1784_v23 = vsel %vm1752_vm1, %v1736_v46, %v1768_v3  ;;  %vm2649_vm14 = vcmask 138248   ;;  %vm2707_vm15 = vcmask 523264  }
 0x2a3   : > { %1864 = vrot.lane.b32.xlu0 %v1792_v0, %s7307_s22  ;;  %1870 = vrot.lane.b32.xlu1 %v1795_v13, %s7307_s22  ;;  %v4572_v13 = vld [vmem:[%s7237_s3 + $0x80] sm:$0xff] }
 0x2a4   : > { %5163 = vmatprep.mubr.f32.mxu0 %v4572_v13  ;;  %v2469_v13 = vld [vmem:[%s7249_s15] sm:$0xff] }
 0x2a7   : > { %1860 = vrot.lane.b32.xlu0 %v1790_v58, %s7307_s22  ;;  %1866 = vrot.lane.b32.xlu1 %v1793_v60, %s7307_s22  ;;  %v2395_v58 = vld [vmem:[%s7238_s4 + $0x30] sm:$0xff] }
 0x2ab   : > { %1856 = vrot.lane.b32.xlu0 %v1788_v2, %s7307_s22  ;;  %1862 = vrot.lane.b32.xlu1 %v1791_v10, %s7307_s22 }
 0x2af   : > { %1852 = vrot.lane.b32.xlu0 %v1786_v22, %s7307_s22  ;;  %1858 = vrot.lane.b32.xlu1 %v1789_v18, %s7307_s22 }
 0x2b3   : > { %1848 = vrot.lane.b32.xlu0 %v1784_v23, %s7307_s22  ;;  %1854 = vrot.lane.b32.xlu1 %v1787_v32, %s7307_s22 }
 0x2b7   : > { %1850 = vrot.lane.b32.xlu1 %v1785_v33, %s7307_s22 }
 0x309   : > { %v1877_v35 = vpop.permute.xlu0 %1876 }
 0x30a   : > { %1910 = vst.msk [vmem:[#allocation2 + $0x150] sm:$0xff] %vm802_vm2, %v1877_v35 }
 0x30d   : > { %v1873_v36 = vpop.permute.xlu0 %1872  ;;  %v1879_v38 = vpop.permute.xlu1 %1878 }
 0x30e   : > { %1908 = vst.msk [vmem:[#allocation2 + $0x120] sm:$0xff] %vm802_vm2, %v1873_v36  ;;  %1911 = vst.msk [vmem:[#allocation2 + $0x168] sm:$0xff] %vm802_vm2, %v1879_v38 }
 0x311   : > { %v1869_v44 = vpop.permute.xlu0 %1868  ;;  %v1875_v39 = vpop.permute.xlu1 %1874  ;;  %v6601_v43 = vld [vmem:[#allocation2 + $0x150] sm:$0xff] }
 0x312   : > { %1906 = vst.msk [vmem:[#allocation2 + $0xf0] sm:$0xff] %vm802_vm2, %v1869_v44  ;;  %1909 = vst.msk [vmem:[#allocation2 + $0x138] sm:$0xff] %vm802_vm2, %v1875_v39  ;;  %1989 = vrot.lane.b32.xlu0 %v6601_v43, %s7322_s27 }
 0x315   : > { %v1865_v48 = vpop.permute.xlu0 %1864  ;;  %v1871_v49 = vpop.permute.xlu1 %1870  ;;  %v6607_v52 = vld [vmem:[#allocation2 + $0x120] sm:$0xff]  ;;  %v6609_v55 = vld [vmem:[#allocation2 + $0x168] sm:$0xff] }
 0x316   : > { %1904 = vst.msk [vmem:[#allocation2 + $0xc0] sm:$0xff] %vm802_vm2, %v1865_v48  ;;  %1907 = vst.msk [vmem:[#allocation2 + $0x108] sm:$0xff] %vm802_vm2, %v1871_v49  ;;  %1985 = vrot.lane.b32.xlu0 %v6607_v52, %s7322_s27  ;;  %1991 = vrot.lane.b32.xlu1 %v6609_v55, %s7322_s27  ;;  %v4566_v48 = vld [vmem:[%s7237_s3 + $0x50] sm:$0xff]  ;;  %v4567_v49 = vld [vmem:[%s7237_s3 + $0x58] sm:$0xff] }
 0x319   : > { %v1861_v6 = vpop.permute.xlu0 %1860  ;;  %v1867_v11 = vpop.permute.xlu1 %1866  ;;  %v6617_v26 = vld [vmem:[#allocation2 + $0xf0] sm:$0xff]  ;;  %v6619_v27 = vld [vmem:[#allocation2 + $0x138] sm:$0xff] }
 0x31a   : > { %1902 = vst.msk [vmem:[#allocation2 + $0x90] sm:$0xff] %vm802_vm2, %v1861_v6  ;;  %1905 = vst.msk [vmem:[#allocation2 + $0xd8] sm:$0xff] %vm802_vm2, %v1867_v11  ;;  %1981 = vrot.lane.b32.xlu0 %v6617_v26, %s7322_s27  ;;  %1987 = vrot.lane.b32.xlu1 %v6619_v27, %s7322_s27  ;;  %v4568_v6 = vld [vmem:[%s7237_s3 + $0x60] sm:$0xff] }
 0x31d   : > { %v1857_v47 = vpop.permute.xlu0 %1856  ;;  %v1863_v20 = vpop.permute.xlu1 %1862  ;;  %v6627_v21 = vld [vmem:[#allocation2 + $0xc0] sm:$0xff]  ;;  %v6629_v54 = vld [vmem:[#allocation2 + $0x108] sm:$0xff] }
 0x31e   : > { %1900 = vst.msk [vmem:[#allocation2 + $0x60] sm:$0xff] %vm802_vm2, %v1857_v47  ;;  %1903 = vst.msk [vmem:[#allocation2 + $0xa8] sm:$0xff] %vm802_vm2, %v1863_v20  ;;  %1977 = vrot.lane.b32.xlu0 %v6627_v21, %s7322_s27  ;;  %1983 = vrot.lane.b32.xlu1 %v6629_v54, %s7322_s27  ;;  %v4571_v20 = vld [vmem:[%s7237_s3 + $0x78] sm:$0xff] }
 0x321   : > { %v6637_v40 = vld [vmem:[#allocation2 + $0x90] sm:$0xff]  ;;  %v1853_v7 = vpop.permute.xlu0 %1852  ;;  %v1859_v29 = vpop.permute.xlu1 %1858  ;;  %v6639_v30 = vld [vmem:[#allocation2 + $0xd8] sm:$0xff] }
 0x322   : > { %2606 = vst.msk [vmem:[#allocation2 + $0x90] sm:$0xff] %vm608_vm0, %v7323_v62  ;;  %1973 = vrot.lane.b32.xlu0 %v6637_v40, %s7322_s27  ;;  %1979 = vrot.lane.b32.xlu1 %v6639_v30, %s7322_s27 }
 0x323   : > { %1898 = vst.msk [vmem:[#allocation2 + $0x30] sm:$0xff] %vm802_vm2, %v1853_v7  ;;  %1901 = vst.msk [vmem:[#allocation2 + $0x78] sm:$0xff] %vm802_vm2, %v1859_v29  ;;  %v1913_v7 = vld [vmem:[%s7237_s3 + $0x8] sm:$0xff] }
 0x324   : > { %v4573_v29 = vld [vmem:[%s7237_s3 + $0x88] sm:$0xff]  ;;  %2615 = vst.msk [vmem:[#allocation2 + $0x90] sm:$0xff] %vm2608_vm13, %v7323_v62 }
 0x325   : > { %v6649_v56 = vld [vmem:[#allocation2 + $0x60] sm:$0xff]  ;;  %v6651_v4 = vld [vmem:[#allocation2 + $0xa8] sm:$0xff]  ;;  %v1849_v1 = vpop.permute.xlu0 %1848  ;;  %v1855_v8 = vpop.permute.xlu1 %1854 }
 0x326   : > { %2604 = vst.msk [vmem:[#allocation2 + $0x60] sm:$0xff] %vm608_vm0, %v7323_v62  ;;  %2607 = vst.msk [vmem:[#allocation2 + $0xa8] sm:$0xff] %vm608_vm0, %v7323_v62  ;;  %1969 = vrot.lane.b32.xlu0 %v6649_v56, %s7322_s27  ;;  %1975 = vrot.lane.b32.xlu1 %v6651_v4, %s7322_s27 }
 0x327   : > { %1896 = vst.msk [vmem:[#allocation2] sm:$0xff] %vm802_vm2, %v1849_v1  ;;  %1899 = vst.msk [vmem:[#allocation2 + $0x48] sm:$0xff] %vm802_vm2, %v1855_v8  ;;  %v4575_v1 = vld [vmem:[%s7237_s3 + $0x98] sm:$0xff]  ;;  %v1916_v8 = vld [vmem:[%s7237_s3 + $0x20] sm:$0xff] }
 0x328   : > { %2616 = vst.msk [vmem:[#allocation2 + $0xa8] sm:$0xff] %vm2608_vm13, %v7323_v62  ;;  %2613 = vst.msk [vmem:[#allocation2 + $0x60] sm:$0xff] %vm2608_vm13, %v7323_v62 }
 0x329   : > { %v1851_v16 = vpop.permute.xlu1 %1850 }
 0x32a   : > { %v6666_v37 = vld [vmem:[#allocation2 + $0x30] sm:$0xff]  ;;  %v6668_v12 = vld [vmem:[#allocation2 + $0x78] sm:$0xff]  ;;  %1897 = vst.msk [vmem:[#allocation2 + $0x18] sm:$0xff] %vm802_vm2, %v1851_v16  ;;  %vm2470_vm2 = vcmask 64512  }
 0x32b   : > { %2602 = vst.msk [vmem:[#allocation2 + $0x30] sm:$0xff] %vm608_vm0, %v7323_v62  ;;  %2605 = vst.msk [vmem:[#allocation2 + $0x78] sm:$0xff] %vm608_vm0, %v7323_v62  ;;  %1965 = vrot.lane.b32.xlu0 %v6666_v37, %s7322_s27  ;;  %1971 = vrot.lane.b32.xlu1 %v6668_v12, %s7322_s27  ;;  %v1918_v16 = vld [vmem:[%s7237_s3 + $0x30] sm:$0xff] }
 0x32c   : > { %2611 = vst.msk [vmem:[#allocation2 + $0x30] sm:$0xff] %vm2608_vm13, %v7323_v62  ;;  %2614 = vst.msk [vmem:[#allocation2 + $0x78] sm:$0xff] %vm2608_vm13, %v7323_v62 }
 0x32e   : > { %v6679_v50 = vld [vmem:[#allocation2] sm:$0xff]  ;;  %v6681_v28 = vld [vmem:[#allocation2 + $0x48] sm:$0xff] }
 0x32f   : > { %2600 = vst.msk [vmem:[#allocation2] sm:$0xff] %vm608_vm0, %v7323_v62  ;;  %2603 = vst.msk [vmem:[#allocation2 + $0x48] sm:$0xff] %vm608_vm0, %v7323_v62  ;;  %1961 = vrot.lane.b32.xlu0 %v6679_v50, %s7322_s27  ;;  %1967 = vrot.lane.b32.xlu1 %v6681_v28, %s7322_s27 }
 0x330   : > { %2609 = vst.msk [vmem:[#allocation2] sm:$0xff] %vm2608_vm13, %v7323_v62  ;;  %2612 = vst.msk [vmem:[#allocation2 + $0x48] sm:$0xff] %vm2608_vm13, %v7323_v62 }
 0x331   : > { %v6691_v0 = vld [vmem:[#allocation2 + $0x18] sm:$0xff] }
 0x332   : > { %2601 = vst.msk [vmem:[#allocation2 + $0x18] sm:$0xff] %vm608_vm0, %v7323_v62 }
 0x333   : > { %2256 = vrot.lane.b32.xlu0 %v6601_v43, %s7324_s1  ;;  %1963 = vrot.lane.b32.xlu1 %v6691_v0, %s7322_s27  ;;  %2610 = vst.msk [vmem:[#allocation2 + $0x18] sm:$0xff] %vm2608_vm13, %v7323_v62 }
 0x337   : > { %2252 = vrot.lane.b32.xlu0 %v6607_v52, %s7324_s1  ;;  %2258 = vrot.lane.b32.xlu1 %v6609_v55, %s7324_s1 }
 0x33b   : > { %2248 = vrot.lane.b32.xlu0 %v6617_v26, %s7324_s1  ;;  %2254 = vrot.lane.b32.xlu1 %v6619_v27, %s7324_s1 }
 0x33f   : > { %2244 = vrot.lane.b32.xlu0 %v6627_v21, %s7324_s1  ;;  %2250 = vrot.lane.b32.xlu1 %v6629_v54, %s7324_s1 }
 0x343   : > { %2240 = vrot.lane.b32.xlu0 %v6637_v40, %s7324_s1  ;;  %2246 = vrot.lane.b32.xlu1 %v6639_v30, %s7324_s1 }
 0x347   : > { %2236 = vrot.lane.b32.xlu0 %v6649_v56, %s7324_s1  ;;  %2242 = vrot.lane.b32.xlu1 %v6651_v4, %s7324_s1 }
 0x34b   : > { %2232 = vrot.lane.b32.xlu0 %v6666_v37, %s7324_s1  ;;  %2238 = vrot.lane.b32.xlu1 %v6668_v12, %s7324_s1 }
 0x34f   : > { %2228 = vrot.lane.b32.xlu0 %v6679_v50, %s7324_s1  ;;  %2234 = vrot.lane.b32.xlu1 %v6681_v28, %s7324_s1 }
 0x353   : > { %2404 = vperm.xlu0 %5377, %v2390_v59   ;;  %2230 = vrot.lane.b32.xlu1 %v6691_v0, %s7324_s1 }
 0x357   : > { %2414 = vperm.xlu0 %5377, %v2392_v63   ;;  %2399 = vperm.xlu1 %5378, %v2389_v53  }
 0x35b   : > { %2424 = vperm.xlu0 %5377, %v2394_v9   ;;  %2409 = vperm.xlu1 %5378, %v2391_v25  }
 0x35f   : > { %2434 = vperm.xlu0 %5377, %v2396_v31   ;;  %2419 = vperm.xlu1 %5378, %v2393_v57  }
 0x363   : > { %2429 = vperm.xlu1 %5378, %v2395_v58  }
 0x384   : > { %v1990_v60 = vpop.permute.xlu0 %1989 }
 0x388   : > { %v1986_v61 = vpop.permute.xlu0 %1985  ;;  %v1992_v5 = vpop.permute.xlu1 %1991 }
 0x389   : > { %5043 = vmatprep.subr.mxu1 %v1992_v5 }
 0x38a   : > { %5044 = vmatpush3.msra.mxu1 %v1992_v5 }
 0x38b   : > { %5045 = vmatprep.subr.mxu1 %v1990_v60 }
 0x38c   : > { %v1982_v46 = vpop.permute.xlu0 %1981  ;;  %5046 = vmatpush3.msra.mxu1 %v1990_v60  ;;  %v1988_v34 = vpop.permute.xlu1 %1987 }
 0x38d   : > { %5047 = vmatprep.subr.mxu1 %v1988_v34 }
 0x38e   : > { %5048 = vmatpush3.msra.mxu1 %v1988_v34 }
 0x38f   : > { %5049 = vmatprep.subr.mxu1 %v1986_v61 }
 0x390   : > { %v1978_v42 = vpop.permute.xlu0 %1977  ;;  %5050 = vmatpush3.msra.mxu1 %v1986_v61  ;;  %v1984_v17 = vpop.permute.xlu1 %1983 }
 0x391   : > { %5051 = vmatprep.subr.mxu1 %v1984_v17 }
 0x392   : > { %5052 = vmatpush3.msra.mxu1 %v1984_v17 }
 0x393   : > { %5053 = vmatprep.subr.mxu1 %v1982_v46 }
 0x394   : > { %v1974_v2 = vpop.permute.xlu0 %1973  ;;  %5054 = vmatpush3.msra.mxu1 %v1982_v46  ;;  %v1980_v10 = vpop.permute.xlu1 %1979 }
 0x395   : > { %5055 = vmatprep.subr.mxu1 %v1980_v10 }
 0x396   : > { %5056 = vmatpush3.msra.mxu1 %v1980_v10 }
 0x397   : > { %5057 = vmatprep.subr.mxu1 %v1978_v42 }
 0x398   : > { %v1970_v51 = vpop.permute.xlu0 %1969  ;;  %5058 = vmatpush3.msra.mxu1 %v1978_v42  ;;  %v1976_v14 = vpop.permute.xlu1 %1975 }
 0x399   : > { %5059 = vmatprep.subr.mxu1 %v1976_v14 }
 0x39a   : > { %5060 = vmatpush3.msra.mxu1 %v1976_v14 }
 0x39b   : > { %5061 = vmatprep.subr.mxu1 %v1974_v2 }
 0x39c   : > { %5062 = vmatpush3.msra.mxu1 %v1974_v2 }
 0x39d   : > { %v1966_v3 = vpop.permute.xlu0 %1965  ;;  %v1972_v45 = vpop.permute.xlu1 %1971 }
 0x39e   : > { %5063 = vmatprep.subr.mxu1 %v1972_v45 }
 0x39f   : > { %5064 = vmatpush3.msra.mxu1 %v1972_v45 }
 0x3a0   : > { %5065 = vmatprep.subr.mxu1 %v1970_v51 }
 0x3a1   : > { %v1962_v15 = vpop.permute.xlu0 %1961  ;;  %5066 = vmatpush3.msra.mxu1 %v1970_v51  ;;  %v1968_v22 = vpop.permute.xlu1 %1967 }
 0x3a2   : > { %5067 = vmatprep.subr.mxu1 %v1968_v22 }
 0x3a3   : > { %5068 = vmatpush3.msra.mxu1 %v1968_v22 }
 0x3a4   : > { %5069 = vmatprep.subr.mxu1 %v1966_v3 }
 0x3a5   : > { %v2257_v18 = vpop.permute.xlu0 %2256  ;;  %5070 = vmatpush3.msra.mxu1 %v1966_v3  ;;  %v1964_v41 = vpop.permute.xlu1 %1963 }
 0x3a6   : > { %5071 = vmatprep.subr.mxu1 %v1964_v41 }
 0x3a7   : > { %5072 = vmatpush3.msra.mxu1 %v1964_v41 }
 0x3a8   : > { %5073 = vmatprep.subr.mxu1 %v1962_v15 }
 0x3a9   : > { %v2253_v23 = vpop.permute.xlu0 %2252  ;;  %5074 = vmatpush3.msra.mxu1 %v1962_v15  ;;  %v2259_v32 = vpop.permute.xlu1 %2258 }
 0x3aa   : > { %5087 = vmatprep.subr.mxu1 %v6609_v55  ;;  %5131 = vmatprep.subr.mxu0 %v2259_v32 }
 0x3ab   : > { %5076 = vmatmul.mubr.f32.vlgmr.msra.gmra.mxu1 %v4565_v19  ;;  %5132 = vmatpush3.msra.mxu0 %v2259_v32 }
 0x3ac   : > { %5088 = vmatpush3.msra.mxu1 %v6609_v55  ;;  %5133 = vmatprep.subr.mxu0 %v2257_v18 }
 0x3ad   : > { %5089 = vmatprep.subr.mxu1 %v6601_v43  ;;  %v2249_v33 = vpop.permute.xlu0 %2248  ;;  %5134 = vmatpush3.msra.mxu0 %v2257_v18  ;;  %v2255_v35 = vpop.permute.xlu1 %2254 }
 0x3ae   : > { %5090 = vmatpush3.msra.mxu1 %v6601_v43  ;;  %5135 = vmatprep.subr.mxu0 %v2255_v35 }
 0x3af   : > { %5091 = vmatprep.subr.mxu1 %v6619_v27  ;;  %5136 = vmatpush3.msra.mxu0 %v2255_v35 }
 0x3b0   : > { %5092 = vmatpush3.msra.mxu1 %v6619_v27  ;;  %5137 = vmatprep.subr.mxu0 %v2253_v23  ;;  %v4570_v27 = vld [vmem:[%s7237_s3 + $0x70] sm:$0xff] }
 0x3b1   : > { %5093 = vmatprep.subr.mxu1 %v6607_v52  ;;  %5138 = vmatpush3.msra.mxu0 %v2253_v23  ;;  %v2251_v36 = vpop.permute.xlu1 %2250  ;;  %v2245_v38 = vpop.permute.xlu0 %2244 }
 0x3b2   : > { %5094 = vmatpush3.msra.mxu1 %v6607_v52  ;;  %5139 = vmatprep.subr.mxu0 %v2251_v36 }
 0x3b3   : > { %5095 = vmatprep.subr.mxu1 %v6629_v54  ;;  %5140 = vmatpush3.msra.mxu0 %v2251_v36 }
 0x3b4   : > { %5096 = vmatpush3.msra.mxu1 %v6629_v54  ;;  %5141 = vmatprep.subr.mxu0 %v2249_v33  ;;  %v1912_v54 = vld [vmem:[%s7237_s3] sm:$0xff] }
 0x3b5   : > { %5097 = vmatprep.subr.mxu1 %v6617_v26  ;;  %5142 = vmatpush3.msra.mxu0 %v2249_v33  ;;  %v2247_v44 = vpop.permute.xlu1 %2246  ;;  %v2241_v39 = vpop.permute.xlu0 %2240 }
 0x3b6   : > { %5098 = vmatpush3.msra.mxu1 %v6617_v26  ;;  %5143 = vmatprep.subr.mxu0 %v2247_v44  ;;  %v4569_v26 = vld [vmem:[%s7237_s3 + $0x68] sm:$0xff] }
 0x3b7   : > { %5099 = vmatprep.subr.mxu1 %v6639_v30  ;;  %5144 = vmatpush3.msra.mxu0 %v2247_v44 }
 0x3b8   : > { %5100 = vmatpush3.msra.mxu1 %v6639_v30  ;;  %5145 = vmatprep.subr.mxu0 %v2245_v38  ;;  %v1914_v30 = vld [vmem:[%s7237_s3 + $0x10] sm:$0xff] }
 0x3b9   : > { %5101 = vmatprep.subr.mxu1 %v6627_v21  ;;  %5146 = vmatpush3.msra.mxu0 %v2245_v38  ;;  %v2243_v43 = vpop.permute.xlu1 %2242  ;;  %v2237_v55 = vpop.permute.xlu0 %2236 }
 0x3ba   : > { %5102 = vmatpush3.msra.mxu1 %v6627_v21  ;;  %5147 = vmatprep.subr.mxu0 %v2243_v43 }
 0x3bb   : > { %5103 = vmatprep.subr.mxu1 %v6651_v4  ;;  %5148 = vmatpush3.msra.mxu0 %v2243_v43 }
 0x3bc   : > { %5104 = vmatpush3.msra.mxu1 %v6651_v4  ;;  %5149 = vmatprep.subr.mxu0 %v2241_v39  ;;  %v1915_v4 = vld [vmem:[%s7237_s3 + $0x18] sm:$0xff] }
 0x3bd   : > { %5105 = vmatprep.subr.mxu1 %v6637_v40  ;;  %5078 = vmatprep.mubr.f32.mxu1 %v4566_v48  ;;  %v2239_v52 = vpop.permute.xlu1 %2238  ;;  %v2233_v47 = vpop.permute.xlu0 %2232 }
 0x3be   : > { %5106 = vmatpush3.msra.mxu1 %v6637_v40  ;;  %5150 = vmatpush3.msra.mxu0 %v2241_v39 }
 0x3bf   : > { %5079 = vmatmul.mubr.f32.gmra.mxu1 %v4567_v49  ;;  %5107 = vmatprep.subr.mxu1 %v6668_v12 }
 0x3c0   : > { %5151 = vmatprep.subr.mxu0 %v2239_v52  ;;  %5108 = vmatpush3.msra.mxu1 %v6668_v12  ;;  %v4577_v12 = vld [vmem:[%s7237_s3 + $0xa8] sm:$0xff] }
 0x3c1   : > { %5152 = vmatpush3.msra.mxu0 %v2239_v52  ;;  %5109 = vmatprep.subr.mxu1 %v6649_v56  ;;  %v2235_v11 = vpop.permute.xlu1 %2234  ;;  %v2229_v40 = vpop.permute.xlu0 %2228 }
 0x3c2   : > { %5153 = vmatprep.subr.mxu0 %v2237_v55  ;;  %5081 = vmatprep.mubr.f32.mxu1 %v4568_v6 }
 0x3c3   : > { %5110 = vmatpush3.msra.mxu1 %v6649_v56  ;;  %5154 = vmatpush3.msra.mxu0 %v2237_v55  ;;  %v4574_v56 = vld [vmem:[%s7237_s3 + $0x90] sm:$0xff] }
 0x3c4   : > { %5082 = vmatmul.mubr.f32.gmra.mxu1 %v4569_v26  ;;  %5111 = vmatprep.subr.mxu1 %v6681_v28 }
 0x3c5   : > { %5155 = vmatprep.subr.mxu0 %v2235_v11  ;;  %5112 = vmatpush3.msra.mxu1 %v6681_v28  ;;  %v2231_v21 = vpop.permute.xlu1 %2230  ;;  %v1919_v28 = vld [vmem:[%s7237_s3 + $0x38] sm:$0xff] }
 0x3c6   : > { %5156 = vmatpush3.msra.mxu0 %v2235_v11  ;;  %5113 = vmatprep.subr.mxu1 %v6666_v37 }
 0x3c7   : > { %5157 = vmatprep.subr.mxu0 %v2233_v47  ;;  %5084 = vmatprep.mubr.f32.mxu1 %v4570_v27 }
 0x3c8   : > { %5114 = vmatpush3.msra.mxu1 %v6666_v37  ;;  %5158 = vmatpush3.msra.mxu0 %v2233_v47  ;;  %v1917_v37 = vld [vmem:[%s7237_s3 + $0x28] sm:$0xff] }
 0x3c9   : > { %5085 = vmatmul.mubr.f32.gmra.mxu1 %v4571_v20  ;;  %5115 = vmatprep.subr.mxu1 %v6691_v0 }
 0x3ca   : > { %5159 = vmatprep.subr.mxu0 %v2231_v21  ;;  %5116 = vmatpush3.msra.mxu1 %v6691_v0  ;;  %v4579_v0 = vld [vmem:[%s7237_s3 + $0xb8] sm:$0xff] }
 0x3cb   : > { %5160 = vmatpush3.msra.mxu0 %v2231_v21  ;;  %5117 = vmatprep.subr.mxu1 %v6679_v50 }
 0x3cc   : > { %5161 = vmatprep.subr.mxu0 %v2229_v40  ;;  %5118 = vmatpush3.msra.mxu1 %v6679_v50  ;;  %v4578_v50 = vld [vmem:[%s7237_s3 + $0xb0] sm:$0xff] }
 0x3cd   : > { %5119 = vmatprep.mubr.f32.mxu1 %v1912_v54  ;;  %5162 = vmatpush3.msra.mxu0 %v2229_v40 }
 0x3ce   : > { %5120 = vmatmul.mubr.f32.vlgmr.msra.gmra.mxu1 %v1913_v7  ;;  %5164 = vmatmul.mubr.f32.vlgmr.msra.gmra.mxu0 %v4573_v29  ;;  %v2405_v58 = vpop.permute.xlu0 %2404 }
 0x3cf   : > { %5122 = vmatprep.mubr.f32.mxu1 %v1914_v30  ;;  %5166 = vmatprep.mubr.f32.mxu0 %v4574_v56 }
 0x3d0   : > { %5175 = vmatprep.subr.mxu1 %v2469_v13 }
 0x3d1   : > { %5176 = vmatpush3.msra.mxu1 %v2469_v13 }
 0x3d2   : > { %5123 = vmatmul.mubr.f32.gmra.mxu1 %v1915_v4  ;;  %5167 = vmatmul.mubr.f32.gmra.mxu0 %v4575_v1  ;;  %v2400_v61 = vpop.permute.xlu1 %2399  ;;  %v2415_v2 = vpop.permute.xlu0 %2414 }
 0x3d3   : > { %5125 = vmatprep.mubr.f32.mxu1 %v1916_v8  ;;  %5169 = vmatprep.mubr.f32.mxu0 %v4576_v24 }
 0x3d6   : > { %5126 = vmatmul.mubr.f32.gmra.mxu1 %v1917_v37  ;;  %5170 = vmatmul.mubr.f32.gmra.mxu0 %v4577_v12  ;;  %v2410_v45 = vpop.permute.xlu1 %2409  ;;  %v2425_v44 = vpop.permute.xlu0 %2424 }
 0x3d7   : > { %5128 = vmatprep.mubr.f32.mxu1 %v1918_v16  ;;  %5172 = vmatprep.mubr.f32.mxu0 %v4578_v50 }
 0x3da   : > { %5129 = vmatmul.mubr.f32.gmra.mxu1 %v1919_v28  ;;  %5173 = vmatmul.mubr.f32.gmra.mxu0 %v4579_v0  ;;  %v2420_v6 = vpop.permute.xlu1 %2419  ;;  %v2435_v37 = vpop.permute.xlu0 %2434 }
 0x46b   : > { %v5077_v59 = vpop.f32.mrf.mxu1 }
 0x46d   : > { %v2075_v63 = vpop.f32.mrf.mxu1 }
 0x47f   : > { %v5080_v53 = vpop.f32.mrf.mxu1 }
 0x481   : > { %v2085_v9 = vpop.f32.mrf.mxu1 }
 0x484   : > { %v5083_v25 = vpop.f32.mrf.mxu1 }
 0x486   : > { %v2095_v31 = vpop.f32.mrf.mxu1 }
 0x489   : > { %v5086_v57 = vpop.f32.mrf.mxu1 }
 0x48b   : > { %v2105_v60 = vpop.f32.mrf.mxu1 }
 0x48e   : > { %v5121_v5 = vpop.f32.mrf.mxu1  ;;  %v5165_v46 = vpop.f32.mrf.mxu0 }
 0x48f   : > { %v2186_v34 = vadd.f32 %v5121_v5, %v5077_v59 }
 0x490   : > { %v2180_v42 = vpop.f32.mrf.mxu1  ;;  %v2342_v17 = vpop.f32.mrf.mxu0 }
 0x491   : > { %v2181_v10 = vadd.f32 %v2180_v42, %v2075_v63  ;;  %v2382_v51 = vadd.f32 %v5165_v46, %v2186_v34  ;;  %v2430_v63 = vpop.permute.xlu1 %2429 }
 0x492   : > { %v5124_v14 = vpop.f32.mrf.mxu1  ;;  %v5168_v3 = vpop.f32.mrf.mxu0 }
 0x493   : > { %v2438_v15 = vadd.f32 %v2405_v58, %v2382_v51  ;;  %v2196_v22 = vadd.f32 %v5124_v14, %v5080_v53  ;;  %v2381_v18 = vadd.f32 %v2342_v17, %v2181_v10 }
 0x494   : > { %v2190_v41 = vpop.f32.mrf.mxu1  ;;  %v2352_v19 = vpop.f32.mrf.mxu0 }
 0x495   : > { %v2437_v23 = vadd.f32 %v2400_v61, %v2381_v18  ;;  %v2191_v32 = vadd.f32 %v2190_v41, %v2085_v9  ;;  %v2454_v33 = vmul.f32 0.01, %v2438_v15  ;;  %v2384_v35 = vadd.f32 %v5168_v3, %v2196_v22 }
 0x496   : > { %v5127_v36 = vpop.f32.mrf.mxu1  ;;  %v5171_v38 = vpop.f32.mrf.mxu0  ;;  %vm2446_vm5 = vcmp.gt.f32.partialorder %v2438_v15, 0.0 }
 0x497   : > { %v2453_v39 = vmul.f32 0.01, %v2437_v23  ;;  %v2206_v43 = vadd.f32 %v5127_v36, %v5083_v25  ;;  %v2383_v48 = vadd.f32 %v2352_v19, %v2191_v32  ;;  %v2440_v49 = vadd.f32 %v2415_v2, %v2384_v35  ;;  %v4588_v19 = vld [vmem:[%s7239_s5 + $0x20] sm:$0xff] }
 0x498   : > { %v2200_v52 = vpop.f32.mrf.mxu1  ;;  %v2362_v55 = vpop.f32.mrf.mxu0  ;;  %vm2445_vm6 = vcmp.gt.f32.partialorder %v2437_v23, 0.0  ;;  %v2462_v20 = vsel %vm2446_vm5, %v2438_v15, %v2454_v33 }
 0x499   : > { %v2439_v11 = vadd.f32 %v2410_v45, %v2383_v48  ;;  %v2201_v26 = vadd.f32 %v2200_v52, %v2095_v31  ;;  %v2386_v27 = vadd.f32 %v5171_v38, %v2206_v43  ;;  %v2461_v47 = vsel %vm2445_vm6, %v2437_v23, %v2453_v39  ;;  %v2658_v23 = vld [vmem:[%s7239_s5] sm:$0xff]  ;;  %v2659_v48 = vld [vmem:[%s7239_s5 + $0x8] sm:$0xff]  ;;  %v2661_v52 = vld [vmem:[%s7239_s5 + $0x18] sm:$0xff] }
 0x49a   : > { %v2456_v21 = vmul.f32 0.01, %v2440_v49  ;;  %v5130_v54 = vpop.f32.mrf.mxu1  ;;  %5177 = vmatprep.mubr.msk.f32.mxu1 %vm2470_vm2, %v2461_v47  ;;  %v5174_v40 = vpop.f32.mrf.mxu0  ;;  %vm2448_vm7 = vcmp.gt.f32.partialorder %v2440_v49, 0.0  ;;  %5227 = vmatprep.mubr.msk.f32.mxu0 %vm2707_vm15, %v2658_v23  ;;  %vm3125_vm6 = vcmask 261120  }
 0x49b   : > { %v2455_v7 = vmul.f32 0.01, %v2439_v11  ;;  %v2442_v29 = vadd.f32 %v2425_v44, %v2386_v27  ;;  %v2216_v30 = vadd.f32 %v5130_v54, %v5086_v57  ;;  %v2385_v56 = vadd.f32 %v2362_v55, %v2201_v26  ;;  %5178 = vmatmul.mubr.msk.f32.vlgmr.msra.gmra.mxu1 %vm2470_vm2, %v2462_v20  ;;  %v3035_v55 = vld [vmem:[%s7240_s6 + $0x18] sm:$0xff]  ;;  %v3032_v26 = vld [vmem:[%s7240_s6] sm:$0xff] }
 0x49c   : > { %v2210_v4 = vpop.f32.mrf.mxu1  ;;  %vm2447_vm8 = vcmp.gt.f32.partialorder %v2439_v11, 0.0  ;;  %v2372_v16 = vpop.f32.mrf.mxu0  ;;  %v2464_v28 = vsel %vm2448_vm7, %v2440_v49, %v2456_v21  ;;  %v2660_v49 = vld [vmem:[%s7239_s5 + $0x10] sm:$0xff] }
 0x49d   : > { %v2441_v1 = vadd.f32 %v2420_v6, %v2385_v56  ;;  %v2211_v8 = vadd.f32 %v2210_v4, %v2105_v60  ;;  %v2388_v24 = vadd.f32 %v5174_v40, %v2216_v30  ;;  %v2458_v12 = vmul.f32 0.01, %v2442_v29  ;;  %v3034_v6 = vld [vmem:[%s7240_s6 + $0x10] sm:$0xff]  ;;  %v4589_v30 = vld [vmem:[%s7239_s5 + $0x28] sm:$0xff] }
 0x49e   : > { %v2463_v50 = vsel %vm2447_vm8, %v2439_v11, %v2455_v7  ;;  %vm2450_vm10 = vcmp.gt.f32.partialorder %v2442_v29, 0.0  ;;  %v3033_v11 = vld [vmem:[%s7240_s6 + $0x8] sm:$0xff]  ;;  %v4590_v56 = vld [vmem:[%s7239_s5 + $0x30] sm:$0xff] }
 0x49f   : > { %v2457_v0 = vmul.f32 0.01, %v2441_v1  ;;  %v2444_v13 = vadd.f32 %v2435_v37, %v2388_v24  ;;  %v2387_v59 = vadd.f32 %v2372_v16, %v2211_v8  ;;  %5180 = vmatprep.mubr.msk.f32.mxu1 %vm2470_vm2, %v2463_v50  ;;  %vm2449_vm9 = vcmp.gt.f32.partialorder %v2441_v1, 0.0  ;;  %v4591_v8 = vld [vmem:[%s7239_s5 + $0x38] sm:$0xff]  ;;  %v4600_v24 = vld [vmem:[%s7239_s5 + $0x40] sm:$0xff] }
 0x4a0   : > { %5181 = vmatmul.mubr.msk.f32.gmra.mxu1 %vm2470_vm2, %v2464_v28  ;;  %v2466_v57 = vsel %vm2450_vm10, %v2442_v29, %v2458_v12  ;;  %vm3492_vm10 = vcmask 540168  }
 0x4a1   : > { %v2443_v53 = vadd.f32 %v2430_v63, %v2387_v59  ;;  %v2465_v9 = vsel %vm2449_vm9, %v2441_v1, %v2457_v0  ;;  %v2460_v25 = vmul.f32 0.01, %v2444_v13  ;;  %vm2452_vm12 = vcmp.gt.f32.partialorder %v2444_v13, 0.0  ;;  %v4602_v59 = vld [vmem:[%s7239_s5 + $0x50] sm:$0xff]  ;;  %v4603_v63 = vld [vmem:[%s7239_s5 + $0x58] sm:$0xff] }
 0x4a2   : > { %5183 = vmatprep.mubr.msk.f32.mxu1 %vm2470_vm2, %v2465_v9  ;;  %vm3408_vm9 = vcmask 130048  }
 0x4a3   : > { %v2459_v31 = vmul.f32 0.01, %v2443_v53  ;;  %vm2451_vm11 = vcmp.gt.f32.partialorder %v2443_v53, 0.0  ;;  %v2468_v60 = vsel %vm2452_vm12, %v2444_v13, %v2460_v25  ;;  %v4601_v13 = vld [vmem:[%s7239_s5 + $0x48] sm:$0xff]  ;;  %vm5450_vm12 = vmmov 0  }
 0x4a4   : > { %5184 = vmatmul.mubr.msk.f32.gmra.mxu1 %vm2470_vm2, %v2466_v57 }
 0x4a5   : > { %v2467_v58 = vsel %vm2451_vm11, %v2443_v53, %v2459_v31  ;;  %vm3503_vm11 = vcmask 531464  }
 0x4a6   : > { %5186 = vmatprep.mubr.msk.f32.mxu1 %vm2470_vm2, %v2467_v58 }
 0x4a8   : > { %5187 = vmatmul.mubr.msk.f32.gmra.mxu1 %vm2470_vm2, %v2468_v60 }
 0x4a9   : > { %5205 = vmatprep.mubr.msk.f32.mxu1 %vm2707_vm15, %v4588_v19 }
 0x55b   : > { %v5179_v61 = vpop.f32.mrf.mxu1 }
 0x55d   : > { %v2561_v5 = vpop.f32.mrf.mxu1 }
 0x560   : > { %v5182_v46 = vpop.f32.mrf.mxu1 }
 0x562   : > { %v2571_v34 = vpop.f32.mrf.mxu1 }
 0x564   : > { %v5185_v42 = vpop.f32.mrf.mxu1 }
 0x566   : > { %v2581_v17 = vpop.f32.mrf.mxu1 }
 0x568   : > { %v5188_v2 = vpop.f32.mrf.mxu1 }
 0x569   : > { %2639 = vrot.lane.b32.xlu1 %v5188_v2, %s7307_s22 }
 0x56a   : > { %v2591_v10 = vpop.f32.mrf.mxu1 }
 0x56b   : > { %2637 = vrot.lane.b32.xlu0 %v2591_v10, %s7307_s22 }
 0x56d   : > { %2635 = vrot.lane.b32.xlu1 %v5185_v42, %s7307_s22 }
 0x56f   : > { %2633 = vrot.lane.b32.xlu0 %v2581_v17, %s7307_s22 }
 0x571   : > { %2631 = vrot.lane.b32.xlu1 %v5182_v46, %s7307_s22 }
 0x573   : > { %2629 = vrot.lane.b32.xlu0 %v2571_v34, %s7307_s22 }
 0x575   : > { %2627 = vrot.lane.b32.xlu1 %v5179_v61, %s7307_s22 }
 0x577   : > { %2625 = vrot.lane.b32.xlu0 %v2561_v5, %s7307_s22 }
 0x5db   : > { %v2640_v51 = vpop.permute.xlu1 %2639 }
 0x5dc   : > { %2657 = vst.msk [vmem:[#allocation2 + $0xa8] sm:$0xff] %vm2649_vm14, %v2640_v51 }
 0x5dd   : > { %v2638_v14 = vpop.permute.xlu0 %2637 }
 0x5de   : > { %2656 = vst.msk [vmem:[#allocation2 + $0x90] sm:$0xff] %vm2649_vm14, %v2638_v14 }
 0x5df   : > { %v2636_v3 = vpop.permute.xlu1 %2635 }
 0x5e0   : > { %2655 = vst.msk [vmem:[#allocation2 + $0x78] sm:$0xff] %vm2649_vm14, %v2636_v3 }
 0x5e1   : > { %v2634_v45 = vpop.permute.xlu0 %2633 }
 0x5e2   : > { %2654 = vst.msk [vmem:[#allocation2 + $0x60] sm:$0xff] %vm2649_vm14, %v2634_v45 }
 0x5e3   : > { %v2632_v15 = vpop.permute.xlu1 %2631  ;;  %v2669_v22 = vld [vmem:[#allocation2 + $0xa8] sm:$0xff] }
 0x5e4   : > { %2653 = vst.msk [vmem:[#allocation2 + $0x48] sm:$0xff] %vm2649_vm14, %v2632_v15  ;;  %2697 = vrot.lane.b32.xlu1 %v2669_v22, %s7322_s27  ;;  %5211 = vmatprep.subr.mxu0 %v2669_v22 }
 0x5e5   : > { %5212 = vmatpush3.msra.mxu0 %v2669_v22  ;;  %v2630_v18 = vpop.permute.xlu0 %2629  ;;  %v2668_v41 = vld [vmem:[#allocation2 + $0x90] sm:$0xff] }
 0x5e6   : > { %2652 = vst.msk [vmem:[#allocation2 + $0x30] sm:$0xff] %vm2649_vm14, %v2630_v18  ;;  %2695 = vrot.lane.b32.xlu0 %v2668_v41, %s7322_s27  ;;  %5213 = vmatprep.subr.mxu0 %v2668_v41 }
 0x5e7   : > { %v2628_v32 = vpop.permute.xlu1 %2627  ;;  %5214 = vmatpush3.msra.mxu0 %v2668_v41  ;;  %v2667_v33 = vld [vmem:[#allocation2 + $0x78] sm:$0xff] }
 0x5e8   : > { %2651 = vst.msk [vmem:[#allocation2 + $0x18] sm:$0xff] %vm2649_vm14, %v2628_v32  ;;  %2693 = vrot.lane.b32.xlu1 %v2667_v33, %s7322_s27  ;;  %5215 = vmatprep.subr.mxu0 %v2667_v33 }
 0x5e9   : > { %5216 = vmatpush3.msra.mxu0 %v2667_v33  ;;  %v2626_v35 = vpop.permute.xlu0 %2625  ;;  %v2666_v36 = vld [vmem:[#allocation2 + $0x60] sm:$0xff] }
 0x5ea   : > { %2650 = vst.msk [vmem:[#allocation2] sm:$0xff] %vm2649_vm14, %v2626_v35  ;;  %2691 = vrot.lane.b32.xlu0 %v2666_v36, %s7322_s27  ;;  %5217 = vmatprep.subr.mxu0 %v2666_v36 }
 0x5eb   : > { %v2665_v38 = vld [vmem:[#allocation2 + $0x48] sm:$0xff]  ;;  %5218 = vmatpush3.msra.mxu0 %v2666_v36 }
 0x5ec   : > { %3075 = vst.msk [vmem:[#allocation2 + $0x48] sm:$0xff] %vm608_vm0, %v7323_v62  ;;  %2689 = vrot.lane.b32.xlu1 %v2665_v38, %s7322_s27  ;;  %5219 = vmatprep.subr.mxu0 %v2665_v38 }
 0x5ed   : > { %3079 = vst.msk [vmem:[#allocation2 + $0x48] sm:$0xff] %vm2608_vm13, %v7323_v62  ;;  %v2664_v44 = vld [vmem:[#allocation2 + $0x30] sm:$0xff]  ;;  %5220 = vmatpush3.msra.mxu0 %v2665_v38 }
 0x5ee   : > { %3074 = vst.msk [vmem:[#allocation2 + $0x30] sm:$0xff] %vm608_vm0, %v7323_v62  ;;  %2687 = vrot.lane.b32.xlu0 %v2664_v44, %s7322_s27  ;;  %5221 = vmatprep.subr.mxu0 %v2664_v44 }
 0x5ef   : > { %3078 = vst.msk [vmem:[#allocation2 + $0x30] sm:$0xff] %vm2608_vm13, %v7323_v62  ;;  %v2663_v39 = vld [vmem:[#allocation2 + $0x18] sm:$0xff]  ;;  %5222 = vmatpush3.msra.mxu0 %v2664_v44 }
 0x5f0   : > { %3073 = vst.msk [vmem:[#allocation2 + $0x18] sm:$0xff] %vm608_vm0, %v7323_v62  ;;  %2685 = vrot.lane.b32.xlu1 %v2663_v39, %s7322_s27  ;;  %5223 = vmatprep.subr.mxu0 %v2663_v39 }
 0x5f1   : > { %3077 = vst.msk [vmem:[#allocation2 + $0x18] sm:$0xff] %vm2608_vm13, %v7323_v62  ;;  %v2662_v43 = vld [vmem:[#allocation2] sm:$0xff]  ;;  %5224 = vmatpush3.msra.mxu0 %v2663_v39 }
 0x5f2   : > { %3072 = vst.msk [vmem:[#allocation2] sm:$0xff] %vm608_vm0, %v7323_v62  ;;  %2683 = vrot.lane.b32.xlu0 %v2662_v43, %s7322_s27  ;;  %5225 = vmatprep.subr.mxu0 %v2662_v43 }
 0x5f3   : > { %3076 = vst.msk [vmem:[#allocation2] sm:$0xff] %vm2608_vm13, %v7323_v62  ;;  %5226 = vmatpush3.msra.mxu0 %v2662_v43 }
 0x5f4   : > { %2921 = vrot.lane.b32.xlu1 %v2669_v22, %s7324_s1  ;;  %5228 = vmatmul.mubr.msk.f32.vlgmr.msra.gmra.mxu0 %vm2707_vm15, %v2659_v48 }
 0x5f5   : > { %5230 = vmatprep.mubr.msk.f32.mxu0 %vm2707_vm15, %v2660_v49 }
 0x5f6   : > { %2919 = vrot.lane.b32.xlu0 %v2668_v41, %s7324_s1 }
 0x5f8   : > { %2917 = vrot.lane.b32.xlu1 %v2667_v33, %s7324_s1  ;;  %5231 = vmatmul.mubr.msk.f32.gmra.mxu0 %vm2707_vm15, %v2661_v52 }
 0x5fa   : > { %2915 = vrot.lane.b32.xlu0 %v2666_v36, %s7324_s1 }
 0x5fc   : > { %2913 = vrot.lane.b32.xlu1 %v2665_v38, %s7324_s1 }
 0x5fe   : > { %2911 = vrot.lane.b32.xlu0 %v2664_v44, %s7324_s1 }
 0x600   : > { %2909 = vrot.lane.b32.xlu1 %v2663_v39, %s7324_s1 }
 0x602   : > { %2907 = vrot.lane.b32.xlu0 %v2662_v43, %s7324_s1 }
 0x604   : > { %3053 = vperm.xlu1 %5378, %v3035_v55  }
 0x606   : > { %3048 = vperm.xlu0 %5377, %v3034_v6  }
 0x608   : > { %3043 = vperm.xlu1 %5378, %v3033_v11   ;;  %v4608_v11 = vld [vmem:[%s7241_s7 + $0x10] sm:$0xff] }
 0x609   : > { %5263 = vmatprep.mubr.msk.f32.mxu0 %vm3125_vm6, %v4608_v11 }
 0x60a   : > { %3038 = vperm.xlu0 %5377, %v3032_v26   ;;  %v3100_v26 = vld [vmem:[%s7241_s7] sm:$0xff] }
 0x656   : > { %v2698_v27 = vpop.permute.xlu1 %2697 }
 0x657   : > { %5189 = vmatprep.subr.mxu1 %v2698_v27 }
 0x658   : > { %5190 = vmatpush3.msra.mxu1 %v2698_v27  ;;  %v2696_v47 = vpop.permute.xlu0 %2695 }
 0x659   : > { %5191 = vmatprep.subr.mxu1 %v2696_v47 }
 0x65a   : > { %v2694_v20 = vpop.permute.xlu1 %2693  ;;  %5192 = vmatpush3.msra.mxu1 %v2696_v47 }
 0x65b   : > { %5193 = vmatprep.subr.mxu1 %v2694_v20 }
 0x65c   : > { %5194 = vmatpush3.msra.mxu1 %v2694_v20  ;;  %v2692_v21 = vpop.permute.xlu0 %2691 }
 0x65d   : > { %5195 = vmatprep.subr.mxu1 %v2692_v21 }
 0x65e   : > { %v2690_v54 = vpop.permute.xlu1 %2689  ;;  %5196 = vmatpush3.msra.mxu1 %v2692_v21 }
 0x65f   : > { %5197 = vmatprep.subr.mxu1 %v2690_v54 }
 0x660   : > { %5198 = vmatpush3.msra.mxu1 %v2690_v54  ;;  %v2688_v40 = vpop.permute.xlu0 %2687 }
 0x661   : > { %5199 = vmatprep.subr.mxu1 %v2688_v40 }
 0x662   : > { %v2686_v7 = vpop.permute.xlu1 %2685  ;;  %5200 = vmatpush3.msra.mxu1 %v2688_v40 }
 0x663   : > { %5201 = vmatprep.subr.mxu1 %v2686_v7 }
 0x664   : > { %5202 = vmatpush3.msra.mxu1 %v2686_v7  ;;  %v2684_v29 = vpop.permute.xlu0 %2683  ;;  %v3101_v7 = vld [vmem:[%s7241_s7 + $0x8] sm:$0xff] }
 0x665   : > { %5203 = vmatprep.subr.mxu1 %v2684_v29 }
 0x666   : > { %v2922_v4 = vpop.permute.xlu1 %2921  ;;  %5204 = vmatpush3.msra.mxu1 %v2684_v29  ;;  %v3386_v29 = vld [vmem:[%s7242_s8] sm:$0xff] }
 0x667   : > { %5233 = vmatprep.subr.mxu1 %v2922_v4  ;;  %5206 = vmatmul.mubr.msk.f32.vlgmr.msra.gmra.mxu1 %vm2707_vm15, %v4589_v30  ;;  %v3387_v30 = vld [vmem:[%s7242_s8 + $0x8] sm:$0xff] }
 0x668   : > { %5234 = vmatpush3.msra.mxu1 %v2922_v4  ;;  %v2920_v1 = vpop.permute.xlu0 %2919  ;;  %5208 = vmatprep.mubr.msk.f32.mxu1 %vm2707_vm15, %v4590_v56 }
 0x669   : > { %5235 = vmatprep.subr.mxu1 %v2920_v1 }
 0x66a   : > { %v2918_v37 = vpop.permute.xlu1 %2917  ;;  %5236 = vmatpush3.msra.mxu1 %v2920_v1 }
 0x66b   : > { %5237 = vmatprep.subr.mxu1 %v2918_v37  ;;  %5209 = vmatmul.mubr.msk.f32.gmra.mxu1 %vm2707_vm15, %v4591_v8 }
 0x66c   : > { %5238 = vmatpush3.msra.mxu1 %v2918_v37  ;;  %v2916_v12 = vpop.permute.xlu0 %2915  ;;  %5249 = vmatprep.mubr.msk.f32.mxu1 %vm2707_vm15, %v4600_v24  ;;  %v4609_v24 = vld [vmem:[%s7241_s7 + $0x18] sm:$0xff]  ;;  %v4614_v37 = vld [vmem:[%s7241_s7 + $0x20] sm:$0xff] }
 0x66d   : > { %5239 = vmatprep.subr.mxu1 %v2916_v12 }
 0x66e   : > { %v2914_v16 = vpop.permute.xlu1 %2913  ;;  %5240 = vmatpush3.msra.mxu1 %v2916_v12 }
 0x66f   : > { %5241 = vmatprep.subr.mxu1 %v2914_v16 }
 0x670   : > { %5242 = vmatpush3.msra.mxu1 %v2914_v16  ;;  %v2912_v50 = vpop.permute.xlu0 %2911 }
 0x671   : > { %5243 = vmatprep.subr.mxu1 %v2912_v50 }
 0x672   : > { %v2910_v28 = vpop.permute.xlu1 %2909  ;;  %5244 = vmatpush3.msra.mxu1 %v2912_v50 }
 0x673   : > { %5245 = vmatprep.subr.mxu1 %v2910_v28 }
 0x674   : > { %5246 = vmatpush3.msra.mxu1 %v2910_v28  ;;  %v2908_v0 = vpop.permute.xlu0 %2907 }
 0x675   : > { %5247 = vmatprep.subr.mxu1 %v2908_v0 }
 0x676   : > { %5248 = vmatpush3.msra.mxu1 %v2908_v0  ;;  %v4615_v0 = vld [vmem:[%s7241_s7 + $0x28] sm:$0xff] }
 0x677   : > { %5250 = vmatmul.mubr.msk.f32.vlgmr.msra.gmra.mxu1 %vm2707_vm15, %v4601_v13  ;;  %v3407_v13 = vld [vmem:[%s7250_s16 + $0x8] sm:$0xff] }
 0x678   : > { %5252 = vmatprep.mubr.msk.f32.mxu1 %vm2707_vm15, %v4602_v59  ;;  %v3406_v59 = vld [vmem:[%s7250_s16] sm:$0xff] }
 0x67b   : > { %5253 = vmatmul.mubr.msk.f32.gmra.mxu1 %vm2707_vm15, %v4603_v63 }
 0x67c   : > { %5274 = vmatprep.mubr.msk.f32.mxu1 %vm3125_vm6, %v3100_v26 }
 0x67f   : > { %v3054_v61 = vpop.permute.xlu1 %3053 }
 0x681   : > { %v3049_v46 = vpop.permute.xlu0 %3048 }
 0x683   : > { %v3044_v22 = vpop.permute.xlu1 %3043 }
 0x685   : > { %v3039_v32 = vpop.permute.xlu0 %3038 }
 0x6b4   : > { %v5229_v25 = vpop.f32.mrf.mxu0 }
 0x6b6   : > { %v2883_v57 = vpop.f32.mrf.mxu0 }
 0x6b8   : > { %v5232_v60 = vpop.f32.mrf.mxu0 }
 0x6ba   : > { %v2893_v17 = vpop.f32.mrf.mxu0 }
 0x727   : > { %v5207_v53 = vpop.f32.mrf.mxu1 }
 0x728   : > { %v2889_v34 = vadd.f32 %v5229_v25, %v5207_v53 }
 0x729   : > { %v2786_v9 = vpop.f32.mrf.mxu1 }
 0x72a   : > { %v2884_v2 = vadd.f32 %v2883_v57, %v2786_v9 }
 0x72b   : > { %v5210_v31 = vpop.f32.mrf.mxu1 }
 0x72c   : > { %v2899_v51 = vadd.f32 %v5232_v60, %v5210_v31 }
 0x72d   : > { %v2796_v58 = vpop.f32.mrf.mxu1 }
 0x72e   : > { %v2894_v45 = vadd.f32 %v2893_v17, %v2796_v58 }
 0x737   : > { %v5251_v5 = vpop.f32.mrf.mxu1 }
 0x738   : > { %v3029_v10 = vadd.f32 %v5251_v5, %v2889_v34 }
 0x739   : > { %v3009_v42 = vpop.f32.mrf.mxu1 }
 0x73a   : > { %v3028_v3 = vadd.f32 %v3009_v42, %v2884_v2  ;;  %v3057_v41 = vadd.f32 %v3044_v22, %v3029_v10 }
 0x73b   : > { %v5254_v14 = vpop.f32.mrf.mxu1 }
 0x73c   : > { %v3031_v15 = vadd.f32 %v5254_v14, %v2899_v51  ;;  %v3056_v33 = vadd.f32 %v3039_v32, %v3028_v3  ;;  %v3065_v38 = vmul.f32 0.01, %v3057_v41  ;;  %vm3061_vm4 = vcmp.gt.f32.partialorder %v3057_v41, 0.0 }
 0x73d   : > { %v3019_v18 = vpop.f32.mrf.mxu1 }
 0x73e   : > { %v3059_v19 = vadd.f32 %v3054_v61, %v3031_v15  ;;  %v3030_v23 = vadd.f32 %v3019_v18, %v2894_v45  ;;  %v3064_v43 = vmul.f32 0.01, %v3056_v33  ;;  %vm3060_vm5 = vcmp.gt.f32.partialorder %v3056_v33, 0.0 }
 0x73f   : > { %v3069_v49 = vsel %vm3061_vm4, %v3057_v41, %v3065_v38  ;;  %v3506_v41 = vld [vmem:[%s7243_s9] sm:$0xff]  ;;  %v4623_v38 = vld [vmem:[%s7243_s9 + $0x10] sm:$0xff]  ;;  %vm4133_vm4 = vcmask 31744  }
 0x740   : > { %v3067_v35 = vmul.f32 0.01, %v3059_v19  ;;  %v3058_v36 = vadd.f32 %v3049_v46, %v3030_v23  ;;  %vm3063_vm1 = vcmp.gt.f32.partialorder %v3059_v19, 0.0  ;;  %v3068_v52 = vsel %vm3060_vm5, %v3056_v33, %v3064_v43  ;;  %v3747_v23 = vld [vmem:[%s7244_s10] sm:$0xff]  ;;  %v4620_v33 = vld [vmem:[%s7243_s9 + $0x8] sm:$0xff] }
 0x741   : > { %vm4299_vm5 = vcmask 1031168  }
 0x742   : > { %v3066_v44 = vmul.f32 0.01, %v3058_v36  ;;  %v3071_v39 = vsel %vm3063_vm1, %v3059_v19, %v3067_v35  ;;  %vm3062_vm3 = vcmp.gt.f32.partialorder %v3058_v36, 0.0  ;;  %vm4099_vm1 = vcmask 11272  }
 0x743   : > { %3090 = vrot.lane.b32.xlu1 %v3071_v39, %s7307_s22  ;;  %4100 = vst.msk [vmem:[#allocation2 + $0x10] sm:$0xf] %vm4099_vm1, %v7323_v62 }
 0x744   : > { %v3070_v48 = vsel %vm3062_vm3, %v3058_v36, %v3066_v44  ;;  %vm4111_vm3 = vcmask 1043464  }
 0x745   : > { %3088 = vrot.lane.b32.xlu0 %v3070_v48, %s7307_s22 }
 0x747   : > { %3086 = vrot.lane.b32.xlu1 %v3069_v49, %s7307_s22 }
 0x749   : > { %3084 = vrot.lane.b32.xlu0 %v3068_v52, %s7307_s22 }
 0x7b5   : > { %v3091_v55 = vpop.permute.xlu1 %3090 }
 0x7b6   : > { %3099 = vst.msk [vmem:[#allocation2 + $0x48] sm:$0xff] %vm2649_vm14, %v3091_v55 }
 0x7b7   : > { %v3089_v6 = vpop.permute.xlu0 %3088 }
 0x7b8   : > { %3098 = vst.msk [vmem:[#allocation2 + $0x30] sm:$0xff] %vm2649_vm14, %v3089_v6 }
 0x7b9   : > { %v3087_v27 = vpop.permute.xlu1 %3086 }
 0x7ba   : > { %3097 = vst.msk [vmem:[#allocation2 + $0x18] sm:$0xff] %vm2649_vm14, %v3087_v27 }
 0x7bb   : > { %v3085_v47 = vpop.permute.xlu0 %3084 }
 0x7bc   : > { %3096 = vst.msk [vmem:[#allocation2] sm:$0xff] %vm2649_vm14, %v3085_v47  ;;  %vm4097_vm14 = vcmask 3072  }
 0x7bd   : > { %v3105_v20 = vld [vmem:[#allocation2 + $0x48] sm:$0xff] }
 0x7be   : > { %3119 = vrot.lane.b32.xlu1 %v3105_v20, %s7322_s27  ;;  %5266 = vmatprep.subr.mxu1 %v3105_v20 }
 0x7bf   : > { %5267 = vmatpush3.msra.mxu1 %v3105_v20  ;;  %v3104_v21 = vld [vmem:[#allocation2 + $0x30] sm:$0xff] }
 0x7c0   : > { %3117 = vrot.lane.b32.xlu0 %v3104_v21, %s7322_s27  ;;  %5268 = vmatprep.subr.mxu1 %v3104_v21 }
 0x7c1   : > { %v3103_v54 = vld [vmem:[#allocation2 + $0x18] sm:$0xff]  ;;  %5269 = vmatpush3.msra.mxu1 %v3104_v21 }
 0x7c2   : > { %3491 = vst.msk [vmem:[#allocation2 + $0x18] sm:$0xff] %vm608_vm0, %v7323_v62  ;;  %3115 = vrot.lane.b32.xlu1 %v3103_v54, %s7322_s27  ;;  %5270 = vmatprep.subr.mxu1 %v3103_v54 }
 0x7c3   : > { %v3102_v40 = vld [vmem:[#allocation2] sm:$0xff]  ;;  %5271 = vmatpush3.msra.mxu1 %v3103_v54  ;;  %3494 = vst.msk [vmem:[#allocation2 + $0x18] sm:$0xff] %vm3492_vm10, %v7323_v62 }
 0x7c4   : > { %3490 = vst.msk [vmem:[#allocation2] sm:$0xff] %vm608_vm0, %v7323_v62  ;;  %3113 = vrot.lane.b32.xlu0 %v3102_v40, %s7322_s27  ;;  %5272 = vmatprep.subr.mxu1 %v3102_v40 }
 0x7c5   : > { %5273 = vmatpush3.msra.mxu1 %v3102_v40  ;;  %3493 = vst.msk [vmem:[#allocation2] sm:$0xff] %vm3492_vm10, %v7323_v62 }
 0x7c6   : > { %3297 = vrot.lane.b32.xlu1 %v3105_v20, %s7324_s1  ;;  %5275 = vmatmul.mubr.msk.f32.vlgmr.msra.gmra.mxu1 %vm3125_vm6, %v3101_v7  ;;  %v4022_v7 = vld [vmem:[%s7251_s17 + $0x78] sm:$0xff] }
 0x7c7   : > { %5288 = vmatprep.subr.mxu1 %v3407_v13 }
 0x7c8   : > { %3295 = vrot.lane.b32.xlu0 %v3104_v21, %s7324_s1  ;;  %5289 = vmatpush3.msra.mxu1 %v3407_v13  ;;  %v4013_v13 = vld [vmem:[%s7251_s17 + $0x30] sm:$0xff] }
 0x7c9   : > { %5290 = vmatprep.subr.mxu1 %v3406_v59 }
 0x7ca   : > { %3293 = vrot.lane.b32.xlu1 %v3103_v54, %s7324_s1  ;;  %5291 = vmatpush3.msra.mxu1 %v3406_v59  ;;  %v4012_v59 = vld [vmem:[%s7251_s17 + $0x28] sm:$0xff] }
 0x7cb   : > { %5295 = vmatprep.subr.mxu1 %v7323_v62 }
 0x7cc   : > { %3291 = vrot.lane.b32.xlu0 %v3102_v40, %s7324_s1  ;;  %v3764_v40 = vld [vmem:[%s7245_s11] sm:$0xf] }
 0x7ce   : > { %3390 = vperm.xlu1 %5378, %v3386_v29   ;;  %v4021_v29 = vld [vmem:[%s7251_s17 + $0x70] sm:$0xff] }
 0x7d0   : > { %3395 = vperm.xlu0 %5377, %v3387_v30   ;;  %v3997_v30 = vld [vmem:[%s7246_s12] sm:$0xf] }
 0x830   : > { %v3120_v56 = vpop.permute.xlu1 %3119 }
 0x831   : > { %5255 = vmatprep.subr.mxu0 %v3120_v56 }
 0x832   : > { %5256 = vmatpush3.msra.mxu0 %v3120_v56  ;;  %v3118_v4 = vpop.permute.xlu0 %3117  ;;  %v4020_v56 = vld [vmem:[%s7251_s17 + $0x68] sm:$0xff] }
 0x833   : > { %5257 = vmatprep.subr.mxu0 %v3118_v4 }
 0x834   : > { %v3116_v1 = vpop.permute.xlu1 %3115  ;;  %5258 = vmatpush3.msra.mxu0 %v3118_v4  ;;  %v4019_v4 = vld [vmem:[%s7251_s17 + $0x60] sm:$0xff] }
 0x835   : > { %5259 = vmatprep.subr.mxu0 %v3116_v1 }
 0x836   : > { %5260 = vmatpush3.msra.mxu0 %v3116_v1  ;;  %v3114_v8 = vpop.permute.xlu0 %3113  ;;  %v4625_v1 = vld [vmem:[%s7245_s11 + $0x4] sm:$0xf] }
 0x837   : > { %5261 = vmatprep.subr.mxu0 %v3114_v8 }
 0x838   : > { %v3298_v12 = vpop.permute.xlu1 %3297  ;;  %5262 = vmatpush3.msra.mxu0 %v3114_v8 }
 0x839   : > { %5277 = vmatprep.subr.mxu0 %v3298_v12  ;;  %5264 = vmatmul.mubr.msk.f32.vlgmr.msra.gmra.mxu0 %vm3125_vm6, %v4609_v24 }
 0x83a   : > { %5278 = vmatpush3.msra.mxu0 %v3298_v12  ;;  %v3296_v16 = vpop.permute.xlu0 %3295  ;;  %5285 = vmatprep.mubr.msk.f32.mxu0 %vm3125_vm6, %v4614_v37  ;;  %v4628_v37 = vld [vmem:[%s7245_s11 + $0x8] sm:$0xf]  ;;  %v4018_v12 = vld [vmem:[%s7251_s17 + $0x58] sm:$0xff] }
 0x83b   : > { %5279 = vmatprep.subr.mxu0 %v3296_v16 }
 0x83c   : > { %v3294_v50 = vpop.permute.xlu1 %3293  ;;  %5280 = vmatpush3.msra.mxu0 %v3296_v16  ;;  %v4017_v16 = vld [vmem:[%s7251_s17 + $0x50] sm:$0xff] }
 0x83d   : > { %5281 = vmatprep.subr.mxu0 %v3294_v50 }
 0x83e   : > { %5282 = vmatpush3.msra.mxu0 %v3294_v50  ;;  %v3292_v28 = vpop.permute.xlu0 %3291  ;;  %v4016_v50 = vld [vmem:[%s7251_s17 + $0x48] sm:$0xff] }
 0x83f   : > { %5283 = vmatprep.subr.mxu0 %v3292_v28 }
 0x840   : > { %5284 = vmatpush3.msra.mxu0 %v3292_v28  ;;  %v4015_v28 = vld [vmem:[%s7251_s17 + $0x40] sm:$0xff] }
 0x841   : > { %5286 = vmatmul.mubr.msk.f32.vlgmr.msra.gmra.mxu0 %vm3125_vm6, %v4615_v0  ;;  %5302 = vmatprep.subr.mxu0 %v7323_v62  ;;  %v4014_v0 = vld [vmem:[%s7251_s17 + $0x38] sm:$0xff] }
 0x842   : > { %5306 = vmatprep.mubr.msk.f32.mxu0 %vm5450_vm12, %v7323_v62 }
 0x849   : > { %v3391_v42 = vpop.permute.xlu1 %3390 }
 0x84b   : > { %v3396_v61 = vpop.permute.xlu0 %3395 }
 0x886   : > { %v5276_v53 = vpop.f32.mrf.mxu1 }
 0x888   : > { %v3279_v25 = vpop.f32.mrf.mxu1 }
 0x8f9   : > { %v5265_v63 = vpop.f32.mrf.mxu0 }
 0x8fa   : > { %v3285_v31 = vadd.f32 %v5276_v53, %v5265_v63  ;;  %v4011_v63 = vld [vmem:[%s7251_s17 + $0x20] sm:$0xff]  ;;  %v4010_v53 = vld [vmem:[%s7251_s17 + $0x18] sm:$0xff] }
 0x8fb   : > { %v3198_v9 = vpop.f32.mrf.mxu0 }
 0x8fc   : > { %v3280_v58 = vadd.f32 %v3279_v25, %v3198_v9  ;;  %v4009_v9 = vld [vmem:[%s7251_s17 + $0x10] sm:$0xff]  ;;  %v4008_v25 = vld [vmem:[%s7251_s17 + $0x8] sm:$0xff] }
 0x901   : > { %v5287_v57 = vpop.f32.mrf.mxu0 }
 0x902   : > { %v3385_v60 = vadd.f32 %v5287_v57, %v3285_v31  ;;  %v4007_v31 = vld [vmem:[%s7251_s17] sm:$0xff] }
 0x903   : > { %v3375_v5 = vpop.f32.mrf.mxu0 }
 0x904   : > { %v3399_v46 = vadd.f32 %v3396_v61, %v3385_v60  ;;  %v3384_v34 = vadd.f32 %v3375_v5, %v3280_v58 }
 0x906   : > { %v3398_v17 = vadd.f32 %v3391_v42, %v3384_v34  ;;  %v3403_v2 = vmul.f32 0.01, %v3399_v46  ;;  %vm3401_vm7 = vcmp.gt.f32.partialorder %v3399_v46, 0.0 }
 0x908   : > { %v3402_v10 = vmul.f32 0.01, %v3398_v17  ;;  %vm3400_vm8 = vcmp.gt.f32.partialorder %v3398_v17, 0.0  ;;  %v3405_v14 = vsel %vm3401_vm7, %v3399_v46, %v3403_v2 }
 0x90a   : > { %v3404_v51 = vsel %vm3400_vm8, %v3398_v17, %v3402_v10 }
 0x90b   : > { %5292 = vmatprep.mubr.msk.f32.mxu1 %vm3408_vm9, %v3404_v51 }
 0x90c   : > { %5293 = vmatmul.mubr.msk.f32.vlgmr.msra.gmra.mxu1 %vm3408_vm9, %v3405_v14 }
 0x90d   : > { %5299 = vmatprep.mubr.msk.f32.mxu1 %vm5450_vm12, %v7323_v62 }
 0x9cc   : > { %v5294_v3 = vpop.f32.mrf.mxu1 }
 0x9cd   : > { %3499 = vrot.lane.b32.xlu1 %v5294_v3, %s7307_s22 }
 0x9ce   : > { %v3481_v45 = vpop.f32.mrf.mxu1 }
 0x9cf   : > { %3497 = vrot.lane.b32.xlu0 %v3481_v45, %s7307_s22 }
 0xa3f   : > { %v3500_v15 = vpop.permute.xlu1 %3499 }
 0xa40   : > { %3505 = vst.msk [vmem:[#allocation2 + $0x18] sm:$0xff] %vm3503_vm11, %v3500_v15 }
 0xa41   : > { %v3498_v22 = vpop.permute.xlu0 %3497 }
 0xa42   : > { %3504 = vst.msk [vmem:[#allocation2] sm:$0xff] %vm3503_vm11, %v3498_v22 }
 0xa47   : > { %v3508_v18 = vld [vmem:[#allocation2 + $0x18] sm:$0xff] }
 0xa48   : > { %3515 = vrot.lane.b32.xlu1 %v3508_v18, %s7322_s27  ;;  %5303 = vmatpush3.msra.mxu0 %v3508_v18 }
 0xa49   : > { %5304 = vmatprep.subr.mxu0 %v7323_v62  ;;  %v3507_v19 = vld [vmem:[#allocation2] sm:$0xff] }
 0xa4a   : > { %3513 = vrot.lane.b32.xlu0 %v3507_v19, %s7322_s27  ;;  %3757 = vst.msk [vmem:[#allocation2] sm:$0xff] %vm608_vm0, %v7323_v62  ;;  %5305 = vmatpush3.msra.mxu0 %v3507_v19 }
 0xa4b   : > { %3758 = vst.msk [vmem:[#allocation2] sm:$0xff] %vm3492_vm10, %v7323_v62  ;;  %5307 = vmatmul.mubr.msk.f32.vlgmr.msra.gmra.mxu0 %vm3408_vm9, %v3506_v41  ;;  %5316 = vmatprep.subr.mxu0 %v7323_v62 }
 0xa4c   : > { %3669 = vrot.lane.b32.xlu1 %v3508_v18, %s7324_s1  ;;  %5318 = vmatprep.mubr.msk.f32.mxu0 %vm5450_vm12, %v7323_v62 }
 0xa4e   : > { %3667 = vrot.lane.b32.xlu0 %v3507_v19, %s7324_s1 }
 0xa50   : > { %3750 = vperm.xlu1 %5378, %v3747_v23   ;;  %v4382_v23 = vld [vmem:[#allocation3] sm:$0x1] }
 0xaba   : > { %v3516_v32 = vpop.permute.xlu1 %3515 }
 0xabb   : > { %5296 = vmatpush3.msra.mxu1 %v3516_v32 }
 0xabc   : > { %5297 = vmatprep.subr.mxu1 %v7323_v62  ;;  %v3514_v35 = vpop.permute.xlu0 %3513 }
 0xabd   : > { %5298 = vmatpush3.msra.mxu1 %v3514_v35 }
 0xabe   : > { %v3670_v36 = vpop.permute.xlu1 %3669  ;;  %5300 = vmatmul.mubr.msk.f32.vlgmr.msra.gmra.mxu1 %vm3408_vm9, %v4620_v33  ;;  %5309 = vmatprep.subr.mxu1 %v7323_v62 }
 0xabf   : > { %5310 = vmatpush3.msra.mxu1 %v3670_v36  ;;  %5313 = vmatprep.mubr.msk.f32.mxu1 %vm5450_vm12, %v7323_v62 }
 0xac0   : > { %5311 = vmatprep.subr.mxu1 %v7323_v62  ;;  %v3668_v44 = vpop.permute.xlu0 %3667 }
 0xac1   : > { %5312 = vmatpush3.msra.mxu1 %v3668_v44  ;;  %v4631_v44 = vld [vmem:[%s7247_s13 + $0x1] sm:$0x1] }
 0xac2   : > { %5314 = vmatmul.mubr.msk.f32.vlgmr.msra.gmra.mxu1 %vm3408_vm9, %v4623_v38  ;;  %5321 = vmatprep.subr.mxu1 %v7323_v62 }
 0xac3   : > { %5323 = vmatprep.mubr.msk.f32.mxu1 %vm5450_vm12, %v7323_v62 }
 0xacb   : > { %v3751_v11 = vpop.permute.xlu1 %3750 }
 0xb0b   : > { %v3661_v39 = vpop.f32.mrf.mxu0 }
 0xb0d   : > { %v5308_v43 = vpop.f32.mrf.mxu0 }
 0xb7e   : > { %v3588_v48 = vpop.f32.mrf.mxu1 }
 0xb7f   : > { %v3662_v52 = vadd.f32 %v3661_v39, %v3588_v48 }
 0xb80   : > { %v5301_v49 = vpop.f32.mrf.mxu1 }
 0xb81   : > { %v4115_v49 = vld [vmem:[%s7247_s13] sm:$0x1] }
 0xb82   : > { %v3742_v55 = vpop.f32.mrf.mxu1 }
 0xb83   : > { %v3746_v6 = vadd.f32 %v3742_v55, %v3662_v52 }
 0xb84   : > { %v5315_v26 = vpop.f32.mrf.mxu1 }
 0xb85   : > { %v3753_v27 = vadd.f32 %v3751_v11, %v3746_v6  ;;  %v4638_v6 = vld [vmem:[%s7247_s13 + $0x2] sm:$0x1]  ;;  %v4388_v11 = vlaneseq }
 0xb87   : > { %v3755_v47 = vmul.f32 0.01, %v3753_v27  ;;  %vm3754_vm13 = vcmp.gt.f32.partialorder %v3753_v27, 0.0  ;;  %vm4416_vm6 = vcmp.lt.s32.totalorder %v4388_v11, 256 }
 0xb89   : > { %v3756_v20 = vsel %vm3754_vm13, %v3753_v27, %v3755_v47  ;;  %v4389_v27 = vshrl.u32 %v4388_v11, 7 }
 0xb8a   : > { %3760 = vrot.lane.b32.xlu0 %v3756_v20, %s7307_s22 }
 0xbfc   : > { %v3761_v21 = vpop.permute.xlu0 %3760 }
 0xbfd   : > { %3763 = vst.msk [vmem:[#allocation2] sm:$0xff] %vm3503_vm11, %v3761_v21  ;;  %v4390_v21 = vsub.s32 0, %v4389_v27 }
 0xc04   : > { %v3765_v54 = vld [vmem:[#allocation2] sm:$0xff] }
 0xc05   : > { %3920 = vrot.lane.b32.xlu0 %v3765_v54, %s7324_s1  ;;  %3769 = vrot.lane.b32.xlu1 %v3765_v54, %s7322_s27  ;;  %4098 = vst.msk [vmem:[#allocation2] sm:$0xf] %vm4097_vm14, %v7323_v62 }
 0xc06   : > { %5322 = vmatpush3.msra.mxu1 %v3765_v54 }
 0xc07   : > { %5324 = vmatmul.mubr.msk.f32.vlgmr.msra.gmra.mxu1 %vm2470_vm2, %v3764_v40  ;;  %4042 = vmatprep.subr.mxu1 %v4022_v7 }
 0xc08   : > { %4043 = vmatpush1.msra.mxu1 %v4021_v29  ;;  %4090 = vmatprep.mubr.f32.mxu1 %v7323_v62 }
 0xc09   : > { %4000 = vperm.xlu1 %5378, %v3997_v30   ;;  %4044 = vmatprep.subr.mxu1 %v4020_v56 }
 0xc0a   : > { %4045 = vmatpush1.msra.mxu1 %v4019_v4 }
 0xc0b   : > { %4046 = vmatprep.subr.mxu1 %v4018_v12 }
 0xc0c   : > { %4047 = vmatpush1.msra.mxu1 %v4017_v16 }
 0xc0d   : > { %4048 = vmatprep.subr.mxu1 %v4016_v50 }
 0xc0e   : > { %4049 = vmatpush1.msra.mxu1 %v4015_v28 }
 0xc0f   : > { %4050 = vmatprep.subr.mxu1 %v4014_v0 }
 0xc10   : > { %4051 = vmatpush1.msra.mxu1 %v4013_v13 }
 0xc11   : > { %4052 = vmatprep.subr.mxu1 %v4012_v59 }
 0xc12   : > { %4053 = vmatpush1.msra.mxu1 %v4011_v63 }
 0xc13   : > { %4054 = vmatprep.subr.mxu1 %v4010_v53 }
 0xc14   : > { %4055 = vmatpush1.msra.mxu1 %v4009_v9 }
 0xc15   : > { %4056 = vmatprep.subr.mxu1 %v4008_v25 }
 0xc16   : > { %4057 = vmatpush1.msra.mxu1 %v4007_v31 }
 0xc77   : > { %v3770_v8 = vpop.permute.xlu1 %3769  ;;  %v3921_v24 = vpop.permute.xlu0 %3920 }
 0xc78   : > { %5317 = vmatpush3.msra.mxu0 %v3770_v8 }
 0xc79   : > { %5319 = vmatmul.mubr.msk.f32.vlgmr.msra.gmra.mxu0 %vm2470_vm2, %v4625_v1  ;;  %5326 = vmatprep.subr.mxu0 %v7323_v62 }
 0xc7a   : > { %5327 = vmatpush3.msra.mxu0 %v3921_v24  ;;  %5328 = vmatprep.mubr.msk.f32.mxu0 %vm5450_vm12, %v7323_v62 }
 0xc7d   : > { %5329 = vmatmul.mubr.msk.f32.vlgmr.msra.gmra.mxu0 %vm2470_vm2, %v4628_v37  ;;  %v5451_v37 = vmov 1966171168  }
 0xc7e   : > { %4206 = vmatprep.mubr.f32.mxu0 %v7323_v62  ;;  %v4400_v12 = vunpack.c.l.s4 %v5451_v37 }
 0xc80   : > { %v4401_v16 = vunpack.c.0.s8 %v4400_v12 }
 0xc82   : > { %v4404_v28 = vsub.s32 %v4401_v16, %v4389_v27 }
 0xc84   : > { %v4001_v42 = vpop.permute.xlu1 %4000 }
 0xcc7   : > { %v3914_v57 = vpop.f32.mrf.mxu1 }
 0xcc9   : > { %v5325_v58 = vpop.f32.mrf.mxu1 }
 0xd39   : > { %v3841_v60 = vpop.f32.mrf.mxu0 }
 0xd3a   : > { %v3915_v5 = vadd.f32 %v3914_v57, %v3841_v60 }
 0xd3b   : > { %v5320_v61 = vpop.f32.mrf.mxu0 }
 0xd3d   : > { %v3992_v46 = vpop.f32.mrf.mxu0 }
 0xd3e   : > { %v3996_v34 = vadd.f32 %v3992_v46, %v3915_v5 }
 0xd3f   : > { %v5330_v17 = vpop.f32.mrf.mxu0 }
 0xd40   : > { %v4003_v2 = vadd.f32 %v4001_v42, %v3996_v34 }
 0xd42   : > { %vm4004_vm2 = vcmp.gt.f32.partialorder %v4003_v2, 0.0  ;;  %v4005_v10 = vmul.f32 0.01, %v4003_v2 }
 0xd44   : > { %v4006_v51 = vsel %vm4004_vm2, %v4003_v2, %v4005_v10 }
 0xd45   : > { %4630 = vmatmul.mubr.msk.f32.vlgmr.msra.gmra.mxu1 %vm2707_vm15, %v4006_v51  ;;  %vm4137_vm15 = vcmask 1043456  }
 0xe05   : > { %v4092_v14 = vpop.f32.mrf.mxu1 }
 0xe06   : > { %4103 = vrot.lane.b32.xlu0 %v4092_v14, %s7307_s22 }
 0xe07   : > { %v4094_v3 = vpop.f32.mrf.mxu1 }
 0xe08   : > { %4105 = vrot.lane.b32.xlu1 %v4094_v3, %s7307_s22  ;;  %s4432_s22 = scalar_lea.hbm %s7252_s18, %s4648_s28 }
 0xe78   : > { %v4104_v45 = vpop.permute.xlu0 %4103 }
 0xe79   : > { %4112 = vst.msk [vmem:[#allocation2] sm:$0xf] %vm4111_vm3, %v4104_v45 }
 0xe7a   : > { %v4106_v15 = vpop.permute.xlu1 %4105 }
 0xe7b   : > { %v4107_v22 = vsel %vm608_vm0, %v4104_v45, %v4106_v15  ;;  %4114 = vst.msk [vmem:[#allocation2 + $0x10] sm:$0xf] %vm4097_vm14, %v4106_v15  ;;  %vm4130_vm0 = vcmask 1039360  }
 0xe7c   : > { %4113 = vst [vmem:[#allocation2 + $0x8] sm:$0xf] %v4107_v22 }
 0xe80   : > { %v4116_v19 = vld [vmem:[#allocation2] sm:$0xf] }
 0xe82   : > { %v4120_v18 = vld [vmem:[#allocation2 + $0x10] sm:$0xf] }
 0xe83   : > { %4128 = vrot.lane.b32.xlu1 %v4120_v18, %s7322_s27  ;;  %v4117_v41 = vld [vmem:[#allocation2 + $0x8] sm:$0xf] }
 0xe84   : > { %4126 = vrot.lane.b32.xlu0 %v4117_v41, %s7322_s27 }
 0xe87   : > { %4295 = vrot.lane.b32.xlu1 %v4117_v41, %s7324_s1 }
 0xe88   : > { %4124 = vrot.lane.b32.xlu0 %v4116_v19, %s7322_s27  ;;  %s5383_s27 = scalar_lea.vmem %s4435_s20, 32 }
 0xe89   : > { %p5384_p11 = scmp.ne.s32.totalorder %s4435_s20, %s5383_s27 }
 0xe8b   : > { %4293 = vrot.lane.b32.xlu1 %v4116_v19, %s7324_s1  ;;  %p5385_p12 = pnand %p5384_p11, %p5589_p5 }
 0xe8c   : > { %4297 = vrot.lane.b32.xlu0 %v4120_v18, %s7324_s1  ;;  %s5452_s1 = smov [#allocation4]  }
 0xe8d   : > { %p5386_p13 = pneg %p5385_p12  ;;  %s5387_s29 = sshll.u32 %s5452_s1, 4  ;;  %s5388_s29 = int_to_ptr.vmem [resolvable:$false] %s5387_s29 }
 0xe8e   : > { %s5389_s14 = scalar_lea.vmem %s5388_s29, 64  ;;  %p5390_p0 = scmp.lt.s32.totalorder %s4435_s20, %s5388_s29 }
 0xe8f   : > { %p5391_p1 = scmp.lt.s32.totalorder %s5389_s14, %s5383_s27 }
 0xe90   : > { %4385 = vperm.xlu0 %5377, %v4382_v23  }
 0xe91   : > { %p5392_p2 = por %p5391_p1, %p5390_p0 }
 0xe93   : > { %p5393_p3 = pnand %p5392_p2, %p5386_p13 }
 0xef5   : > { %v4129_v32 = vpop.permute.xlu1 %4128 }
 0xef6   : > { %v4127_v33 = vpop.permute.xlu0 %4126 }
 0xef7   : > { %v4132_v35 = vsel %vm4130_vm0, %v4127_v33, %v4129_v32 }
 0xef8   : > { %4632 = vmatprep.subr.msk.mxu0 %vm4137_vm15, %v4132_v35 }
 0xef9   : > { %v4296_v36 = vpop.permute.xlu1 %4295 }
 0xefa   : > { %v4125_v38 = vpop.permute.xlu0 %4124 }
 0xefb   : > { %v4131_v39 = vsel %vm4130_vm0, %v4125_v38, %v4127_v33 }
 0xefc   : > { %4633 = vmatpush1.msk.msra.mxu0 %vm4137_vm15, %v4131_v39 }
 0xefd   : > { %4634 = vmatmul.mubr.msk.f32.vlgmr.msra.gmra.mxu0 %vm4133_vm4, %v4631_v44  ;;  %4635 = vmatprep.subr.msk.mxu0 %vm4137_vm15, %v4117_v41  ;;  %v4294_v43 = vpop.permute.xlu1 %4293 }
 0xefe   : > { %4636 = vmatpush1.msk.msra.mxu0 %vm4137_vm15, %v4116_v19  ;;  %v4298_v48 = vpop.permute.xlu0 %4297  ;;  %4284 = vmatprep.mubr.f32.mxu0 %v7323_v62  ;;  %v4300_v55 = vsel %vm4299_vm5, %v4294_v43, %v4296_v36 }
 0xeff   : > { %v4301_v52 = vsel %vm4299_vm5, %v4296_v36, %v4298_v48 }
 0xf00   : > { %4639 = vmatprep.subr.msk.mxu0 %vm4137_vm15, %v4301_v52 }
 0xf01   : > { %4637 = vmatmul.mubr.msk.f32.vlgmr.msra.gmra.mxu0 %vm4133_vm4, %v4115_v49 }
 0xf02   : > { %4640 = vmatpush1.msk.msra.mxu0 %vm4137_vm15, %v4300_v55  ;;  %4373 = vmatprep.mubr.f32.mxu0 %v7323_v62 }
 0xf05   : > { %4641 = vmatmul.mubr.msk.f32.vlgmr.msra.gmra.mxu0 %vm4133_vm4, %v4638_v6 }
 0xf0b   : > { %v4386_v54 = vpop.permute.xlu0 %4385 }
 0xf0c   : > { %v4391_v30 = vrot.slane %v4386_v54, %v4390_v21 }
 0xfbd   : > { %v4208_v26 = vpop.f32.mrf.mxu0 }
 0xfbf   : > { %v4210_v47 = vpop.f32.mrf.mxu0 }
 0xfc1   : > { %v4286_v20 = vpop.f32.mrf.mxu0 }
 0xfc2   : > { %v4287_v7 = vadd.f32 %v4286_v20, %v4208_v26 }
 0xfc3   : > { %v4288_v40 = vpop.f32.mrf.mxu0 }
 0xfc4   : > { %v4289_v56 = vadd.f32 %v4288_v40, %v4210_v47 }
 0xfc5   : > { %v4375_v29 = vpop.f32.mrf.mxu0 }
 0xfc6   : > { %v4380_v62 = vadd.f32 %v4375_v29, %v4287_v7 }
 0xfc7   : > { %v4377_v4 = vpop.f32.mrf.mxu0 }
 0xfc8   : > { %v4392_v1 = vadd.f32 %v4391_v30, %v4380_v62  ;;  %v4381_v8 = vadd.f32 %v4377_v4, %v4289_v56 }
 0xfca   : > { %v4393_v24 = vadd.f32 %v4391_v30, %v4381_v8  ;;  %5379 = vtanh.f32 %v4392_v1 }
 0xfcc   : > { %5381 = vtanh.f32 %v4393_v24 }
 0xfd7   : > { %v5380_v50 = vpop.eup %5379 }
 0xfd9   : > { %v5382_v0 = vpop.eup %5381 }
 0xfda   : > { %v4398_v13 = vcombine.low %v5380_v50, %v5382_v0 }
 0xfdc   : > { %v4405_v59 = vrot.slane %v4398_v13, %v4404_v28 }
 0xfde   : > { %v4412_v63 = vrot.slane %v4405_v59, %v4404_v28 }
 0xfe0   : > { %4418 = vst.msk [vmem:[%s570_s26] sm:$0x3] %vm4416_vm6, %v4412_v63 }
 0xfe1   : > { %5396 = shalt.err (!%p5393_p3)
}
 0xfe2   : > { %s5397_s24 = scalar_lea.hbm %s4432_s22, 32  ;;  %s5401_s28 = scalar_lea.hbm %s7252_s18, 64 }
 0xfe3   : > { %p5398_p4 = scmp.ne.s32.totalorder %s4432_s22, %s5397_s24  ;;  %p5402_p9 = scmp.lt.s32.totalorder %s4432_s22, %s7252_s18 }
 0xfe4   : > { %p5403_p10 = scmp.lt.s32.totalorder %s5401_s28, %s5397_s24 }
 0xfe5   : > { %p5399_p7 = pnand %p5398_p4, %p5589_p5 }
 0xfe6   : > { %p5404_p11 = por %p5403_p10, %p5402_p9 }
 0xfe7   : > { %p5400_p8 = pneg %p5399_p7 }
 0xfe9   : > { %p5405_p12 = pnand %p5404_p11, %p5400_p8 }
 0xfeb   : > { %5408 = shalt.err (!%p5405_p12)
}
 0xfec   : > { %5331 = dma.vmem_to_hbm [thread:$0]  (%p5589_p5), %s4435_s20, 32, %s4432_s22, %s4420_s2  }
 0xfed PF: > { %s7325_s0 = sld [smem:[#allocation9_spill]] }
 0xfee   : > { %s7326_s27 = sld [smem:[#allocation7_spill]] }
 0xff3   : > { %p5337_p13 = scmp.ge.s32.totalorder %s7325_s0, 2 }
 0xff4   : > { %s4446_s29 = sand.u32 1, %s7326_s27  }
 0xff5   : > { %p5334_p0 = pnand %p5337_p13, %p5593_p6  ;;  %s4447_s14 = scalar_lea.sflag [#allocation5], %s4446_s29 }
 0xff7   : > { %p5335_p1 = pneg %p5334_p0 }
 0xff9   : > { %5426 = dma.done.wait (%p5335_p1), %s4447_s14, 32  }
 0xffa   : > { %5428 = vsyncadd (%p5335_p1), %s4447_s14, 4294967264  ;;  %s7328_s19 = sld [smem:[#allocation10_spill]]  ;;  %s7331_s29 = smov %s5435_s30 }
 0xffb   : > { %s7329_s24 = sld [smem:[#allocation8_spill]] }
 0xffc   : > { %s7330_s0 = sld [smem:[#allocation11_spill]] }
0x1000   : > { %p30_p2 = scmp.ge.s32.totalorder %s7328_s19, 4  }
0x1001   : > { %s7332_s30 = smov %s7329_s24 }
0x1002   :  { %32 = sbr.rel (!%p30_p2) target bundleno = 7 (0x7), region = 141 }
0x1007   :  { %4452 = vsyncpa [#allocation5], 1 }
0x1008   :  { %4454 = vsyncpa [#allocation5 + $0x1], 1 }

</bundles_post_ra>
